<compile_context>
chip_gen: v5e
topology: v5e:2x2
jax: 0.10.0
libtpu: 0.0.40
codegen_flags: <defaults>
</compile_context>

<pallas_src>
import functools

import jax
import jax.numpy as jnp
from jax import lax
from jax.experimental import pallas as pl
from jax.experimental.pallas import tpu as pltpu

_HALO = 16  # sublane-aligned zero halo (top/bottom) of the flat conv2 scratch


def _bottleneck_kernel(x_ref, w1_ref, s1_ref, b1_ref,
                       w2_ref, s2_ref, b2_ref,
                       w3_ref, s3_ref, b3_ref,
                       fca_ref, fcb_ref,
                       saM_ref, m2_ref, q_ref, simg_ref, eimg_ref,
                       out_ref,
                       pad_ref,
                       *, img_w):
    f32, bf16 = jnp.float32, jnp.bfloat16
    R, _ = x_ref.shape
    P = w1_ref.shape[1]
    HW = q_ref.shape[1]
    Nb = simg_ref.shape[0]

    # ---- conv1 (1x1) + bn1 + relu -------------------------------------------
    h1 = jnp.dot(x_ref[...].astype(bf16), w1_ref[...], preferred_element_type=f32)
    h1 = jnp.maximum(h1 * s1_ref[...] + b1_ref[...], 0.0)                 # (R, P)

    # ---- conv2 (3x3, pad 1): flat-halo scratch + 9 accumulating MXU dots ----
    pad_ref[0:_HALO, :] = jnp.zeros((_HALO, P), bf16)
    pad_ref[_HALO + R:_HALO + R + _HALO, :] = jnp.zeros((_HALO, P), bf16)
    pad_ref[_HALO:_HALO + R, :] = h1.astype(bf16)

    acc = jnp.zeros((R, P), f32)
    tap = 0
    for dy in (-1, 0, 1):
        for dx in (-1, 0, 1):
            s = dy * img_w + dx
            slab = pad_ref[_HALO + s:_HALO + s + R, :]                    # (R, P) bf16
            slab = slab * m2_ref[:, tap:tap + 1]                          # zero invalid rows
            wt = w2_ref[tap * P:(tap + 1) * P, :]                         # (P, P) bf16
            acc = acc + jnp.dot(slab, wt, preferred_element_type=f32)
            tap += 1
    h2 = jnp.maximum(acc * s2_ref[...] + b2_ref[...], 0.0)                # (R, P)

    # ---- conv3 (1x1) + bn3 ----------------------------------------------------
    h3 = jnp.dot(h2.astype(bf16), w3_ref[...], preferred_element_type=f32)
    h3 = h3 * s3_ref[...] + b3_ref[...]                                   # (R, C4)

    # ---- channel attention (per-image pooling, shared MLP on stacked rows) ----
    avg_list, max_list = [], []
    for n in range(Nb):
        hn = h3[n * HW:(n + 1) * HW, :]
        avg_list.append(jnp.mean(hn, axis=0, keepdims=True))
        max_list.append(jnp.max(hn, axis=0, keepdims=True))
    pooled = jnp.concatenate(avg_list + max_list, axis=0)                 # (2*Nb, C4)
    hid = jnp.maximum(jnp.dot(pooled.astype(bf16), fca_ref[...],
                              preferred_element_type=f32), 0.0)
    fc_out = jnp.dot(hid.astype(bf16), fcb_ref[...], preferred_element_type=f32)
    ca = jax.nn.sigmoid(fc_out[0:Nb, :] + fc_out[Nb:2 * Nb, :])           # (Nb, C4)
    # expand per-image ca back to rows with the 0/1 image-indicator matrix (MXU)
    ca_rows = jnp.dot(eimg_ref[...], ca.astype(bf16), preferred_element_type=f32)
    h3 = h3 * ca_rows                                                     # (R, C4)

    # ---- spatial attention (7x7 conv == one dense matmul) ---------------------
    q = q_ref[...]                                                        # (R, HW) 0/1
    avg_s = jnp.mean(h3, axis=1, keepdims=True).astype(bf16)              # (R, 1)
    max_s = jnp.max(h3, axis=1, keepdims=True).astype(bf16)               # (R, 1)
    # scatter each row's pooled value onto its pixel lane, collapse rows per image
    avg_sp = jnp.broadcast_to(avg_s, (R, HW)) * q
    max_sp = jnp.broadcast_to(max_s, (R, HW)) * q
    spread = jnp.concatenate([avg_sp, max_sp], axis=1)                    # (R, 2*HW)
    sa_in = jnp.dot(simg_ref[...], spread, preferred_element_type=f32)    # (Nb, 2*HW)
    sa_lin = jnp.dot(sa_in.astype(bf16), saM_ref[...], preferred_element_type=f32)
    sa = jax.nn.sigmoid(sa_lin)                                           # (Nb, HW)
    # gather the per-pixel attention value back to rows
    sa_rows = jnp.dot(eimg_ref[...], sa.astype(bf16), preferred_element_type=f32)
    sa_col = jnp.sum(sa_rows * q.astype(f32), axis=1, keepdims=True)      # (R, 1)
    h3 = h3 * sa_col

    # ---- residual + relu -------------------------------------------------------
    out_ref[...] = jnp.maximum(h3 + x_ref[...], 0.0)


def bottleneck_forward(x_nhwc, w1, s1, b1, w2, s2, b2, w3, s3, b3, fca, fcb, saw,
                       *, block_n=4):
    N, H, W, Cin = x_nhwc.shape
    P = w1.shape[1]
    C4 = w3.shape[1]
    assert Cin == C4, "downsample=None requires inplanes == planes*4"
    assert N % block_n == 0, "batch must be divisible by block_n"
    HW = H * W
    R = block_n * HW
    bf16 = jnp.bfloat16

    x_flat = x_nhwc.reshape(N * HW, Cin)

    # bf16 MXU operands (accumulation stays f32 inside the kernel)
    w1b = w1.astype(bf16)                              # (Cin, P)
    w2b = w2.reshape(9 * P, P).astype(bf16)            # rows ordered (ky, kx, cin)
    w3b = w3.astype(bf16)                              # (P, C4)
    fcab = fca.astype(bf16)
    fcbb = fcb.astype(bf16)

    # ---- host-built constant matrices (all exact 0/1 except sa_mat) ------------
    r = jnp.arange(R)
    h_idx = (r % HW) // W
    w_idx = r % W
    n_idx = r // HW

    taps = []
    for dy in (-1, 0, 1):
        for dx in (-1, 0, 1):
            taps.append((h_idx + dy >= 0) & (h_idx + dy < H)
                        & (w_idx + dx >= 0) & (w_idx + dx < W))
    m2 = jnp.stack(taps, axis=1).astype(bf16)                              # (R, 9)

    q_mat = (jnp.arange(HW)[None, :] == (r % HW)[:, None]).astype(bf16)    # (R, HW)
    s_img = (jnp.arange(block_n)[:, None] == n_idx[None, :]).astype(bf16)  # (Nb, R)
    e_img = (n_idx[:, None] == jnp.arange(block_n)[None, :]).astype(bf16)  # (R, Nb)

    # 7x7 spatial-attention conv expressed as a dense (2*HW, HW) matrix
    pidx = jnp.arange(HW)
    ph, pw = pidx // W, pidx % W
    ky = ph[:, None] - ph[None, :] + 3
    kx = pw[:, None] - pw[None, :] + 3
    valid = (ky >= 0) & (ky < 7) & (kx >= 0) & (kx < 7)
    kyc = jnp.clip(ky, 0, 6)
    kxc = jnp.clip(kx, 0, 6)
    saw3 = saw.reshape(7, 7, 2)
    sa_mat = jnp.concatenate(
        [jnp.where(valid, saw3[kyc, kxc, c], 0.0) for c in (0, 1)], axis=0
    ).astype(bf16)                                                         # (2*HW, HW)

    consts = (w1b, s1, b1, w2b, s2, b2, w3b, s3, b3, fcab, fcbb,
              sa_mat, m2, q_mat, s_img, e_img)

    def full(a):
        nd = a.ndim
        return pl.BlockSpec(a.shape, lambda i, _nd=nd: (0,) * _nd)

    # VMEM budget: double-buffered x/out blocks + (pipeline-double-buffered) consts
    # + conv2 scratch + headroom.  (No extra x2 on the total.)
    block_bytes = R * Cin * 4 + R * C4 * 4
    const_bytes = sum(int(a.size) * a.dtype.itemsize for a in consts)
    scratch_bytes = (R + 2 * _HALO) * P * 2
    vmem_limit = int(2 * block_bytes + 2 * const_bytes + scratch_bytes + (8 << 20))

    grid_spec = pltpu.PrefetchScalarGridSpec(
        num_scalar_prefetch=0,
        grid=(N // block_n,),
        in_specs=[pl.BlockSpec((R, Cin), lambda i: (i, 0))]
                 + [full(a) for a in consts],
        out_specs=pl.BlockSpec((R, C4), lambda i: (i, 0)),
        scratch_shapes=[pltpu.VMEM((R + 2 * _HALO, P), jnp.bfloat16)],
    )

    kernel = functools.partial(_bottleneck_kernel, img_w=W)
    out_flat = pl.pallas_call(
        kernel,
        out_shape=jax.ShapeDtypeStruct((N * HW, C4), jnp.float32),
        grid_spec=grid_spec,
        compiler_params=pltpu.CompilerParams(
            dimension_semantics=("parallel",),
            vmem_limit_bytes=vmem_limit,
        ),
    )(x_flat, *consts)
    return out_flat.reshape(N, H, W, C4)


def reference_forward(x, w1, s1, b1, w2, s2, b2, w3, s3, b3, fca, fcb, saw):
    # Pure-JAX reference mirroring the kernel's bf16-operand / f32-accumulate matmuls.
    bf16, f32 = jnp.bfloat16, jnp.float32
    relu = lambda v: jnp.maximum(v, 0.0)
    sig = jax.nn.sigmoid
    h1 = jnp.einsum('nhwc,cp->nhwp', x.astype(bf16), w1.astype(bf16),
                    preferred_element_type=f32)
    h1 = relu(h1 * s1 + b1)
    h2 = lax.conv_general_dilated(h1.astype(bf16), w2.astype(bf16), (1, 1),
                                  [(1, 1), (1, 1)],
                                  dimension_numbers=('NHWC', 'HWIO', 'NHWC'),
                                  preferred_element_type=f32)
    h2 = relu(h2 * s2 + b2)
    h3 = jnp.einsum('nhwp,pc->nhwc', h2.astype(bf16), w3.astype(bf16),
                    preferred_element_type=f32)
    h3 = h3 * s3 + b3
    avg_c = jnp.mean(h3, axis=(1, 2), keepdims=True)
    max_c = jnp.max(h3, axis=(1, 2), keepdims=True)

    def fc(v):
        hid = relu(jnp.einsum('nhwc,cr->nhwr', v.astype(bf16), fca.astype(bf16),
                              preferred_element_type=f32))
        return jnp.einsum('nhwr,rc->nhwc', hid.astype(bf16), fcb.astype(bf16),
                          preferred_element_type=f32)

    ca = sig(fc(avg_c) + fc(max_c)).astype(bf16).astype(f32)  # mirror kernel bf16 use
    h3 = h3 * ca
    avg_s = jnp.mean(h3, axis=3, keepdims=True)
    max_s = jnp.max(h3, axis=3, keepdims=True)
    sa_in = jnp.concatenate([avg_s, max_s], axis=3)
    sa = sig(lax.conv_general_dilated(sa_in.astype(bf16),
                                      saw.reshape(7, 7, 2, 1).astype(bf16), (1, 1),
                                      [(3, 3), (3, 3)],
                                      dimension_numbers=('NHWC', 'HWIO', 'NHWC'),
                                      preferred_element_type=f32))
    sa = sa.astype(bf16).astype(f32)
    return relu(h3 * sa + x)


def make_params(key, inplanes, planes):
    C4 = planes * 4
    Cr = C4 // 16
    ks = jax.random.split(key, 16)
    eps = 1e-5

    def bn(kg, kb, km, kv, C):
        gamma = 1.0 + 0.1 * jax.random.normal(kg, (C,), jnp.float32)
        beta = 0.1 * jax.random.normal(kb, (C,), jnp.float32)
        mean = 0.1 * jax.random.normal(km, (C,), jnp.float32)
        var = jax.random.uniform(kv, (C,), jnp.float32, 0.5, 1.5)
        scale = gamma / jnp.sqrt(var + eps)
        bias = beta - mean * scale
        return scale.reshape(1, C), bias.reshape(1, C)

    # conv weights stored in matmul / HWIO layout (torch OIHW -> transposed here)
    w1 = 0.1 * jax.random.normal(ks[0], (inplanes, planes), jnp.float32)
    w2 = 0.1 * jax.random.normal(ks[1], (3, 3, planes, planes), jnp.float32)
    w3 = 0.1 * jax.random.normal(ks[2], (planes, C4), jnp.float32)
    s1, b1 = bn(ks[3], ks[4], ks[5], ks[6], planes)
    s2, b2 = bn(ks[7], ks[8], ks[9], ks[10], planes)
    s3, b3 = bn(ks[11], ks[12], ks[13], ks[14], C4)
    fk = jax.random.split(ks[15], 3)
    fca = 0.2 * jax.random.normal(fk[0], (C4, Cr), jnp.float32)
    fcb = 0.2 * jax.random.normal(fk[1], (Cr, C4), jnp.float32)
    # spatial-attention 7x7 conv weight, flattened as (ky, kx, channel[avg, max])
    saw = 0.2 * jax.random.normal(fk[2], (7, 7, 2), jnp.float32).reshape(-1)
    return (w1, s1, b1, w2, s2, b2, w3, s3, b3, fca, fcb, saw)


if __name__ == "__main__":
    N, H, W = 8, 8, 8
    planes = 32
    inplanes = planes * 4   # 128 lane-dense channels; residual needs inplanes == 4*planes

    key = jax.random.PRNGKey(0)
    kx_, kp = jax.random.split(key)
    x_nchw = jax.random.normal(kx_, (N, inplanes, H, W), jnp.float32)  # PyTorch layout
    x_nhwc = jnp.transpose(x_nchw, (0, 2, 3, 1))                       # kernel layout

    params = make_params(kp, inplanes, planes)

    out = jax.block_until_ready(bottleneck_forward(x_nhwc, *params, block_n=4))
    ref = reference_forward(x_nhwc, *params)

    err = float(jnp.max(jnp.abs(out - ref)))
    assert out.shape == (N, H, W, inplanes)
    assert err < 5e-2, f"mismatch vs reference, max abs err = {err}"
    print("KERNEL_OK")
</pallas_src>

<mosaic_0001>
module attributes {stable_mosaic.version = 11 : i64} {
  func.func @_bottleneck_kernel(%arg0: i32, %arg1: memref<256x128xf32, #tpu.memory_space<vmem>>, %arg2: memref<128x32xbf16, #tpu.memory_space<vmem>>, %arg3: memref<1x32xf32, #tpu.memory_space<vmem>>, %arg4: memref<1x32xf32, #tpu.memory_space<vmem>>, %arg5: memref<288x32xbf16, #tpu.memory_space<vmem>>, %arg6: memref<1x32xf32, #tpu.memory_space<vmem>>, %arg7: memref<1x32xf32, #tpu.memory_space<vmem>>, %arg8: memref<32x128xbf16, #tpu.memory_space<vmem>>, %arg9: memref<1x128xf32, #tpu.memory_space<vmem>>, %arg10: memref<1x128xf32, #tpu.memory_space<vmem>>, %arg11: memref<128x8xbf16, #tpu.memory_space<vmem>>, %arg12: memref<8x128xbf16, #tpu.memory_space<vmem>>, %arg13: memref<128x64xbf16, #tpu.memory_space<vmem>>, %arg14: memref<256x9xbf16, #tpu.memory_space<vmem>>, %arg15: memref<256x64xbf16, #tpu.memory_space<vmem>>, %arg16: memref<4x256xbf16, #tpu.memory_space<vmem>>, %arg17: memref<256x4xbf16, #tpu.memory_space<vmem>>, %arg18: memref<256x128xf32, #tpu.memory_space<vmem>>, %arg19: memref<288x32xbf16, #tpu.memory_space<vmem>>) attributes {dimension_semantics = [#tpu.dimension_semantics<parallel>], iteration_bounds = array<i64: 2>, scalar_prefetch = 0 : i64, scratch_operands = 1 : i64, tpu.core_type = #tpu.core_type<tc>, window_params = [{transform_indices = @transform_0, window_bounds = array<i64: 256, 128>}, {pipeline_mode = #tpu.pipeline_mode<synchronous>, transform_indices = @transform_1, window_bounds = array<i64: 128, 32>}, {pipeline_mode = #tpu.pipeline_mode<synchronous>, transform_indices = @transform_2, window_bounds = array<i64: 1, 32>}, {pipeline_mode = #tpu.pipeline_mode<synchronous>, transform_indices = @transform_3, window_bounds = array<i64: 1, 32>}, {pipeline_mode = #tpu.pipeline_mode<synchronous>, transform_indices = @transform_4, window_bounds = array<i64: 288, 32>}, {pipeline_mode = #tpu.pipeline_mode<synchronous>, transform_indices = @transform_5, window_bounds = array<i64: 1, 32>}, {pipeline_mode = #tpu.pipeline_mode<synchronous>, transform_indices = @transform_6, window_bounds = array<i64: 1, 32>}, {pipeline_mode = #tpu.pipeline_mode<synchronous>, transform_indices = @transform_7, window_bounds = array<i64: 32, 128>}, {pipeline_mode = #tpu.pipeline_mode<synchronous>, transform_indices = @transform_8, window_bounds = array<i64: 1, 128>}, {pipeline_mode = #tpu.pipeline_mode<synchronous>, transform_indices = @transform_9, window_bounds = array<i64: 1, 128>}, {pipeline_mode = #tpu.pipeline_mode<synchronous>, transform_indices = @transform_10, window_bounds = array<i64: 128, 8>}, {pipeline_mode = #tpu.pipeline_mode<synchronous>, transform_indices = @transform_11, window_bounds = array<i64: 8, 128>}, {pipeline_mode = #tpu.pipeline_mode<synchronous>, transform_indices = @transform_12, window_bounds = array<i64: 128, 64>}, {pipeline_mode = #tpu.pipeline_mode<synchronous>, transform_indices = @transform_13, window_bounds = array<i64: 256, 9>}, {pipeline_mode = #tpu.pipeline_mode<synchronous>, transform_indices = @transform_14, window_bounds = array<i64: 256, 64>}, {pipeline_mode = #tpu.pipeline_mode<synchronous>, transform_indices = @transform_15, window_bounds = array<i64: 4, 256>}, {pipeline_mode = #tpu.pipeline_mode<synchronous>, transform_indices = @transform_16, window_bounds = array<i64: 256, 4>}, {transform_indices = @transform_17, window_bounds = array<i64: 256, 128>}]} {
    %c0 = arith.constant 0 : index
    %c0_0 = arith.constant 0 : index
    %0 = vector.load %arg1[%c0, %c0_0] : memref<256x128xf32, #tpu.memory_space<vmem>>, vector<256x128xf32>
    %1 = arith.truncf %0 : vector<256x128xf32> to vector<256x128xbf16>
    %c0_1 = arith.constant 0 : index
    %c0_2 = arith.constant 0 : index
    %2 = vector.load %arg2[%c0_1, %c0_2] : memref<128x32xbf16, #tpu.memory_space<vmem>>, vector<128x32xbf16>
    %cst = arith.constant dense<0.000000e+00> : vector<256x32xf32>
    %3 = tpu.matmul %1, %2, %cst {dimension_numbers = #tpu.dot_dimension_numbers<[1], [0], [0], [1], [0, 0, 1, 1], [], []>} : vector<256x128xbf16>, vector<128x32xbf16>, vector<256x32xf32> -> vector<256x32xf32>
    %c0_3 = arith.constant 0 : index
    %c0_4 = arith.constant 0 : index
    %4 = vector.load %arg3[%c0_3, %c0_4] : memref<1x32xf32, #tpu.memory_space<vmem>>, vector<1x32xf32>
    %5 = vector.broadcast %4 : vector<1x32xf32> to vector<256x32xf32>
    %6 = arith.mulf %3, %5 : vector<256x32xf32>
    %c0_5 = arith.constant 0 : index
    %c0_6 = arith.constant 0 : index
    %7 = vector.load %arg4[%c0_5, %c0_6] : memref<1x32xf32, #tpu.memory_space<vmem>>, vector<1x32xf32>
    %8 = vector.broadcast %7 : vector<1x32xf32> to vector<256x32xf32>
    %9 = arith.addf %6, %8 : vector<256x32xf32>
    %cst_7 = arith.constant 0.000000e+00 : f32
    %10 = vector.broadcast %cst_7 : f32 to vector<256x32xf32>
    %11 = arith.maximumf %9, %10 : vector<256x32xf32>
    %cst_8 = arith.constant 0.000000e+00 : bf16
    %12 = vector.broadcast %cst_8 : bf16 to vector<16x32xbf16>
    %c0_9 = arith.constant 0 : index
    %c0_10 = arith.constant 0 : index
    %13 = vector.load %arg19[%c0_9, %c0_10] : memref<288x32xbf16, #tpu.memory_space<vmem>>, vector<16x32xbf16>
    tpu.vector_store %arg19[%c0_9, %c0_10], %12 {strides = array<i32>} : memref<288x32xbf16, #tpu.memory_space<vmem>>, vector<16x32xbf16>,
    %cst_11 = arith.constant 0.000000e+00 : bf16
    %14 = vector.broadcast %cst_11 : bf16 to vector<16x32xbf16>
    %c272 = arith.constant 272 : index
    %c0_12 = arith.constant 0 : index
    %15 = vector.load %arg19[%c272, %c0_12] : memref<288x32xbf16, #tpu.memory_space<vmem>>, vector<16x32xbf16>
    tpu.vector_store %arg19[%c272, %c0_12], %14 {strides = array<i32>} : memref<288x32xbf16, #tpu.memory_space<vmem>>, vector<16x32xbf16>,
    %16 = arith.truncf %11 : vector<256x32xf32> to vector<256x32xbf16>
    %c16 = arith.constant 16 : index
    %c0_13 = arith.constant 0 : index
    %17 = vector.load %arg19[%c16, %c0_13] : memref<288x32xbf16, #tpu.memory_space<vmem>>, vector<256x32xbf16>
    tpu.vector_store %arg19[%c16, %c0_13], %16 {strides = array<i32>} : memref<288x32xbf16, #tpu.memory_space<vmem>>, vector<256x32xbf16>,
    %cst_14 = arith.constant 0.000000e+00 : f32
    %18 = vector.broadcast %cst_14 : f32 to vector<256x32xf32>
    %c7 = arith.constant 7 : index
    %c0_15 = arith.constant 0 : index
    %19 = vector.load %arg19[%c7, %c0_15] : memref<288x32xbf16, #tpu.memory_space<vmem>>, vector<256x32xbf16>
    %c0_16 = arith.constant 0 : index
    %c0_17 = arith.constant 0 : index
    %20 = vector.load %arg14[%c0_16, %c0_17] : memref<256x9xbf16, #tpu.memory_space<vmem>>, vector<256x1xbf16>
    %21 = vector.broadcast %20 : vector<256x1xbf16> to vector<256x32xbf16>
    %22 = arith.mulf %19, %21 : vector<256x32xbf16>
    %c0_18 = arith.constant 0 : index
    %c0_19 = arith.constant 0 : index
    %23 = vector.load %arg5[%c0_18, %c0_19] : memref<288x32xbf16, #tpu.memory_space<vmem>>, vector<32x32xbf16>
    %cst_20 = arith.constant dense<0.000000e+00> : vector<256x32xf32>
    %24 = tpu.matmul %22, %23, %cst_20 {dimension_numbers = #tpu.dot_dimension_numbers<[1], [0], [0], [1], [0, 0, 1, 1], [], []>} : vector<256x32xbf16>, vector<32x32xbf16>, vector<256x32xf32> -> vector<256x32xf32>
    %25 = arith.addf %18, %24 : vector<256x32xf32>
    %c8 = arith.constant 8 : index
    %c0_21 = arith.constant 0 : index
    %26 = vector.load %arg19[%c8, %c0_21] : memref<288x32xbf16, #tpu.memory_space<vmem>>, vector<256x32xbf16>
    %c0_22 = arith.constant 0 : index
    %c1 = arith.constant 1 : index
    %27 = vector.load %arg14[%c0_22, %c1] : memref<256x9xbf16, #tpu.memory_space<vmem>>, vector<256x1xbf16>
    %28 = vector.broadcast %27 : vector<256x1xbf16> to vector<256x32xbf16>
    %29 = arith.mulf %26, %28 : vector<256x32xbf16>
    %c32 = arith.constant 32 : index
    %c0_23 = arith.constant 0 : index
    %30 = vector.load %arg5[%c32, %c0_23] : memref<288x32xbf16, #tpu.memory_space<vmem>>, vector<32x32xbf16>
    %cst_24 = arith.constant dense<0.000000e+00> : vector<256x32xf32>
    %31 = tpu.matmul %29, %30, %cst_24 {dimension_numbers = #tpu.dot_dimension_numbers<[1], [0], [0], [1], [0, 0, 1, 1], [], []>} : vector<256x32xbf16>, vector<32x32xbf16>, vector<256x32xf32> -> vector<256x32xf32>
    %32 = arith.addf %25, %31 : vector<256x32xf32>
    %c9 = arith.constant 9 : index
    %c0_25 = arith.constant 0 : index
    %33 = vector.load %arg19[%c9, %c0_25] : memref<288x32xbf16, #tpu.memory_space<vmem>>, vector<256x32xbf16>
    %c0_26 = arith.constant 0 : index
    %c2 = arith.constant 2 : index
    %34 = vector.load %arg14[%c0_26, %c2] : memref<256x9xbf16, #tpu.memory_space<vmem>>, vector<256x1xbf16>
    %35 = vector.broadcast %34 : vector<256x1xbf16> to vector<256x32xbf16>
    %36 = arith.mulf %33, %35 : vector<256x32xbf16>
    %c64 = arith.constant 64 : index
    %c0_27 = arith.constant 0 : index
    %37 = vector.load %arg5[%c64, %c0_27] : memref<288x32xbf16, #tpu.memory_space<vmem>>, vector<32x32xbf16>
    %cst_28 = arith.constant dense<0.000000e+00> : vector<256x32xf32>
    %38 = tpu.matmul %36, %37, %cst_28 {dimension_numbers = #tpu.dot_dimension_numbers<[1], [0], [0], [1], [0, 0, 1, 1], [], []>} : vector<256x32xbf16>, vector<32x32xbf16>, vector<256x32xf32> -> vector<256x32xf32>
    %39 = arith.addf %32, %38 : vector<256x32xf32>
    %c15 = arith.constant 15 : index
    %c0_29 = arith.constant 0 : index
    %40 = vector.load %arg19[%c15, %c0_29] : memref<288x32xbf16, #tpu.memory_space<vmem>>, vector<256x32xbf16>
    %c0_30 = arith.constant 0 : index
    %c3 = arith.constant 3 : index
    %41 = vector.load %arg14[%c0_30, %c3] : memref<256x9xbf16, #tpu.memory_space<vmem>>, vector<256x1xbf16>
    %42 = vector.broadcast %41 : vector<256x1xbf16> to vector<256x32xbf16>
    %43 = arith.mulf %40, %42 : vector<256x32xbf16>
    %c96 = arith.constant 96 : index
    %c0_31 = arith.constant 0 : index
    %44 = vector.load %arg5[%c96, %c0_31] : memref<288x32xbf16, #tpu.memory_space<vmem>>, vector<32x32xbf16>
    %cst_32 = arith.constant dense<0.000000e+00> : vector<256x32xf32>
    %45 = tpu.matmul %43, %44, %cst_32 {dimension_numbers = #tpu.dot_dimension_numbers<[1], [0], [0], [1], [0, 0, 1, 1], [], []>} : vector<256x32xbf16>, vector<32x32xbf16>, vector<256x32xf32> -> vector<256x32xf32>
    %46 = arith.addf %39, %45 : vector<256x32xf32>
    %c16_33 = arith.constant 16 : index
    %c0_34 = arith.constant 0 : index
    %47 = vector.load %arg19[%c16_33, %c0_34] : memref<288x32xbf16, #tpu.memory_space<vmem>>, vector<256x32xbf16>
    %c0_35 = arith.constant 0 : index
    %c4 = arith.constant 4 : index
    %48 = vector.load %arg14[%c0_35, %c4] : memref<256x9xbf16, #tpu.memory_space<vmem>>, vector<256x1xbf16>
    %49 = vector.broadcast %48 : vector<256x1xbf16> to vector<256x32xbf16>
    %50 = arith.mulf %47, %49 : vector<256x32xbf16>
    %c128 = arith.constant 128 : index
    %c0_36 = arith.constant 0 : index
    %51 = vector.load %arg5[%c128, %c0_36] : memref<288x32xbf16, #tpu.memory_space<vmem>>, vector<32x32xbf16>
    %cst_37 = arith.constant dense<0.000000e+00> : vector<256x32xf32>
    %52 = tpu.matmul %50, %51, %cst_37 {dimension_numbers = #tpu.dot_dimension_numbers<[1], [0], [0], [1], [0, 0, 1, 1], [], []>} : vector<256x32xbf16>, vector<32x32xbf16>, vector<256x32xf32> -> vector<256x32xf32>
    %53 = arith.addf %46, %52 : vector<256x32xf32>
    %c17 = arith.constant 17 : index
    %c0_38 = arith.constant 0 : index
    %54 = vector.load %arg19[%c17, %c0_38] : memref<288x32xbf16, #tpu.memory_space<vmem>>, vector<256x32xbf16>
    %c0_39 = arith.constant 0 : index
    %c5 = arith.constant 5 : index
    %55 = vector.load %arg14[%c0_39, %c5] : memref<256x9xbf16, #tpu.memory_space<vmem>>, vector<256x1xbf16>
    %56 = vector.broadcast %55 : vector<256x1xbf16> to vector<256x32xbf16>
    %57 = arith.mulf %54, %56 : vector<256x32xbf16>
    %c160 = arith.constant 160 : index
    %c0_40 = arith.constant 0 : index
    %58 = vector.load %arg5[%c160, %c0_40] : memref<288x32xbf16, #tpu.memory_space<vmem>>, vector<32x32xbf16>
    %cst_41 = arith.constant dense<0.000000e+00> : vector<256x32xf32>
    %59 = tpu.matmul %57, %58, %cst_41 {dimension_numbers = #tpu.dot_dimension_numbers<[1], [0], [0], [1], [0, 0, 1, 1], [], []>} : vector<256x32xbf16>, vector<32x32xbf16>, vector<256x32xf32> -> vector<256x32xf32>
    %60 = arith.addf %53, %59 : vector<256x32xf32>
    %c23 = arith.constant 23 : index
    %c0_42 = arith.constant 0 : index
    %61 = vector.load %arg19[%c23, %c0_42] : memref<288x32xbf16, #tpu.memory_space<vmem>>, vector<256x32xbf16>
    %c0_43 = arith.constant 0 : index
    %c6 = arith.constant 6 : index
    %62 = vector.load %arg14[%c0_43, %c6] : memref<256x9xbf16, #tpu.memory_space<vmem>>, vector<256x1xbf16>
    %63 = vector.broadcast %62 : vector<256x1xbf16> to vector<256x32xbf16>
    %64 = arith.mulf %61, %63 : vector<256x32xbf16>
    %c192 = arith.constant 192 : index
    %c0_44 = arith.constant 0 : index
    %65 = vector.load %arg5[%c192, %c0_44] : memref<288x32xbf16, #tpu.memory_space<vmem>>, vector<32x32xbf16>
    %cst_45 = arith.constant dense<0.000000e+00> : vector<256x32xf32>
    %66 = tpu.matmul %64, %65, %cst_45 {dimension_numbers = #tpu.dot_dimension_numbers<[1], [0], [0], [1], [0, 0, 1, 1], [], []>} : vector<256x32xbf16>, vector<32x32xbf16>, vector<256x32xf32> -> vector<256x32xf32>
    %67 = arith.addf %60, %66 : vector<256x32xf32>
    %c24 = arith.constant 24 : index
    %c0_46 = arith.constant 0 : index
    %68 = vector.load %arg19[%c24, %c0_46] : memref<288x32xbf16, #tpu.memory_space<vmem>>, vector<256x32xbf16>
    %c0_47 = arith.constant 0 : index
    %c7_48 = arith.constant 7 : index
    %69 = vector.load %arg14[%c0_47, %c7_48] : memref<256x9xbf16, #tpu.memory_space<vmem>>, vector<256x1xbf16>
    %70 = vector.broadcast %69 : vector<256x1xbf16> to vector<256x32xbf16>
    %71 = arith.mulf %68, %70 : vector<256x32xbf16>
    %c224 = arith.constant 224 : index
    %c0_49 = arith.constant 0 : index
    %72 = vector.load %arg5[%c224, %c0_49] : memref<288x32xbf16, #tpu.memory_space<vmem>>, vector<32x32xbf16>
    %cst_50 = arith.constant dense<0.000000e+00> : vector<256x32xf32>
    %73 = tpu.matmul %71, %72, %cst_50 {dimension_numbers = #tpu.dot_dimension_numbers<[1], [0], [0], [1], [0, 0, 1, 1], [], []>} : vector<256x32xbf16>, vector<32x32xbf16>, vector<256x32xf32> -> vector<256x32xf32>
    %74 = arith.addf %67, %73 : vector<256x32xf32>
    %c25 = arith.constant 25 : index
    %c0_51 = arith.constant 0 : index
    %75 = vector.load %arg19[%c25, %c0_51] : memref<288x32xbf16, #tpu.memory_space<vmem>>, vector<256x32xbf16>
    %c0_52 = arith.constant 0 : index
    %c8_53 = arith.constant 8 : index
    %76 = vector.load %arg14[%c0_52, %c8_53] : memref<256x9xbf16, #tpu.memory_space<vmem>>, vector<256x1xbf16>
    %77 = vector.broadcast %76 : vector<256x1xbf16> to vector<256x32xbf16>
    %78 = arith.mulf %75, %77 : vector<256x32xbf16>
    %c256 = arith.constant 256 : index
    %c0_54 = arith.constant 0 : index
    %79 = vector.load %arg5[%c256, %c0_54] : memref<288x32xbf16, #tpu.memory_space<vmem>>, vector<32x32xbf16>
    %cst_55 = arith.constant dense<0.000000e+00> : vector<256x32xf32>
    %80 = tpu.matmul %78, %79, %cst_55 {dimension_numbers = #tpu.dot_dimension_numbers<[1], [0], [0], [1], [0, 0, 1, 1], [], []>} : vector<256x32xbf16>, vector<32x32xbf16>, vector<256x32xf32> -> vector<256x32xf32>
    %81 = arith.addf %74, %80 : vector<256x32xf32>
    %c0_56 = arith.constant 0 : index
    %c0_57 = arith.constant 0 : index
    %82 = vector.load %arg6[%c0_56, %c0_57] : memref<1x32xf32, #tpu.memory_space<vmem>>, vector<1x32xf32>
    %83 = vector.broadcast %82 : vector<1x32xf32> to vector<256x32xf32>
    %84 = arith.mulf %81, %83 : vector<256x32xf32>
    %c0_58 = arith.constant 0 : index
    %c0_59 = arith.constant 0 : index
    %85 = vector.load %arg7[%c0_58, %c0_59] : memref<1x32xf32, #tpu.memory_space<vmem>>, vector<1x32xf32>
    %86 = vector.broadcast %85 : vector<1x32xf32> to vector<256x32xf32>
    %87 = arith.addf %84, %86 : vector<256x32xf32>
    %cst_60 = arith.constant 0.000000e+00 : f32
    %88 = vector.broadcast %cst_60 : f32 to vector<256x32xf32>
    %89 = arith.maximumf %87, %88 : vector<256x32xf32>
    %90 = arith.truncf %89 : vector<256x32xf32> to vector<256x32xbf16>
    %c0_61 = arith.constant 0 : index
    %c0_62 = arith.constant 0 : index
    %91 = vector.load %arg8[%c0_61, %c0_62] : memref<32x128xbf16, #tpu.memory_space<vmem>>, vector<32x128xbf16>
    %cst_63 = arith.constant dense<0.000000e+00> : vector<256x128xf32>
    %92 = tpu.matmul %90, %91, %cst_63 {dimension_numbers = #tpu.dot_dimension_numbers<[1], [0], [0], [1], [0, 0, 1, 1], [], []>} : vector<256x32xbf16>, vector<32x128xbf16>, vector<256x128xf32> -> vector<256x128xf32>
    %c0_64 = arith.constant 0 : index
    %c0_65 = arith.constant 0 : index
    %93 = vector.load %arg9[%c0_64, %c0_65] : memref<1x128xf32, #tpu.memory_space<vmem>>, vector<1x128xf32>
    %94 = vector.broadcast %93 : vector<1x128xf32> to vector<256x128xf32>
    %95 = arith.mulf %92, %94 : vector<256x128xf32>
    %c0_66 = arith.constant 0 : index
    %c0_67 = arith.constant 0 : index
    %96 = vector.load %arg10[%c0_66, %c0_67] : memref<1x128xf32, #tpu.memory_space<vmem>>, vector<1x128xf32>
    %97 = vector.broadcast %96 : vector<1x128xf32> to vector<256x128xf32>
    %98 = arith.addf %95, %97 : vector<256x128xf32>
    %99 = vector.extract_strided_slice %98 {offsets = [0, 0], sizes = [64, 128], strides = [1, 1]} : vector<256x128xf32> to vector<64x128xf32>
    %cst_68 = arith.constant dense<0.000000e+00> : vector<128xf32>
    %100 = vector.multi_reduction <add>, %99, %cst_68 [0] : vector<64x128xf32> to vector<128xf32>
    %101 = vector.shape_cast %100 : vector<128xf32> to vector<1x128xf32>
    %cst_69 = arith.constant 6.400000e+01 : f32
    %102 = vector.broadcast %cst_69 : f32 to vector<1x128xf32>
    %103 = arith.divf %101, %102 : vector<1x128xf32>
    %cst_70 = arith.constant dense<0xFF800000> : vector<128xf32>
    %104 = vector.multi_reduction <maximumf>, %99, %cst_70 [0] : vector<64x128xf32> to vector<128xf32>
    %105 = vector.shape_cast %104 : vector<128xf32> to vector<1x128xf32>
    %106 = vector.extract_strided_slice %98 {offsets = [64, 0], sizes = [64, 128], strides = [1, 1]} : vector<256x128xf32> to vector<64x128xf32>
    %cst_71 = arith.constant dense<0.000000e+00> : vector<128xf32>
    %107 = vector.multi_reduction <add>, %106, %cst_71 [0] : vector<64x128xf32> to vector<128xf32>
    %108 = vector.shape_cast %107 : vector<128xf32> to vector<1x128xf32>
    %cst_72 = arith.constant 6.400000e+01 : f32
    %109 = vector.broadcast %cst_72 : f32 to vector<1x128xf32>
    %110 = arith.divf %108, %109 : vector<1x128xf32>
    %cst_73 = arith.constant dense<0xFF800000> : vector<128xf32>
    %111 = vector.multi_reduction <maximumf>, %106, %cst_73 [0] : vector<64x128xf32> to vector<128xf32>
    %112 = vector.shape_cast %111 : vector<128xf32> to vector<1x128xf32>
    %113 = vector.extract_strided_slice %98 {offsets = [128, 0], sizes = [64, 128], strides = [1, 1]} : vector<256x128xf32> to vector<64x128xf32>
    %cst_74 = arith.constant dense<0.000000e+00> : vector<128xf32>
    %114 = vector.multi_reduction <add>, %113, %cst_74 [0] : vector<64x128xf32> to vector<128xf32>
    %115 = vector.shape_cast %114 : vector<128xf32> to vector<1x128xf32>
    %cst_75 = arith.constant 6.400000e+01 : f32
    %116 = vector.broadcast %cst_75 : f32 to vector<1x128xf32>
    %117 = arith.divf %115, %116 : vector<1x128xf32>
    %cst_76 = arith.constant dense<0xFF800000> : vector<128xf32>
    %118 = vector.multi_reduction <maximumf>, %113, %cst_76 [0] : vector<64x128xf32> to vector<128xf32>
    %119 = vector.shape_cast %118 : vector<128xf32> to vector<1x128xf32>
    %120 = vector.extract_strided_slice %98 {offsets = [192, 0], sizes = [64, 128], strides = [1, 1]} : vector<256x128xf32> to vector<64x128xf32>
    %cst_77 = arith.constant dense<0.000000e+00> : vector<128xf32>
    %121 = vector.multi_reduction <add>, %120, %cst_77 [0] : vector<64x128xf32> to vector<128xf32>
    %122 = vector.shape_cast %121 : vector<128xf32> to vector<1x128xf32>
    %cst_78 = arith.constant 6.400000e+01 : f32
    %123 = vector.broadcast %cst_78 : f32 to vector<1x128xf32>
    %124 = arith.divf %122, %123 : vector<1x128xf32>
    %cst_79 = arith.constant dense<0xFF800000> : vector<128xf32>
    %125 = vector.multi_reduction <maximumf>, %120, %cst_79 [0] : vector<64x128xf32> to vector<128xf32>
    %126 = vector.shape_cast %125 : vector<128xf32> to vector<1x128xf32>
    %127 = tpu.concatenate %103, %110, %117, %124, %105, %112, %119, %126 in 0 : vector<1x128xf32>, vector<1x128xf32>, vector<1x128xf32>, vector<1x128xf32>, vector<1x128xf32>, vector<1x128xf32>, vector<1x128xf32>, vector<1x128xf32> -> vector<8x128xf32>
    %128 = arith.truncf %127 : vector<8x128xf32> to vector<8x128xbf16>
    %c0_80 = arith.constant 0 : index
    %c0_81 = arith.constant 0 : index
    %129 = vector.load %arg11[%c0_80, %c0_81] : memref<128x8xbf16, #tpu.memory_space<vmem>>, vector<128x8xbf16>
    %cst_82 = arith.constant dense<0.000000e+00> : vector<8x8xf32>
    %130 = tpu.matmul %128, %129, %cst_82 {dimension_numbers = #tpu.dot_dimension_numbers<[1], [0], [0], [1], [0, 0, 1, 1], [], []>} : vector<8x128xbf16>, vector<128x8xbf16>, vector<8x8xf32> -> vector<8x8xf32>
    %cst_83 = arith.constant 0.000000e+00 : f32
    %131 = vector.broadcast %cst_83 : f32 to vector<8x8xf32>
    %132 = arith.maximumf %130, %131 : vector<8x8xf32>
    %133 = arith.truncf %132 : vector<8x8xf32> to vector<8x8xbf16>
    %c0_84 = arith.constant 0 : index
    %c0_85 = arith.constant 0 : index
    %134 = vector.load %arg12[%c0_84, %c0_85] : memref<8x128xbf16, #tpu.memory_space<vmem>>, vector<8x128xbf16>
    %cst_86 = arith.constant dense<0.000000e+00> : vector<8x128xf32>
    %135 = tpu.matmul %133, %134, %cst_86 {dimension_numbers = #tpu.dot_dimension_numbers<[1], [0], [0], [1], [0, 0, 1, 1], [], []>} : vector<8x8xbf16>, vector<8x128xbf16>, vector<8x128xf32> -> vector<8x128xf32>
    %136 = vector.extract_strided_slice %135 {offsets = [0, 0], sizes = [4, 128], strides = [1, 1]} : vector<8x128xf32> to vector<4x128xf32>
    %137 = vector.extract_strided_slice %135 {offsets = [4, 0], sizes = [4, 128], strides = [1, 1]} : vector<8x128xf32> to vector<4x128xf32>
    %138 = arith.addf %136, %137 : vector<4x128xf32>
    %139 = arith.negf %138 : vector<4x128xf32>
    %140 = math.exp %139 : vector<4x128xf32>
    %cst_87 = arith.constant 1.000000e+00 : f32
    %141 = vector.broadcast %cst_87 : f32 to vector<4x128xf32>
    %142 = arith.addf %141, %140 : vector<4x128xf32>
    %143 = arith.divf %141, %142 : vector<4x128xf32>
    %c0_88 = arith.constant 0 : index
    %c0_89 = arith.constant 0 : index
    %144 = vector.load %arg17[%c0_88, %c0_89] : memref<256x4xbf16, #tpu.memory_space<vmem>>, vector<256x4xbf16>
    %145 = arith.truncf %143 : vector<4x128xf32> to vector<4x128xbf16>
    %cst_90 = arith.constant dense<0.000000e+00> : vector<256x128xf32>
    %146 = tpu.matmul %144, %145, %cst_90 {dimension_numbers = #tpu.dot_dimension_numbers<[1], [0], [0], [1], [0, 0, 1, 1], [], []>} : vector<256x4xbf16>, vector<4x128xbf16>, vector<256x128xf32> -> vector<256x128xf32>
    %147 = arith.mulf %98, %146 : vector<256x128xf32>
    %c0_91 = arith.constant 0 : index
    %c0_92 = arith.constant 0 : index
    %148 = vector.load %arg15[%c0_91, %c0_92] : memref<256x64xbf16, #tpu.memory_space<vmem>>, vector<256x64xbf16>
    %cst_93 = arith.constant dense<0.000000e+00> : vector<256xf32>
    %149 = vector.multi_reduction <add>, %147, %cst_93 [1] : vector<256x128xf32> to vector<256xf32>
    %150 = vector.shape_cast %149 : vector<256xf32> to vector<256x1xf32>
    %cst_94 = arith.constant 1.280000e+02 : f32
    %151 = vector.broadcast %cst_94 : f32 to vector<256x1xf32>
    %152 = arith.divf %150, %151 : vector<256x1xf32>
    %153 = arith.truncf %152 : vector<256x1xf32> to vector<256x1xbf16>
    %cst_95 = arith.constant dense<0xFF800000> : vector<256xf32>
    %154 = vector.multi_reduction <maximumf>, %147, %cst_95 [1] : vector<256x128xf32> to vector<256xf32>
    %155 = vector.shape_cast %154 : vector<256xf32> to vector<256x1xf32>
    %156 = arith.truncf %155 : vector<256x1xf32> to vector<256x1xbf16>
    %157 = vector.shape_cast %153 : vector<256x1xbf16> to vector<256x1xbf16>
    %158 = vector.broadcast %157 : vector<256x1xbf16> to vector<256x64xbf16>
    %159 = arith.mulf %158, %148 : vector<256x64xbf16>
    %160 = vector.shape_cast %156 : vector<256x1xbf16> to vector<256x1xbf16>
    %161 = vector.broadcast %160 : vector<256x1xbf16> to vector<256x64xbf16>
    %162 = arith.mulf %161, %148 : vector<256x64xbf16>
    %163 = tpu.concatenate %159, %162 in 1 : vector<256x64xbf16>, vector<256x64xbf16> -> vector<256x128xbf16>
    %c0_96 = arith.constant 0 : index
    %c0_97 = arith.constant 0 : index
    %164 = vector.load %arg16[%c0_96, %c0_97] : memref<4x256xbf16, #tpu.memory_space<vmem>>, vector<4x256xbf16>
    %cst_98 = arith.constant dense<0.000000e+00> : vector<4x128xf32>
    %165 = tpu.matmul %164, %163, %cst_98 {dimension_numbers = #tpu.dot_dimension_numbers<[1], [0], [0], [1], [0, 0, 1, 1], [], []>} : vector<4x256xbf16>, vector<256x128xbf16>, vector<4x128xf32> -> vector<4x128xf32>
    %166 = arith.truncf %165 : vector<4x128xf32> to vector<4x128xbf16>
    %c0_99 = arith.constant 0 : index
    %c0_100 = arith.constant 0 : index
    %167 = vector.load %arg13[%c0_99, %c0_100] : memref<128x64xbf16, #tpu.memory_space<vmem>>, vector<128x64xbf16>
    %cst_101 = arith.constant dense<0.000000e+00> : vector<4x64xf32>
    %168 = tpu.matmul %166, %167, %cst_101 {dimension_numbers = #tpu.dot_dimension_numbers<[1], [0], [0], [1], [0, 0, 1, 1], [], []>} : vector<4x128xbf16>, vector<128x64xbf16>, vector<4x64xf32> -> vector<4x64xf32>
    %169 = arith.negf %168 : vector<4x64xf32>
    %170 = math.exp %169 : vector<4x64xf32>
    %cst_102 = arith.constant 1.000000e+00 : f32
    %171 = vector.broadcast %cst_102 : f32 to vector<4x64xf32>
    %172 = arith.addf %171, %170 : vector<4x64xf32>
    %173 = arith.divf %171, %172 : vector<4x64xf32>
    %c0_103 = arith.constant 0 : index
    %c0_104 = arith.constant 0 : index
    %174 = vector.load %arg17[%c0_103, %c0_104] : memref<256x4xbf16, #tpu.memory_space<vmem>>, vector<256x4xbf16>
    %175 = arith.truncf %173 : vector<4x64xf32> to vector<4x64xbf16>
    %cst_105 = arith.constant dense<0.000000e+00> : vector<256x64xf32>
    %176 = tpu.matmul %174, %175, %cst_105 {dimension_numbers = #tpu.dot_dimension_numbers<[1], [0], [0], [1], [0, 0, 1, 1], [], []>} : vector<256x4xbf16>, vector<4x64xbf16>, vector<256x64xf32> -> vector<256x64xf32>
    %177 = arith.extf %148 : vector<256x64xbf16> to vector<256x64xf32>
    %178 = arith.mulf %176, %177 : vector<256x64xf32>
    %cst_106 = arith.constant dense<0.000000e+00> : vector<256xf32>
    %179 = vector.multi_reduction <add>, %178, %cst_106 [1] : vector<256x64xf32> to vector<256xf32>
    %180 = vector.shape_cast %179 : vector<256xf32> to vector<256x1xf32>
    %181 = vector.broadcast %180 : vector<256x1xf32> to vector<256x128xf32>
    %182 = arith.mulf %147, %181 : vector<256x128xf32>
    %c0_107 = arith.constant 0 : index
    %c0_108 = arith.constant 0 : index
    %183 = vector.load %arg1[%c0_107, %c0_108] : memref<256x128xf32, #tpu.memory_space<vmem>>, vector<256x128xf32>
    %184 = arith.addf %182, %183 : vector<256x128xf32>
    %cst_109 = arith.constant 0.000000e+00 : f32
    %185 = vector.broadcast %cst_109 : f32 to vector<256x128xf32>
    %186 = arith.maximumf %184, %185 : vector<256x128xf32>
    %c0_110 = arith.constant 0 : index
    %c0_111 = arith.constant 0 : index
    %187 = vector.load %arg18[%c0_110, %c0_111] : memref<256x128xf32, #tpu.memory_space<vmem>>, vector<256x128xf32>
    tpu.vector_store %arg18[%c0_110, %c0_111], %186 {strides = array<i32>} : memref<256x128xf32, #tpu.memory_space<vmem>>, vector<256x128xf32>,
    return
  }
  func.func @transform_0(%arg0: i32) -> (i32, i32) {
    %c0_i32 = arith.constant 0 : i32
    %c0_i32_0 = arith.constant 0 : i32
    return %arg0, %c0_i32 : i32, i32
  }
  func.func @transform_1(%arg0: i32) -> (i32, i32) {
    %c0_i32 = arith.constant 0 : i32
    %c0_i32_0 = arith.constant 0 : i32
    %c0_i32_1 = arith.constant 0 : i32
    return %c0_i32, %c0_i32_0 : i32, i32
  }
  func.func @transform_2(%arg0: i32) -> (i32, i32) {
    %c0_i32 = arith.constant 0 : i32
    %c0_i32_0 = arith.constant 0 : i32
    %c0_i32_1 = arith.constant 0 : i32
    return %c0_i32, %c0_i32_0 : i32, i32
  }
  func.func @transform_3(%arg0: i32) -> (i32, i32) {
    %c0_i32 = arith.constant 0 : i32
    %c0_i32_0 = arith.constant 0 : i32
    %c0_i32_1 = arith.constant 0 : i32
    return %c0_i32, %c0_i32_0 : i32, i32
  }
  func.func @transform_4(%arg0: i32) -> (i32, i32) {
    %c0_i32 = arith.constant 0 : i32
    %c0_i32_0 = arith.constant 0 : i32
    %c0_i32_1 = arith.constant 0 : i32
    return %c0_i32, %c0_i32_0 : i32, i32
  }
  func.func @transform_5(%arg0: i32) -> (i32, i32) {
    %c0_i32 = arith.constant 0 : i32
    %c0_i32_0 = arith.constant 0 : i32
    %c0_i32_1 = arith.constant 0 : i32
    return %c0_i32, %c0_i32_0 : i32, i32
  }
  func.func @transform_6(%arg0: i32) -> (i32, i32) {
    %c0_i32 = arith.constant 0 : i32
    %c0_i32_0 = arith.constant 0 : i32
    %c0_i32_1 = arith.constant 0 : i32
    return %c0_i32, %c0_i32_0 : i32, i32
  }
  func.func @transform_7(%arg0: i32) -> (i32, i32) {
    %c0_i32 = arith.constant 0 : i32
    %c0_i32_0 = arith.constant 0 : i32
    %c0_i32_1 = arith.constant 0 : i32
    return %c0_i32, %c0_i32_0 : i32, i32
  }
  func.func @transform_8(%arg0: i32) -> (i32, i32) {
    %c0_i32 = arith.constant 0 : i32
    %c0_i32_0 = arith.constant 0 : i32
    %c0_i32_1 = arith.constant 0 : i32
    return %c0_i32, %c0_i32_0 : i32, i32
  }
  func.func @transform_9(%arg0: i32) -> (i32, i32) {
    %c0_i32 = arith.constant 0 : i32
    %c0_i32_0 = arith.constant 0 : i32
    %c0_i32_1 = arith.constant 0 : i32
    return %c0_i32, %c0_i32_0 : i32, i32
  }
  func.func @transform_10(%arg0: i32) -> (i32, i32) {
    %c0_i32 = arith.constant 0 : i32
    %c0_i32_0 = arith.constant 0 : i32
    %c0_i32_1 = arith.constant 0 : i32
    return %c0_i32, %c0_i32_0 : i32, i32
  }
  func.func @transform_11(%arg0: i32) -> (i32, i32) {
    %c0_i32 = arith.constant 0 : i32
    %c0_i32_0 = arith.constant 0 : i32
    %c0_i32_1 = arith.constant 0 : i32
    return %c0_i32, %c0_i32_0 : i32, i32
  }
  func.func @transform_12(%arg0: i32) -> (i32, i32) {
    %c0_i32 = arith.constant 0 : i32
    %c0_i32_0 = arith.constant 0 : i32
    %c0_i32_1 = arith.constant 0 : i32
    return %c0_i32, %c0_i32_0 : i32, i32
  }
  func.func @transform_13(%arg0: i32) -> (i32, i32) {
    %c0_i32 = arith.constant 0 : i32
    %c0_i32_0 = arith.constant 0 : i32
    %c0_i32_1 = arith.constant 0 : i32
    return %c0_i32, %c0_i32_0 : i32, i32
  }
  func.func @transform_14(%arg0: i32) -> (i32, i32) {
    %c0_i32 = arith.constant 0 : i32
    %c0_i32_0 = arith.constant 0 : i32
    %c0_i32_1 = arith.constant 0 : i32
    return %c0_i32, %c0_i32_0 : i32, i32
  }
  func.func @transform_15(%arg0: i32) -> (i32, i32) {
    %c0_i32 = arith.constant 0 : i32
    %c0_i32_0 = arith.constant 0 : i32
    %c0_i32_1 = arith.constant 0 : i32
    return %c0_i32, %c0_i32_0 : i32, i32
  }
  func.func @transform_16(%arg0: i32) -> (i32, i32) {
    %c0_i32 = arith.constant 0 : i32
    %c0_i32_0 = arith.constant 0 : i32
    %c0_i32_1 = arith.constant 0 : i32
    return %c0_i32, %c0_i32_0 : i32, i32
  }
  func.func @transform_17(%arg0: i32) -> (i32, i32) {
    %c0_i32 = arith.constant 0 : i32
    %c0_i32_0 = arith.constant 0 : i32
    return %arg0, %c0_i32 : i32, i32
  }
}

</mosaic_0001>

<bundles_post_ra>
// kernel: tpu_custom_call.1
= control target key start
LH: loop header
LB: loop body
LE: loop exit
PB: predicated region body
PF: predicated region fallthrough
CT: control target
= control target key end

     0   :  { %s17541_s0 = inlined_call_operand.hbm [shape: f32[512,128], index: 0, kind: input, shape index: {}]   ;;  %s17542_s1 = inlined_call_operand.vmem [shape: bf16[128,32], index: 1, kind: input, shape index: {}]   ;;  %s17543_s2 = inlined_call_operand.vmem [shape: f32[1,32], index: 2, kind: input, shape index: {}]   ;;  %s17544_s3 = inlined_call_operand.vmem [shape: f32[1,32], index: 3, kind: input, shape index: {}]   ;;  %s17545_s4 = inlined_call_operand.vmem [shape: bf16[288,32], index: 4, kind: input, shape index: {}]   ;;  %s17546_s5 = inlined_call_operand.vmem [shape: f32[1,32], index: 5, kind: input, shape index: {}]   ;;  %s17547_s6 = inlined_call_operand.vmem [shape: f32[1,32], index: 6, kind: input, shape index: {}]   ;;  %s17548_s7 = inlined_call_operand.vmem [shape: bf16[32,128], index: 7, kind: input, shape index: {}]   ;;  %s17549_s8 = inlined_call_operand.vmem [shape: f32[1,128], index: 8, kind: input, shape index: {}]   ;;  %s17550_s9 = inlined_call_operand.vmem [shape: f32[1,128], index: 9, kind: input, shape index: {}]   ;;  %s17551_s10 = inlined_call_operand.vmem [shape: bf16[128,8], index: 10, kind: input, shape index: {}]   ;;  %s17552_s11 = inlined_call_operand.vmem [shape: bf16[8,128], index: 11, kind: input, shape index: {}]   ;;  %s17553_s12 = inlined_call_operand.vmem [shape: bf16[128,64], index: 12, kind: input, shape index: {}]   ;;  %s17554_s13 = inlined_call_operand.vmem [shape: bf16[256,9], index: 13, kind: input, shape index: {}]   ;;  %s17555_s14 = inlined_call_operand.vmem [shape: bf16[256,64], index: 14, kind: input, shape index: {}]   ;;  %s17556_s15 = inlined_call_operand.vmem [shape: bf16[4,256], index: 15, kind: input, shape index: {}]   ;;  %s17557_s16 = inlined_call_operand.vmem [shape: bf16[256,4], index: 16, kind: input, shape index: {}]   ;;  %s17558_s17 = inlined_call_operand.hbm [shape: f32[512,128], index: 17, kind: output, shape index: {}]  }
   0x1   :  { %17772 = sst [smem:[#allocation117_spill]] %s17541_s0 }
   0x2   :  { %17773 = sst [smem:[#allocation118_spill]] %s17542_s1 }
   0x3   :  { %17774 = sst [smem:[#allocation119_spill]] %s17543_s2 }
   0x4   :  { %17775 = sst [smem:[#allocation120_spill]] %s17544_s3 }
   0x5   :  { %17776 = sst [smem:[#allocation121_spill]] %s17545_s4 }
   0x6   :  { %17777 = sst [smem:[#allocation122_spill]] %s17546_s5 }
   0x7   :  { %17778 = sst [smem:[#allocation123_spill]] %s17553_s12 }
   0x8   :  { %17779 = sst [smem:[#allocation124_spill]] %s17555_s14 }
   0x9   :  { %17780 = sst [smem:[#allocation125_spill]] %s17556_s15 }
   0xa   :  { %17781 = sst [smem:[#allocation126_spill]] %s17558_s17 }
   0xb   :  { %22 = vsyncpa [#allocation4], 0 }
   0xc   :  { %24 = vsyncpa [#allocation4 + $0x1], 0 }
   0xd   :  { %25 = vsyncpa [#allocation5], 0 }
   0xe   :  { %27 = vsyncpa [#allocation5 + $0x1], 0  ;;  %s11291_s24 = smov 0   ;;  %s11293_s25 = smov 0  }
   0xf   :  { %s11295_s26 = smov 0   ;;  %s11297_s27 = smov 0  }
  0x10 LB: > { %17782 = sst [smem:[#allocation9_spill]] %s11170_s24  ;;  %s11312_s28 = sadd.s32 4294967295, %s11182_s27   ;;  %s11182_s27 = sphi %s11297_s27, %s18602_s27   ;;  %s11178_s26 = sphi %s11295_s26, %s18604_s26   ;;  %s11174_s25 = sphi %s11293_s25, %s18606_s25   ;;  %s11170_s24 = sphi %s11291_s24, %s18605_s24  }
  0x11   : > { %17783 = sst [smem:[#allocation10_spill]] %s11178_s26  ;;  %s9770_s29 = sadd.s32 4294967294, %s11182_s27  }
  0x12   : > { %17784 = sst [smem:[#allocation11_spill]] %s11312_s28  ;;  %s11316_s0 = sadd.s32 1, %s11182_s27  }
  0x13   : > { %17785 = sst [smem:[#allocation12_spill]] %s11316_s0  ;;  %s40_s30 = sadd.s32 1, %s11178_s26 }
  0x14   : > { %s37_s18 = ssub.s32 %s11182_s27, %s11316_s0  ;;  %p47_p0 = scmp.ne.s32.totalorder %s11178_s26, %s11174_s25 }
  0x15   : > { %p38_p1 = scmp.eq.s32.totalorder %s37_s18, 0  ;;  %p48_p2 = scmp.eq.s32.totalorder %s11182_s27, 0 }
  0x16   : > { %p53_p3 = scmp.ne.s32.totalorder %s11174_s25, %s11170_s24  ;;  %p54_p4 = scmp.eq.s32.totalorder %s11312_s28, 0 }
  0x17   : > { %s11328_s19 = scalar_select %p38_p1, %s11178_s26, %s40_s30  }
  0x18   : > { %p11330_p5 = por %p48_p2, %p47_p0  ;;  %p11334_p6 = por %p54_p4, %p53_p3 }
  0x19   : > { %17786 = sst [smem:[#allocation13_spill]] %s11328_s19  ;;  %p413_p7 = scmp.eq.s32.totalorder %s11312_s28, 1 }
  0x1a   : > { %p419_p8 = scmp.eq.s32.totalorder %s9770_s29, 1  ;;  %p10683_p10 = scmp.lt.s32.totalorder %s11182_s27, 2 }
  0x1b   : > { %p11341_p11 = por %p413_p7, %p47_p0  ;;  %s487_s23 = sand.u32 1, %s11178_s26  }
  0x1c   : > { %p11345_p12 = por %p419_p8, %p53_p3  ;;  %s10219_s30 = sshll.u32 %s11182_s27, 8 }
  0x1d   : > { %s17789_s21 = scalar_select %p11341_p11, 1, 0 }
  0x1e   : > { %s17791_s22 = scalar_select %p11345_p12, 1, 0 }
  0x1f   : > { %17790 = sst [smem:[#allocation14_spill]] %s17789_s21  ;;  %s9773_s18 = sshll.u32 %s487_s23, 8 }
  0x20   : > { %17792 = sst [smem:[#allocation15_spill]] %s17791_s22  ;;  %s491_s29 = scalar_lea.vmem [#allocation3], %s9773_s18 }
  0x21   : > { %s17793_s24 = sld [smem:[#allocation117_spill]]  ;;  %s499_s15 = sshll.u32 %s491_s29, 4  ;;  %s500_s15 = int_to_ptr.vmem [resolvable:$true] %s499_s15 }
  0x22   : > { %p11356_p13 = pnand %p10683_p10, %p11330_p5  ;;  %p9776_p0 = scmp.ge.s32.totalorder %s11182_s27, 1 }
  0x23   : > { %p507_p1 = scmp.lt.s32.totalorder %s11182_s27, 3  ;;  %s488_s26 = scalar_lea.sflag [#allocation4], %s487_s23 }
  0x24   : > { %p11090_p3 = pneg %p11356_p13 }
  0x27   : > { %s17794_s17 = smov %s17793_s24  ;;  %s496_s28 = scalar_lea.hbm %s17793_s24, %s10219_s30 }
  0x28   : > { %s497_s12 = sshll.u32 %s496_s28, 4  ;;  %s11093_s0 = scalar_lea.hbm %s17794_s17, 512  ;;  %s498_s12 = int_to_ptr.hbm [resolvable:$true] %s497_s12 }
  0x29   : > { %s11086_s22 = sshra.s32 %s498_s12, 4  ;;  %s11087_s22 = int_to_ptr.hbm [resolvable:$true] %s11086_s22 }
  0x2a   : > { %s11088_s21 = scalar_lea.hbm %s11087_s22, 256  ;;  %p11094_p5 = scmp.lt.s32.totalorder %s11087_s22, %s17794_s17 }
  0x2b   : > { %p11089_p2 = scmp.ne.s32.totalorder %s11087_s22, %s11088_s21  ;;  %p11095_p8 = scmp.lt.s32.totalorder %s11093_s0, %s11088_s21 }
  0x2d   : > { %p11091_p4 = pnand %p11090_p3, %p11089_p2  ;;  %p11096_p10 = por %p11095_p8, %p11094_p5 }
  0x2f   : > { %p11092_p7 = pneg %p11091_p4 }
  0x31   : > { %p11097_p9 = pnand %p11096_p10, %p11092_p7 }
  0x33   : > { %11100 = shalt.err (!%p11097_p9)
}
  0x34   : > { %s11184_s23 = smov 128   ;;  %s11185_s30 = smov 8  }
  0x35   : > { %10678 = dma.hbm_to_vmem [thread:$0]  (!%p11356_p13), %s498_s12, 4096, %s500_s15, %s488_s26, %s11184_s23, %s11184_s23, %s11185_s30  }
  0x36   : > { %p508_p2 = pnand %p9776_p0, %p507_p1 }
  0x38   : > { %511 = sbr.rel (%p508_p2) target bundleno = 3351 (0xd17), region = 88 }
  0x3d   : > { %s11377_s18 = sand.u32 1, %s11174_s25  }
  0x3e   : > { %s9777_s21 = sshll.u32 %s11377_s18, 8  ;;  %s514_s22 = scalar_lea.sflag [#allocation4], %s11377_s18 }
  0x3f   : > { %s11383_s29 = scalar_lea.vmem [#allocation3], %s9777_s21 }
  0x40   : > { %11161 = dma.done.wait (%p11334_p6), %s514_s22, 4096  }
  0x41   : > { %11163 = vsyncadd (%p11334_p6), %s514_s22, 4294963200  ;;  %v17574_v0 = vmov 1   ;;  %v11395_v1 = vld [vmem:[%s17554_s13 + $0x40] sm:$0xf]  ;;  %v11400_v2 = vld [vmem:[%s17554_s13 + $0x38] sm:$0xf] }
  0x42   : > { %10736 = vset.pattern.permute.xlu2 %v17574_v0  ;;  %10735 = vset.pattern.permute.xlu1 %v17574_v0  ;;  %v11405_v3 = vld [vmem:[%s17554_s13 + $0x30] sm:$0xf]  ;;  %s17796_s19 = sld [smem:[#allocation118_spill]]  ;;  %v11419_v6 = vld [vmem:[%s17554_s13 + $0x44] sm:$0xf]  ;;  %v17576_v20 = vmov 0  }
  0x43   : > { %10734 = vset.pattern.permute.xlu0 %v17574_v0  ;;  %1676 = vperm.xlu2 %10736, %v11395_v1   ;;  %v11424_v7 = vld [vmem:[%s17554_s13 + $0x3c] sm:$0xf]  ;;  %v11429_v8 = vld [vmem:[%s17554_s13 + $0x34] sm:$0xf]  ;;  %v11443_v11 = vld [vmem:[%s17554_s13 + $0x50] sm:$0xf] }
  0x44   : > { %1660 = vperm.xlu1 %10735, %v11400_v2   ;;  %1644 = vperm.xlu0 %10734, %v11405_v3   ;;  %v11448_v12 = vld [vmem:[%s17554_s13 + $0x4c] sm:$0xf]  ;;  %v11453_v13 = vld [vmem:[%s17554_s13 + $0x48] sm:$0xf]  ;;  %v11467_v16 = vld [vmem:[%s17554_s13 + $0x54] sm:$0xf] }
  0x45   : > { %v11472_v17 = vld [vmem:[%s17554_s13 + $0x4] sm:$0xf]  ;;  %v11480_v19 = vld [vmem:[%s17554_s13] sm:$0xf]  ;;  %v572_v22 = vld [vmem:[%s11383_s29] sm:$0xff]  ;;  %v17572_v48 = vmov 2  }
  0x46   : > { %v573_v23 = vld [vmem:[%s11383_s29 + $0x8] sm:$0xff]  ;;  %v11495_v24 = vld [vmem:[%s17554_s13 + $0x10] sm:$0xf]  ;;  %v11500_v25 = vld [vmem:[%s17554_s13 + $0x8] sm:$0xf]  ;;  %vm877_vm0 = vcmask 257024  }
  0x47   : > { %v11505_v26 = vld [vmem:[%s17554_s13 + $0xc] sm:$0xf]  ;;  %v604_v27 = vpack.c.bf16 %v573_v23, %v572_v22  ;;  %v11514_v28 = vld [vmem:[%s17554_s13 + $0x18] sm:$0xf]  ;;  %v11519_v29 = vld [vmem:[%s17554_s13 + $0x1c] sm:$0xf] }
  0x48   : > { %v10227_v4 = vld [vmem:[%s17796_s19 + $0x38] sm:$0xff]  ;;  %v10226_v5 = vld [vmem:[%s17796_s19 + $0x30] sm:$0xff]  ;;  %v10225_v9 = vld [vmem:[%s17796_s19 + $0x28] sm:$0xff]  ;;  %878 = vst.msk [vmem:[#allocation2] sm:$0xf] %vm877_vm0, %v17576_v20  ;;  %s17799_s2 = sld [smem:[#allocation119_spill]] }
  0x49   : > { %684 = vmatpush.bf16.msra.mxu0 %v10227_v4  ;;  %v10224_v10 = vld [vmem:[%s17796_s19 + $0x20] sm:$0xff]  ;;  %v10223_v14 = vld [vmem:[%s17796_s19 + $0x18] sm:$0xff]  ;;  %v10222_v15 = vld [vmem:[%s17796_s19 + $0x10] sm:$0xff]  ;;  %879 = vst.msk [vmem:[#allocation2 + $0x4] sm:$0xf] %vm877_vm0, %v17576_v20  ;;  %s17800_s3 = sld [smem:[#allocation120_spill]] }
  0x4a   : > { %v10221_v18 = vld [vmem:[%s17796_s19 + $0x8] sm:$0xff]  ;;  %v10220_v21 = vld [vmem:[%s17796_s19] sm:$0xff]  ;;  %v11524_v30 = vld [vmem:[%s17554_s13 + $0x14] sm:$0xf]  ;;  %880 = vst.msk [vmem:[#allocation2 + $0x88] sm:$0xf] %vm877_vm0, %v17576_v20 }
  0x4b   : > { %1684 = vperm.xlu2 %10736, %v11419_v6   ;;  %v574_v31 = vld [vmem:[%s11383_s29 + $0x10] sm:$0xff]  ;;  %v575_v32 = vld [vmem:[%s11383_s29 + $0x18] sm:$0xff]  ;;  %v11534_v33 = vld [vmem:[%s17554_s13 + $0x24] sm:$0xf]  ;;  %881 = vst.msk [vmem:[#allocation2 + $0x8c] sm:$0xf] %vm877_vm0, %v17576_v20 }
  0x4c   : > { %1668 = vperm.xlu1 %10735, %v11424_v7   ;;  %1652 = vperm.xlu0 %10734, %v11429_v8   ;;  %v11539_v34 = vld [vmem:[%s17554_s13 + $0x28] sm:$0xf]  ;;  %v11544_v35 = vld [vmem:[%s17554_s13 + $0x20] sm:$0xf]  ;;  %v605_v36 = vpack.c.bf16 %v575_v32, %v574_v31  ;;  %v11552_v37 = vld [vmem:[%s17554_s13 + $0x2c] sm:$0xf] }
  0x4d   : > { %685 = vmatpush.bf16.msra.mxu0 %v10226_v5  ;;  %v576_v38 = vld [vmem:[%s11383_s29 + $0x20] sm:$0xff]  ;;  %v577_v39 = vld [vmem:[%s11383_s29 + $0x28] sm:$0xff]  ;;  %v578_v45 = vld [vmem:[%s11383_s29 + $0x30] sm:$0xff]  ;;  %s17825_s4 = sld [smem:[#allocation121_spill]]  ;;  %vm1899_vm1 = vcmask 261120   ;;  %vm1396_vm2 = vcmask 1046528  }
  0x4e   : > { %v606_v40 = vpack.c.bf16 %v577_v39, %v576_v38  ;;  %v11562_v41 = vld [vmem:[%s17554_s13 + $0x5c] sm:$0xf]  ;;  %v11568_v42 = vld [vmem:[%s17554_s13 + $0x58] sm:$0xf]  ;;  %v11577_v43 = vld [vmem:[%s17554_s13 + $0x64] sm:$0xf] }
  0x4f   : > { %v11582_v44 = vld [vmem:[%s17554_s13 + $0x60] sm:$0xf]  ;;  %v579_v46 = vld [vmem:[%s11383_s29 + $0x38] sm:$0xff]  ;;  %v1006_v50 = vld [vmem:[%s17554_s13 + $0x6c] sm:$0xf]  ;;  %vm2725_vm4 = vcmask 1040384  }
  0x50   : > { %v607_v47 = vpack.c.bf16 %v579_v46, %v578_v45  ;;  %v11605_v51 = vld [vmem:[%s17554_s13 + $0x68] sm:$0xf]  ;;  %v580_v52 = vld [vmem:[%s11383_s29 + $0x40] sm:$0xff]  ;;  %v581_v53 = vld [vmem:[%s11383_s29 + $0x48] sm:$0xff]  ;;  %vm2037_vm3 = vsmask.f32 4352 }
  0x51   : > { %686 = vmatpush.bf16.msra.mxu0 %v10225_v9  ;;  %v608_v54 = vpack.c.bf16 %v581_v53, %v580_v52  ;;  %v1007_v56 = vld [vmem:[%s17554_s13 + $0x70] sm:$0xf]  ;;  %v582_v58 = vld [vmem:[%s11383_s29 + $0x50] sm:$0xff]  ;;  %v11630_v60 = vld [vmem:[%s17554_s13 + $0x74] sm:$0xf]  ;;  %s18414_s5 = sld [smem:[#allocation122_spill]] }
  0x52   : > { %v583_v59 = vld [vmem:[%s11383_s29 + $0x58] sm:$0xff]  ;;  %v11650_v4 = vld [vmem:[%s17554_s13 + $0x7c] sm:$0xf]  ;;  %v11655_v5 = vld [vmem:[%s17554_s13 + $0x78] sm:$0xf]  ;;  %vm8005_vm7 = vcmask 1041408  }
  0x53   : > { %1708 = vperm.xlu2 %10736, %v11443_v11   ;;  %v609_v61 = vpack.c.bf16 %v583_v59, %v582_v58  ;;  %v586_v32 = vld [vmem:[%s11383_s29 + $0x70] sm:$0xff]  ;;  %v588_v52 = vld [vmem:[%s11383_s29 + $0x80] sm:$0xff]  ;;  %v589_v53 = vld [vmem:[%s11383_s29 + $0x88] sm:$0xff]  ;;  %vm2876_vm5 = vsmask.f32 7424  ;;  %vm8007_vm8 = vcmask 1042432  }
  0x54   : > { %1700 = vperm.xlu1 %10735, %v11448_v12   ;;  %1692 = vperm.xlu0 %10734, %v11453_v13   ;;  %v612_v59 = vpack.c.bf16 %v589_v53, %v588_v52  ;;  %vm8009_vm9 = vcmask 1043456   ;;  %vm8011_vm10 = vcmask 1044480   ;;  %vm8013_vm11 = vcmask 1045504   ;;  %s18468_s30 = sld [smem:[#allocation124_spill]]  ;;  %s11198_s12 = smov 64  }
  0x55   : > { %687 = vmatpush.bf16.msra.mxu0 %v10224_v10  ;;  %vm8097_vm12 = vcmask 64512   ;;  %s18534_s22 = sld [smem:[#allocation125_spill]] }
  0x56   : > { %s18535_s26 = sld [smem:[#allocation123_spill]] }
  0x57   : > { %s18595_s24 = sld [smem:[#allocation126_spill]] }
  0x59   : > { %688 = vmatpush.bf16.msra.mxu0 %v10223_v14  ;;  %v584_v14 = vld [vmem:[%s11383_s29 + $0x60] sm:$0xff] }
  0x5b   : > { %10738 = vset.pattern.permute.xlu2 %v17576_v20 }
  0x5c   : > { %10737 = vset.pattern.permute.xlu1 %v17576_v20  ;;  %1716 = vperm.xlu0 %10734, %v11467_v16   ;;  %s18536_s20 = smov %s18535_s26 }
  0x5d   : > { %689 = vmatpush.bf16.msra.mxu0 %v10222_v15  ;;  %1022 = vperm.xlu2 %10738, %v11472_v17   ;;  %v585_v15 = vld [vmem:[%s11383_s29 + $0x68] sm:$0xff]  ;;  %s18596_s28 = smov %s18595_s24 }
  0x5e   : > { %1013 = vperm.xlu1 %10737, %v11480_v19   ;;  %s11136_s15 = scalar_lea.hbm %s18596_s28, 512 }
  0x61   : > { %690 = vmatpush.bf16.msra.mxu0 %v10221_v18  ;;  %v610_v18 = vpack.c.bf16 %v585_v15, %v584_v14 }
  0x64   : > { %10739 = vset.pattern.permute.xlu0 %v17576_v20 }
  0x65   : > { %691 = vmatpush.bf16.msra.mxu0 %v10220_v21  ;;  %1049 = vperm.xlu2 %10738, %v11495_v24  }
  0x66   : > { %1031 = vperm.xlu0 %10739, %v11500_v25   ;;  %1040 = vperm.xlu1 %10737, %v11505_v26  }
  0x68   : > { %692 = vmatmul.bf16.vlgmr.msra.gmra.mxu0 %v604_v27 }
  0x6d   : > { %1067 = vperm.xlu2 %10738, %v11514_v28  }
  0x6e   : > { %1076 = vperm.xlu0 %10739, %v11519_v29   ;;  %1058 = vperm.xlu1 %10737, %v11524_v30  }
  0x75   : > { %1094 = vperm.xlu2 %10738, %v11534_v33  }
  0x76   : > { %1103 = vperm.xlu0 %10739, %v11539_v34   ;;  %1085 = vperm.xlu1 %10737, %v11544_v35  }
  0x78   : > { %697 = vmatmul.bf16.gmra.mxu0 %v605_v36  ;;  %v587_v36 = vld [vmem:[%s11383_s29 + $0x78] sm:$0xff] }
  0x79   : > { %v611_v39 = vpack.c.bf16 %v587_v36, %v586_v32 }
  0x7d   : > { %1121 = vperm.xlu2 %10738, %v11405_v3  }
  0x7e   : > { %1130 = vperm.xlu0 %10739, %v11429_v8   ;;  %1112 = vperm.xlu1 %10737, %v11552_v37  }
  0x85   : > { %10741 = vset.pattern.permute.xlu2 %v17574_v0 }
  0x86   : > { %1139 = vperm.xlu0 %10739, %v11400_v2   ;;  %10740 = vset.pattern.permute.xlu1 %v17574_v0 }
  0x87   : > { %1732 = vperm.xlu2 %10741, %v11562_v41   ;;  %1724 = vperm.xlu1 %10740, %v11568_v42  }
  0x88   : > { %702 = vmatmul.bf16.gmra.mxu0 %v606_v40 }
  0x8e   : > { %10743 = vset.pattern.permute.xlu0 %v17574_v0 }
  0x8f   : > { %1748 = vperm.xlu0 %10743, %v11577_v43   ;;  %1740 = vperm.xlu2 %10741, %v11582_v44  }
  0x90   : > { %10742 = vset.pattern.permute.xlu1 %v17576_v20 }
  0x91   : > { %1148 = vperm.xlu1 %10742, %v11424_v7  }
  0x97   : > { %10751 = vset.pattern.permute.xlu0 %v17572_v48  ;;  %10744 = vset.pattern.permute.xlu2 %v17576_v20 }
  0x98   : > { %707 = vmatmul.bf16.gmra.mxu0 %v607_v47  ;;  %2373 = vperm.xlu0 %10751, %v11480_v19  }
  0x99   : > { %1166 = vperm.xlu2 %10744, %v11419_v6   ;;  %1157 = vperm.xlu1 %10742, %v11395_v1  }
  0x9d   : > { %v11596_v49 = vpop.permute.xlu2 %1676 }
  0xa0   : > { %10752 = vset.pattern.permute.xlu0 %v17576_v20 }
  0xa1   : > { %10746 = vset.pattern.permute.xlu2 %v17574_v0  ;;  %10745 = vset.pattern.permute.xlu1 %v17574_v0 }
  0xa2   : > { %1764 = vperm.xlu2 %10746, %v1006_v50   ;;  %1175 = vperm.xlu0 %10752, %v11453_v13  }
  0xa3   : > { %1756 = vperm.xlu1 %10745, %v11605_v51  }
  0xa5   : > { %v11613_v55 = vpop.permute.xlu2 %1684 }
  0xa8   : > { %712 = vmatmul.bf16.gmra.mxu0 %v608_v54 }
  0xaa   : > { %1772 = vperm.xlu2 %10746, %v1007_v56   ;;  %1202 = vperm.xlu0 %10752, %v11467_v16  }
  0xab   : > { %10747 = vset.pattern.permute.xlu1 %v17576_v20 }
  0xac   : > { %1184 = vperm.xlu1 %10747, %v11448_v12  }
  0xad   : > { %v11621_v57 = vpop.permute.xlu2 %1708 }
  0xb2   : > { %10749 = vset.pattern.permute.xlu2 %v17576_v20  ;;  %1220 = vperm.xlu0 %10752, %v11562_v41  }
  0xb3   : > { %1193 = vperm.xlu2 %10749, %v11443_v11  }
  0xb4   : > { %10748 = vset.pattern.permute.xlu1 %v17574_v0 }
  0xb5   : > { %1780 = vperm.xlu1 %10748, %v11630_v60  }
  0xb6   : > { %v11641_v62 = vpop.permute.xlu1 %1660  ;;  %v11674_v23 = vpop.permute.xlu0 %1644 }
  0xb7   : > { %v11645_v63 = vpop.permute.xlu2 %1022 }
  0xb8   : > { %717 = vmatmul.bf16.gmra.mxu0 %v609_v61 }
  0xba   : > { %1256 = vperm.xlu0 %10752, %v1006_v50   ;;  %v11710_v50 = vld [vmem:[%s17799_s2] ss:$0 sm:$0xff] }
  0xbb   : > { %10750 = vset.pattern.permute.xlu2 %v17574_v0 }
  0xbc   : > { %1796 = vperm.xlu2 %10750, %v11650_v4  }
  0xbd   : > { %1788 = vperm.xlu1 %10748, %v11655_v5  }
  0xbe   : > { %v11660_v9 = vpop.permute.xlu1 %1668  ;;  %v11687_v38 = vpop.permute.xlu0 %1652 }
  0xbf   : > { %v11662_v10 = vpop.permute.xlu2 %1049 }
  0xc2   : > { %1265 = vperm.xlu0 %10752, %v1007_v56   ;;  %v11719_v56 = vld [vmem:[%s17800_s3] ss:$0 sm:$0xff] }
  0xc4   : > { %10754 = vset.pattern.permute.xlu2 %v17572_v48 }
  0xc5   : > { %10753 = vset.pattern.permute.xlu1 %v17572_v48  ;;  %2389 = vperm.xlu2 %10754, %v11500_v25  }
  0xc6   : > { %2381 = vperm.xlu1 %10753, %v11472_v17   ;;  %v11670_v21 = vpop.permute.xlu1 %1700  ;;  %v11699_v46 = vpop.permute.xlu0 %1692 }
  0xc7   : > { %v11672_v22 = vpop.permute.xlu2 %1067 }
  0xc8   : > { %722 = vmatmul.bf16.gmra.mxu0 %v610_v18 }
  0xca   : > { %10775 = vset.pattern.permute.xlu0 %v17574_v0 }
  0xcb   : > { %1620 = vperm.xlu0 %10775, %v11534_v33  }
  0xcd   : > { %10755 = vset.pattern.permute.xlu2 %v17576_v20 }
  0xce   : > { %2397 = vperm.xlu1 %10753, %v11505_v26   ;;  %1211 = vperm.xlu2 %10755, %v11568_v42   ;;  %v11723_v14 = vpop.permute.xlu0 %1716 }
  0xcf   : > { %v11681_v27 = vpop.permute.xlu2 %1094 }
  0xd0   : > { %17797 = vst [vmem:[#allocation16_spill] sm:$0xff] %v11681_v27  ;;  %v11683_v31 = vpop.permute.xlu1 %1013  ;;  %v593_v27 = vld [vmem:[%s11383_s29 + $0xa8] sm:$0xff] }
  0xd3   : > { %10776 = vset.pattern.permute.xlu0 %v17572_v48 }
  0xd4   : > { %2421 = vperm.xlu0 %10776, %v11514_v28  }
  0xd6   : > { %2405 = vperm.xlu1 %10753, %v11495_v24   ;;  %10756 = vset.pattern.permute.xlu2 %v17572_v48 }
  0xd7   : > { %2413 = vperm.xlu2 %10756, %v11524_v30   ;;  %v11696_v45 = vpop.permute.xlu2 %1121 }
  0xd8   : > { %727 = vmatmul.bf16.gmra.mxu0 %v611_v39  ;;  %v11694_v40 = vpop.permute.xlu1 %1040  ;;  %17798 = vst [vmem:[#allocation17_spill] sm:$0xff] %v11696_v45 }
  0xdc   : > { %2461 = vperm.xlu0 %10776, %v11552_v37  }
  0xde   : > { %10757 = vset.pattern.permute.xlu1 %v17576_v20 }
  0xdf   : > { %1229 = vperm.xlu1 %10757, %v11582_v44   ;;  %10758 = vset.pattern.permute.xlu2 %v17576_v20 }
  0xe0   : > { %1238 = vperm.xlu2 %10758, %v11577_v43   ;;  %v11705_v47 = vpop.permute.xlu1 %1058 }
  0xe1   : > { %v11714_v54 = vpop.permute.xlu2 %1732 }
  0xe4   : > { %2469 = vperm.xlu0 %10776, %v11405_v3  }
  0xe5   : > { %v693_v58 = vpop.f32.mrf.mxu0 }
  0xe6   : > { %v777_v61 = vmul.f32 %v11710_v50, %v693_v58 }
  0xe7   : > { %10759 = vset.pattern.permute.xlu1 %v17572_v48  ;;  %v591_v48 = vld [vmem:[%s11383_s29 + $0x98] sm:$0xff] }
  0xe8   : > { %v813_v15 = vadd.f32 %v11719_v56, %v777_v61  ;;  %2429 = vperm.xlu1 %10759, %v11519_v29   ;;  %732 = vmatmul.bf16.gmra.mxu0 %v612_v59  ;;  %v11728_v18 = vpop.permute.xlu1 %1085  ;;  %v11739_v59 = vpop.permute.xlu0 %1031 }
  0xe9   : > { %17801 = vst [vmem:[#allocation18_spill] sm:$0xff] %v11728_v18  ;;  %10760 = vset.pattern.permute.xlu2 %v17574_v0  ;;  %v11731_v36 = vpop.permute.xlu2 %1740  ;;  %v17808_v18 = vmov 1  }
  0xea   : > { %v845_v32 = vmax.f32 %v813_v15, 0.0  ;;  %17802 = vst [vmem:[#allocation19_spill] sm:$0xff] %v11731_v36  ;;  %1564 = vperm.xlu2 %10760, %v11500_v25   ;;  %v590_v15 = vld [vmem:[%s11383_s29 + $0x90] sm:$0xff] }
  0xec   : > { %v882_v39 = vpack.c.bf16 %v845_v32, %v845_v32  ;;  %2509 = vperm.xlu0 %10776, %v11419_v6  }
  0xed   : > { %v695_v52 = vpop.f32.mrf.mxu0 }
  0xee   : > { %914 = vst.msk [vmem:[#allocation2 + $0x8] sm:$0xf] %vm877_vm0, %v882_v39  ;;  %v778_v53 = vmul.f32 %v11710_v50, %v695_v52  ;;  %v17578_v52 = vmov 4  }
  0xf0   : > { %v814_v58 = vadd.f32 %v11719_v56, %v778_v53  ;;  %10761 = vset.pattern.permute.xlu1 %v17574_v0  ;;  %v11745_v32 = vpop.permute.xlu1 %1112  ;;  %v613_v0 = vpack.c.bf16 %v591_v48, %v590_v15 }
  0xf1   : > { %1572 = vperm.xlu1 %10761, %v11505_v26   ;;  %17803 = vst [vmem:[#allocation20_spill] sm:$0xff] %v11745_v32  ;;  %v17805_v32 = vmov 2  }
  0xf2   : > { %v846_v61 = vmax.f32 %v814_v58, 0.0  ;;  %10762 = vset.pattern.permute.xlu2 %v17576_v20 }
  0xf3   : > { %1247 = vperm.xlu2 %10762, %v11605_v51   ;;  %v11748_v39 = vpop.permute.xlu2 %1166 }
  0xf4   : > { %v883_v45 = vpack.c.bf16 %v846_v61, %v846_v61  ;;  %17804 = vst [vmem:[#allocation21_spill] sm:$0xff] %v11748_v39  ;;  %10789 = vset.pattern.permute.xlu0 %v17578_v52  ;;  %v11759_v52 = vpop.permute.xlu0 %1076 }
  0xf5   : > { %v698_v53 = vpop.f32.mrf.mxu0  ;;  %4022 = vperm.xlu0 %10789, %v11505_v26   ;;  %17806 = vst [vmem:[#allocation22_spill] sm:$0xff] %v11759_v52 }
  0xf6   : > { %915 = vst.msk [vmem:[#allocation2 + $0xc] sm:$0xf] %vm877_vm0, %v883_v45  ;;  %v779_v58 = vmul.f32 %v11710_v50, %v698_v53 }
  0xf8   : > { %v815_v20 = vadd.f32 %v11719_v56, %v779_v58  ;;  %737 = vmatmul.bf16.gmra.mxu0 %v613_v0  ;;  %v592_v58 = vld [vmem:[%s11383_s29 + $0xa0] sm:$0xff] }
  0xf9   : > { %10763 = vset.pattern.permute.xlu1 %v17805_v32  ;;  %v11757_v39 = vpop.permute.xlu1 %1724 }
  0xfa   : > { %v847_v61 = vmax.f32 %v815_v20, 0.0  ;;  %2437 = vperm.xlu1 %10763, %v11544_v35  }
  0xfb   : > { %10764 = vset.pattern.permute.xlu2 %v17805_v32 }
  0xfc   : > { %v884_v48 = vpack.c.bf16 %v847_v61, %v847_v61  ;;  %2445 = vperm.xlu2 %10764, %v11534_v33   ;;  %v11763_v15 = vpop.permute.xlu2 %1764 }
  0xfd   : > { %v700_v45 = vpop.f32.mrf.mxu0  ;;  %17807 = vst [vmem:[#allocation23_spill] sm:$0xff] %v11763_v15  ;;  %4030 = vperm.xlu0 %10789, %v11495_v24  }
  0xfe   : > { %916 = vst.msk [vmem:[#allocation2 + $0x10] sm:$0xf] %vm877_vm0, %v884_v48  ;;  %v780_v0 = vmul.f32 %v11710_v50, %v700_v45  ;;  %v614_v48 = vpack.c.bf16 %v593_v27, %v592_v58  ;;  %v11778_v45 = vpop.permute.xlu0 %1103 }
  0xff   : > { %17811 = vst [vmem:[#allocation26_spill] sm:$0xff] %v11778_v45 }
 0x100   : > { %v816_v20 = vadd.f32 %v11719_v56, %v780_v0 }
 0x102   : > { %v848_v53 = vmax.f32 %v816_v20, 0.0  ;;  %10765 = vset.pattern.permute.xlu1 %v17808_v18  ;;  %v17580_v20 = vmov 3  }
 0x103   : > { %1580 = vperm.xlu1 %10765, %v11495_v24   ;;  %v11773_v36 = vpop.permute.xlu1 %1148 }
 0x104   : > { %v885_v61 = vpack.c.bf16 %v848_v53, %v848_v53  ;;  %17809 = vst [vmem:[#allocation24_spill] sm:$0xff] %v11773_v36  ;;  %10766 = vset.pattern.permute.xlu2 %v17808_v18  ;;  %v11776_v52 = vpop.permute.xlu2 %1772  ;;  %v17812_v36 = vmov 0  }
 0x105   : > { %v703_v15 = vpop.f32.mrf.mxu0  ;;  %17810 = vst [vmem:[#allocation25_spill] sm:$0xff] %v11776_v52  ;;  %1588 = vperm.xlu2 %10766, %v11524_v30   ;;  %10794 = vset.pattern.permute.xlu0 %v17580_v20 }
 0x106   : > { %917 = vst.msk [vmem:[#allocation2 + $0x14] sm:$0xf] %vm877_vm0, %v885_v61  ;;  %v781_v0 = vmul.f32 %v11710_v50, %v703_v15  ;;  %3193 = vperm.xlu0 %10794, %v11480_v19  }
 0x108   : > { %v817_v53 = vadd.f32 %v11719_v56, %v781_v0  ;;  %742 = vmatmul.bf16.gmra.mxu0 %v614_v48  ;;  %v11797_v48 = vpop.permute.xlu0 %1130 }
 0x10a   : > { %v849_v27 = vmax.f32 %v817_v53, 0.0 }
 0x10b   : > { %10767 = vset.pattern.permute.xlu1 %v17812_v36  ;;  %v11787_v52 = vpop.permute.xlu1 %1157 }
 0x10c   : > { %v886_v58 = vpack.c.bf16 %v849_v27, %v849_v27  ;;  %17813 = vst [vmem:[#allocation27_spill] sm:$0xff] %v11787_v52  ;;  %1274 = vperm.xlu1 %10767, %v11630_v60   ;;  %v594_v27 = vld [vmem:[%s11383_s29 + $0xb0] sm:$0xff]  ;;  %v595_v60 = vld [vmem:[%s11383_s29 + $0xb8] sm:$0xff] }
 0x10d   : > { %v705_v61 = vpop.f32.mrf.mxu0  ;;  %10768 = vset.pattern.permute.xlu2 %v17805_v32  ;;  %v11793_v20 = vpop.permute.xlu2 %1193  ;;  %v615_v45 = vpack.c.bf16 %v595_v60, %v594_v27 }
 0x10e   : > { %918 = vst.msk [vmem:[#allocation2 + $0x18] sm:$0xf] %vm877_vm0, %v886_v58  ;;  %v782_v15 = vmul.f32 %v11710_v50, %v705_v61  ;;  %2453 = vperm.xlu2 %10768, %v11539_v34   ;;  %3265 = vperm.xlu0 %10794, %v11534_v33  }
 0x10f   : > { %17814 = vst [vmem:[#allocation28_spill] sm:$0xff] %v11793_v20 }
 0x110   : > { %v818_v0 = vadd.f32 %v11719_v56, %v782_v15  ;;  %v11812_v15 = vpop.permute.xlu0 %1139 }
 0x111   : > { %17816 = vst [vmem:[#allocation30_spill] sm:$0xff] %v11812_v15 }
 0x112   : > { %v850_v53 = vmax.f32 %v818_v0, 0.0 }
 0x114   : > { %v887_v52 = vpack.c.bf16 %v850_v53, %v850_v53  ;;  %10769 = vset.pattern.permute.xlu1 %v17808_v18 }
 0x115   : > { %v708_v58 = vpop.f32.mrf.mxu0  ;;  %1596 = vperm.xlu1 %10769, %v11514_v28   ;;  %v11806_v20 = vpop.permute.xlu1 %1756 }
 0x116   : > { %919 = vst.msk [vmem:[#allocation2 + $0x1c] sm:$0xf] %vm877_vm0, %v887_v52  ;;  %v783_v61 = vmul.f32 %v11710_v50, %v708_v58  ;;  %10770 = vset.pattern.permute.xlu2 %v17808_v18  ;;  %3273 = vperm.xlu0 %10794, %v11539_v34   ;;  %v11810_v33 = vpop.permute.xlu2 %1796 }
 0x117   : > { %17815 = vst [vmem:[#allocation29_spill] sm:$0xff] %v11810_v33  ;;  %1604 = vperm.xlu2 %10770, %v11519_v29  }
 0x118   : > { %v819_v0 = vadd.f32 %v11719_v56, %v783_v61  ;;  %747 = vmatmul.bf16.gmra.mxu0 %v615_v45 }
 0x11a   : > { %v851_v52 = vmax.f32 %v819_v0, 0.0  ;;  %v11829_v0 = vpop.permute.xlu0 %1748 }
 0x11c   : > { %v888_v53 = vpack.c.bf16 %v851_v52, %v851_v52 }
 0x11d   : > { %v710_v27 = vpop.f32.mrf.mxu0  ;;  %10771 = vset.pattern.permute.xlu1 %v17812_v36 }
 0x11e   : > { %920 = vst.msk [vmem:[#allocation2 + $0x20] sm:$0xf] %vm877_vm0, %v888_v53  ;;  %v784_v60 = vmul.f32 %v11710_v50, %v710_v27  ;;  %1283 = vperm.xlu1 %10771, %v11655_v5   ;;  %10801 = vset.pattern.permute.xlu0 %v17805_v32  ;;  %v11821_v58 = vpop.permute.xlu1 %1184  ;;  %v596_v53 = vld [vmem:[%s11383_s29 + $0xc0] sm:$0xff]  ;;  %v597_v27 = vld [vmem:[%s11383_s29 + $0xc8] sm:$0xff] }
 0x11f   : > { %17817 = vst [vmem:[#allocation31_spill] sm:$0xff] %v11821_v58  ;;  %10772 = vset.pattern.permute.xlu2 %v17812_v36  ;;  %2517 = vperm.xlu0 %10801, %v11453_v13   ;;  %v11826_v45 = vpop.permute.xlu2 %2389  ;;  %v616_v33 = vpack.c.bf16 %v597_v27, %v596_v53 }
 0x120   : > { %v820_v61 = vadd.f32 %v11719_v56, %v784_v60  ;;  %17818 = vst [vmem:[#allocation32_spill] sm:$0xff] %v11826_v45  ;;  %1292 = vperm.xlu2 %10772, %v11650_v4  }
 0x122   : > { %v852_v52 = vmax.f32 %v820_v61, 0.0 }
 0x124   : > { %v889_v5 = vpack.c.bf16 %v852_v52, %v852_v52 }
 0x125   : > { %v713_v15 = vpop.f32.mrf.mxu0 }
 0x126   : > { %921 = vst.msk [vmem:[#allocation2 + $0x24] sm:$0xf] %vm877_vm0, %v889_v5  ;;  %v785_v60 = vmul.f32 %v11710_v50, %v713_v15  ;;  %10773 = vset.pattern.permute.xlu1 %v17805_v32  ;;  %v11845_v15 = vpop.permute.xlu0 %2373 }
 0x127   : > { %2477 = vperm.xlu1 %10773, %v11429_v8   ;;  %2573 = vperm.xlu0 %10801, %v11577_v43   ;;  %v11839_v58 = vpop.permute.xlu1 %1780  ;;  %17820 = vst [vmem:[#allocation34_spill] sm:$0xff] %v11845_v15 }
 0x128   : > { %v821_v36 = vadd.f32 %v11719_v56, %v785_v60  ;;  %10774 = vset.pattern.permute.xlu2 %v17808_v18  ;;  %752 = vmatmul.bf16.gmra.mxu0 %v616_v33  ;;  %v11842_v61 = vpop.permute.xlu2 %1211 }
 0x129   : > { %17819 = vst [vmem:[#allocation33_spill] sm:$0xff] %v11842_v61  ;;  %1612 = vperm.xlu2 %10774, %v11544_v35   ;;  %v598_v61 = vld [vmem:[%s11383_s29 + $0xd0] sm:$0xff] }
 0x12a   : > { %v853_v52 = vmax.f32 %v821_v36, 0.0 }
 0x12c   : > { %v890_v53 = vpack.c.bf16 %v853_v52, %v853_v52  ;;  %v599_v52 = vld [vmem:[%s11383_s29 + $0xd8] sm:$0xff] }
 0x12d   : > { %v715_v27 = vpop.f32.mrf.mxu0 }
 0x12e   : > { %922 = vst.msk [vmem:[#allocation2 + $0x28] sm:$0xf] %vm877_vm0, %v890_v53  ;;  %v786_v8 = vmul.f32 %v11710_v50, %v715_v27  ;;  %v617_v27 = vpack.c.bf16 %v599_v52, %v598_v61  ;;  %v11860_v15 = vpop.permute.xlu0 %1175 }
 0x12f   : > { %2485 = vperm.xlu1 %10773, %v11400_v2   ;;  %2581 = vperm.xlu0 %10801, %v11605_v51   ;;  %v11852_v33 = vpop.permute.xlu1 %1788  ;;  %17823 = vst [vmem:[#allocation37_spill] sm:$0xff] %v11860_v15 }
 0x130   : > { %v822_v5 = vadd.f32 %v11719_v56, %v786_v8  ;;  %17821 = vst [vmem:[#allocation35_spill] sm:$0xff] %v11852_v33 }
 0x131   : > { %10777 = vset.pattern.permute.xlu2 %v17805_v32  ;;  %v11855_v36 = vpop.permute.xlu2 %2413 }
 0x132   : > { %v854_v60 = vmax.f32 %v822_v5, 0.0  ;;  %17822 = vst [vmem:[#allocation36_spill] sm:$0xff] %v11855_v36  ;;  %2493 = vperm.xlu2 %10777, %v11424_v7   ;;  %v17582_v5 = vmov 5  }
 0x134   : > { %v891_v53 = vpack.c.bf16 %v854_v60, %v854_v60  ;;  %v10231_v60 = vld [vmem:[%s17825_s4 + $0x18] sm:$0xff] }
 0x135   : > { %v718_v45 = vpop.f32.mrf.mxu0  ;;  %10666 = vmatpush.bf16.msra.mxu2 %v10231_v60  ;;  %10665 = vmatpush.bf16.msra.mxu1 %v10231_v60 }
 0x136   : > { %923 = vst.msk [vmem:[#allocation2 + $0x2c] sm:$0xf] %vm877_vm0, %v891_v53  ;;  %v787_v2 = vmul.f32 %v11710_v50, %v718_v45  ;;  %10667 = vmatpush.bf16.msra.mxu3 %v10231_v60  ;;  %1954 = vmatpush.bf16.msrb.mxu0 %v10231_v60  ;;  %v11880_v53 = vpop.permute.xlu0 %1202 }
 0x137   : > { %10778 = vset.pattern.permute.xlu1 %v17808_v18  ;;  %10824 = vset.pattern.permute.xlu0 %v17582_v5  ;;  %17826 = vst [vmem:[#allocation39_spill] sm:$0xff] %v11880_v53 }
 0x138   : > { %v823_v8 = vadd.f32 %v11719_v56, %v787_v2  ;;  %1628 = vperm.xlu1 %10778, %v11539_v34   ;;  %v11868_v36 = vpop.permute.xlu1 %2381  ;;  %757 = vmatmul.bf16.gmra.mxu0 %v617_v27  ;;  %v10230_v2 = vld [vmem:[%s17825_s4 + $0x10] sm:$0xff] }
 0x139   : > { %4568 = vperm.xlu0 %10824, %v11500_v25   ;;  %10669 = vmatpush.bf16.msra.mxu2 %v10230_v2 }
 0x13a   : > { %v855_v7 = vmax.f32 %v823_v8, 0.0  ;;  %10779 = vset.pattern.permute.xlu2 %v17808_v18  ;;  %v11873_v45 = vpop.permute.xlu2 %1238  ;;  %v17827_v8 = vmov 3   ;;  %10668 = vmatpush.bf16.msra.mxu1 %v10230_v2 }
 0x13b   : > { %1636 = vperm.xlu2 %10779, %v11552_v37   ;;  %17824 = vst [vmem:[#allocation38_spill] sm:$0xff] %v11873_v45  ;;  %v601_v45 = vld [vmem:[%s11383_s29 + $0xe8] sm:$0xff]  ;;  %10670 = vmatpush.bf16.msra.mxu3 %v10230_v2 }
 0x13c   : > { %v892_v61 = vpack.c.bf16 %v855_v7, %v855_v7  ;;  %1955 = vmatpush.bf16.msrb.mxu0 %v10230_v2 }
 0x13d   : > { %v720_v52 = vpop.f32.mrf.mxu0 }
 0x13e   : > { %924 = vst.msk [vmem:[#allocation2 + $0x30] sm:$0xf] %vm877_vm0, %v892_v61  ;;  %v788_v34 = vmul.f32 %v11710_v50, %v720_v52  ;;  %v17829_v61 = vmov 4   ;;  %v600_v52 = vld [vmem:[%s11383_s29 + $0xe0] sm:$0xff] }
 0x13f   : > { %v618_v53 = vpack.c.bf16 %v601_v45, %v600_v52 }
 0x140   : > { %v824_v27 = vadd.f32 %v11719_v56, %v788_v34  ;;  %10780 = vset.pattern.permute.xlu1 %v17827_v8  ;;  %v11887_v7 = vpop.permute.xlu1 %2397 }
 0x141   : > { %17828 = vst [vmem:[#allocation40_spill] sm:$0xff] %v11887_v7  ;;  %10825 = vset.pattern.permute.xlu0 %v17829_v61  ;;  %3201 = vperm.xlu1 %10780, %v11472_v17  }
 0x142   : > { %v856_v5 = vmax.f32 %v824_v27, 0.0  ;;  %4086 = vperm.xlu0 %10825, %v11552_v37   ;;  %v11901_v37 = vpop.permute.xlu0 %1220 }
 0x143   : > { %10781 = vset.pattern.permute.xlu2 %v17827_v8  ;;  %17830 = vst [vmem:[#allocation41_spill] sm:$0xff] %v11901_v37  ;;  %v10605_v37 = vld [vmem:[#allocation2 + $0x10] sm:$0xff]  }
 0x144   : > { %v893_v60 = vpack.c.bf16 %v856_v5, %v856_v5  ;;  %3209 = vperm.xlu2 %10781, %v11500_v25   ;;  %v11897_v27 = vpop.permute.xlu2 %1564 }
 0x145   : > { %v723_v34 = vpop.f32.mrf.mxu0 }
 0x146   : > { %925 = vst.msk [vmem:[#allocation2 + $0x34] sm:$0xf] %vm877_vm0, %v893_v60  ;;  %v789_v15 = vmul.f32 %v11710_v50, %v723_v34  ;;  %v603_v60 = vld [vmem:[%s11383_s29 + $0xf8] sm:$0xff]  ;;  %v11192_v34 = vmov 839922192  }
 0x148   : > { %v825_v33 = vadd.f32 %v11719_v56, %v789_v15  ;;  %762 = vmatmul.bf16.gmra.mxu0 %v618_v53  ;;  %v11903_v7 = vpop.permute.xlu1 %2405 }
 0x149   : > { %17831 = vst [vmem:[#allocation42_spill] sm:$0xff] %v11903_v7  ;;  %3217 = vperm.xlu1 %10780, %v11505_v26  }
 0x14a   : > { %v857_v5 = vmax.f32 %v825_v33, 0.0  ;;  %4094 = vperm.xlu0 %10825, %v11405_v3   ;;  %v602_v3 = vld [vmem:[%s11383_s29 + $0xf0] sm:$0xff] }
 0x14c   : > { %v894_v45 = vpack.c.bf16 %v857_v5, %v857_v5  ;;  %10782 = vset.pattern.permute.xlu2 %v17805_v32  ;;  %v1017_v5 = vunpack.c.l.s4 %v11192_v34 }
 0x14d   : > { %v725_v52 = vpop.f32.mrf.mxu0  ;;  %2501 = vperm.xlu2 %10782, %v11395_v1   ;;  %v11911_v53 = vpop.permute.xlu2 %1247 }
 0x14e   : > { %926 = vst.msk [vmem:[#allocation2 + $0x38] sm:$0xf] %vm877_vm0, %v894_v45  ;;  %v790_v15 = vmul.f32 %v11710_v50, %v725_v52  ;;  %v11921_v1 = vpop.permute.xlu0 %1256 }
 0x14f   : > { %17832 = vst [vmem:[#allocation43_spill] sm:$0xff] %v11911_v53  ;;  %v619_v53 = vpack.c.bf16 %v603_v60, %v602_v3  ;;  %v11934_v3 = vld [vmem:[#allocation2 + $0x30] sm:$0xff]  }
 0x150   : > { %v826_v33 = vadd.f32 %v11719_v56, %v790_v15  ;;  %17834 = vst [vmem:[#allocation45_spill] sm:$0xff] %v11921_v1 }
 0x151   : > { %10783 = vset.pattern.permute.xlu1 %v17829_v61  ;;  %v11915_v26 = vpop.permute.xlu1 %1229 }
 0x152   : > { %v858_v2 = vmax.f32 %v826_v33, 0.0  ;;  %17833 = vst [vmem:[#allocation44_spill] sm:$0xff] %v11915_v26  ;;  %4134 = vperm.xlu0 %10825, %v11419_v6   ;;  %3998 = vperm.xlu1 %10783, %v11480_v19   ;;  %v11926_v33 = vunpack.c.0.s8 %v1017_v5 }
 0x154   : > { %v895_v45 = vpack.c.bf16 %v858_v2, %v858_v2  ;;  %v1650_v19 = vperm.slane %v11674_v23, %v11926_v33  ;;  %v1658_v60 = vperm.slane %v11687_v38, %v11926_v33 }
 0x155   : > { %v728_v52 = vpop.f32.mrf.mxu0  ;;  %10784 = vset.pattern.permute.xlu2 %v17829_v61 }
 0x156   : > { %927 = vst.msk [vmem:[#allocation2 + $0x3c] sm:$0xf] %vm877_vm0, %v895_v45  ;;  %v791_v15 = vmul.f32 %v11710_v50, %v728_v52  ;;  %4006 = vperm.xlu2 %10784, %v11472_v17   ;;  %v11929_v34 = vpop.permute.xlu2 %2445  ;;  %v1815_v45 = vunpack.c.l.bf16 %v1650_v19  ;;  %v11944_v52 = vunpack.c.h.bf16 %v11934_v3  ;;  %v1570_v19 = vperm.slane %v11897_v27, %v11926_v33 }
 0x157   : > { %17835 = vst [vmem:[#allocation46_spill] sm:$0xff] %v11929_v34 }
 0x158   : > { %v827_v26 = vadd.f32 %v11719_v56, %v791_v15  ;;  %767 = vmatmul.bf16.gmra.mxu0 %v619_v53  ;;  %17837 = vst [vmem:[#allocation48_spill] sm:$0xff] %v11944_v52  ;;  %v1816_v15 = vunpack.c.l.bf16 %v1658_v60 }
 0x15a   : > { %v859_v2 = vmax.f32 %v827_v26, 0.0  ;;  %4198 = vperm.xlu0 %10825, %v11577_v43   ;;  %10785 = vset.pattern.permute.xlu1 %v17827_v8  ;;  %v11940_v5 = vpop.permute.xlu1 %2429  ;;  %v11946_v26 = vpop.permute.xlu0 %1265 }
 0x15b   : > { %17836 = vst [vmem:[#allocation47_spill] sm:$0xff] %v11940_v5  ;;  %3225 = vperm.xlu1 %10785, %v11495_v24   ;;  %v1805_v5 = vunpack.c.l.bf16 %v1570_v19 }
 0x15c   : > { %v896_v17 = vpack.c.bf16 %v859_v2, %v859_v2  ;;  %17838 = vst [vmem:[#allocation49_spill] sm:$0xff] %v11946_v26  ;;  %v1847_v26 = vmul.f32 %v11944_v52, %v1815_v45  ;;  %v11972_v45 = vunpack.c.l.bf16 %v10605_v37 }
 0x15d   : > { %v730_v23 = vpop.f32.mrf.mxu0  ;;  %v10595_v53 = vld [vmem:[#allocation2 + $0x38] sm:$0xff]  }
 0x15e   : > { %928 = vst.msk [vmem:[#allocation2 + $0x40] sm:$0xf] %vm877_vm0, %v896_v17  ;;  %v792_v38 = vmul.f32 %v11710_v50, %v730_v23  ;;  %v11950_v43 = vunpack.c.l.bf16 %v10595_v53  ;;  %10786 = vset.pattern.permute.xlu2 %v17827_v8  ;;  %v11962_v23 = vld [vmem:[#allocation2 + $0x8] sm:$0xff]  }
 0x15f   : > { %3233 = vperm.xlu2 %10786, %v11524_v30   ;;  %v11955_v24 = vpop.permute.xlu2 %1588  ;;  %17841 = vst [vmem:[#allocation52_spill] sm:$0xff] %v11972_v45 }
 0x160   : > { %17839 = vst [vmem:[#allocation50_spill] sm:$0xff] %v11950_v43  ;;  %v828_v2 = vadd.f32 %v11719_v56, %v792_v38  ;;  %v1848_v17 = vmul.f32 %v11950_v43, %v1816_v15 }
 0x162   : > { %v860_v1 = vmax.f32 %v828_v2, 0.0  ;;  %4206 = vperm.xlu0 %10825, %v11605_v51   ;;  %v1873_v60 = vpack.c.bf16 %v1848_v17, %v1847_v26  ;;  %v11970_v51 = vunpack.c.h.bf16 %v11962_v23  ;;  %v11975_v15 = vpop.permute.xlu0 %1620 }
 0x163   : > { %10787 = vset.pattern.permute.xlu1 %v17805_v32  ;;  %v1573_v34 = vpop.permute.xlu1 %1572 }
 0x164   : > { %v897_v38 = vpack.c.bf16 %v860_v1, %v860_v1  ;;  %v1578_v7 = vperm.slane %v1573_v34, %v11926_v33  ;;  %2525 = vperm.xlu1 %10787, %v11448_v12   ;;  %9825 = vmatmul.msk.bf16.vlgmr.msra.gmra.mxu2 %vm1899_vm1, %v1873_v60  ;;  %17840 = vst [vmem:[#allocation51_spill] sm:$0xff] %v11970_v51 }
 0x165   : > { %v733_v27 = vpop.f32.mrf.mxu0  ;;  %v1837_v34 = vmul.f32 %v11970_v51, %v1805_v5  ;;  %v1666_v60 = vperm.slane %v11641_v62, %v11926_v33 }
 0x166   : > { %929 = vst.msk [vmem:[#allocation2 + $0x44] sm:$0xf] %vm877_vm0, %v897_v38  ;;  %v1806_v26 = vunpack.c.l.bf16 %v1578_v7  ;;  %v793_v1 = vmul.f32 %v11710_v50, %v733_v27  ;;  %v1674_v38 = vperm.slane %v11660_v9, %v11926_v33 }
 0x167   : > { %10788 = vset.pattern.permute.xlu2 %v17829_v61 }
 0x168   : > { %v1838_v12 = vmul.f32 %v11972_v45, %v1806_v26  ;;  %v829_v2 = vadd.f32 %v11719_v56, %v793_v1  ;;  %4014 = vperm.xlu2 %10788, %v11500_v25   ;;  %v11982_v19 = vpop.permute.xlu2 %2453  ;;  %v11995_v1 = vunpack.c.h.bf16 %v10595_v53  ;;  %v1818_v9 = vunpack.c.l.bf16 %v1674_v38 }
 0x169   : > { %17842 = vst [vmem:[#allocation53_spill] sm:$0xff] %v11982_v19 }
 0x16a   : > { %v861_v17 = vmax.f32 %v829_v2, 0.0  ;;  %10845 = vset.pattern.permute.xlu0 %v17827_v8  ;;  %v1868_v7 = vpack.c.bf16 %v1838_v12, %v1837_v34  ;;  %17844 = vst [vmem:[#allocation55_spill] sm:$0xff] %v11995_v1  ;;  %v12003_v2 = vpop.permute.xlu0 %2421 }
 0x16b   : > { %3329 = vperm.xlu0 %10845, %v11419_v6   ;;  %v1817_v6 = vunpack.c.l.bf16 %v1666_v60  ;;  %17846 = vst [vmem:[#allocation57_spill] sm:$0xff] %v12003_v2 }
 0x16c   : > { %v898_v5 = vpack.c.bf16 %v861_v17, %v861_v17  ;;  %10790 = vset.pattern.permute.xlu1 %v17827_v8  ;;  %v11991_v27 = vpop.permute.xlu1 %2437  ;;  %9820 = vmatmul.msk.bf16.vlgmr.msra.gmra.mxu1 %vm1899_vm1, %v1868_v7  ;;  %v1594_v17 = vperm.slane %v11955_v24, %v11926_v33 }
 0x16d   : > { %17843 = vst [vmem:[#allocation54_spill] sm:$0xff] %v11991_v27  ;;  %v10596_v25 = vld [vmem:[#allocation2 + $0x40] sm:$0xff]   ;;  %3241 = vperm.xlu1 %10790, %v11514_v28   ;;  %v735_v26 = vpop.f32.mrf.mxu0  ;;  %v1849_v28 = vmul.f32 %v11995_v1, %v1817_v6 }
 0x16e   : > { %v11997_v34 = vunpack.c.l.bf16 %v10596_v25  ;;  %930 = vst.msk [vmem:[#allocation2 + $0x48] sm:$0xf] %vm877_vm0, %v898_v5  ;;  %v794_v62 = vmul.f32 %v11710_v50, %v735_v26  ;;  %v10606_v26 = vld [vmem:[#allocation2 + $0x18] sm:$0xff]   ;;  %v1808_v19 = vunpack.c.l.bf16 %v1594_v17  ;;  %v1690_v17 = vperm.slane %v11613_v55, %v11926_v33 }
 0x170   : > { %17845 = vst [vmem:[#allocation56_spill] sm:$0xff] %v11997_v34  ;;  %v830_v12 = vadd.f32 %v11719_v56, %v794_v62  ;;  %10791 = vset.pattern.permute.xlu2 %v17827_v8  ;;  %v1850_v53 = vmul.f32 %v11997_v34, %v1818_v9  ;;  %v12017_v9 = vunpack.c.h.bf16 %v10605_v37  ;;  %v1820_v27 = vunpack.c.l.bf16 %v1690_v17 }
 0x171   : > { %3249 = vperm.xlu2 %10791, %v11519_v29   ;;  %v1605_v5 = vpop.permute.xlu2 %1604 }
 0x172   : > { %v862_v7 = vmax.f32 %v830_v12, 0.0  ;;  %v1874_v60 = vpack.c.bf16 %v1850_v53, %v1849_v28  ;;  %17847 = vst [vmem:[#allocation58_spill] sm:$0xff] %v12017_v9  ;;  %v1682_v53 = vperm.slane %v11596_v49, %v11926_v33 }
 0x173   : > { %3337 = vperm.xlu0 %10845, %v11453_v13   ;;  %v12019_v13 = vunpack.c.l.bf16 %v10606_v26 }
 0x174   : > { %v899_v38 = vpack.c.bf16 %v862_v7, %v862_v7  ;;  %9826 = vmatmul.msk.bf16.gmra.mxu2 %vm1899_vm1, %v1874_v60  ;;  %v1819_v55 = vunpack.c.l.bf16 %v1682_v53 }
 0x175   : > { %10792 = vset.pattern.permute.xlu1 %v17805_v32  ;;  %v1581_v62 = vpop.permute.xlu1 %1580  ;;  %v738_v29 = vpop.f32.mrf.mxu0  ;;  %17848 = vst [vmem:[#allocation59_spill] sm:$0xff] %v12019_v13  ;;  %v1840_v7 = vmul.f32 %v12019_v13, %v1808_v19 }
 0x176   : > { %931 = vst.msk [vmem:[#allocation2 + $0x4c] sm:$0xf] %vm877_vm0, %v899_v38  ;;  %v1586_v6 = vperm.slane %v1581_v62, %v11926_v33  ;;  %v795_v24 = vmul.f32 %v11710_v50, %v738_v29  ;;  %2533 = vperm.xlu1 %10792, %v11443_v11   ;;  %v12032_v38 = vpop.permute.xlu0 %2461  ;;  %v12035_v29 = vunpack.c.h.bf16 %v10596_v25 }
 0x177   : > { %17850 = vst [vmem:[#allocation61_spill] sm:$0xff] %v12032_v38 }
 0x178   : > { %v1807_v12 = vunpack.c.l.bf16 %v1586_v6  ;;  %v831_v28 = vadd.f32 %v11719_v56, %v795_v24  ;;  %17851 = vst [vmem:[#allocation62_spill] sm:$0xff] %v12035_v29 }
 0x179   : > { %10793 = vset.pattern.permute.xlu2 %v17805_v32 }
 0x17a   : > { %v1839_v60 = vmul.f32 %v12017_v9, %v1807_v12  ;;  %v863_v11 = vmax.f32 %v831_v28, 0.0  ;;  %2541 = vperm.xlu2 %10793, %v11467_v16   ;;  %v12030_v37 = vpop.permute.xlu2 %1292  ;;  %v1851_v28 = vmul.f32 %v12035_v29, %v1819_v55 }
 0x17b   : > { %17849 = vst [vmem:[#allocation60_spill] sm:$0xff] %v12030_v37  ;;  %3377 = vperm.xlu0 %10845, %v11562_v41  }
 0x17c   : > { %v900_v62 = vpack.c.bf16 %v863_v11, %v863_v11  ;;  %v1869_v49 = vpack.c.bf16 %v1840_v7, %v1839_v60  ;;  %v1610_v60 = vperm.slane %v1605_v5, %v11926_v33 }
 0x17d   : > { %v740_v6 = vpop.f32.mrf.mxu0  ;;  %v10597_v24 = vld [vmem:[#allocation2 + $0x48] sm:$0xff]  }
 0x17e   : > { %932 = vst.msk [vmem:[#allocation2 + $0x50] sm:$0xf] %vm877_vm0, %v900_v62  ;;  %v796_v19 = vmul.f32 %v11710_v50, %v740_v6  ;;  %10795 = vset.pattern.permute.xlu1 %v17829_v61  ;;  %9821 = vmatmul.msk.bf16.gmra.mxu1 %vm1899_vm1, %v1869_v49  ;;  %v12041_v16 = vpop.permute.xlu1 %1274  ;;  %v12043_v12 = vunpack.c.l.bf16 %v10597_v24  ;;  %v12060_v6 = vld [vmem:[#allocation2 + $0x20] sm:$0xff]  }
 0x17f   : > { %17852 = vst [vmem:[#allocation63_spill] sm:$0xff] %v12041_v16  ;;  %4038 = vperm.xlu1 %10795, %v11524_v30   ;;  %v12055_v30 = vpop.permute.xlu0 %2469 }
 0x180   : > { %17853 = vst [vmem:[#allocation64_spill] sm:$0xff] %v12043_v12  ;;  %v832_v25 = vadd.f32 %v11719_v56, %v796_v19  ;;  %v1852_v53 = vmul.f32 %v12043_v12, %v1820_v27  ;;  %v12066_v19 = vunpack.c.h.bf16 %v10606_v26 }
 0x181   : > { %17854 = vst [vmem:[#allocation65_spill] sm:$0xff] %v12055_v30 }
 0x182   : > { %v864_v17 = vmax.f32 %v832_v25, 0.0  ;;  %10796 = vset.pattern.permute.xlu2 %v17827_v8  ;;  %v1875_v7 = vpack.c.bf16 %v1852_v53, %v1851_v28  ;;  %17855 = vst [vmem:[#allocation66_spill] sm:$0xff] %v12066_v19  ;;  %v12069_v25 = vunpack.c.l.bf16 %v12060_v6 }
 0x183   : > { %3257 = vperm.xlu2 %10796, %v11544_v35   ;;  %3385 = vperm.xlu0 %10845, %v11582_v44   ;;  %v12053_v62 = vpop.permute.xlu2 %1612  ;;  %v1810_v44 = vunpack.c.l.bf16 %v1610_v60 }
 0x184   : > { %v901_v11 = vpack.c.bf16 %v864_v17, %v864_v17  ;;  %9827 = vmatmul.msk.bf16.gmra.mxu2 %vm1899_vm1, %v1875_v7  ;;  %17856 = vst [vmem:[#allocation67_spill] sm:$0xff] %v12069_v25  ;;  %v1706_v17 = vperm.slane %v11670_v21, %v11926_v33  ;;  %v1698_v7 = vperm.slane %v11699_v46, %v11926_v33 }
 0x185   : > { %v743_v49 = vpop.f32.mrf.mxu0  ;;  %v1842_v60 = vmul.f32 %v12069_v25, %v1810_v44 }
 0x186   : > { %933 = vst.msk [vmem:[#allocation2 + $0x54] sm:$0xf] %vm877_vm0, %v901_v11  ;;  %v797_v27 = vmul.f32 %v11710_v50, %v743_v49  ;;  %v1028_v49 = vperm.slane %v11645_v63, %v11926_v33  ;;  %v1822_v63 = vunpack.c.l.bf16 %v1706_v17  ;;  %v12112_v17 = vld [vmem:[%s17554_s13 + $0x18] sm:$0xf] }
 0x187   : > { %10797 = vset.pattern.permute.xlu1 %v17805_v32  ;;  %v1597_v35 = vpop.permute.xlu1 %1596 }
 0x188   : > { %v833_v5 = vadd.f32 %v11719_v56, %v797_v27  ;;  %v1602_v55 = vperm.slane %v1597_v35, %v11926_v33  ;;  %2549 = vperm.xlu1 %10797, %v11568_v42   ;;  %v12084_v27 = vunpack.c.h.bf16 %v10597_v24  ;;  %v1019_v35 = vperm.slane %v11683_v31, %v11926_v33 }
 0x189   : > { %v1821_v24 = vunpack.c.l.bf16 %v1698_v7  ;;  %v1037_v31 = vperm.slane %v11739_v59, %v11926_v33 }
 0x18a   : > { %v865_v28 = vmax.f32 %v833_v5, 0.0  ;;  %v1809_v53 = vunpack.c.l.bf16 %v1602_v55  ;;  %17858 = vst [vmem:[#allocation69_spill] sm:$0xff] %v12084_v27  ;;  %v12098_v55 = vpop.permute.xlu0 %2509  ;;  %v1332_v59 = vunpack.c.l.bf16 %v1019_v35 }
 0x18b   : > { %10798 = vset.pattern.permute.xlu2 %v17805_v32  ;;  %3441 = vperm.xlu0 %10845, %v11650_v4   ;;  %v10229_v4 = vld [vmem:[%s17825_s4 + $0x8] sm:$0xff]  ;;  %17860 = vst [vmem:[#allocation71_spill] sm:$0xff] %v12098_v55  ;;  %v1853_v7 = vmul.f32 %v12084_v27, %v1821_v24 }
 0x18c   : > { %v902_v42 = vpack.c.bf16 %v865_v28, %v865_v28  ;;  %v1841_v26 = vmul.f32 %v12066_v19, %v1809_v53  ;;  %2557 = vperm.xlu2 %10798, %v11562_v41   ;;  %v12080_v11 = vpop.permute.xlu2 %2493  ;;  %2256 = vmatpush.bf16.msrb.mxu2 %v10229_v4 }
 0x18d   : > { %17857 = vst [vmem:[#allocation68_spill] sm:$0xff] %v12080_v11  ;;  %v745_v21 = vpop.f32.mrf.mxu0  ;;  %v12086_v46 = vld [vmem:[#allocation2 + $0x50] sm:$0xff]  }
 0x18e   : > { %934 = vst.msk [vmem:[#allocation2 + $0x58] sm:$0xf] %vm877_vm0, %v902_v42  ;;  %v798_v41 = vmul.f32 %v11710_v50, %v745_v21  ;;  %v1870_v44 = vpack.c.bf16 %v1842_v60, %v1841_v26  ;;  %v12096_v5 = vunpack.c.l.bf16 %v12086_v46  ;;  %v1046_v60 = vperm.slane %v11694_v40, %v11926_v33  ;;  %v10228_v26 = vld [vmem:[%s17825_s4] sm:$0xff] }
 0x18f   : > { %v1333_v21 = vunpack.c.l.bf16 %v1028_v49  ;;  %v1618_v40 = vperm.slane %v12053_v62, %v11926_v33  ;;  %v946_v49 = vld [vmem:[#allocation2] sm:$0x8]  ;;  %v1334_v62 = vunpack.c.l.bf16 %v1037_v31 }
 0x190   : > { %17859 = vst [vmem:[#allocation70_spill] sm:$0xff] %v12096_v5  ;;  %v834_v28 = vadd.f32 %v11719_v56, %v798_v41  ;;  %10799 = vset.pattern.permute.xlu1 %v17829_v61  ;;  %v12102_v53 = vpop.permute.xlu1 %1283  ;;  %9822 = vmatmul.msk.bf16.gmra.mxu1 %vm1899_vm1, %v1870_v44  ;;  %v1854_v42 = vmul.f32 %v12096_v5, %v1822_v63  ;;  %v12129_v63 = vld [vmem:[%s17554_s13 + $0x4] sm:$0xf]  ;;  %v12132_v35 = vunpack.c.l.bf16 %v1046_v60 }
 0x191   : > { %17861 = vst [vmem:[#allocation72_spill] sm:$0xff] %v12102_v53  ;;  %4046 = vperm.xlu1 %10799, %v12112_v17   ;;  %2257 = vmatpush.bf16.msrb.mxu2 %v10228_v26  ;;  %v1626_v44 = vperm.slane %v11975_v15, %v11926_v33  ;;  %v10977_v15 = vld [vmem:[%s17554_s13 + $0x1c] sm:$0xf]  ;;  %v1397_v26 = vrot.slane %v1332_v59, 1  ;;  %v1714_v60 = vperm.slane %v11621_v57, %v11926_v33  ;;  %v1299_v53 = vunpack.c.l.bf16 %v946_v49 }
 0x192   : > { %v866_v4 = vmax.f32 %v834_v28, 0.0  ;;  %v1876_v41 = vpack.c.bf16 %v1854_v42, %v1853_v7  ;;  %v1398_v7 = vrot.slane %v1333_v21, 1  ;;  %v12138_v42 = vld [vmem:[#allocation2 + $0x4] sm:$0xf]  ;;  %v12149_v21 = vunpack.c.h.bf16 %v12060_v6  ;;  %v12156_v55 = vpop.permute.xlu0 %4022 }
 0x193   : > { %10855 = vset.pattern.permute.xlu0 %v17808_v18  ;;  %17862 = vst [vmem:[#allocation73_spill] sm:$0xff] %v12138_v42  ;;  %v1812_v37 = vunpack.c.l.bf16 %v1626_v44  ;;  %v1400_v16 = vrot.slane %v1334_v62, 1  ;;  %v1823_v62 = vunpack.c.l.bf16 %v1714_v60  ;;  %v17869_v5 = vunpack.c.l.bf16 %v12138_v42 }
 0x194   : > { %v903_v24 = vpack.c.bf16 %v866_v4, %v866_v4  ;;  %10800 = vset.pattern.permute.xlu2 %v17829_v61  ;;  %1556 = vperm.xlu0 %10855, %v12129_v63   ;;  %v1811_v4 = vunpack.c.l.bf16 %v1618_v40  ;;  %17863 = vst [vmem:[#allocation74_spill] sm:$0xff] %v12149_v21  ;;  %v1722_v40 = vperm.slane %v11723_v14, %v11926_v33  ;;  %v12169_v14 = vld [vmem:[%s17554_s13 + $0x2c] sm:$0xf] }
 0x195   : > { %9828 = vmatmul.msk.bf16.gmra.mxu2 %vm1899_vm1, %v1876_v41  ;;  %4054 = vperm.xlu2 %10800, %v10977_v15   ;;  %v748_v28 = vpop.f32.mrf.mxu0  ;;  %v12141_v18 = vpop.permute.xlu2 %1636  ;;  %v12146_v41 = vld [vmem:[#allocation2 + $0x28] sm:$0xff]   ;;  %17864 = vst [vmem:[#allocation75_spill] sm:$0xff] %v12156_v55  ;;  %v1399_v44 = vsel %vm1396_vm2, %v1397_v26, %v1398_v7  ;;  %v1493_v55 = vmul.f32 %v1397_v26, %v1299_v53 }
 0x196   : > { %935 = vst.msk [vmem:[#allocation2 + $0x5c] sm:$0xf] %vm877_vm0, %v903_v24  ;;  %v799_v31 = vmul.f32 %v11710_v50, %v748_v28  ;;  %v12163_v6 = vunpack.c.l.bf16 %v12146_v41  ;;  %v1843_v49 = vmul.f32 %v12149_v21, %v1811_v4  ;;  %v1055_v28 = vperm.slane %v11662_v10, %v11926_v33 }
 0x197   : > { %v12175_v24 = vunpack.c.l.bf16 %v11962_v23  ;;  %v17867_v4 = vmov 5   ;;  %v1494_v38 = vmul.f32 %v1399_v44, %v17869_v5  ;;  %v1401_v60 = vsel %vm1396_vm2, %v1398_v7, %v1400_v16  ;;  %v10979_v5 = vld [vmem:[%s17554_s13 + $0x60] sm:$0xf] }
 0x198   : > { %v835_v59 = vadd.f32 %v11719_v56, %v799_v31  ;;  %17866 = vst [vmem:[#allocation77_spill] sm:$0xff] %v12163_v6  ;;  %v1844_v11 = vmul.f32 %v12163_v6, %v1812_v37  ;;  %v17870_v10 = vrot.slane %v12132_v35, 1 }
 0x199   : > { %10802 = vset.pattern.permute.xlu1 %v17827_v8  ;;  %v12159_v57 = vpop.permute.xlu1 %2477 }
 0x19a   : > { %17865 = vst [vmem:[#allocation76_spill] sm:$0xff] %v12159_v57  ;;  %v867_v31 = vmax.f32 %v835_v59, 0.0  ;;  %3281 = vperm.xlu1 %10802, %v12169_v14   ;;  %v12180_v59 = vunpack.c.h.bf16 %v12086_v46  ;;  %v1824_v57 = vunpack.c.l.bf16 %v1722_v40  ;;  %v1403_v23 = vsel %vm1396_vm2, %v1400_v16, %v17870_v10 }
 0x19b   : > { %v1064_v46 = vperm.slane %v11705_v47, %v11926_v33  ;;  %v1871_v16 = vpack.c.bf16 %v1844_v11, %v1843_v49  ;;  %v1495_v40 = vmul.f32 %v12175_v24, %v1401_v60  ;;  %v1496_v44 = vmul.f32 %v11970_v51, %v1403_v23  ;;  %v12214_v23 = vpop.permute.xlu0 %4030 }
 0x19c   : > { %v904_v30 = vpack.c.bf16 %v867_v31, %v867_v31  ;;  %10856 = vset.pattern.permute.xlu0 %v17867_v4  ;;  %17868 = vst [vmem:[#allocation78_spill] sm:$0xff] %v12180_v59  ;;  %v1526_v31 = vpack.c.bf16 %v1494_v38, %v1493_v55 }
 0x19d   : > { %10803 = vset.pattern.permute.xlu2 %v17805_v32  ;;  %4608 = vperm.xlu0 %10856, %v10977_v15   ;;  %v750_v37 = vpop.f32.mrf.mxu0  ;;  %v12189_v53 = vld [vmem:[#allocation2 + $0x58] sm:$0xff]   ;;  %v12211_v11 = vunpack.c.l.bf16 %v1064_v46  ;;  %17873 = vst [vmem:[#allocation81_spill] sm:$0xff] %v12214_v23 }
 0x19e   : > { %936 = vst.msk [vmem:[#allocation2 + $0x60] sm:$0xf] %vm877_vm0, %v904_v30  ;;  %v800_v26 = vmul.f32 %v11710_v50, %v750_v37  ;;  %2565 = vperm.xlu2 %10803, %v10979_v5   ;;  %v12198_v7 = vpop.permute.xlu2 %3209  ;;  %v12201_v15 = vunpack.c.l.bf16 %v12189_v53  ;;  %v1855_v50 = vmul.f32 %v12180_v59, %v1823_v62  ;;  %v1336_v37 = vunpack.c.l.bf16 %v1055_v28  ;;  %v12225_v46 = vld [vmem:[%s17799_s2] ss:$0 sm:$0xff]  ;;  %s9682_s2 = scalar_lea.sflag [#allocation5], %s11377_s18 }
 0x19f   : > { %v1527_v5 = vpack.c.bf16 %v1496_v44, %v1495_v40  ;;  %v17588_v28 = vrot.slane %v12211_v11, 1  ;;  %v12234_v40 = vld [vmem:[%s17554_s13 + $0x24] sm:$0xf]  ;;  %v3215_v29 = vperm.slane %v12198_v7, %v11926_v33 }
 0x1a0   : > { %17871 = vst [vmem:[#allocation79_spill] sm:$0xff] %v12201_v15  ;;  %v836_v47 = vadd.f32 %v11719_v56, %v800_v26  ;;  %9823 = vmatmul.msk.bf16.gmra.mxu1 %vm1899_vm1, %v1871_v16  ;;  %v1856_v30 = vmul.f32 %v12201_v15, %v1824_v57  ;;  %v10980_v56 = vld [vmem:[%s17554_s13 + $0x20] sm:$0xf]  ;;  %v2039_v57 = vshrl.u32 %v1526_v31, 16  ;;  %v1404_v55 = vrot.slane %v1336_v37, 1 }
 0x1a1   : > { %v12209_v10 = vpop.permute.xlu1 %2485  ;;  %v1642_v16 = vperm.slane %v12141_v18, %v11926_v33  ;;  %v2050_v37 = vshll.u32 %v1527_v5, 16  ;;  %v10235_v18 = vld [vmem:[%s17825_s4 + $0x38] sm:$0xff] }
 0x1a2   : > { %17872 = vst [vmem:[#allocation80_spill] sm:$0xff] %v12209_v10  ;;  %v868_v49 = vmax.f32 %v836_v47, 0.0  ;;  %10804 = vset.pattern.permute.xlu1 %v17829_v61  ;;  %v1877_v60 = vpack.c.bf16 %v1856_v30, %v1855_v50  ;;  %v2047_v47 = vshrl.u32 %v1527_v5, 16  ;;  %v12242_v50 = vld [vmem:[%s17800_s3] ss:$0 sm:$0xff]  ;;  %v1407_v42 = vsel %vm1396_vm2, %v1404_v55, %v17588_v28  ;;  %3882 = vmatpush.bf16.msrb.mxu1 %v10235_v18 }
 0x1a3   : > { %4062 = vperm.xlu1 %10804, %v10980_v56   ;;  %v1738_v5 = vperm.slane %v11714_v54, %v11926_v33  ;;  %v12269_v54 = vld [vmem:[%s17554_s13 + $0x30] sm:$0xf]  ;;  %v12284_v18 = vld [vmem:[%s17554_s13 + $0x38] sm:$0xf] }
 0x1a4   : > { %v905_v62 = vpack.c.bf16 %v868_v49, %v868_v49  ;;  %v12248_v49 = vrot.slane %v2039_v57, 3  ;;  %v1814_v57 = vunpack.c.l.bf16 %v1642_v16  ;;  %v12279_v16 = vunpack.c.l.bf16 %v11934_v3 }
 0x1a5   : > { %9829 = vmatmul.msk.bf16.gmra.mxu2 %vm1899_vm1, %v1877_v60  ;;  %4616 = vperm.xlu0 %10856, %v10980_v56   ;;  %v753_v38 = vpop.f32.mrf.mxu0  ;;  %v2042_v60 = vshll.u32 %v1526_v31, 16  ;;  %v1073_v56 = vperm.slane %v11672_v22, %v11926_v33  ;;  %v1730_v31 = vperm.slane %v11757_v39, %v11926_v33  ;;  %v10234_v39 = vld [vmem:[%s17825_s4 + $0x30] sm:$0xff]  ;;  %v1826_v10 = vunpack.c.l.bf16 %v1738_v5 }
 0x1a6   : > { %937 = vst.msk [vmem:[#allocation2 + $0x64] sm:$0xf] %vm877_vm0, %v905_v62  ;;  %v801_v26 = vmul.f32 %v12225_v46, %v753_v38  ;;  %10805 = vset.pattern.permute.xlu2 %v17829_v61  ;;  %v17875_v62 = vrot.slane %v12132_v35, 1  ;;  %v2049_v35 = vrot.slane %v2047_v47, 3  ;;  %3883 = vmatpush.bf16.msrb.mxu1 %v10234_v39  ;;  %v1846_v59 = vmul.f32 %v12279_v16, %v1814_v57 }
 0x1a7   : > { %4070 = vperm.xlu2 %10805, %v12234_v40   ;;  %v12237_v44 = vpop.permute.xlu2 %2501  ;;  %17877 = vst [vmem:[#allocation84_spill] sm:$0xff] %v12279_v16  ;;  %v1825_v15 = vunpack.c.l.bf16 %v1730_v31 }
 0x1a8   : > { %17874 = vst [vmem:[#allocation82_spill] sm:$0xff] %v12237_v44  ;;  %v837_v30 = vadd.f32 %v12242_v50, %v801_v26  ;;  %v1405_v38 = vsel %vm1396_vm2, %v17875_v62, %v1404_v55  ;;  %v1498_v44 = vmul.f32 %v12017_v9, %v1407_v42  ;;  %v3194_v42 = vpop.permute.xlu0 %3193 }
 0x1a9   : > { %v1497_v62 = vmul.f32 %v11972_v45, %v1405_v38  ;;  %v12288_v38 = vunpack.c.h.bf16 %v12189_v53  ;;  %v3199_v28 = vperm.slane %v3194_v42, %v11926_v33 }
 0x1aa   : > { %v869_v26 = vmax.f32 %v837_v30, 0.0  ;;  %v1629_v23 = vpop.permute.xlu1 %1628  ;;  %v2052_v30 = vrot.slane %v2050_v37, 4 }
 0x1ab   : > { %v1634_v22 = vperm.slane %v1629_v23, %v11926_v33  ;;  %10806 = vset.pattern.permute.xlu1 %v17827_v8  ;;  %v12276_v23 = vunpack.c.h.bf16 %v12146_v41  ;;  %17878 = vst [vmem:[#allocation85_spill] sm:$0xff] %v12288_v38  ;;  %v2044_v41 = vrot.slane %v2042_v60, 4  ;;  %v17880_v60 = vld [vmem:[#allocation22_spill] sm:$0xff]  ;;  %v1528_v31 = vpack.c.bf16 %v1498_v44, %v1497_v62 }
 0x1ac   : > { %v906_v55 = vpack.c.bf16 %v869_v26, %v869_v26  ;;  %3289 = vperm.xlu1 %10806, %v12269_v54   ;;  %v1082_v27 = vperm.slane %v17880_v60, %v11926_v33  ;;  %v12310_v5 = vor.u32 %v2052_v30, %v2049_v35  ;;  %v3450_v60 = vunpack.c.l.bf16 %v3199_v28 }
 0x1ad   : > { %17876 = vst [vmem:[#allocation83_spill] sm:$0xff] %v12276_v23  ;;  %v1813_v47 = vunpack.c.l.bf16 %v1634_v22  ;;  %4664 = vperm.xlu0 %10856, %v12284_v18   ;;  %v755_v37 = vpop.f32.mrf.mxu0  ;;  %v12290_v26 = vld [vmem:[#allocation2 + $0x60] sm:$0xff]   ;;  %v2045_v12 = vor.u32 %v2044_v41, %v12248_v49  ;;  %v1338_v30 = vunpack.c.l.bf16 %v1073_v56  ;;  %v2056_v28 = vshrl.u32 %v1528_v31, 16 }
 0x1ae   : > { %938 = vst.msk [vmem:[#allocation2 + $0x68] sm:$0xf] %vm877_vm0, %v906_v55  ;;  %v802_v3 = vmul.f32 %v12225_v46, %v755_v37  ;;  %v12296_v22 = vunpack.c.l.bf16 %v12290_v26  ;;  %v12307_v55 = vld [vmem:[%s17554_s13 + $0x34] sm:$0xf]  ;;  %v2059_v49 = vshll.u32 %v1528_v31, 16  ;;  %v3514_v41 = vrot.slane %v3450_v60, 1 }
 0x1af   : > { %v1845_v53 = vmul.f32 %v12276_v23, %v1813_v47  ;;  %10807 = vset.pattern.permute.xlu2 %v17827_v8  ;;  %v1857_v47 = vmul.f32 %v12288_v38, %v1825_v15  ;;  %v12324_v15 = vunpack.c.l.bf16 %v1082_v27  ;;  %v1408_v31 = vrot.slane %v1338_v30, 1 }
 0x1b0   : > { %17879 = vst [vmem:[#allocation86_spill] sm:$0xff] %v12296_v22  ;;  %v838_v42 = vadd.f32 %v12242_v50, %v802_v3  ;;  %3297 = vperm.xlu2 %10807, %v12307_v55   ;;  %v12312_v57 = vpop.permute.xlu2 %4006  ;;  %v1858_v37 = vmul.f32 %v12296_v22, %v1826_v10  ;;  %v3190_v10 = vld [vmem:[#allocation2 + $0x4] sm:$0x8] }
 0x1b1   : > { %17881 = vst [vmem:[#allocation22_spill] sm:$0xff] %v12312_v57  ;;  %v1872_v39 = vpack.c.bf16 %v1846_v59, %v1845_v53  ;;  %v2054_v59 = vsel %vm2037_vm3, %v2045_v12, %v12310_v5  ;;  %v12335_v12 = vld [vmem:[%s17554_s13 + $0x6c] sm:$0xf]  ;;  %v1754_v53 = vperm.slane %v11829_v0, %v11926_v33  ;;  %v2058_v0 = vrot.slane %v2056_v28, 3 }
 0x1b2   : > { %v870_v3 = vmax.f32 %v838_v42, 0.0  ;;  %v1878_v35 = vpack.c.bf16 %v1858_v37, %v1857_v47  ;;  %v3452_v42 = vunpack.c.l.bf16 %v3215_v29  ;;  %v2061_v29 = vrot.slane %v2059_v49, 4 }
 0x1b3   : > { %v3202_v34 = vpop.permute.xlu1 %3201  ;;  %9824 = vmatmul.msk.bf16.gmra.mxu1 %vm1899_vm1, %v1872_v39  ;;  %v3448_v39 = vunpack.c.l.bf16 %v3190_v10  ;;  %v1828_v10 = vunpack.c.l.bf16 %v1754_v53  ;;  %v17885_v49 = vrot.slane %v12211_v11, 1 }
 0x1b4   : > { %v907_v44 = vpack.c.bf16 %v870_v3, %v870_v3  ;;  %v3207_v62 = vperm.slane %v3202_v34, %v11926_v33  ;;  %10808 = vset.pattern.permute.xlu1 %v17805_v32  ;;  %9830 = vmatmul.msk.bf16.vlgmr.msra.gmra.mxu3 %vm1899_vm1, %v1878_v35  ;;  %v10987_v34 = vld [vmem:[%s17554_s13 + $0x44] sm:$0xf]  ;;  %v17882_v3 = vld [vmem:[#allocation19_spill] sm:$0xff] }
 0x1b5   : > { %9843 = vmatmul.msk.bf16.vlgmr.msrb.gmra.mxu2 %vm1899_vm1, %v2054_v59  ;;  %v758_v7 = vpop.f32.mrf.mxu0  ;;  %4688 = vperm.xlu0 %10856, %v10987_v34   ;;  %v1746_v35 = vperm.slane %v17882_v3, %v11926_v33  ;;  %v12353_v34 = vunpack.c.h.bf16 %v12290_v26  ;;  %v12365_v26 = vor.u32 %v2061_v29, %v2058_v0 }
 0x1b6   : > { %939 = vst.msk [vmem:[#allocation2 + $0x6c] sm:$0xf] %vm877_vm0, %v907_v44  ;;  %v3451_v56 = vunpack.c.l.bf16 %v3207_v62  ;;  %2589 = vperm.xlu1 %10808, %v12335_v12   ;;  %v803_v27 = vmul.f32 %v12225_v46, %v758_v7  ;;  %v10989_v44 = vld [vmem:[%s17554_s13 + $0x28] sm:$0xf]  ;;  %v3517_v7 = vrot.slane %v3452_v42, 1 }
 0x1b7   : > { %17883 = vst [vmem:[#allocation19_spill] sm:$0xff] %v12353_v34  ;;  %v1827_v53 = vunpack.c.l.bf16 %v1746_v35 }
 0x1b8   : > { %v3515_v47 = vrot.slane %v3451_v56, 1  ;;  %v839_v37 = vadd.f32 %v12242_v50, %v803_v27  ;;  %10809 = vset.pattern.permute.xlu2 %v17829_v61  ;;  %v3610_v27 = vmul.f32 %v3514_v41, %v3448_v39 }
 0x1b9   : > { %4078 = vperm.xlu2 %10809, %v10989_v44   ;;  %v12349_v62 = vpop.permute.xlu2 %3233  ;;  %v17884_v44 = vrot.slane %v12324_v15, 1 }
 0x1ba   : > { %v3516_v30 = vsel %vm1396_vm2, %v3514_v41, %v3515_v47  ;;  %v871_v59 = vmax.f32 %v839_v37, 0.0  ;;  %v1409_v37 = vsel %vm1396_vm2, %v17885_v49, %v1408_v31  ;;  %v3518_v0 = vsel %vm1396_vm2, %v3515_v47, %v3517_v7  ;;  %v17888_v47 = vld [vmem:[#allocation18_spill] sm:$0xff]  ;;  %v17889_v49 = vld [vmem:[#allocation16_spill] sm:$0xff] }
 0x1bb   : > { %v3218_v56 = vpop.permute.xlu1 %3217  ;;  %v3611_v3 = vmul.f32 %v12175_v24, %v3516_v30  ;;  %v1411_v28 = vsel %vm1396_vm2, %v1408_v31, %v17884_v44  ;;  %v17603_v30 = vmov 8   ;;  %v1499_v35 = vmul.f32 %v12019_v13, %v1409_v37 }
 0x1bc   : > { %v908_v60 = vpack.c.bf16 %v871_v59, %v871_v59  ;;  %v3223_v57 = vperm.slane %v3218_v56, %v11926_v33  ;;  %v1500_v41 = vmul.f32 %v12066_v19, %v1411_v28  ;;  %v1091_v28 = vperm.slane %v17888_v47, %v11926_v33 }
 0x1bd   : > { %v760_v42 = vpop.f32.mrf.mxu0  ;;  %v12363_v22 = vld [vmem:[#allocation2 + $0x68] sm:$0xff]   ;;  %10868 = vset.pattern.permute.xlu0 %v17603_v30  ;;  %v3643_v29 = vpack.c.bf16 %v3611_v3, %v3610_v27  ;;  %v1100_v37 = vperm.slane %v17889_v49, %v11926_v33  ;;  %v12401_v27 = vld [vmem:[%s17554_s13 + $0x3c] sm:$0xf] }
 0x1be   : > { %940 = vst.msk [vmem:[#allocation2 + $0x70] sm:$0xf] %vm877_vm0, %v908_v60  ;;  %v12369_v39 = vunpack.c.l.bf16 %v3223_v57  ;;  %10810 = vset.pattern.permute.xlu1 %v17827_v8  ;;  %v804_v11 = vmul.f32 %v12225_v46, %v760_v42  ;;  %v12375_v31 = vunpack.c.l.bf16 %v12363_v22  ;;  %v12382_v60 = vld [vmem:[%s17554_s13 + $0x10] sm:$0xf]  ;;  %v1859_v57 = vmul.f32 %v12353_v34, %v1827_v53 }
 0x1bf   : > { %17887 = vst [vmem:[#allocation88_spill] sm:$0xff] %v12382_v60  ;;  %6761 = vperm.xlu0 %10868, %v12382_v60   ;;  %3305 = vperm.xlu1 %10810, %v12284_v18   ;;  %v1529_v3 = vpack.c.bf16 %v1500_v41, %v1499_v35  ;;  %v1340_v34 = vunpack.c.l.bf16 %v1091_v28  ;;  %v12415_v35 = vunpack.c.l.bf16 %v1100_v37 }
 0x1c0   : > { %17886 = vst [vmem:[#allocation87_spill] sm:$0xff] %v12375_v31  ;;  %v17605_v59 = vrot.slane %v12369_v39, 1  ;;  %v840_v56 = vadd.f32 %v12242_v50, %v804_v11  ;;  %v1860_v44 = vmul.f32 %v12375_v31, %v1828_v10  ;;  %v3612_v11 = vmul.f32 %v11970_v51, %v3518_v0 }
 0x1c1   : > { %10811 = vset.pattern.permute.xlu2 %v17827_v8  ;;  %v3668_v31 = vshll.u32 %v3643_v29, 16  ;;  %v2065_v28 = vshrl.u32 %v1529_v3, 16 }
 0x1c2   : > { %v3520_v42 = vsel %vm1396_vm2, %v3517_v7, %v17605_v59  ;;  %v872_v53 = vmax.f32 %v840_v56, 0.0  ;;  %3313 = vperm.xlu2 %10811, %v12401_v27   ;;  %v1879_v10 = vpack.c.bf16 %v1860_v44, %v1859_v57  ;;  %v12406_v30 = vpop.permute.xlu2 %4014  ;;  %v2063_v7 = vsel %vm2037_vm3, %v12310_v5, %v12365_v26  ;;  %v12419_v57 = vpop.permute.xlu0 %3265 }
 0x1c3   : > { %v3613_v47 = vmul.f32 %v11972_v45, %v3520_v42  ;;  %17890 = vst [vmem:[#allocation18_spill] sm:$0xff] %v12406_v30  ;;  %v3665_v59 = vshrl.u32 %v3643_v29, 16  ;;  %v3239_v5 = vperm.slane %v12349_v62, %v11926_v33  ;;  %v17612_v44 = vmov 7   ;;  %v10993_v62 = vld [vmem:[%s17554_s13 + $0x70] sm:$0xf] }
 0x1c4   : > { %v909_v56 = vpack.c.bf16 %v872_v53, %v872_v53  ;;  %v12411_v49 = vpop.permute.xlu1 %3998  ;;  %9831 = vmatmul.msk.bf16.gmra.mxu3 %vm1899_vm1, %v1879_v10  ;;  %v2068_v42 = vshll.u32 %v1529_v3, 16  ;;  %v12429_v53 = vld [vmem:[%s17554_s13 + $0xc] sm:$0xf]  ;;  %v17892_v3 = vld [vmem:[#allocation23_spill] sm:$0xff] }
 0x1c5   : > { %17891 = vst [vmem:[#allocation16_spill] sm:$0xff] %v12411_v49  ;;  %v3644_v38 = vpack.c.bf16 %v3613_v47, %v3612_v11  ;;  %9844 = vmatmul.msk.bf16.gmra.mxu2 %vm1899_vm1, %v2063_v7  ;;  %v763_v41 = vpop.f32.mrf.mxu0  ;;  %v3667_v10 = vrot.slane %v3665_v59, 3  ;;  %v3670_v11 = vrot.slane %v3668_v31, 4  ;;  %v1412_v7 = vrot.slane %v1340_v34, 1  ;;  %v10994_v59 = vld [vmem:[%s17554_s13 + $0x74] sm:$0xf] }
 0x1c6   : > { %941 = vst.msk [vmem:[#allocation2 + $0x74] sm:$0xf] %vm877_vm0, %v909_v56  ;;  %v805_v0 = vmul.f32 %v12225_v46, %v763_v41  ;;  %v1770_v41 = vperm.slane %v17892_v3, %v11926_v33  ;;  %v1762_v49 = vperm.slane %v11806_v20, %v11926_v33  ;;  %v2067_v34 = vrot.slane %v2065_v28, 3 }
 0x1c7   : > { %10873 = vset.pattern.permute.xlu0 %v17612_v44  ;;  %10812 = vset.pattern.permute.xlu1 %v17805_v32  ;;  %v3673_v29 = vshrl.u32 %v3644_v38, 16  ;;  %v3676_v47 = vshll.u32 %v3644_v38, 16  ;;  %v2070_v31 = vrot.slane %v2068_v42, 4  ;;  %v17894_v20 = vrot.slane %v12415_v35, 1 }
 0x1c8   : > { %v841_v37 = vadd.f32 %v12242_v50, %v805_v0  ;;  %6199 = vperm.xlu0 %10873, %v12429_v53   ;;  %2597 = vperm.xlu1 %10812, %v10993_v62   ;;  %v3671_v62 = vor.u32 %v3670_v11, %v3667_v10  ;;  %v1829_v11 = vunpack.c.l.bf16 %v1762_v49 }
 0x1c9   : > { %v3675_v56 = vrot.slane %v3673_v29, 3  ;;  %v3678_v44 = vrot.slane %v3676_v47, 4  ;;  %v12446_v29 = vunpack.c.l.bf16 %v3239_v5  ;;  %v17893_v47 = vrot.slane %v12324_v15, 1 }
 0x1ca   : > { %v873_v0 = vmax.f32 %v841_v37, 0.0  ;;  %10813 = vset.pattern.permute.xlu2 %v17805_v32  ;;  %v1415_v60 = vsel %vm1396_vm2, %v1412_v7, %v17894_v20  ;;  %v1830_v5 = vunpack.c.l.bf16 %v1770_v41  ;;  %v17898_v20 = vld [vmem:[#allocation20_spill] sm:$0xff] }
 0x1cb   : > { %2605 = vperm.xlu2 %10813, %v10994_v59   ;;  %v12444_v38 = vpop.permute.xlu2 %3249  ;;  %v12448_v3 = vor.u32 %v3678_v44, %v3675_v56  ;;  %v1413_v30 = vsel %vm1396_vm2, %v17893_v47, %v1412_v7  ;;  %v12457_v59 = vunpack.c.h.bf16 %v12363_v22  ;;  %v1502_v22 = vmul.f32 %v12149_v21, %v1415_v60  ;;  %v12480_v60 = vpop.permute.xlu0 %3273 }
 0x1cc   : > { %v910_v37 = vpack.c.bf16 %v873_v0, %v873_v0  ;;  %v1501_v7 = vmul.f32 %v12069_v25, %v1413_v30  ;;  %v17617_v41 = vrot.slane %v12446_v29, 1  ;;  %v17897_v30 = vld [vmem:[#allocation26_spill] sm:$0xff] }
 0x1cd   : > { %17895 = vst [vmem:[#allocation23_spill] sm:$0xff] %v12457_v59  ;;  %v3226_v2 = vpop.permute.xlu1 %3225  ;;  %v765_v28 = vpop.f32.mrf.mxu0  ;;  %v12459_v42 = vld [vmem:[#allocation2 + $0x70] sm:$0xff]   ;;  %v3680_v10 = vsel %vm2037_vm3, %v3671_v62, %v12448_v3  ;;  %v1109_v49 = vperm.slane %v17897_v30, %v11926_v33  ;;  %v1861_v62 = vmul.f32 %v12457_v59, %v1829_v11 }
 0x1ce   : > { %942 = vst.msk [vmem:[#allocation2 + $0x78] sm:$0xf] %vm877_vm0, %v910_v37  ;;  %v3231_v44 = vperm.slane %v3226_v2, %v11926_v33  ;;  %v806_v15 = vmul.f32 %v12225_v46, %v765_v28  ;;  %9891 = vmatmul.msk.bf16.vlgmr.msrb.gmra.mxu1 %vm1899_vm1, %v3680_v10  ;;  %v12470_v56 = vunpack.c.l.bf16 %v12459_v42  ;;  %v12476_v37 = vor.u32 %v2070_v31, %v2067_v34 }
 0x1cf   : > { %v1118_v28 = vperm.slane %v17898_v20, %v11926_v33  ;;  %v17899_v31 = vrot.slane %v12369_v39, 1  ;;  %v1342_v39 = vunpack.c.l.bf16 %v1109_v49 }
 0x1d0   : > { %17896 = vst [vmem:[#allocation89_spill] sm:$0xff] %v12470_v56  ;;  %v3454_v0 = vunpack.c.l.bf16 %v3231_v44  ;;  %v842_v2 = vadd.f32 %v12242_v50, %v806_v15  ;;  %6223 = vperm.xlu0 %10873, %v12112_v17   ;;  %10814 = vset.pattern.permute.xlu1 %v17829_v61  ;;  %v1862_v47 = vmul.f32 %v12470_v56, %v1830_v5  ;;  %v12497_v5 = vld [vmem:[%s17554_s13 + $0x40] sm:$0xf]  ;;  %v10998_v56 = vld [vmem:[%s17554_s13 + $0x7c] sm:$0xf] }
 0x1d1   : > { %4102 = vperm.xlu1 %10814, %v12307_v55   ;;  %v1530_v15 = vpack.c.bf16 %v1502_v22, %v1501_v7  ;;  %v2072_v7 = vsel %vm2037_vm3, %v12365_v26, %v12476_v37 }
 0x1d2   : > { %v3521_v44 = vrot.slane %v3454_v0, 1  ;;  %v874_v17 = vmax.f32 %v842_v2, 0.0  ;;  %v1880_v34 = vpack.c.bf16 %v1862_v47, %v1861_v62  ;;  %v12509_v47 = vunpack.c.l.bf16 %v1118_v28  ;;  %v10996_v28 = vld [vmem:[%s17554_s13 + $0x8] sm:$0xf] }
 0x1d3   : > { %10815 = vset.pattern.permute.xlu2 %v17827_v8  ;;  %v2077_v49 = vshll.u32 %v1530_v15, 16 }
 0x1d4   : > { %v3522_v10 = vsel %vm1396_vm2, %v17899_v31, %v3521_v44  ;;  %v3524_v30 = vsel %vm1396_vm2, %v3521_v44, %v17617_v41  ;;  %v911_v11 = vpack.c.bf16 %v874_v17, %v874_v17  ;;  %3321 = vperm.xlu2 %10815, %v12497_v5   ;;  %v12503_v22 = vpop.permute.xlu2 %2541  ;;  %9832 = vmatmul.msk.bf16.gmra.mxu3 %vm1899_vm1, %v1880_v34  ;;  %v2074_v17 = vshrl.u32 %v1530_v15, 16 }
 0x1d5   : > { %17900 = vst [vmem:[#allocation26_spill] sm:$0xff] %v12503_v22  ;;  %v3614_v0 = vmul.f32 %v12017_v9, %v3522_v10  ;;  %v3615_v2 = vmul.f32 %v12019_v13, %v3524_v30  ;;  %9845 = vmatmul.msk.bf16.gmra.mxu2 %vm1899_vm1, %v2072_v7  ;;  %v768_v62 = vpop.f32.mrf.mxu0  ;;  %v17615_v10 = vmov 6   ;;  %v1416_v34 = vrot.slane %v1342_v39, 1  ;;  %v12529_v39 = vld [vmem:[%s17554_s13 + $0x78] sm:$0xf] }
 0x1d6   : > { %943 = vst.msk [vmem:[#allocation2 + $0x7c] sm:$0xf] %vm877_vm0, %v911_v11  ;;  %v807_v20 = vmul.f32 %v12225_v46, %v768_v62  ;;  %v12513_v44 = vpop.permute.xlu1 %2525  ;;  %v2079_v41 = vrot.slane %v2077_v49, 4  ;;  %v1136_v22 = vperm.slane %v11797_v48, %v11926_v33  ;;  %v12547_v49 = vunpack.c.h.bf16 %v12459_v42 }
 0x1d7   : > { %17901 = vst [vmem:[#allocation20_spill] sm:$0xff] %v12513_v44  ;;  %v3645_v26 = vpack.c.bf16 %v3615_v2, %v3614_v0  ;;  %v17902_v0 = vld [vmem:[#allocation25_spill] sm:$0xff]  ;;  %v1786_v2 = vperm.slane %v11839_v58, %v11926_v33 }
 0x1d8   : > { %v843_v31 = vadd.f32 %v12242_v50, %v807_v20  ;;  %10886 = vset.pattern.permute.xlu0 %v17615_v10  ;;  %v1778_v15 = vperm.slane %v17902_v0, %v11926_v33  ;;  %v12532_v20 = vpop.permute.xlu0 %2517  ;;  %v2076_v10 = vrot.slane %v2074_v17, 3  ;;  %v3255_v0 = vperm.slane %v12444_v38, %v11926_v33  ;;  %v17904_v58 = vld [vmem:[#allocation17_spill] sm:$0xff] }
 0x1d9   : > { %5386 = vperm.xlu0 %10886, %v10996_v28   ;;  %10816 = vset.pattern.permute.xlu1 %v17805_v32  ;;  %v3682_v30 = vshrl.u32 %v3645_v26, 16  ;;  %v3685_v11 = vshll.u32 %v3645_v26, 16  ;;  %17903 = vst [vmem:[#allocation25_spill] sm:$0xff] %v12532_v20 }
 0x1da   : > { %v875_v62 = vmax.f32 %v843_v31, 0.0  ;;  %2613 = vperm.xlu1 %10816, %v12529_v39   ;;  %v1127_v31 = vperm.slane %v17904_v58, %v11926_v33  ;;  %17905 = vst [vmem:[#allocation17_spill] sm:$0xff] %v12547_v49  ;;  %v1831_v58 = vunpack.c.l.bf16 %v1778_v15  ;;  %v12568_v44 = vor.u32 %v2079_v41, %v2076_v10  ;;  %v10232_v10 = vld [vmem:[%s17825_s4 + $0x20] sm:$0xff] }
 0x1db   : > { %v3684_v28 = vrot.slane %v3682_v30, 3  ;;  %v3687_v26 = vrot.slane %v3685_v11, 4  ;;  %v17906_v11 = vrot.slane %v12415_v35, 1 }
 0x1dc   : > { %v912_v7 = vpack.c.bf16 %v875_v62, %v875_v62  ;;  %10817 = vset.pattern.permute.xlu2 %v17805_v32  ;;  %v10233_v32 = vld [vmem:[%s17825_s4 + $0x28] sm:$0xff]  ;;  %v17907_v62 = vrot.slane %v12509_v47, 1 }
 0x1dd   : > { %2621 = vperm.xlu2 %10817, %v10998_v56   ;;  %v3258_v30 = vpop.permute.xlu2 %3257  ;;  %v12544_v17 = vor.u32 %v3687_v26, %v3684_v28  ;;  %v12549_v38 = vld [vmem:[#allocation2 + $0x78] sm:$0xff]   ;;  %v1417_v48 = vsel %vm1396_vm2, %v17906_v11, %v1416_v34  ;;  %v1832_v28 = vunpack.c.l.bf16 %v1786_v2  ;;  %3075 = vmatpush.bf16.msrb.mxu3 %v10233_v32  ;;  %v12576_v2 = vunpack.c.l.bf16 %v1136_v22 }
 0x1de   : > { %v1419_v56 = vsel %vm1396_vm2, %v1416_v34, %v17907_v62  ;;  %944 = vst.msk [vmem:[#allocation2 + $0x80] sm:$0xf] %vm877_vm0, %v912_v7  ;;  %v12562_v42 = vunpack.c.l.bf16 %v12549_v38  ;;  %v1503_v26 = vmul.f32 %v12163_v6, %v1417_v48  ;;  %v12571_v34 = vunpack.c.l.bf16 %v3255_v0  ;;  %v17909_v48 = vld [vmem:[#allocation34_spill] sm:$0xff] }
 0x1df   : > { %v3242_v20 = vpop.permute.xlu1 %3241  ;;  %v3689_v35 = vsel %vm2037_vm3, %v12448_v3, %v12544_v17  ;;  %v1504_v11 = vmul.f32 %v12276_v23, %v1419_v56  ;;  %v3263_v7 = vperm.slane %v3258_v30, %v11926_v33  ;;  %v2379_v62 = vperm.slane %v17909_v48, %v11926_v33  ;;  %v17911_v48 = vld [vmem:[#allocation29_spill] sm:$0xff] }
 0x1e0   : > { %17908 = vst [vmem:[#allocation90_spill] sm:$0xff] %v12562_v42  ;;  %v3247_v15 = vperm.slane %v3242_v20, %v11926_v33  ;;  %9892 = vmatmul.msk.bf16.gmra.mxu1 %vm1899_vm1, %v3689_v35  ;;  %v1863_v3 = vmul.f32 %v12547_v49, %v1831_v58  ;;  %v1864_v41 = vmul.f32 %v12562_v42, %v1832_v28  ;;  %v12589_v22 = vunpack.c.l.bf16 %v1127_v31 }
 0x1e1   : > { %5442 = vperm.xlu0 %10886, %v12234_v40   ;;  %v3271_v20 = vperm.slane %v12419_v57, %v11926_v33  ;;  %v2387_v30 = vperm.slane %v11868_v36, %v11926_v33  ;;  %v12593_v40 = vpop.permute.xlu0 %2573  ;;  %v2081_v56 = vsel %vm2037_vm3, %v12476_v37, %v12568_v44  ;;  %3076 = vmatpush.bf16.msrb.mxu3 %v10232_v10  ;;  %v3527_v57 = vrot.slane %v12571_v34, 1  ;;  %v17913_v37 = vld [vmem:[#allocation40_spill] sm:$0xff] }
 0x1e2   : > { %v3456_v0 = vunpack.c.l.bf16 %v3247_v15  ;;  %10818 = vset.pattern.permute.xlu1 %v17829_v61  ;;  %17910 = vst [vmem:[#allocation34_spill] sm:$0xff] %v12593_v40  ;;  %v1881_v32 = vpack.c.bf16 %v1864_v41, %v1863_v3  ;;  %v1531_v58 = vpack.c.bf16 %v1504_v11, %v1503_v26  ;;  %v3458_v28 = vunpack.c.l.bf16 %v3263_v7  ;;  %v12601_v15 = vld [vmem:[#allocation2 + $0x4] sm:$0xf]  ;;  %v17912_v3 = vld [vmem:[#allocation32_spill] sm:$0xff] }
 0x1e3   : > { %4110 = vperm.xlu1 %10818, %v12284_v18   ;;  %v12603_v36 = vunpack.c.l.bf16 %v2379_v62  ;;  %v1802_v40 = vperm.slane %v17911_v48, %v11926_v33  ;;  %v2395_v41 = vperm.slane %v17912_v3, %v11926_v33  ;;  %v2403_v26 = vperm.slane %v17913_v37, %v11926_v33 }
 0x1e4   : > { %v3525_v35 = vrot.slane %v3456_v0, 1  ;;  %9833 = vmatmul.msk.bf16.gmra.mxu3 %vm1899_vm1, %v1881_v32  ;;  %v12613_v11 = vunpack.c.l.bf16 %v3271_v20  ;;  %v17914_v34 = vrot.slane %v12446_v29, 1  ;;  %v1420_v0 = vrot.slane %v12589_v22, 1 }
 0x1e5   : > { %9846 = vmatmul.msk.bf16.gmra.mxu2 %vm1899_vm1, %v2081_v56  ;;  %10819 = vset.pattern.permute.xlu2 %v17829_v61  ;;  %v12623_v32 = vunpack.c.l.bf16 %v2387_v30  ;;  %v2628_v29 = vunpack.c.l.bf16 %v12601_v15  ;;  %v3529_v3 = vrot.slane %v3458_v28, 1  ;;  %v12633_v37 = vld [vmem:[#allocation2 + $0x80] sm:$0xf]  ;;  %v2086_v31 = vshll.u32 %v1531_v58, 16  ;;  %v17919_v15 = vld [vmem:[#allocation35_spill] sm:$0xff] }
 0x1e6   : > { %v3526_v7 = vsel %vm1396_vm2, %v17914_v34, %v3525_v35  ;;  %v3528_v62 = vsel %vm1396_vm2, %v3525_v35, %v3527_v57  ;;  %v12620_v10 = vpop.permute.xlu2 %2557  ;;  %4118 = vperm.xlu2 %10819, %v12401_v27   ;;  %v2083_v34 = vshrl.u32 %v1531_v58, 16  ;;  %v17918_v22 = vrot.slane %v12576_v2, 1 }
 0x1e7   : > { %17915 = vst [vmem:[#allocation29_spill] sm:$0xff] %v12620_v10  ;;  %v3616_v56 = vmul.f32 %v12066_v19, %v3526_v7  ;;  %v3617_v48 = vmul.f32 %v12069_v25, %v3528_v62  ;;  %v12628_v20 = vpop.f32.mrf.mxu2  ;;  %v2726_v7 = vrot.slane %v12603_v36, 7  ;;  %v1834_v62 = vunpack.c.l.bf16 %v1802_v40 }
 0x1e8   : > { %17916 = vst [vmem:[#allocation32_spill] sm:$0xff] %v12628_v20  ;;  %v12631_v35 = vpop.permute.xlu1 %2533  ;;  %v1423_v30 = vsel %vm1396_vm2, %v1420_v0, %v17918_v22  ;;  %v2663_v27 = vunpack.c.l.bf16 %v2395_v41  ;;  %v1794_v28 = vperm.slane %v17919_v15, %v11926_v33  ;;  %v12642_v20 = vunpack.c.l.bf16 %v2403_v26  ;;  %v12655_v41 = vld [vmem:[%s17554_s13 + $0x4c] sm:$0xf] }
 0x1e9   : > { %17917 = vst [vmem:[#allocation40_spill] sm:$0xff] %v12631_v35  ;;  %v3646_v10 = vpack.c.bf16 %v3617_v48, %v3616_v56  ;;  %5466 = vperm.xlu0 %10886, %v12269_v54   ;;  %v17622_v42 = vrot.slane %v12613_v11, 1  ;;  %v2727_v58 = vrot.slane %v12623_v32, 7  ;;  %v3530_v40 = vsel %vm1396_vm2, %v3527_v57, %v3529_v3  ;;  %v12658_v56 = vpop.permute.xlu0 %2581 }
 0x1ea   : > { %v2085_v26 = vrot.slane %v2083_v34, 3  ;;  %v2088_v32 = vrot.slane %v2086_v31, 4  ;;  %v12661_v57 = vunpack.c.h.bf16 %v12549_v38  ;;  %v17921_v15 = vrot.slane %v12509_v47, 1 }
 0x1eb   : > { %10820 = vset.pattern.permute.xlu1 %v17827_v8  ;;  %v3691_v35 = vshrl.u32 %v3646_v10, 16  ;;  %v3694_v22 = vshll.u32 %v3646_v10, 16  ;;  %v3532_v54 = vsel %vm1396_vm2, %v3529_v3, %v17622_v42  ;;  %v2729_v42 = vrot.slane %v2663_v27, 7 }
 0x1ec   : > { %3345 = vperm.xlu1 %10820, %v12655_v41   ;;  %17920 = vst [vmem:[#allocation35_spill] sm:$0xff] %v12661_v57  ;;  %v1421_v3 = vsel %vm1396_vm2, %v17921_v15, %v1420_v0  ;;  %v1833_v36 = vunpack.c.l.bf16 %v1794_v28  ;;  %v17627_v49 = vrot.slane %v12642_v20, 7  ;;  %v3618_v59 = vmul.f32 %v12149_v21, %v3530_v40  ;;  %v17927_v15 = vld [vmem:[#allocation24_spill] sm:$0xff] }
 0x1ed   : > { %v3693_v10 = vrot.slane %v3691_v35, 3  ;;  %v3696_v48 = vrot.slane %v3694_v22, 4  ;;  %v3619_v31 = vmul.f32 %v12163_v6, %v3532_v54  ;;  %v17924_v47 = vunpack.c.l.bf16 %v12633_v37 }
 0x1ee   : > { %4126 = vperm.xlu2 %10819, %v12497_v5   ;;  %v2728_v0 = vsel %vm2725_vm4, %v2726_v7, %v2727_v58  ;;  %v1506_v27 = vmul.f32 %v11944_v52, %v1423_v30  ;;  %v1505_v28 = vmul.f32 %v12279_v16, %v1421_v3  ;;  %v12681_v40 = vor.u32 %v2088_v32, %v2085_v26  ;;  %v12700_v32 = vld [vmem:[%s17554_s13 + $0x50] sm:$0xf] }
 0x1ef   : > { %v12670_v34 = vpop.permute.xlu2 %4054  ;;  %v12672_v35 = vpop.f32.mrf.mxu2  ;;  %v12674_v38 = vor.u32 %v3696_v48, %v3693_v10  ;;  %v1866_v22 = vmul.f32 %v1834_v62, %v17924_v47  ;;  %v1865_v10 = vmul.f32 %v12661_v57, %v1833_v36  ;;  %v17926_v62 = vld [vmem:[#allocation30_spill] sm:$0xff]  ;;  %v1154_v30 = vperm.slane %v17927_v15, %v11926_v33 }
 0x1f0   : > { %17922 = vst [vmem:[#allocation91_spill] sm:$0xff] %v12670_v34  ;;  %v1145_v48 = vperm.slane %v17926_v62, %v11926_v33  ;;  %v2732_v26 = vsel %vm2725_vm4, %v2729_v42, %v17627_v49  ;;  %v2823_v36 = vmul.f32 %v12175_v24, %v2728_v0  ;;  %v3647_v3 = vpack.c.bf16 %v3619_v31, %v3618_v59  ;;  %v17928_v34 = vld [vmem:[#allocation42_spill] sm:$0xff] }
 0x1f1   : > { %17923 = vst [vmem:[#allocation92_spill] sm:$0xff] %v12672_v35  ;;  %10895 = vset.pattern.permute.xlu0 %v17867_v4  ;;  %v12684_v5 = vpop.permute.xlu1 %4038  ;;  %v3698_v54 = vsel %vm2037_vm3, %v12544_v17, %v12674_v38  ;;  %v2822_v17 = vmul.f32 %v2726_v7, %v2628_v29  ;;  %v1882_v47 = vpack.c.bf16 %v1866_v22, %v1865_v10  ;;  %v12715_v29 = vunpack.c.l.bf16 %v1154_v30  ;;  %v12720_v22 = vpop.permute.xlu0 %4568 }
 0x1f2   : > { %17925 = vst [vmem:[#allocation93_spill] sm:$0xff] %v12684_v5  ;;  %4712 = vperm.xlu0 %10895, %v12700_v32   ;;  %9893 = vmatmul.msk.bf16.gmra.mxu1 %vm1899_vm1, %v3698_v54  ;;  %v2730_v62 = vsel %vm2725_vm4, %v2727_v58, %v2729_v42  ;;  %v1532_v15 = vpack.c.bf16 %v1506_v27, %v1505_v28  ;;  %v1346_v59 = vunpack.c.l.bf16 %v1145_v48  ;;  %v17929_v42 = vld [vmem:[#allocation36_spill] sm:$0xff]  ;;  %v3703_v0 = vshll.u32 %v3647_v3, 16 }
 0x1f3   : > { %v2090_v49 = vsel %vm2037_vm3, %v12568_v44, %v12681_v40  ;;  %v2825_v35 = vmul.f32 %v11972_v45, %v2732_v26  ;;  %v2411_v5 = vperm.slane %v17928_v34, %v11926_v33  ;;  %v2419_v7 = vperm.slane %v17929_v42, %v11926_v33  ;;  %17930 = vst [vmem:[#allocation30_spill] sm:$0xff] %v12720_v22  ;;  %v12726_v34 = vld [vmem:[%s17554_s13 + $0x54] sm:$0xf] }
 0x1f4   : > { %3353 = vperm.xlu1 %10820, %v12700_v32   ;;  %9834 = vmatmul.msk.bf16.gmra.mxu3 %vm1899_vm1, %v1882_v47  ;;  %v2824_v58 = vmul.f32 %v11970_v51, %v2730_v62  ;;  %v2855_v31 = vpack.c.bf16 %v2823_v36, %v2822_v17  ;;  %v3700_v44 = vshrl.u32 %v3647_v3, 16  ;;  %v2092_v28 = vshrl.u32 %v1532_v15, 16 }
 0x1f5   : > { %9847 = vmatmul.msk.bf16.gmra.mxu2 %vm1899_vm1, %v2090_v49  ;;  %v2095_v54 = vshll.u32 %v1532_v15, 16  ;;  %v2665_v48 = vunpack.c.l.bf16 %v2411_v5  ;;  %v1424_v30 = vrot.slane %v1346_v59, 1  ;;  %v17629_v26 = vrot.slane %v12715_v29, 1  ;;  %v11002_v59 = vld [vmem:[%s17554_s13] sm:$0xf] }
 0x1f6   : > { %10821 = vset.pattern.permute.xlu2 %v17827_v8  ;;  %v12733_v10 = vpack.c.bf16 %v2825_v35, %v2824_v58  ;;  %v12736_v17 = vunpack.c.l.bf16 %v2419_v7  ;;  %v3702_v3 = vrot.slane %v3700_v44, 3  ;;  %v3705_v47 = vrot.slane %v3703_v0, 4 }
 0x1f7   : > { %3361 = vperm.xlu2 %10821, %v12726_v34   ;;  %v12729_v49 = vpop.f32.mrf.mxu2  ;;  %v2880_v62 = vshll.u32 %v2855_v31, 16  ;;  %v17932_v42 = vrot.slane %v12576_v2, 1  ;;  %v2094_v35 = vrot.slane %v2092_v28, 3  ;;  %v2097_v5 = vrot.slane %v2095_v54, 4 }
 0x1f8   : > { %17931 = vst [vmem:[#allocation24_spill] sm:$0xff] %v12729_v49  ;;  %v12731_v27 = vpop.permute.xlu2 %2565  ;;  %v2733_v15 = vrot.slane %v2665_v48, 7  ;;  %v1427_v7 = vsel %vm1396_vm2, %v1424_v30, %v17629_v26  ;;  %v17628_v2 = vrot.slane %v12736_v17, 7  ;;  %v12755_v0 = vor.u32 %v3705_v47, %v3702_v3 }
 0x1f9   : > { %v1425_v49 = vsel %vm1396_vm2, %v17932_v42, %v1424_v30  ;;  %v1508_v44 = vmul.f32 %v11995_v1, %v1427_v7  ;;  %v2882_v28 = vrot.slane %v2880_v62, 1  ;;  %v12760_v48 = vor.u32 %v2097_v5, %v2094_v35  ;;  %v12774_v62 = vpop.permute.xlu0 %4086 }
 0x1fa   : > { %4768 = vperm.xlu0 %10895, %v12335_v12   ;;  %v12739_v36 = vpop.permute.xlu1 %2549  ;;  %v2885_v12 = vshll.u32 %v12733_v10, 16  ;;  %v1507_v58 = vmul.f32 %v11950_v43, %v1425_v49  ;;  %v17934_v42 = vrot.slane %v12642_v20, 7  ;;  %v3707_v49 = vsel %vm2037_vm3, %v12674_v38, %v12755_v0  ;;  %17935 = vst [vmem:[#allocation36_spill] sm:$0xff] %v12774_v62  ;;  %v17939_v38 = vld [vmem:[#allocation27_spill] sm:$0xff] }
 0x1fb   : > { %v2878_v30 = vshrl.u32 %v2855_v31, 16  ;;  %v2736_v47 = vsel %vm2725_vm4, %v2733_v15, %v17628_v2  ;;  %v17937_v20 = vmov 8   ;;  %v1163_v31 = vperm.slane %v17939_v38, %v11926_v33  ;;  %v17941_v2 = vld [vmem:[#allocation47_spill] sm:$0xff] }
 0x1fc   : > { %10822 = vset.pattern.permute.xlu1 %v17867_v4  ;;  %v12769_v3 = vrot.slane %v2885_v12, 1  ;;  %v1533_v7 = vpack.c.bf16 %v1508_v44, %v1507_v58  ;;  %v2435_v26 = vperm.slane %v17941_v2, %v11926_v33  ;;  %v3279_v38 = vperm.slane %v12480_v60, %v11926_v33  ;;  %v770_v58 = vpop.f32.mrf.mxu0  ;;  %v17942_v2 = vld [vmem:[#allocation57_spill] sm:$0xff] }
 0x1fd   : > { %4552 = vperm.xlu1 %10822, %v11002_v59   ;;  %v2734_v59 = vsel %vm2725_vm4, %v17934_v42, %v2733_v15  ;;  %v2883_v15 = vor.u32 %v2882_v28, %v2878_v30  ;;  %v2427_v44 = vperm.slane %v17942_v2, %v11926_v33  ;;  %v1348_v60 = vunpack.c.l.bf16 %v1163_v31 }
 0x1fe   : > { %v2826_v42 = vmul.f32 %v12017_v9, %v2734_v59  ;;  %v2101_v59 = vshrl.u32 %v1533_v7, 16  ;;  %v2104_v30 = vshll.u32 %v1533_v7, 16 }
 0x1ff   : > { %10823 = vset.pattern.permute.xlu2 %v17867_v4  ;;  %v12758_v54 = vpop.f32.mrf.mxu2  ;;  %v2667_v2 = vunpack.c.l.bf16 %v2427_v44  ;;  %v1428_v7 = vrot.slane %v1348_v60, 1 }
 0x200   : > { %17933 = vst [vmem:[#allocation42_spill] sm:$0xff] %v12758_v54  ;;  %4560 = vperm.xlu2 %10823, %v12129_v63   ;;  %v17938_v63 = vld [vmem:[#allocation21_spill] sm:$0xff]  ;;  %v12796_v54 = vpop.f32.mrf.mxu1 }
 0x201   : > { %v12776_v35 = vpop.permute.xlu2 %4070  ;;  %v1172_v5 = vperm.slane %v17938_v63, %v11926_v33  ;;  %v2827_v63 = vmul.f32 %v12019_v13, %v2736_v47  ;;  %v12808_v47 = vunpack.c.l.bf16 %v2435_v26 }
 0x202   : > { %17936 = vst [vmem:[#allocation94_spill] sm:$0xff] %v12776_v35  ;;  %10900 = vset.pattern.permute.xlu0 %v17937_v20  ;;  %9894 = vmatmul.msk.bf16.gmra.mxu1 %vm1899_vm1, %v3707_v49  ;;  %v2099_v49 = vsel %vm2037_vm3, %v12681_v40, %v12760_v48  ;;  %v808_v40 = vmul.f32 %v12225_v46, %v770_v58  ;;  %v11003_v46 = vld [vmem:[%s17554_s13 + $0x48] sm:$0xf] }
 0x203   : > { %6817 = vperm.xlu0 %10900, %v12169_v14   ;;  %v12785_v12 = vpop.permute.xlu1 %4046  ;;  %v2888_v14 = vsel %vm2876_vm5, %v2883_v15, %v12769_v3  ;;  %v12806_v28 = vunpack.c.l.bf16 %v1172_v5  ;;  %v3460_v15 = vunpack.c.l.bf16 %v3279_v38  ;;  %v12814_v62 = vpack.c.bf16 %v2827_v63, %v2826_v42  ;;  %v12824_v42 = vpop.permute.xlu0 %4094 }
 0x204   : > { %17940 = vst [vmem:[#allocation21_spill] sm:$0xff] %v12785_v12  ;;  %9867 = vmatmul.msk.bf16.vlgmr.msrb.gmra.mxu3 %vm1899_vm1, %v2888_v14  ;;  %v2106_v38 = vrot.slane %v2104_v30, 4  ;;  %v17631_v14 = vrot.slane %v12808_v47, 7  ;;  %v17967_v12 = vld [vmem:[#allocation28_spill] sm:$0xff] }
 0x205   : > { %4576 = vperm.xlu1 %10822, %v12429_v53   ;;  %9848 = vmatmul.msk.bf16.gmra.mxu2 %vm1899_vm1, %v2099_v49  ;;  %v844_v49 = vadd.f32 %v12242_v50, %v808_v40  ;;  %v17630_v26 = vrot.slane %v12806_v28, 1  ;;  %v2103_v50 = vrot.slane %v2101_v59, 3  ;;  %17944 = vst [vmem:[#allocation47_spill] sm:$0xff] %v12824_v42  ;;  %v3533_v44 = vrot.slane %v3460_v15, 1  ;;  %v17947_v42 = vld [vmem:[#allocation62_spill] sm:$0xff] }
 0x207   : > { %v12810_v53 = vpop.f32.mrf.mxu2  ;;  %v876_v31 = vmax.f32 %v844_v49, 0.0  ;;  %v2893_v49 = vshll.u32 %v12814_v62, 16  ;;  %v1431_v59 = vsel %vm1396_vm2, %v1428_v7, %v17630_v26 }
 0x208   : > { %17943 = vst [vmem:[#allocation27_spill] sm:$0xff] %v12810_v53  ;;  %10826 = vset.pattern.permute.xlu2 %v17829_v61  ;;  %v12837_v30 = vpop.f32.mrf.mxu1 }
 0x209   : > { %4142 = vperm.xlu2 %10826, %v11003_v46   ;;  %v913_v58 = vpack.c.bf16 %v876_v31, %v876_v31  ;;  %v2737_v46 = vrot.slane %v2667_v2, 7  ;;  %v12841_v31 = vor.u32 %v2106_v38, %v2103_v50  ;;  %v12855_v50 = vrot.slane %v2893_v49, 1  ;;  %v17950_v38 = vld [vmem:[#allocation37_spill] sm:$0xff] }
 0x20a   : > { %v12819_v5 = vpop.permute.xlu2 %3297  ;;  %v1181_v35 = vperm.slane %v17950_v38, %v11926_v33 }
 0x20b   : > { %6841 = vperm.xlu0 %10900, %v12284_v18   ;;  %945 = vst.msk [vmem:[#allocation2 + $0x84] sm:$0xf] %vm877_vm0, %v913_v58  ;;  %v17945_v18 = vrot.slane %v12715_v29, 1  ;;  %v2740_v2 = vsel %vm2725_vm4, %v2737_v46, %v17631_v14  ;;  %v1510_v29 = vmul.f32 %v17947_v42, %v1431_v59  ;;  %v17951_v14 = vld [vmem:[#allocation31_spill] sm:$0xff]  ;;  %v17952_v59 = vrot.slane %v12736_v17, 7 }
 0x20c   : > { %v3282_v63 = vpop.permute.xlu1 %3281  ;;  %v17953_v17 = vmov 7   ;;  %v1350_v22 = vunpack.c.l.bf16 %v1181_v35 }
 0x20d   : > { %10827 = vset.pattern.permute.xlu1 %v17829_v61  ;;  %v3287_v40 = vperm.slane %v3282_v63, %v11926_v33  ;;  %v1429_v60 = vsel %vm1396_vm2, %v17945_v18, %v1428_v7  ;;  %v17946_v63 = vld [vmem:[#allocation56_spill] sm:$0xff]  ;;  %v2889_v18 = vshrl.u32 %v12733_v10, 16  ;;  %v17949_v7 = vrot.slane %v12613_v11, 1 }
 0x20e   : > { %4150 = vperm.xlu1 %10827, %v12655_v41   ;;  %v1509_v58 = vmul.f32 %v17946_v63, %v1429_v60  ;;  %v1190_v60 = vperm.slane %v17951_v14, %v11926_v33  ;;  %v2829_v10 = vmul.f32 %v12069_v25, %v2740_v2  ;;  %v2108_v14 = vsel %vm2037_vm3, %v12760_v48, %v12841_v31 }
 0x20f   : > { %v12839_v15 = vunpack.c.l.bf16 %v3287_v40  ;;  %v12848_v53 = vpop.f32.mrf.mxu2  ;;  %v3534_v26 = vsel %vm1396_vm2, %v17949_v7, %v3533_v44  ;;  %v2891_v11 = vor.u32 %v2889_v18, %v12769_v3  ;;  %v12873_v7 = vld [vmem:[%s17554_s13 + $0x58] sm:$0xf]  ;;  %v17954_v3 = vld [vmem:[#allocation54_spill] sm:$0xff] }
 0x210   : > { %17948 = vst [vmem:[#allocation57_spill] sm:$0xff] %v12848_v53  ;;  %v2738_v53 = vsel %vm2725_vm4, %v17952_v59, %v2737_v46  ;;  %v2443_v46 = vperm.slane %v17954_v3, %v11926_v33  ;;  %v1534_v2 = vpack.c.bf16 %v1510_v29, %v1509_v58  ;;  %v3620_v18 = vmul.f32 %v12276_v23, %v3534_v26  ;;  %v17957_v58 = vld [vmem:[#allocation46_spill] sm:$0xff]  ;;  %v12895_v26 = vpop.permute.xlu0 %4134 }
 0x211   : > { %v17632_v40 = vrot.slane %v12839_v15, 1  ;;  %10828 = vset.pattern.permute.xlu2 %v17827_v8  ;;  %v2828_v59 = vmul.f32 %v12066_v19, %v2738_v53  ;;  %v2451_v29 = vperm.slane %v17957_v58, %v11926_v33  ;;  %17958 = vst [vmem:[#allocation54_spill] sm:$0xff] %v12895_v26  ;;  %v12901_v53 = vpop.f32.mrf.mxu1 }
 0x212   : > { %3369 = vperm.xlu2 %10828, %v12873_v7   ;;  %v2669_v3 = vunpack.c.l.bf16 %v2443_v46  ;;  %v2110_v58 = vshrl.u32 %v1534_v2, 16  ;;  %v11005_v46 = vld [vmem:[%s17554_s13 + $0x14] sm:$0xf] }
 0x213   : > { %v3536_v49 = vsel %vm1396_vm2, %v3533_v44, %v17632_v40  ;;  %10909 = vset.pattern.permute.xlu0 %v17953_v17  ;;  %v12884_v38 = vpop.permute.xlu2 %4078  ;;  %v2896_v40 = vsel %vm2876_vm5, %v2891_v11, %v12855_v50  ;;  %v12904_v11 = vpack.c.bf16 %v2829_v10, %v2828_v59  ;;  %v12910_v26 = vunpack.c.l.bf16 %v2451_v29 }
 0x214   : > { %v3621_v44 = vmul.f32 %v12279_v16, %v3536_v49  ;;  %17955 = vst [vmem:[#allocation37_spill] sm:$0xff] %v12884_v38  ;;  %6279 = vperm.xlu0 %10909, %v12307_v55   ;;  %9868 = vmatmul.msk.bf16.gmra.mxu3 %vm1899_vm1, %v2896_v40  ;;  %v12899_v55 = vunpack.c.l.bf16 %v1190_v60  ;;  %v2741_v59 = vrot.slane %v2669_v3, 7 }
 0x215   : > { %9849 = vmatmul.msk.bf16.gmra.mxu2 %vm1899_vm1, %v2108_v14  ;;  %v12891_v48 = vpop.permute.xlu1 %4062  ;;  %v17959_v14 = vld [vmem:[#allocation88_spill] sm:$0xff]  ;;  %v2901_v29 = vshll.u32 %v12904_v11, 16 }
 0x216   : > { %17956 = vst [vmem:[#allocation31_spill] sm:$0xff] %v12891_v48  ;;  %v3648_v49 = vpack.c.bf16 %v3621_v44, %v3620_v18  ;;  %10829 = vset.pattern.permute.xlu1 %v17867_v4  ;;  %v2113_v48 = vshll.u32 %v1534_v2, 16  ;;  %v3303_v18 = vperm.slane %v12819_v5, %v11926_v33  ;;  %v1432_v44 = vrot.slane %v1350_v22, 1 }
 0x217   : > { %4584 = vperm.xlu1 %10829, %v17959_v14   ;;  %v17634_v25 = vrot.slane %v12899_v55, 1  ;;  %v2112_v5 = vrot.slane %v2110_v58, 3  ;;  %v17961_v14 = vrot.slane %v12806_v28, 1  ;;  %v17962_v28 = vrot.slane %v12808_v47, 7 }
 0x218   : > { %v12906_v35 = vpop.f32.mrf.mxu2  ;;  %v3709_v38 = vshrl.u32 %v3648_v49, 16  ;;  %v3712_v40 = vshll.u32 %v3648_v49, 16  ;;  %v2115_v22 = vrot.slane %v2113_v48, 4 }
 0x219   : > { %17960 = vst [vmem:[#allocation46_spill] sm:$0xff] %v12906_v35  ;;  %v1433_v3 = vsel %vm1396_vm2, %v17961_v14, %v1432_v44  ;;  %v1435_v58 = vsel %vm1396_vm2, %v1432_v44, %v17634_v25  ;;  %v12945_v14 = vpop.permute.xlu0 %4198  ;;  %v17966_v25 = vld [vmem:[#allocation69_spill] sm:$0xff]  ;;  %v12957_v35 = vpop.f32.mrf.mxu1 }
 0x21a   : > { %v3711_v60 = vrot.slane %v3709_v38, 3  ;;  %10830 = vset.pattern.permute.xlu2 %v17867_v4  ;;  %v3714_v10 = vrot.slane %v3712_v40, 4  ;;  %v12921_v38 = vunpack.c.l.bf16 %v3303_v18  ;;  %v17635_v40 = vrot.slane %v12910_v26, 7  ;;  %17963 = vst [vmem:[#allocation88_spill] sm:$0xff] %v12945_v14 }
 0x21b   : > { %4592 = vperm.xlu2 %10830, %v11005_v46   ;;  %v2897_v18 = vshrl.u32 %v12814_v62, 16  ;;  %v17965_v62 = vld [vmem:[#allocation64_spill] sm:$0xff] }
 0x21c   : > { %10914 = vset.pattern.permute.xlu0 %v17867_v4  ;;  %v12918_v2 = vpop.permute.xlu2 %3313  ;;  %v12924_v49 = vor.u32 %v3714_v10, %v3711_v60  ;;  %v2742_v60 = vsel %vm2725_vm4, %v17962_v28, %v2741_v59  ;;  %v2744_v10 = vsel %vm2725_vm4, %v2741_v59, %v17635_v40  ;;  %v1511_v47 = vmul.f32 %v17965_v62, %v1433_v3 }
 0x21d   : > { %4792 = vperm.xlu0 %10914, %v12529_v39   ;;  %v1512_v28 = vmul.f32 %v17966_v25, %v1435_v58  ;;  %v17637_v59 = vrot.slane %v12921_v38, 1  ;;  %v2899_v14 = vor.u32 %v2897_v18, %v12855_v50  ;;  %v2830_v3 = vmul.f32 %v12149_v21, %v2742_v60 }
 0x21e   : > { %v3290_v46 = vpop.permute.xlu1 %3289  ;;  %v3716_v39 = vsel %vm2037_vm3, %v12755_v0, %v12924_v49  ;;  %v12953_v0 = vrot.slane %v2901_v29, 1  ;;  %v2831_v58 = vmul.f32 %v12163_v6, %v2744_v10  ;;  %v17970_v18 = vrot.slane %v12839_v15, 1 }
 0x21f   : > { %10831 = vset.pattern.permute.xlu1 %v17829_v61  ;;  %v3295_v48 = vperm.slane %v3290_v46, %v11926_v33  ;;  %9895 = vmatmul.msk.bf16.gmra.mxu1 %vm1899_vm1, %v3716_v39  ;;  %v12951_v46 = vor.u32 %v2115_v22, %v2112_v5  ;;  %v17968_v39 = vld [vmem:[#allocation39_spill] sm:$0xff]  ;;  %v17969_v22 = vld [vmem:[#allocation53_spill] sm:$0xff]  ;;  %v17971_v60 = vmov 6  }
 0x220   : > { %4158 = vperm.xlu1 %10831, %v12700_v32   ;;  %v12948_v44 = vpop.f32.mrf.mxu2  ;;  %v1208_v5 = vperm.slane %v17968_v39, %v11926_v33  ;;  %v2459_v29 = vperm.slane %v17969_v22, %v11926_v33 }
 0x221   : > { %17964 = vst [vmem:[#allocation95_spill] sm:$0xff] %v12948_v44  ;;  %v3462_v40 = vunpack.c.l.bf16 %v3295_v48  ;;  %v1199_v44 = vperm.slane %v17967_v12, %v11926_v33  ;;  %v2117_v50 = vsel %vm2037_vm3, %v12841_v31, %v12951_v46  ;;  %v2904_v12 = vsel %vm2876_vm5, %v2899_v14, %v12953_v0 }
 0x222   : > { %v1535_v48 = vpack.c.bf16 %v1512_v28, %v1511_v47  ;;  %v12989_v14 = vunpack.c.l.bf16 %v1208_v5  ;;  %v17973_v47 = vld [vmem:[#allocation61_spill] sm:$0xff] }
 0x223   : > { %v3537_v13 = vrot.slane %v3462_v40, 1  ;;  %10832 = vset.pattern.permute.xlu2 %v17829_v61  ;;  %v1352_v15 = vunpack.c.l.bf16 %v1199_v44  ;;  %v11006_v44 = vld [vmem:[%s17554_s13 + $0x64] sm:$0xf] }
 0x224   : > { %4166 = vperm.xlu2 %10832, %v12726_v34   ;;  %9869 = vmatmul.msk.bf16.gmra.mxu3 %vm1899_vm1, %v2904_v12  ;;  %v2119_v5 = vshrl.u32 %v1535_v48, 16  ;;  %v13004_v12 = vpack.c.bf16 %v2831_v58, %v2830_v3  ;;  %v17643_v6 = vrot.slane %v12989_v14, 1  ;;  %v3319_v3 = vperm.slane %v12918_v2, %v11926_v33  ;;  %v11007_v58 = vld [vmem:[%s17554_s13 + $0x18] sm:$0xf]  ;;  %v17978_v2 = vld [vmem:[#allocation70_spill] sm:$0xff] }
 0x225   : > { %v3538_v39 = vsel %vm1396_vm2, %v17970_v18, %v3537_v13  ;;  %v3540_v40 = vsel %vm1396_vm2, %v3537_v13, %v17637_v59  ;;  %10919 = vset.pattern.permute.xlu0 %v17971_v60  ;;  %v12983_v10 = vpop.permute.xlu2 %2605  ;;  %9850 = vmatmul.msk.bf16.gmra.mxu2 %vm1899_vm1, %v2117_v50  ;;  %v2467_v13 = vperm.slane %v17973_v47, %v11926_v33  ;;  %v12999_v59 = vpop.f32.mrf.mxu1  ;;  %v2122_v50 = vshll.u32 %v1535_v48, 16 }
 0x226   : > { %17972 = vst [vmem:[#allocation69_spill] sm:$0xff] %v12983_v10  ;;  %v3622_v31 = vmul.f32 %v11944_v52, %v3538_v39  ;;  %v3623_v22 = vmul.f32 %v11950_v43, %v3540_v40  ;;  %5522 = vperm.xlu0 %10919, %v12655_v41   ;;  %v2671_v40 = vunpack.c.l.bf16 %v2459_v29  ;;  %v13006_v41 = vpop.permute.xlu0 %4206  ;;  %v1436_v47 = vrot.slane %v1352_v15, 1 }
 0x227   : > { %17975 = vst [vmem:[#allocation39_spill] sm:$0xff] %v12999_v59  ;;  %v2121_v9 = vrot.slane %v2119_v5, 3  ;;  %v2909_v48 = vshll.u32 %v13004_v12, 16  ;;  %v18002_v59 = vld [vmem:[#allocation44_spill] sm:$0xff] }
 0x228   : > { %v3649_v28 = vpack.c.bf16 %v3623_v22, %v3622_v31  ;;  %10833 = vset.pattern.permute.xlu1 %v17827_v8  ;;  %v12995_v18 = vpop.permute.xlu1 %2589  ;;  %v12997_v39 = vpop.f32.mrf.mxu2  ;;  %17976 = vst [vmem:[#allocation53_spill] sm:$0xff] %v13006_v41  ;;  %v2745_v19 = vrot.slane %v2671_v40, 7  ;;  %v17977_v40 = vrot.slane %v12899_v55, 1  ;;  %v17981_v55 = vrot.slane %v12910_v26, 7  ;;  %v17982_v26 = vld [vmem:[#allocation41_spill] sm:$0xff] }
 0x229   : > { %17974 = vst [vmem:[#allocation28_spill] sm:$0xff] %v12997_v39  ;;  %3393 = vperm.xlu1 %10833, %v11006_v44   ;;  %v13009_v39 = vunpack.c.l.bf16 %v2467_v13  ;;  %v2124_v44 = vrot.slane %v2122_v50, 4 }
 0x22a   : > { %v3718_v31 = vshrl.u32 %v3649_v28, 16  ;;  %v3721_v22 = vshll.u32 %v3649_v28, 16  ;;  %v1439_v28 = vsel %vm1396_vm2, %v1436_v47, %v17643_v6  ;;  %v1437_v5 = vsel %vm1396_vm2, %v17977_v40, %v1436_v47 }
 0x22b   : > { %v17642_v50 = vrot.slane %v13009_v39, 7  ;;  %v2746_v47 = vsel %vm2725_vm4, %v17981_v55, %v2745_v19  ;;  %v1226_v55 = vperm.slane %v17982_v26, %v11926_v33 }
 0x22c   : > { %v3720_v29 = vrot.slane %v3718_v31, 3  ;;  %v3723_v21 = vrot.slane %v3721_v22, 4  ;;  %10834 = vset.pattern.permute.xlu2 %v17867_v4  ;;  %v1513_v31 = vmul.f32 %v17978_v2, %v1437_v5  ;;  %v17979_v22 = vld [vmem:[#allocation78_spill] sm:$0xff]  ;;  %v13046_v5 = vrot.slane %v2909_v48, 1 }
 0x22d   : > { %4600 = vperm.xlu2 %10834, %v11007_v58   ;;  %v1514_v41 = vmul.f32 %v17979_v22, %v1439_v28  ;;  %v13044_v28 = vor.u32 %v2124_v44, %v2121_v9  ;;  %v13056_v6 = vpop.f32.mrf.mxu1  ;;  %v2832_v44 = vmul.f32 %v12276_v23, %v2746_v47  ;;  %v17986_v47 = vld [vmem:[#allocation65_spill] sm:$0xff] }
 0x22e   : > { %v3322_v15 = vpop.permute.xlu2 %3321  ;;  %v13018_v13 = vor.u32 %v3723_v21, %v3720_v29  ;;  %5530 = vperm.xlu0 %10919, %v12700_v32   ;;  %v2905_v29 = vshrl.u32 %v12904_v11, 16  ;;  %v2748_v32 = vsel %vm2725_vm4, %v2745_v19, %v17642_v50  ;;  %v17983_v19 = vld [vmem:[#allocation33_spill] sm:$0xff]  ;;  %17984 = vst [vmem:[#allocation78_spill] sm:$0xff] %v13056_v6 }
 0x22f   : > { %v1217_v50 = vperm.slane %v17983_v19, %v11926_v33  ;;  %v2833_v48 = vmul.f32 %v12279_v16, %v2748_v32  ;;  %v2126_v26 = vsel %vm2037_vm3, %v12951_v46, %v13044_v28  ;;  %v2475_v32 = vperm.slane %v17986_v47, %v11926_v33 }
 0x230   : > { %v13030_v58 = vpop.f32.mrf.mxu2  ;;  %v3725_v21 = vsel %vm2037_vm3, %v12924_v49, %v13018_v13  ;;  %v13048_v49 = vunpack.c.l.bf16 %v3319_v3  ;;  %v2907_v9 = vor.u32 %v2905_v29, %v12953_v0  ;;  %v1536_v3 = vpack.c.bf16 %v1514_v41, %v1513_v31 }
 0x231   : > { %17980 = vst [vmem:[#allocation61_spill] sm:$0xff] %v13030_v58  ;;  %10835 = vset.pattern.permute.xlu1 %v17829_v61  ;;  %v3306_v40 = vpop.permute.xlu1 %3305  ;;  %9896 = vmatmul.msk.bf16.gmra.mxu1 %vm1899_vm1, %v3725_v21  ;;  %v3327_v21 = vperm.slane %v3322_v15, %v11926_v33  ;;  %v17985_v15 = vld [vmem:[#allocation76_spill] sm:$0xff]  ;;  %v13073_v41 = vunpack.c.l.bf16 %v1226_v55  ;;  %v1354_v31 = vunpack.c.l.bf16 %v1217_v50 }
 0x232   : > { %v3311_v11 = vperm.slane %v3306_v40, %v11926_v33  ;;  %4174 = vperm.xlu1 %10835, %v12873_v7   ;;  %v3330_v40 = vpop.permute.xlu0 %3329  ;;  %v2912_v19 = vsel %vm2876_vm5, %v2907_v9, %v13046_v5  ;;  %v2483_v6 = vperm.slane %v17985_v15, %v11926_v33  ;;  %v3543_v0 = vrot.slane %v13048_v49, 1  ;;  %v11008_v50 = vld [vmem:[%s17554_s13 + $0x5c] sm:$0xf] }
 0x233   : > { %v3335_v45 = vperm.slane %v3330_v40, %v11926_v33  ;;  %v3466_v46 = vunpack.c.l.bf16 %v3327_v21  ;;  %v17988_v49 = vrot.slane %v12921_v38, 1  ;;  %v2128_v40 = vshrl.u32 %v1536_v3, 16 }
 0x234   : > { %v3464_v58 = vunpack.c.l.bf16 %v3311_v11  ;;  %9870 = vmatmul.msk.bf16.gmra.mxu3 %vm1899_vm1, %v2912_v19  ;;  %v13099_v47 = vunpack.c.l.bf16 %v2483_v6 }
 0x235   : > { %9851 = vmatmul.msk.bf16.gmra.mxu2 %vm1899_vm1, %v2126_v26  ;;  %10836 = vset.pattern.permute.xlu2 %v17829_v61  ;;  %v13093_v26 = vpack.c.bf16 %v2833_v48, %v2832_v44  ;;  %v13095_v19 = vunpack.c.l.bf16 %v3335_v45  ;;  %v11009_v44 = vld [vmem:[%s17554_s13 + $0x68] sm:$0xf]  ;;  %v2673_v48 = vunpack.c.l.bf16 %v2475_v32 }
 0x236   : > { %v3541_v29 = vrot.slane %v3464_v58, 1  ;;  %10926 = vset.pattern.permute.xlu0 %v17937_v20  ;;  %4182 = vperm.xlu2 %10836, %v11008_v50   ;;  %v1440_v50 = vrot.slane %v1354_v31, 1 }
 0x237   : > { %v13079_v11 = vpop.permute.xlu2 %2621  ;;  %6897 = vperm.xlu0 %10926, %v12726_v34   ;;  %v13089_v55 = vpop.f32.mrf.mxu3  ;;  %v17647_v6 = vrot.slane %v13095_v19, 1 }
 0x238   : > { %17987 = vst [vmem:[#allocation41_spill] sm:$0xff] %v13079_v11  ;;  %v3542_v58 = vsel %vm1396_vm2, %v17988_v49, %v3541_v29  ;;  %v3544_v9 = vsel %vm1396_vm2, %v3541_v29, %v3543_v0  ;;  %v13091_v21 = vpop.f32.mrf.mxu2  ;;  %v2131_v29 = vshll.u32 %v1536_v3, 16  ;;  %v13110_v3 = vpop.f32.mrf.mxu1 }
 0x239   : > { %17989 = vst [vmem:[#allocation33_spill] sm:$0xff] %v13089_v55  ;;  %v3624_v38 = vmul.f32 %v11995_v1, %v3542_v58  ;;  %v3625_v15 = vmul.f32 %v17946_v63, %v3544_v9  ;;  %v3545_v55 = vrot.slane %v3466_v46, 1  ;;  %v2917_v58 = vshll.u32 %v13093_v26, 16 }
 0x23a   : > { %17990 = vst [vmem:[#allocation76_spill] sm:$0xff] %v13091_v21  ;;  %10837 = vset.pattern.permute.xlu1 %v17827_v8  ;;  %v13102_v49 = vpop.permute.xlu1 %2597  ;;  %v2130_v21 = vrot.slane %v2128_v40, 3  ;;  %v2133_v23 = vrot.slane %v2131_v29, 4  ;;  %v2749_v29 = vrot.slane %v2673_v48, 7 }
 0x23b   : > { %17991 = vst [vmem:[#allocation65_spill] sm:$0xff] %v13102_v49  ;;  %v3650_v16 = vpack.c.bf16 %v3625_v15, %v3624_v38  ;;  %3401 = vperm.xlu1 %10837, %v11009_v44   ;;  %v2913_v38 = vshrl.u32 %v13004_v12, 16  ;;  %v17993_v15 = vrot.slane %v12989_v14, 1  ;;  %v3546_v32 = vsel %vm1396_vm2, %v3543_v0, %v3545_v55  ;;  %v18034_v49 = vld [vmem:[#allocation23_spill] sm:$0xff] }
 0x23c   : > { %17992 = vst [vmem:[#allocation96_spill] sm:$0xff] %v13110_v3  ;;  %v3548_v45 = vsel %vm1396_vm2, %v3545_v55, %v17647_v6  ;;  %v17994_v3 = vrot.slane %v13073_v41, 1  ;;  %v17998_v55 = vld [vmem:[#allocation85_spill] sm:$0xff]  ;;  %v13143_v6 = vrot.slane %v2917_v58, 1 }
 0x23d   : > { %v3727_v9 = vshrl.u32 %v3650_v16, 16  ;;  %v3730_v46 = vshll.u32 %v3650_v16, 16  ;;  %v1441_v44 = vsel %vm1396_vm2, %v17993_v15, %v1440_v50  ;;  %v2915_v0 = vor.u32 %v2913_v38, %v13046_v5  ;;  %v17997_v15 = vld [vmem:[#allocation79_spill] sm:$0xff] }
 0x23e   : > { %v1443_v40 = vsel %vm1396_vm2, %v1440_v50, %v17994_v3  ;;  %10838 = vset.pattern.permute.xlu2 %v17827_v8  ;;  %v1515_v31 = vmul.f32 %v17997_v15, %v1441_v44  ;;  %v13136_v50 = vld [vmem:[%s17554_s13 + $0x6c] sm:$0xf]  ;;  %v13141_v3 = vor.u32 %v2133_v23, %v2130_v21  ;;  %v3626_v38 = vmul.f32 %v17947_v42, %v3546_v32  ;;  %v18005_v32 = vld [vmem:[#allocation80_spill] sm:$0xff] }
 0x23f   : > { %v3729_v11 = vrot.slane %v3727_v9, 3  ;;  %6905 = vperm.xlu0 %10926, %v12873_v7   ;;  %v13126_v16 = vpop.f32.mrf.mxu3  ;;  %v3732_v12 = vrot.slane %v3730_v46, 4  ;;  %v1516_v9 = vmul.f32 %v17998_v55, %v1443_v40  ;;  %3409 = vperm.xlu2 %10838, %v13136_v50   ;;  %v18000_v46 = vrot.slane %v13099_v47, 7 }
 0x240   : > { %17995 = vst [vmem:[#allocation97_spill] sm:$0xff] %v13126_v16  ;;  %v13128_v14 = vpop.f32.mrf.mxu2  ;;  %v13139_v48 = vpop.permute.xlu2 %4118  ;;  %v3627_v44 = vmul.f32 %v17965_v62, %v3548_v45  ;;  %v18004_v21 = vrot.slane %v13009_v39, 7  ;;  %v2920_v45 = vsel %vm2876_vm5, %v2915_v0, %v13143_v6 }
 0x241   : > { %17996 = vst [vmem:[#allocation98_spill] sm:$0xff] %v13128_v14  ;;  %v2752_v5 = vsel %vm2725_vm4, %v2749_v29, %v18000_v46  ;;  %v13150_v40 = vor.u32 %v3732_v12, %v3729_v11  ;;  %v18001_v14 = vld [vmem:[#allocation38_spill] sm:$0xff]  ;;  %v2491_v46 = vperm.slane %v18005_v32, %v11926_v33  ;;  %v11011_v11 = vld [vmem:[%s17554_s13 + $0x24] sm:$0xf]  ;;  %v1537_v12 = vpack.c.bf16 %v1516_v9, %v1515_v31 }
 0x242   : > { %17999 = vst [vmem:[#allocation99_spill] sm:$0xff] %v13139_v48  ;;  %v1244_v16 = vperm.slane %v18001_v14, %v11926_v33  ;;  %v1235_v48 = vperm.slane %v18002_v59, %v11926_v33  ;;  %v2750_v58 = vsel %vm2725_vm4, %v18004_v21, %v2749_v29  ;;  %v18006_v14 = vld [vmem:[#allocation68_spill] sm:$0xff]  ;;  %v2835_v29 = vmul.f32 %v11950_v43, %v2752_v5 }
 0x243   : > { %10839 = vset.pattern.permute.xlu1 %v17867_v4  ;;  %v13157_v23 = vpop.permute.xlu1 %4102  ;;  %v3734_v59 = vsel %vm2037_vm3, %v13018_v13, %v13150_v40  ;;  %v2499_v39 = vperm.slane %v18006_v14, %v11926_v33  ;;  %v2135_v21 = vsel %vm2037_vm3, %v13044_v28, %v13141_v3  ;;  %v3651_v32 = vpack.c.bf16 %v3627_v44, %v3626_v38  ;;  %v13184_v14 = vpop.f32.mrf.mxu1  ;;  %v11012_v44 = vld [vmem:[%s17554_s13 + $0x60] sm:$0xf] }
 0x244   : > { %18003 = vst [vmem:[#allocation38_spill] sm:$0xff] %v13157_v23  ;;  %4624 = vperm.xlu1 %10839, %v11011_v11   ;;  %9897 = vmatmul.msk.bf16.gmra.mxu1 %vm1899_vm1, %v3734_v59  ;;  %v13181_v13 = vunpack.c.l.bf16 %v1244_v16  ;;  %v1356_v0 = vunpack.c.l.bf16 %v1235_v48  ;;  %v2834_v11 = vmul.f32 %v11944_v52, %v2750_v58  ;;  %v2675_v5 = vunpack.c.l.bf16 %v2491_v46 }
 0x245   : > { %9852 = vmatmul.msk.bf16.gmra.mxu2 %vm1899_vm1, %v2135_v21  ;;  %9871 = vmatmul.msk.bf16.gmra.mxu3 %vm1899_vm1, %v2920_v45  ;;  %18007 = vst [vmem:[#allocation44_spill] sm:$0xff] %v13184_v14  ;;  %v13191_v28 = vunpack.c.l.bf16 %v2499_v39  ;;  %v2137_v16 = vshrl.u32 %v1537_v12, 16  ;;  %v2140_v38 = vshll.u32 %v1537_v12, 16  ;;  %v3736_v46 = vshrl.u32 %v3651_v32, 16  ;;  %v13210_v12 = vld [vmem:[%s17554_s13 + $0x70] sm:$0xf] }
 0x246   : > { %v13195_v48 = vpack.c.bf16 %v2835_v29, %v2834_v11  ;;  %v3739_v59 = vshll.u32 %v3651_v32, 16  ;;  %v1444_v39 = vrot.slane %v1356_v0, 1  ;;  %v2753_v21 = vrot.slane %v2675_v5, 7  ;;  %v18016_v14 = vld [vmem:[#allocation19_spill] sm:$0xff] }
 0x247   : > { %10933 = vset.pattern.permute.xlu0 %v17953_v17  ;;  %v13187_v31 = vpop.f32.mrf.mxu3  ;;  %10840 = vset.pattern.permute.xlu2 %v17829_v61  ;;  %v2139_v11 = vrot.slane %v2137_v16, 3  ;;  %v3738_v45 = vrot.slane %v3736_v46, 3  ;;  %v18011_v5 = vrot.slane %v13073_v41, 1  ;;  %v18014_v23 = vrot.slane %v13099_v47, 7  ;;  %v18015_v16 = vld [vmem:[#allocation86_spill] sm:$0xff] }
 0x248   : > { %18008 = vst [vmem:[#allocation80_spill] sm:$0xff] %v13187_v31  ;;  %v13189_v9 = vpop.f32.mrf.mxu2  ;;  %6343 = vperm.xlu0 %10933, %v12726_v34   ;;  %4190 = vperm.xlu2 %10840, %v11012_v44   ;;  %v13200_v58 = vpop.permute.xlu2 %4126  ;;  %v2142_v44 = vrot.slane %v2140_v38, 4  ;;  %v2925_v32 = vshll.u32 %v13195_v48, 16  ;;  %v3741_v0 = vrot.slane %v3739_v59, 4  ;;  %v18018_v41 = vrot.slane %v13191_v28, 7 }
 0x249   : > { %18009 = vst [vmem:[#allocation68_spill] sm:$0xff] %v13200_v58  ;;  %v1445_v31 = vsel %vm1396_vm2, %v18011_v5, %v1444_v39  ;;  %v18012_v58 = vrot.slane %v13181_v13, 1  ;;  %v2754_v52 = vsel %vm2725_vm4, %v18014_v23, %v2753_v21  ;;  %v2921_v47 = vshrl.u32 %v13093_v26, 16  ;;  %v18019_v23 = vld [vmem:[#allocation43_spill] sm:$0xff] }
 0x24a   : > { %v1517_v38 = vmul.f32 %v18015_v16, %v1445_v31  ;;  %v2756_v5 = vsel %vm2725_vm4, %v2753_v21, %v18018_v41  ;;  %v1253_v31 = vperm.slane %v18019_v23, %v11926_v33  ;;  %v13253_v26 = vld [vmem:[%s17554_s13 + $0x74] sm:$0xf]  ;;  %v3338_v41 = vpop.permute.xlu0 %3337 }
 0x24b   : > { %v1447_v29 = vsel %vm1396_vm2, %v1444_v39, %v18012_v58  ;;  %v13220_v43 = vpop.f32.mrf.mxu1  ;;  %v13235_v58 = vor.u32 %v2142_v44, %v2139_v11  ;;  %v13238_v39 = vrot.slane %v2925_v32, 1  ;;  %v2923_v11 = vor.u32 %v2921_v47, %v13143_v6  ;;  %v18021_v32 = vld [vmem:[#allocation82_spill] sm:$0xff] }
 0x24c   : > { %10841 = vset.pattern.permute.xlu1 %v17827_v8  ;;  %v13204_v34 = vpop.permute.xlu1 %2613  ;;  %18013 = vst [vmem:[#allocation101_spill] sm:$0xff] %v13220_v43  ;;  %v18020_v43 = vld [vmem:[#allocation45_spill] sm:$0xff]  ;;  %v2837_v44 = vmul.f32 %v17946_v63, %v2756_v5  ;;  %v1358_v47 = vunpack.c.l.bf16 %v1253_v31  ;;  %v3343_v23 = vperm.slane %v3338_v41, %v11926_v33 }
 0x24d   : > { %18010 = vst [vmem:[#allocation100_spill] sm:$0xff] %v13204_v34  ;;  %3417 = vperm.xlu1 %10841, %v13210_v12   ;;  %v1518_v34 = vmul.f32 %v18016_v14, %v1447_v29  ;;  %v1262_v21 = vperm.slane %v18020_v43, %v11926_v33  ;;  %v2144_v6 = vsel %vm2037_vm3, %v13141_v3, %v13235_v58 }
 0x24e   : > { %v2928_v5 = vsel %vm2876_vm5, %v2923_v11, %v13238_v39 }
 0x24f   : > { %v13227_v46 = vpop.f32.mrf.mxu3 }
 0x250   : > { %18017 = vst [vmem:[#allocation102_spill] sm:$0xff] %v13227_v46  ;;  %v13229_v59 = vpop.f32.mrf.mxu2  ;;  %6351 = vperm.xlu0 %10933, %v12873_v7   ;;  %10842 = vset.pattern.permute.xlu2 %v17827_v8  ;;  %v13245_v46 = vor.u32 %v3741_v0, %v3738_v45  ;;  %v2836_v7 = vmul.f32 %v11995_v1, %v2754_v52 }
 0x251   : > { %v13243_v29 = vpop.permute.xlu2 %3361  ;;  %3425 = vperm.xlu2 %10842, %v13253_v26   ;;  %v2507_v45 = vperm.slane %v18021_v32, %v11926_v33  ;;  %v1538_v0 = vpack.c.bf16 %v1518_v34, %v1517_v38  ;;  %v18023_v34 = vld [vmem:[#allocation71_spill] sm:$0xff]  ;;  %v11015_v32 = vld [vmem:[%s17554_s13 + $0x28] sm:$0xf] }
 0x252   : > { %v3743_v52 = vsel %vm2037_vm3, %v13150_v40, %v13245_v46  ;;  %v2515_v38 = vperm.slane %v18023_v34, %v11926_v33  ;;  %v13276_v40 = vunpack.c.l.bf16 %v1262_v21  ;;  %v13286_v63 = vpack.c.bf16 %v2837_v44, %v2836_v7  ;;  %v11016_v7 = vld [vmem:[%s17554_s13 + $0x2c] sm:$0xf] }
 0x253   : > { %v2677_v3 = vunpack.c.l.bf16 %v2507_v45  ;;  %v2146_v11 = vshrl.u32 %v1538_v0, 16  ;;  %v2149_v34 = vshll.u32 %v1538_v0, 16  ;;  %v1448_v21 = vrot.slane %v1358_v47, 1 }
 0x254   : > { %9898 = vmatmul.msk.bf16.gmra.mxu1 %vm1899_vm1, %v3743_v52  ;;  %v13291_v41 = vunpack.c.l.bf16 %v2515_v38  ;;  %v3468_v45 = vunpack.c.l.bf16 %v3343_v23  ;;  %v2933_v47 = vshll.u32 %v13286_v63, 16  ;;  %v18027_v38 = vld [vmem:[#allocation49_spill] sm:$0xff] }
 0x255   : > { %10843 = vset.pattern.permute.xlu1 %v17867_v4  ;;  %v13265_v43 = vpop.permute.xlu1 %4110  ;;  %9853 = vmatmul.msk.bf16.gmra.mxu2 %vm1899_vm1, %v2144_v6  ;;  %v13288_v6 = vpop.f32.mrf.mxu1  ;;  %v2148_v44 = vrot.slane %v2146_v11, 3  ;;  %v2151_v0 = vrot.slane %v2149_v34, 4  ;;  %v2929_v34 = vshrl.u32 %v13195_v48, 16 }
 0x256   : > { %18022 = vst [vmem:[#allocation43_spill] sm:$0xff] %v13265_v43  ;;  %9872 = vmatmul.msk.bf16.gmra.mxu3 %vm1899_vm1, %v2928_v5  ;;  %4632 = vperm.xlu1 %10843, %v11015_v32   ;;  %v1271_v43 = vperm.slane %v18027_v38, %v11926_v33  ;;  %v18028_v5 = vrot.slane %v13181_v13, 1  ;;  %v17653_v1 = vrot.slane %v13291_v41, 7  ;;  %v3549_v10 = vrot.slane %v3468_v45, 1 }
 0x257   : > { %v13282_v52 = vpop.f32.mrf.mxu3  ;;  %18025 = vst [vmem:[#allocation82_spill] sm:$0xff] %v13288_v6  ;;  %v13325_v45 = vor.u32 %v2151_v0, %v2148_v44  ;;  %v18037_v0 = vrot.slane %v13095_v19, 1 }
 0x258   : > { %18024 = vst [vmem:[#allocation45_spill] sm:$0xff] %v13282_v52  ;;  %v13284_v31 = vpop.f32.mrf.mxu2  ;;  %10940 = vset.pattern.permute.xlu0 %v17971_v60  ;;  %v2757_v52 = vrot.slane %v2677_v3, 7  ;;  %v1449_v23 = vsel %vm1396_vm2, %v18028_v5, %v1448_v21  ;;  %v18029_v3 = vrot.slane %v13276_v40, 1 }
 0x259   : > { %5586 = vperm.xlu0 %10940, %v13136_v50   ;;  %10844 = vset.pattern.permute.xlu2 %v17867_v4 }
 0x25a   : > { %v13296_v32 = vpop.permute.xlu2 %4560  ;;  %4640 = vperm.xlu2 %10844, %v11016_v7   ;;  %v1451_v6 = vsel %vm1396_vm2, %v1448_v21, %v18029_v3  ;;  %v18030_v7 = vrot.slane %v13191_v28, 7  ;;  %v2760_v5 = vsel %vm2725_vm4, %v2757_v52, %v17653_v1  ;;  %v13327_v3 = vrot.slane %v2933_v47, 1  ;;  %v18036_v1 = vld [vmem:[#allocation63_spill] sm:$0xff] }
 0x25b   : > { %18026 = vst [vmem:[#allocation71_spill] sm:$0xff] %v13296_v32  ;;  %v1520_v28 = vmul.f32 %v18034_v49, %v1451_v6  ;;  %v1280_v44 = vperm.slane %v18036_v1, %v11926_v33  ;;  %v3550_v47 = vsel %vm1396_vm2, %v18037_v0, %v3549_v10 }
 0x25c   : > { %v2758_v13 = vsel %vm2725_vm4, %v18030_v7, %v2757_v52  ;;  %v3367_v7 = vperm.slane %v13243_v29, %v11926_v33 }
 0x25d   : > { %v13331_v51 = vpop.f32.mrf.mxu1  ;;  %v2838_v6 = vmul.f32 %v17947_v42, %v2758_v13 }
 0x25e   : > { %v3346_v32 = vpop.permute.xlu1 %3345  ;;  %10846 = vset.pattern.permute.xlu1 %v17829_v61  ;;  %18035 = vst [vmem:[#allocation104_spill] sm:$0xff] %v13331_v51  ;;  %v2839_v51 = vmul.f32 %v17965_v62, %v2760_v5  ;;  %v13351_v1 = vunpack.c.l.bf16 %v3367_v7  ;;  %v13367_v5 = vunpack.c.l.bf16 %v1280_v44 }
 0x25f   : > { %v3351_v11 = vperm.slane %v3346_v32, %v11926_v33  ;;  %4214 = vperm.xlu1 %10846, %v13136_v50   ;;  %v13321_v38 = vpop.f32.mrf.mxu3  ;;  %v18033_v32 = vld [vmem:[#allocation87_spill] sm:$0xff]  ;;  %v2931_v50 = vor.u32 %v2929_v34, %v13238_v39  ;;  %v3628_v34 = vmul.f32 %v17966_v25, %v3550_v47 }
 0x260   : > { %18031 = vst [vmem:[#allocation49_spill] sm:$0xff] %v13321_v38  ;;  %v13323_v21 = vpop.f32.mrf.mxu2  ;;  %v1519_v48 = vmul.f32 %v18033_v32, %v1449_v23  ;;  %v13342_v38 = vunpack.c.l.bf16 %v1271_v43  ;;  %v13357_v43 = vld [vmem:[%s17554_s13 + $0x78] sm:$0xf]  ;;  %v13375_v0 = vpack.c.bf16 %v2839_v51, %v2838_v6 }
 0x261   : > { %18032 = vst [vmem:[#allocation103_spill] sm:$0xff] %v13323_v21  ;;  %v3469_v52 = vunpack.c.l.bf16 %v3351_v11  ;;  %5594 = vperm.xlu0 %10940, %v13210_v12   ;;  %v2936_v39 = vsel %vm2876_vm5, %v2931_v50, %v13327_v3 }
 0x262   : > { %10847 = vset.pattern.permute.xlu2 %v17827_v8  ;;  %v1539_v11 = vpack.c.bf16 %v1520_v28, %v1519_v48  ;;  %v2153_v8 = vsel %vm2037_vm3, %v13235_v58, %v13325_v45  ;;  %v18039_v48 = vld [vmem:[#allocation20_spill] sm:$0xff]  ;;  %v18040_v58 = vld [vmem:[#allocation25_spill] sm:$0xff]  ;;  %v2941_v62 = vshll.u32 %v13375_v0, 16 }
 0x263   : > { %v3551_v23 = vrot.slane %v3469_v52, 1  ;;  %v13347_v29 = vpop.permute.xlu2 %4142  ;;  %3433 = vperm.xlu2 %10847, %v13357_v43   ;;  %v2531_v28 = vperm.slane %v18039_v48, %v11926_v33  ;;  %v1452_v52 = vrot.slane %v13342_v38, 1  ;;  %v2523_v50 = vperm.slane %v18040_v58, %v11926_v33 }
 0x264   : > { %18038 = vst [vmem:[#allocation63_spill] sm:$0xff] %v13347_v29  ;;  %v2155_v38 = vshrl.u32 %v1539_v11, 16  ;;  %v2158_v48 = vshll.u32 %v1539_v11, 16 }
 0x265   : > { %v3552_v19 = vsel %vm1396_vm2, %v3549_v10, %v3551_v23  ;;  %9854 = vmatmul.msk.bf16.gmra.mxu2 %vm1899_vm1, %v2153_v8 }
 0x266   : > { %v3629_v13 = vmul.f32 %v17978_v2, %v3552_v19  ;;  %9873 = vmatmul.msk.bf16.gmra.mxu3 %vm1899_vm1, %v2936_v39  ;;  %v3354_v10 = vpop.permute.xlu1 %3353  ;;  %v2157_v58 = vrot.slane %v2155_v38, 3  ;;  %v2160_v42 = vrot.slane %v2158_v48, 4  ;;  %v18047_v48 = vrot.slane %v13367_v5, 1 }
 0x267   : > { %v3359_v7 = vperm.slane %v3354_v10, %v11926_v33  ;;  %10848 = vset.pattern.permute.xlu1 %v17867_v4  ;;  %v13378_v19 = vpop.f32.mrf.mxu3  ;;  %v11018_v10 = vld [vmem:[%s17554_s13 + $0x30] sm:$0xf] }
 0x268   : > { %v3652_v47 = vpack.c.bf16 %v3629_v13, %v3628_v34  ;;  %18041 = vst [vmem:[#allocation20_spill] sm:$0xff] %v13378_v19  ;;  %v13380_v39 = vpop.f32.mrf.mxu2  ;;  %4648 = vperm.xlu1 %10848, %v11018_v10   ;;  %v18043_v34 = vrot.slane %v13276_v40, 1  ;;  %v13391_v19 = vunpack.c.l.bf16 %v2531_v28  ;;  %v2679_v10 = vunpack.c.l.bf16 %v2523_v50 }
 0x269   : > { %18042 = vst [vmem:[#allocation25_spill] sm:$0xff] %v13380_v39  ;;  %v3470_v8 = vunpack.c.l.bf16 %v3359_v7  ;;  %10947 = vset.pattern.permute.xlu0 %v17937_v20  ;;  %v13393_v7 = vpop.f32.mrf.mxu1  ;;  %v18045_v40 = vrot.slane %v13351_v1, 1 }
 0x26a   : > { %v3745_v51 = vshrl.u32 %v3652_v47, 16  ;;  %v3748_v6 = vshll.u32 %v3652_v47, 16  ;;  %v1453_v13 = vsel %vm1396_vm2, %v18043_v34, %v1452_v52  ;;  %18044 = vst [vmem:[#allocation105_spill] sm:$0xff] %v13393_v7  ;;  %6961 = vperm.xlu0 %10947, %v13253_v26   ;;  %v3378_v7 = vpop.permute.xlu0 %3377 }
 0x26b   : > { %v3553_v44 = vrot.slane %v3470_v8, 1  ;;  %10849 = vset.pattern.permute.xlu2 %v17867_v4 }
 0x26c   : > { %v3747_v29 = vrot.slane %v3745_v51, 3  ;;  %v3750_v11 = vrot.slane %v3748_v6, 4  ;;  %v3370_v28 = vpop.permute.xlu2 %3369  ;;  %v11019_v51 = vld [vmem:[%s17554_s13 + $0x34] sm:$0xf] }
 0x26d   : > { %v3554_v47 = vsel %vm1396_vm2, %v3551_v23, %v3553_v44  ;;  %v3556_v34 = vsel %vm1396_vm2, %v3553_v44, %v18045_v40  ;;  %4656 = vperm.xlu2 %10849, %v11019_v51   ;;  %v3375_v23 = vperm.slane %v3370_v28, %v11926_v33  ;;  %v3383_v40 = vperm.slane %v3378_v7, %v11926_v33  ;;  %v18050_v51 = vld [vmem:[#allocation17_spill] sm:$0xff] }
 0x26e   : > { %v3630_v8 = vmul.f32 %v17979_v22, %v3554_v47  ;;  %v3631_v50 = vmul.f32 %v17997_v15, %v3556_v34  ;;  %v13408_v6 = vor.u32 %v3750_v11, %v3747_v29  ;;  %v1455_v47 = vsel %vm1396_vm2, %v1452_v52, %v18047_v48  ;;  %v18049_v11 = vld [vmem:[#allocation89_spill] sm:$0xff] }
 0x26f   : > { %v13412_v38 = vpop.permute.xlu1 %4552  ;;  %v2761_v34 = vrot.slane %v2679_v10, 7  ;;  %v13417_v49 = vpop.f32.mrf.mxu3  ;;  %v1521_v28 = vmul.f32 %v18049_v11, %v1453_v13  ;;  %v1522_v7 = vmul.f32 %v18050_v51, %v1455_v47  ;;  %v3472_v44 = vunpack.c.l.bf16 %v3375_v23 }
 0x270   : > { %18046 = vst [vmem:[#allocation106_spill] sm:$0xff] %v13412_v38  ;;  %v3653_v39 = vpack.c.bf16 %v3631_v50, %v3630_v8  ;;  %v13419_v21 = vpop.f32.mrf.mxu2  ;;  %v3752_v29 = vsel %vm2037_vm3, %v13245_v46, %v13408_v6  ;;  %10850 = vset.pattern.permute.xlu1 %v17829_v61  ;;  %v13428_v52 = vor.u32 %v2160_v42, %v2157_v58  ;;  %v2937_v10 = vshrl.u32 %v13286_v63, 16  ;;  %v18051_v50 = vld [vmem:[#allocation60_spill] sm:$0xff] }
 0x271   : > { %18048 = vst [vmem:[#allocation107_spill] sm:$0xff] %v13417_v49  ;;  %9899 = vmatmul.msk.bf16.gmra.mxu1 %vm1899_vm1, %v3752_v29  ;;  %4222 = vperm.xlu1 %10850, %v13210_v12   ;;  %v13432_v8 = vrot.slane %v2941_v62, 1  ;;  %v1298_v46 = vperm.slane %v18051_v50, %v11926_v33  ;;  %v18052_v13 = vrot.slane %v13391_v19, 7  ;;  %v13439_v23 = vunpack.c.l.bf16 %v3383_v40  ;;  %v13441_v47 = vpop.f32.mrf.mxu1  ;;  %v18053_v42 = vld [vmem:[#allocation72_spill] sm:$0xff] }
 0x272   : > { %6969 = vperm.xlu0 %10947, %v13357_v43   ;;  %v1289_v12 = vperm.slane %v18053_v42, %v11926_v33  ;;  %v2939_v63 = vor.u32 %v2937_v10, %v13327_v3  ;;  %v3754_v62 = vshrl.u32 %v3653_v39, 16  ;;  %v3757_v58 = vshll.u32 %v3653_v39, 16 }
 0x273   : > { %v2764_v48 = vsel %vm2725_vm4, %v2761_v34, %v18052_v13  ;;  %v18054_v29 = vrot.slane %v13291_v41, 7  ;;  %v1540_v49 = vpack.c.bf16 %v1522_v7, %v1521_v28  ;;  %v3557_v38 = vrot.slane %v3472_v44, 1  ;;  %v18057_v28 = vld [vmem:[#allocation40_spill] sm:$0xff] }
 0x274   : > { %v2162_v40 = vsel %vm2037_vm3, %v13325_v45, %v13428_v52  ;;  %v2841_v13 = vmul.f32 %v17978_v2, %v2764_v48  ;;  %v2944_v3 = vsel %vm2876_vm5, %v2939_v63, %v13432_v8  ;;  %v13460_v41 = vunpack.c.l.bf16 %v1298_v46 }
 0x275   : > { %v2762_v50 = vsel %vm2725_vm4, %v18054_v29, %v2761_v34  ;;  %10851 = vset.pattern.permute.xlu2 %v17829_v61  ;;  %9855 = vmatmul.msk.bf16.gmra.mxu2 %vm1899_vm1, %v2162_v40  ;;  %v13458_v39 = vpop.permute.xlu2 %4592  ;;  %v18056_v34 = vld [vmem:[#allocation26_spill] sm:$0xff]  ;;  %v2539_v7 = vperm.slane %v18057_v28, %v11926_v33  ;;  %v17657_v45 = vrot.slane %v13439_v23, 1  ;;  %v1362_v48 = vunpack.c.l.bf16 %v1289_v12 }
 0x276   : > { %18055 = vst [vmem:[#allocation60_spill] sm:$0xff] %v13458_v39  ;;  %v2547_v44 = vperm.slane %v18056_v34, %v11926_v33  ;;  %9874 = vmatmul.msk.bf16.gmra.mxu3 %vm1899_vm1, %v2944_v3  ;;  %4230 = vperm.xlu2 %10851, %v13253_v26   ;;  %v2840_v42 = vmul.f32 %v17966_v25, %v2762_v50  ;;  %v3756_v29 = vrot.slane %v3754_v62, 3  ;;  %v3759_v40 = vrot.slane %v3757_v58, 4 }
 0x277   : > { %v13469_v10 = vpop.permute.xlu1 %4576  ;;  %v13472_v63 = vpop.f32.mrf.mxu3  ;;  %v18060_v34 = vrot.slane %v13351_v1, 1  ;;  %v3560_v3 = vsel %vm1396_vm2, %v3557_v38, %v17657_v45  ;;  %v2164_v2 = vshrl.u32 %v1540_v49, 16  ;;  %v2167_v39 = vshll.u32 %v1540_v49, 16  ;;  %v11020_v1 = vld [vmem:[%s17554_s13 + $0x3c] sm:$0xf] }
 0x278   : > { %18058 = vst [vmem:[#allocation72_spill] sm:$0xff] %v13469_v10  ;;  %v13474_v46 = vpop.f32.mrf.mxu2  ;;  %v13482_v10 = vpack.c.bf16 %v2841_v13, %v2840_v42  ;;  %v13486_v50 = vunpack.c.l.bf16 %v2547_v44  ;;  %v2681_v62 = vunpack.c.l.bf16 %v2539_v7  ;;  %v1456_v58 = vrot.slane %v1362_v48, 1 }
 0x279   : > { %18059 = vst [vmem:[#allocation26_spill] sm:$0xff] %v13472_v63  ;;  %v3558_v28 = vsel %vm1396_vm2, %v18060_v34, %v3557_v38  ;;  %10852 = vset.pattern.permute.xlu1 %v17867_v4  ;;  %v3633_v49 = vmul.f32 %v18015_v16, %v3560_v3  ;;  %v13495_v13 = vor.u32 %v3759_v40, %v3756_v29  ;;  %v13497_v42 = vpop.f32.mrf.mxu1  ;;  %v2166_v44 = vrot.slane %v2164_v2, 3 }
 0x27a   : > { %10954 = vset.pattern.permute.xlu0 %v17953_v17  ;;  %4672 = vperm.xlu1 %10852, %v11020_v1   ;;  %v3632_v38 = vmul.f32 %v17998_v55, %v3558_v28  ;;  %18061 = vst [vmem:[#allocation40_spill] sm:$0xff] %v13497_v42  ;;  %v2169_v7 = vrot.slane %v2167_v39, 4  ;;  %v2949_v34 = vshll.u32 %v13482_v10, 16  ;;  %v2765_v12 = vrot.slane %v2681_v62, 7 }
 0x27b   : > { %6407 = vperm.xlu0 %10954, %v13253_v26   ;;  %v18063_v28 = vrot.slane %v13367_v5, 1  ;;  %v18064_v26 = vrot.slane %v13460_v41, 1  ;;  %v3761_v62 = vsel %vm2037_vm3, %v13408_v6, %v13495_v13 }
 0x27c   : > { %v3654_v40 = vpack.c.bf16 %v3633_v49, %v3632_v38  ;;  %v2951_v38 = vrot.slane %v2949_v34, 1  ;;  %v18067_v49 = vrot.slane %v13391_v19, 7 }
 0x27d   : > { %v1457_v3 = vsel %vm1396_vm2, %v18063_v28, %v1456_v58  ;;  %v1459_v29 = vsel %vm1396_vm2, %v1456_v58, %v18064_v26  ;;  %v13522_v28 = vor.u32 %v2169_v7, %v2166_v44  ;;  %v2945_v58 = vshrl.u32 %v13375_v0, 16 }
 0x27e   : > { %4238 = vperm.xlu2 %10851, %v13357_v43   ;;  %v13502_v48 = vpop.permute.xlu2 %4166  ;;  %v18066_v43 = vld [vmem:[#allocation90_spill] sm:$0xff]  ;;  %v1524_v45 = vmul.f32 %v12661_v57, %v1459_v29  ;;  %v2766_v26 = vsel %vm2725_vm4, %v18067_v49, %v2765_v12  ;;  %v3763_v7 = vshrl.u32 %v3654_v40, 16  ;;  %v3766_v0 = vshll.u32 %v3654_v40, 16  ;;  %v13553_v40 = vld [vmem:[%s17554_s13] sm:$0xf] }
 0x27f   : > { %18062 = vst [vmem:[#allocation108_spill] sm:$0xff] %v13502_v48  ;;  %v13512_v39 = vpop.f32.mrf.mxu3  ;;  %v1523_v1 = vmul.f32 %v18066_v43, %v1457_v3  ;;  %v11021_v3 = vld [vmem:[%s17554_s13 + $0x7c] sm:$0xf]  ;;  %v2947_v44 = vor.u32 %v2945_v58, %v13432_v8  ;;  %v2555_v8 = vperm.slane %v12739_v36, %v11926_v33  ;;  %v18070_v58 = vld [vmem:[#allocation29_spill] sm:$0xff] }
 0x280   : > { %v13510_v2 = vpop.permute.xlu1 %4150  ;;  %18065 = vst [vmem:[#allocation109_spill] sm:$0xff] %v13512_v39  ;;  %v13519_v5 = vpop.f32.mrf.mxu2  ;;  %v18068_v39 = vrot.slane %v13486_v50, 7  ;;  %v2563_v49 = vperm.slane %v18070_v58, %v11926_v33 }
 0x281   : > { %9900 = vmatmul.msk.bf16.gmra.mxu1 %vm1899_vm1, %v3761_v62  ;;  %v1541_v19 = vpack.c.bf16 %v1524_v45, %v1523_v1  ;;  %v13537_v34 = vpop.f32.mrf.mxu1  ;;  %v18069_v45 = vmov 1   ;;  %v3765_v62 = vrot.slane %v3763_v7, 3  ;;  %v3768_v1 = vrot.slane %v3766_v0, 4 }
 0x282   : > { %v2768_v6 = vsel %vm2725_vm4, %v2765_v12, %v18068_v39  ;;  %10853 = vset.pattern.permute.xlu1 %v17829_v61  ;;  %v2171_v12 = vsel %vm2037_vm3, %v13428_v52, %v13522_v28  ;;  %v2842_v61 = vmul.f32 %v17979_v22, %v2766_v26  ;;  %v2952_v39 = vsel %vm2876_vm5, %v2947_v44, %v2951_v38 }
 0x283   : > { %4246 = vperm.xlu1 %10853, %v11021_v3   ;;  %10956 = vset.pattern.permute.xlu0 %v17937_v20  ;;  %v2843_v29 = vmul.f32 %v17997_v15, %v2768_v6  ;;  %v2173_v6 = vshrl.u32 %v1541_v19, 16  ;;  %v2176_v3 = vshll.u32 %v1541_v19, 16  ;;  %v13571_v7 = vunpack.c.l.bf16 %v2563_v49  ;;  %v3386_v19 = vpop.permute.xlu0 %3385  ;;  %v13589_v49 = vld [vmem:[%s17554_s13 + $0x4] sm:$0xf] }
 0x285   : > { %9856 = vmatmul.msk.bf16.gmra.mxu2 %vm1899_vm1, %v2171_v12  ;;  %v13564_v44 = vpack.c.bf16 %v2843_v29, %v2842_v61  ;;  %v2175_v0 = vrot.slane %v2173_v6, 3  ;;  %v2178_v58 = vrot.slane %v2176_v3, 4  ;;  %v17659_v29 = vrot.slane %v13571_v7, 7 }
 0x286   : > { %9875 = vmatmul.msk.bf16.gmra.mxu3 %vm1899_vm1, %v2952_v39  ;;  %10854 = vset.pattern.permute.xlu2 %v18069_v45  ;;  %v2683_v39 = vunpack.c.l.bf16 %v2555_v8  ;;  %v13569_v45 = vor.u32 %v3768_v1, %v3765_v62  ;;  %v18073_v8 = vunpack.c.l.bf16 %v12633_v37  ;;  %v18074_v62 = vrot.slane %v13460_v41, 1 }
 0x287   : > { %1548 = vperm.xlu2 %10854, %v13553_v40   ;;  %v13556_v52 = vpop.permute.xlu2 %4600  ;;  %v13562_v36 = vpop.f32.mrf.mxu3  ;;  %v2957_v63 = vshll.u32 %v13564_v44, 16  ;;  %v2953_v37 = vshrl.u32 %v13482_v10, 16 }
 0x288   : > { %v13560_v26 = vpop.f32.mrf.mxu2  ;;  %18071 = vst [vmem:[#allocation29_spill] sm:$0xff] %v13562_v36  ;;  %v2769_v36 = vrot.slane %v2683_v39, 7  ;;  %v3770_v61 = vsel %vm2037_vm3, %v13495_v13, %v13569_v45  ;;  %v1525_v1 = vmul.f32 %v18074_v62, %v18073_v8  ;;  %v13597_v13 = vor.u32 %v2178_v58, %v2175_v0 }
 0x289   : > { %v13566_v12 = vpop.permute.xlu1 %4584  ;;  %v13575_v42 = vpop.f32.mrf.mxu1  ;;  %v13602_v41 = vrot.slane %v2957_v63, 1  ;;  %v18076_v8 = vrot.slane %v13486_v50, 7  ;;  %v2955_v0 = vor.u32 %v2953_v37, %v2951_v38  ;;  %v10237_v38 = vld [vmem:[%s17825_s4 + $0x48] sm:$0xff] }
 0x28a   : > { %18072 = vst [vmem:[#allocation110_spill] sm:$0xff] %v13575_v42  ;;  %v2772_v42 = vsel %vm2725_vm4, %v2769_v36, %v17659_v29  ;;  %v1542_v58 = vpack.c.bf16 %v1525_v1, %v1525_v1  ;;  %v2180_v10 = vsel %vm2037_vm3, %v13522_v28, %v13597_v13  ;;  %4403 = vmatpush.bf16.msra.mxu2 %v10237_v38 }
 0x28b   : > { %10857 = vset.pattern.permute.xlu1 %v17937_v20  ;;  %v2770_v62 = vsel %vm2725_vm4, %v18076_v8, %v2769_v36  ;;  %v2845_v50 = vmul.f32 %v18015_v16, %v2772_v42  ;;  %v2960_v36 = vsel %vm2876_vm5, %v2955_v0, %v13602_v41  ;;  %v2571_v28 = vperm.slane %v12731_v27, %v11926_v33  ;;  %v10236_v27 = vld [vmem:[%s17825_s4 + $0x40] sm:$0xff] }
 0x28c   : > { %6729 = vperm.xlu1 %10857, %v13553_v40   ;;  %v2844_v63 = vmul.f32 %v17998_v55, %v2770_v62  ;;  %v2265_v42 = vadd.f32 %v13189_v9, %v12796_v54  ;;  %v2182_v8 = vshrl.u32 %v1542_v58, 16  ;;  %v2185_v62 = vshll.u32 %v1542_v58, 16 }
 0x28d   : > { %v2685_v58 = vunpack.c.l.bf16 %v2571_v28 }
 0x28e   : > { %v13636_v0 = vpack.c.bf16 %v2845_v50, %v2844_v63  ;;  %4404 = vmatpush.bf16.msra.mxu2 %v10236_v27  ;;  %v2184_v63 = vrot.slane %v2182_v8, 3  ;;  %v2187_v50 = vrot.slane %v2185_v62, 4 }
 0x28f   : > { %10858 = vset.pattern.permute.xlu2 %v17937_v20  ;;  %v13594_v3 = vpop.f32.mrf.mxu3  ;;  %v2773_v62 = vrot.slane %v2685_v58, 7 }
 0x290   : > { %6737 = vperm.xlu2 %10858, %v13589_v49   ;;  %v13592_v6 = vpop.f32.mrf.mxu2  ;;  %18075 = vst [vmem:[#allocation111_spill] sm:$0xff] %v13594_v3  ;;  %v13610_v15 = vpop.permute.xlu2 %4182  ;;  %v2188_v27 = vor.u32 %v2187_v50, %v2184_v63  ;;  %v18084_v50 = vrot.slane %v13571_v7, 7 }
 0x291   : > { %9901 = vmatmul.msk.bf16.gmra.mxu1 %vm1899_vm1, %v3770_v61  ;;  %18077 = vst [vmem:[#allocation112_spill] sm:$0xff] %v13610_v15  ;;  %v3391_v61 = vperm.slane %v3386_v19, %v11926_v33  ;;  %v13631_v1 = vpop.f32.mrf.mxu1 }
 0x292   : > { %v13599_v39 = vpop.permute.xlu1 %4158 }
 0x293   : > { %v3474_v19 = vunpack.c.l.bf16 %v3391_v61  ;;  %v18078_v61 = vld [vmem:[#allocation34_spill] sm:$0xff] }
 0x294   : > { %10859 = vset.pattern.permute.xlu1 %v17971_v60  ;;  %v2579_v54 = vperm.slane %v18078_v61, %v11926_v33  ;;  %v11024_v61 = vld [vmem:[%s17554_s13 + $0xc] sm:$0xf] }
 0x295   : > { %5370 = vperm.xlu1 %10859, %v13553_v40   ;;  %9857 = vmatmul.msk.bf16.gmra.mxu2 %vm1899_vm1, %v2180_v10  ;;  %v3561_v29 = vrot.slane %v3474_v19, 1  ;;  %v18080_v19 = vrot.slane %v13439_v23, 1  ;;  %v2961_v23 = vshrl.u32 %v13564_v44, 16 }
 0x296   : > { %9876 = vmatmul.msk.bf16.gmra.mxu3 %vm1899_vm1, %v2960_v36 }
 0x297   : > { %v3083_v10 = vpop.f32.mrf.mxu3  ;;  %v3562_v28 = vsel %vm1396_vm2, %v18080_v19, %v3561_v29  ;;  %v2963_v63 = vor.u32 %v2961_v23, %v13602_v41  ;;  %v2587_v41 = vperm.slane %v12658_v56, %v11926_v33 }
 0x298   : > { %10860 = vset.pattern.permute.xlu2 %v17971_v60  ;;  %v13634_v37 = vpop.f32.mrf.mxu2  ;;  %v3160_v9 = vadd.f32 %v3083_v10, %v2265_v42  ;;  %v2965_v42 = vshll.u32 %v13636_v0, 16  ;;  %v13656_v10 = vunpack.c.l.bf16 %v2579_v54  ;;  %v3634_v58 = vmul.f32 %v18016_v14, %v3562_v28 }
 0x299   : > { %5378 = vperm.xlu2 %10860, %v13589_v49   ;;  %v13644_v36 = vpop.permute.xlu2 %3409  ;;  %v13675_v55 = vpop.f32.mrf.mxu1 }
 0x29a   : > { %v13648_v16 = vadd.f32 %v13441_v47, %v3160_v9  ;;  %v2267_v47 = vadd.f32 %v13229_v59, %v12837_v30  ;;  %v13671_v54 = vrot.slane %v2965_v42, 1  ;;  %v17663_v19 = vrot.slane %v13656_v10, 7  ;;  %18081 = vst [vmem:[#allocation113_spill] sm:$0xff] %v13675_v55 }
 0x29b   : > { %v3394_v38 = vpop.permute.xlu1 %3393  ;;  %v2774_v42 = vsel %vm2725_vm4, %v18084_v50, %v2773_v62 }
 0x29c   : > { %v3399_v3 = vperm.slane %v3394_v38, %v11926_v33  ;;  %18079 = vst [vmem:[#allocation34_spill] sm:$0xff] %v13648_v16  ;;  %v2776_v28 = vsel %vm2725_vm4, %v2773_v62, %v17663_v19  ;;  %v2968_v7 = vsel %vm2876_vm5, %v2963_v63, %v13671_v54  ;;  %v18086_v62 = vld [vmem:[#allocation16_spill] sm:$0xff]  ;;  %v2270_v63 = vadd.f32 %v13284_v31, %v12901_v53  ;;  %v11026_v31 = vld [vmem:[%s17554_s13 + $0x40] sm:$0xf] }
 0x29d   : > { %5394 = vperm.xlu1 %10859, %v11024_v61   ;;  %v4004_v23 = vperm.slane %v18086_v62, %v11926_v33  ;;  %v2687_v19 = vunpack.c.l.bf16 %v2587_v41 }
 0x29e   : > { %v13650_v15 = vunpack.c.l.bf16 %v3399_v3 }
 0x29f   : > { %v3085_v38 = vpop.f32.mrf.mxu3 }
 0x2a0   : > { %v17662_v8 = vrot.slane %v13650_v15, 1  ;;  %v13664_v3 = vpop.f32.mrf.mxu2  ;;  %v13678_v59 = vadd.f32 %v3085_v38, %v2267_v47  ;;  %v2189_v38 = vsel %vm2037_vm3, %v13597_v13, %v2188_v27 }
 0x2a1   : > { %10861 = vset.pattern.permute.xlu2 %v17937_v20  ;;  %v13722_v55 = vpop.f32.mrf.mxu1 }
 0x2a2   : > { %v3564_v9 = vsel %vm1396_vm2, %v3561_v29, %v17662_v8  ;;  %18082 = vst [vmem:[#allocation114_spill] sm:$0xff] %v13678_v59  ;;  %v13683_v29 = vld [vmem:[%s17554_s13 + $0x8] sm:$0xf]  ;;  %v2595_v8 = vperm.slane %v12995_v18, %v11926_v33  ;;  %v2846_v18 = vmul.f32 %v18016_v14, %v2774_v42  ;;  %v4253_v42 = vunpack.c.l.bf16 %v4004_v23 }
 0x2a3   : > { %v3635_v30 = vmul.f32 %v18033_v32, %v3564_v9  ;;  %6745 = vperm.xlu2 %10861, %v13683_v29   ;;  %v13695_v9 = vpop.permute.xlu2 %4190 }
 0x2a4   : > { %v13686_v44 = vpop.permute.xlu1 %4174  ;;  %18085 = vst [vmem:[#allocation116_spill] sm:$0xff] %v13695_v9 }
 0x2a5   : > { %18083 = vst [vmem:[#allocation115_spill] sm:$0xff] %v13686_v44  ;;  %v3655_v47 = vpack.c.bf16 %v3635_v30, %v3634_v58  ;;  %10862 = vset.pattern.permute.xlu1 %v17937_v20  ;;  %9858 = vmatmul.msk.bf16.gmra.mxu2 %vm1899_vm1, %v2189_v38  ;;  %v2847_v58 = vmul.f32 %v18033_v32, %v2776_v28  ;;  %v18087_v38 = vld [vmem:[#allocation22_spill] sm:$0xff] }
 0x2a6   : > { %9877 = vmatmul.msk.bf16.gmra.mxu3 %vm1899_vm1, %v2968_v7  ;;  %6753 = vperm.xlu1 %10862, %v11024_v61   ;;  %v3415_v30 = vperm.slane %v13644_v36, %v11926_v33  ;;  %v4012_v62 = vperm.slane %v18087_v38, %v11926_v33  ;;  %v13720_v7 = vunpack.c.l.bf16 %v2595_v8  ;;  %v4285_v38 = vmul.f32 %v12175_v24, %v4253_v42  ;;  %v18090_v42 = vld [vmem:[#allocation51_spill] sm:$0xff] }
 0x2a7   : > { %v3772_v13 = vshrl.u32 %v3655_v47, 16  ;;  %v3775_v27 = vshll.u32 %v3655_v47, 16  ;;  %v3088_v61 = vpop.f32.mrf.mxu3  ;;  %v13725_v36 = vpack.c.bf16 %v2847_v58, %v2846_v18 }
 0x2a8   : > { %v13716_v50 = vpop.f32.mrf.mxu2  ;;  %v3162_v28 = vadd.f32 %v3088_v61, %v2270_v63  ;;  %v13727_v53 = vunpack.c.l.bf16 %v3415_v30  ;;  %v4254_v23 = vunpack.c.l.bf16 %v4012_v62  ;;  %v17665_v63 = vrot.slane %v13720_v7, 7 }
 0x2a9   : > { %v3774_v56 = vrot.slane %v3772_v13, 3  ;;  %v3777_v47 = vrot.slane %v3775_v27, 4  ;;  %v2777_v30 = vrot.slane %v2687_v19, 7  ;;  %v2969_v62 = vshrl.u32 %v13636_v0, 16 }
 0x2aa   : > { %v13737_v41 = vadd.f32 %v13537_v34, %v3162_v28  ;;  %v2973_v61 = vshll.u32 %v13725_v36, 16  ;;  %v18091_v0 = vrot.slane %v13656_v10, 7  ;;  %v13777_v10 = vpop.f32.mrf.mxu1 }
 0x2ab   : > { %10863 = vset.pattern.permute.xlu2 %v17867_v4  ;;  %v13732_v8 = vor.u32 %v3777_v47, %v3774_v56  ;;  %v13734_v27 = vpop.permute.xlu2 %3425  ;;  %v13751_v47 = vpop.permute.xlu0 %3441 }
 0x2ac   : > { %4680 = vperm.xlu2 %10863, %v11026_v31   ;;  %18088 = vst [vmem:[#allocation16_spill] sm:$0xff] %v13737_v41  ;;  %v4286_v31 = vmul.f32 %v18090_v42, %v4254_v23  ;;  %v2778_v56 = vsel %vm2725_vm4, %v18091_v0, %v2777_v30  ;;  %v18094_v23 = vrot.slane %v13727_v53, 1 }
 0x2ad   : > { %v3402_v13 = vpop.permute.xlu1 %3401  ;;  %v3779_v58 = vsel %vm2037_vm3, %v13569_v45, %v13732_v8  ;;  %v18089_v45 = vld [vmem:[#allocation103_spill] sm:$0xff] }
 0x2ae   : > { %v3407_v18 = vperm.slane %v3402_v13, %v11926_v33  ;;  %10864 = vset.pattern.permute.xlu1 %v17953_v17  ;;  %9902 = vmatmul.msk.bf16.gmra.mxu1 %vm1899_vm1, %v3779_v58  ;;  %v2272_v19 = vadd.f32 %v18089_v45, %v12957_v35  ;;  %v2780_v13 = vsel %vm2725_vm4, %v2777_v30, %v17665_v63  ;;  %v18093_v35 = vrot.slane %v13650_v15, 1  ;;  %v18096_v30 = vld [vmem:[#allocation23_spill] sm:$0xff]  ;;  %v18097_v15 = vld [vmem:[#allocation65_spill] sm:$0xff] }
 0x2af   : > { %6175 = vperm.xlu1 %10864, %v13553_v40   ;;  %v3090_v58 = vpop.f32.mrf.mxu3  ;;  %v2971_v40 = vor.u32 %v2969_v62, %v13671_v54  ;;  %v4317_v9 = vpack.c.bf16 %v4286_v31, %v4285_v38  ;;  %v2849_v54 = vmul.f32 %v18049_v11, %v2780_v13  ;;  %18095 = vst [vmem:[#allocation103_spill] sm:$0xff] %v13777_v10  ;;  %v18098_v13 = vld [vmem:[#allocation69_spill] sm:$0xff] }
 0x2b0   : > { %v3476_v34 = vunpack.c.l.bf16 %v3407_v18  ;;  %v13755_v28 = vpop.f32.mrf.mxu2  ;;  %v13765_v32 = vadd.f32 %v3090_v58, %v2272_v19  ;;  %v2603_v19 = vperm.slane %v18097_v15, %v11926_v33  ;;  %v2611_v58 = vperm.slane %v18098_v13, %v11926_v33  ;;  %v13805_v15 = vld [vmem:[%s17554_s13 + $0x10] sm:$0xf] }
 0x2b1   : > { %v2848_v0 = vmul.f32 %v18096_v30, %v2778_v56 }
 0x2b2   : > { %v3565_v18 = vrot.slane %v3476_v34, 1  ;;  %18092 = vst [vmem:[#allocation22_spill] sm:$0xff] %v13765_v32  ;;  %v13774_v34 = vrot.slane %v2973_v61, 1  ;;  %v13823_v32 = vpop.f32.mrf.mxu1 }
 0x2b4   : > { %v3566_v45 = vsel %vm1396_vm2, %v18093_v35, %v3565_v18  ;;  %v3568_v42 = vsel %vm1396_vm2, %v3565_v18, %v18094_v23  ;;  %10865 = vset.pattern.permute.xlu2 %v17953_v17  ;;  %v2976_v31 = vsel %vm2876_vm5, %v2971_v40, %v13774_v34  ;;  %v13787_v61 = vpop.permute.xlu2 %4640  ;;  %v13798_v40 = vpack.c.bf16 %v2849_v54, %v2848_v0  ;;  %v18101_v23 = vld [vmem:[#allocation25_spill] sm:$0xff]  ;;  %v18102_v0 = vld [vmem:[#allocation75_spill] sm:$0xff] }
 0x2b5   : > { %v3636_v62 = vmul.f32 %v18096_v30, %v3566_v45  ;;  %v3637_v38 = vmul.f32 %v18049_v11, %v3568_v42  ;;  %6183 = vperm.xlu2 %10865, %v13589_v49   ;;  %9915 = vmatmul.msk.bf16.vlgmr.msra.gmra.mxu2 %vm1899_vm1, %v4317_v9  ;;  %v18099_v49 = vld [vmem:[#allocation18_spill] sm:$0xff]  ;;  %v18100_v9 = vld [vmem:[#allocation39_spill] sm:$0xff] }
 0x2b6   : > { %v13789_v18 = vpop.permute.xlu1 %4624  ;;  %9878 = vmatmul.msk.bf16.gmra.mxu3 %vm1899_vm1, %v2976_v31  ;;  %v4020_v45 = vperm.slane %v18099_v49, %v11926_v33  ;;  %v2275_v42 = vadd.f32 %v18101_v23, %v18100_v9  ;;  %v3431_v31 = vperm.slane %v13734_v27, %v11926_v33  ;;  %v4028_v49 = vperm.slane %v18102_v0, %v11926_v33  ;;  %v13814_v9 = vpop.permute.xlu0 %1556 }
 0x2b7   : > { %v3656_v35 = vpack.c.bf16 %v3637_v38, %v3636_v62  ;;  %10866 = vset.pattern.permute.xlu1 %v17971_v60  ;;  %v2689_v38 = vunpack.c.l.bf16 %v2603_v19  ;;  %v3093_v13 = vpop.f32.mrf.mxu3  ;;  %v13816_v23 = vunpack.c.l.bf16 %v2611_v58  ;;  %v2981_v19 = vshll.u32 %v13798_v40, 16  ;;  %v13828_v58 = vld [vmem:[%s17554_s13 + $0x14] sm:$0xf] }
 0x2b8   : > { %5402 = vperm.xlu1 %10866, %v13805_v15   ;;  %v13808_v56 = vpop.f32.mrf.mxu2  ;;  %v3164_v63 = vadd.f32 %v3093_v13, %v2275_v42  ;;  %v4255_v10 = vunpack.c.l.bf16 %v4020_v45  ;;  %v4256_v42 = vunpack.c.l.bf16 %v4028_v49 }
 0x2b9   : > { %v3781_v62 = vshrl.u32 %v3656_v35, 16  ;;  %v3784_v54 = vshll.u32 %v3656_v35, 16  ;;  %v2781_v27 = vrot.slane %v2689_v38, 7  ;;  %v3479_v35 = vunpack.c.l.bf16 %v3431_v31 }
 0x2ba   : > { %v13821_v14 = vadd.f32 %v13631_v1, %v3164_v63  ;;  %v18104_v1 = vld [vmem:[#allocation52_spill] sm:$0xff]  ;;  %v3447_v38 = vperm.slane %v13751_v47, %v11926_v33  ;;  %v13848_v49 = vrot.slane %v2981_v19, 1  ;;  %v18106_v47 = vrot.slane %v13720_v7, 7 }
 0x2bb   : > { %v3783_v11 = vrot.slane %v3781_v62, 3  ;;  %v3786_v30 = vrot.slane %v3784_v54, 4  ;;  %v4287_v63 = vmul.f32 %v18104_v1, %v4255_v10  ;;  %v2977_v10 = vshrl.u32 %v13725_v36, 16 }
 0x2bc   : > { %18103 = vst [vmem:[#allocation51_spill] sm:$0xff] %v13821_v14  ;;  %v18105_v14 = vld [vmem:[#allocation78_spill] sm:$0xff]  ;;  %v13862_v59 = vunpack.c.l.bf16 %v3447_v38 }
 0x2bd   : > { %10867 = vset.pattern.permute.xlu2 %v17971_v60  ;;  %v13831_v45 = vor.u32 %v3786_v30, %v3783_v11  ;;  %v3434_v13 = vpop.permute.xlu2 %3433  ;;  %v2277_v41 = vadd.f32 %v13419_v21, %v18105_v14  ;;  %v18107_v21 = vld [vmem:[#allocation58_spill] sm:$0xff]  ;;  %v2979_v7 = vor.u32 %v2977_v10, %v13774_v34 }
 0x2be   : > { %5410 = vperm.xlu2 %10867, %v13828_v58   ;;  %v3439_v31 = vperm.slane %v3434_v13, %v11926_v33  ;;  %v2782_v13 = vsel %vm2725_vm4, %v18106_v47, %v2781_v27  ;;  %v4288_v44 = vmul.f32 %v18107_v21, %v4256_v42 }
 0x2bf   : > { %v3418_v54 = vpop.permute.xlu1 %3417  ;;  %v3788_v30 = vsel %vm2037_vm3, %v13732_v8, %v13831_v45  ;;  %v3095_v14 = vpop.f32.mrf.mxu3  ;;  %v18108_v8 = vrot.slane %v13816_v23, 7  ;;  %v2984_v47 = vsel %vm2876_vm5, %v2979_v7, %v13848_v49  ;;  %v18114_v7 = vld [vmem:[#allocation93_spill] sm:$0xff] }
 0x2c0   : > { %v3423_v0 = vperm.slane %v3418_v54, %v11926_v33  ;;  %10869 = vset.pattern.permute.xlu1 %v17937_v20  ;;  %v13842_v11 = vpop.f32.mrf.mxu2  ;;  %v3571_v54 = vrot.slane %v3479_v35, 1  ;;  %v3480_v1 = vunpack.c.l.bf16 %v3439_v31  ;;  %9903 = vmatmul.msk.bf16.gmra.mxu1 %vm1899_vm1, %v3788_v30  ;;  %v13859_v19 = vadd.f32 %v3095_v14, %v2277_v41  ;;  %v13883_v14 = vpop.f32.mrf.mxu1 }
 0x2c1   : > { %6769 = vperm.xlu1 %10869, %v13828_v58   ;;  %v2784_v36 = vsel %vm2725_vm4, %v2781_v27, %v18108_v8  ;;  %v4318_v31 = vpack.c.bf16 %v4288_v44, %v4287_v63  ;;  %v2850_v30 = vmul.f32 %v18050_v51, %v2782_v13  ;;  %v18110_v27 = vrot.slane %v13727_v53, 1  ;;  %v18111_v44 = vld [vmem:[#allocation100_spill] sm:$0xff]  ;;  %v18112_v53 = vld [vmem:[#allocation41_spill] sm:$0xff]  ;;  %18113 = vst [vmem:[#allocation69_spill] sm:$0xff] %v13883_v14  ;;  %v11029_v8 = vld [vmem:[%s17554_s13 + $0x48] sm:$0xf] }
 0x2c2   : > { %v3478_v62 = vunpack.c.l.bf16 %v3423_v0  ;;  %18109 = vst [vmem:[#allocation65_spill] sm:$0xff] %v13859_v19  ;;  %v13864_v0 = vpop.permute.xlu0 %4608  ;;  %v2851_v42 = vmul.f32 %v18066_v43, %v2784_v36  ;;  %v3573_v21 = vrot.slane %v3480_v1, 1  ;;  %v2619_v63 = vperm.slane %v18111_v44, %v11926_v33 }
 0x2c3   : > { %v2627_v1 = vperm.slane %v18112_v53, %v11926_v33 }
 0x2c4   : > { %v3569_v35 = vrot.slane %v3478_v62, 1  ;;  %v2370_v62 = vld [vmem:[#allocation2 + $0x80] sm:$0xf]  ;;  %v13899_v53 = vpack.c.bf16 %v2851_v42, %v2850_v30  ;;  %v3574_v13 = vsel %vm1396_vm2, %v3571_v54, %v3573_v21 }
 0x2c5   : > { %9916 = vmatmul.msk.bf16.gmra.mxu2 %vm1899_vm1, %v4318_v31  ;;  %v13901_v31 = vunpack.c.l.bf16 %v2370_v62  ;;  %v18118_v62 = vld [vmem:[#allocation81_spill] sm:$0xff] }
 0x2c6   : > { %v3570_v41 = vsel %vm1396_vm2, %v18110_v27, %v3569_v35  ;;  %v3572_v34 = vsel %vm1396_vm2, %v3569_v35, %v3571_v54  ;;  %10870 = vset.pattern.permute.xlu2 %v17867_v4  ;;  %9879 = vmatmul.msk.bf16.gmra.mxu3 %vm1899_vm1, %v2984_v47  ;;  %v4044_v35 = vperm.slane %v18114_v7, %v11926_v33  ;;  %v18115_v47 = vld [vmem:[#allocation96_spill] sm:$0xff]  ;;  %v2691_v7 = vunpack.c.l.bf16 %v2619_v63 }
 0x2c7   : > { %v3638_v38 = vmul.f32 %v18050_v51, %v3570_v41  ;;  %v3639_v10 = vmul.f32 %v18066_v43, %v3572_v34  ;;  %4696 = vperm.xlu2 %10870, %v11029_v8   ;;  %v13889_v36 = vpop.permute.xlu2 %4656  ;;  %v2280_v27 = vadd.f32 %v13474_v46, %v18115_v47  ;;  %18116 = vst [vmem:[#allocation18_spill] sm:$0xff] %v13901_v31  ;;  %v18117_v8 = vrot.slane %v13862_v59, 1 }
 0x2c8   : > { %v13895_v34 = vpop.permute.xlu1 %4632  ;;  %v13897_v44 = vpop.f32.mrf.mxu2  ;;  %v13913_v54 = vunpack.c.l.bf16 %v2627_v1  ;;  %v3640_v47 = vmul.f32 %v12661_v57, %v3574_v13  ;;  %v4258_v63 = vunpack.c.l.bf16 %v4044_v35 }
 0x2c9   : > { %v3657_v41 = vpack.c.bf16 %v3639_v10, %v3638_v38  ;;  %v3576_v14 = vsel %vm1396_vm2, %v3573_v21, %v18117_v8  ;;  %v3098_v43 = vpop.f32.mrf.mxu3  ;;  %10871 = vset.pattern.permute.xlu1 %v17867_v4  ;;  %v11030_v38 = vld [vmem:[%s17554_s13 + $0x4c] sm:$0xf]  ;;  %v4036_v10 = vperm.slane %v18118_v62, %v11926_v33  ;;  %v13925_v1 = vpop.f32.mrf.mxu1 }
 0x2ca   : > { %v3166_v46 = vadd.f32 %v3098_v43, %v2280_v27  ;;  %4704 = vperm.xlu1 %10871, %v11030_v38   ;;  %v3641_v21 = vmul.f32 %v3576_v14, %v13901_v31  ;;  %v2989_v43 = vshll.u32 %v13899_v53, 16  ;;  %v13921_v38 = vpop.permute.xlu0 %4616  ;;  %v17671_v13 = vrot.slane %v13913_v54, 7  ;;  %v18120_v14 = vld [vmem:[#allocation44_spill] sm:$0xff] }
 0x2cb   : > { %v3790_v30 = vshrl.u32 %v3657_v41, 16  ;;  %v3793_v42 = vshll.u32 %v3657_v41, 16  ;;  %v2785_v41 = vrot.slane %v2691_v7, 7  ;;  %v4257_v62 = vunpack.c.l.bf16 %v4036_v10  ;;  %v18122_v7 = vld [vmem:[#allocation66_spill] sm:$0xff] }
 0x2cc   : > { %v13919_v27 = vadd.f32 %v13722_v55, %v3166_v46  ;;  %v2282_v35 = vadd.f32 %v13519_v5, %v18120_v14  ;;  %v2985_v5 = vshrl.u32 %v13798_v40, 16  ;;  %v11031_v40 = vld [vmem:[%s17554_s13 + $0x18] sm:$0xf] }
 0x2cd   : > { %v3792_v8 = vrot.slane %v3790_v30, 3  ;;  %v3795_v51 = vrot.slane %v3793_v42, 4  ;;  %v3658_v30 = vpack.c.bf16 %v3641_v21, %v3640_v47  ;;  %v4290_v42 = vmul.f32 %v18122_v7, %v4258_v63  ;;  %v18126_v63 = vld [vmem:[#allocation59_spill] sm:$0xff] }
 0x2ce   : > { %18119 = vst [vmem:[#allocation39_spill] sm:$0xff] %v13919_v27  ;;  %v13944_v47 = vrot.slane %v2989_v43, 1  ;;  %v2788_v14 = vsel %vm2725_vm4, %v2785_v41, %v17671_v13  ;;  %v4289_v7 = vmul.f32 %v18126_v63, %v4257_v62  ;;  %v2987_v43 = vor.u32 %v2985_v5, %v13848_v49  ;;  %v13967_v62 = vld [vmem:[#allocation2 + $0x84] sm:$0xf]  ;;  %v18128_v49 = vld [vmem:[#allocation21_spill] sm:$0xff] }
 0x2cf   : > { %v13923_v19 = vor.u32 %v3795_v51, %v3792_v8  ;;  %10872 = vset.pattern.permute.xlu2 %v17953_v17  ;;  %18127 = vst [vmem:[#allocation78_spill] sm:$0xff] %v13967_v62  ;;  %v4052_v5 = vperm.slane %v18128_v49, %v11926_v33  ;;  %v18131_v49 = vld [vmem:[#allocation91_spill] sm:$0xff] }
 0x2d0   : > { %6191 = vperm.xlu2 %10872, %v13683_v29   ;;  %v13932_v55 = vpop.permute.xlu2 %4230  ;;  %v13934_v46 = vpop.f32.mrf.mxu2  ;;  %v18124_v29 = vrot.slane %v13816_v23, 7  ;;  %v3799_v23 = vshrl.u32 %v3658_v30, 16 }
 0x2d1   : > { %18121 = vst [vmem:[#allocation25_spill] sm:$0xff] %v13932_v55  ;;  %v3797_v51 = vsel %vm2037_vm3, %v13831_v45, %v13923_v19  ;;  %v3100_v10 = vpop.f32.mrf.mxu3  ;;  %v13940_v8 = vpop.permute.xlu1 %4214 }
 0x2d2   : > { %18123 = vst [vmem:[#allocation75_spill] sm:$0xff] %v13940_v8  ;;  %9904 = vmatmul.msk.bf16.gmra.mxu1 %vm1899_vm1, %v3797_v51  ;;  %v2786_v21 = vsel %vm2725_vm4, %v18124_v29, %v2785_v41  ;;  %v13952_v45 = vadd.f32 %v3100_v10, %v2282_v35  ;;  %10874 = vset.pattern.permute.xlu1 %v17971_v60  ;;  %v3802_v51 = vshll.u32 %v3658_v30, 16  ;;  %v13964_v10 = vpop.permute.xlu0 %4664  ;;  %v18129_v30 = vld [vmem:[#allocation101_spill] sm:$0xff]  ;;  %v3801_v63 = vrot.slane %v3799_v23, 3  ;;  %v13990_v13 = vpop.f32.mrf.mxu1 }
 0x2d3   : > { %5418 = vperm.xlu1 %10874, %v11031_v40   ;;  %v4319_v29 = vpack.c.bf16 %v4290_v42, %v4289_v7  ;;  %v2852_v55 = vmul.f32 %v12661_v57, %v2786_v21  ;;  %v2853_v41 = vmul.f32 %v2788_v14, %v13901_v31  ;;  %v2992_v35 = vsel %vm2876_vm5, %v2987_v43, %v13944_v47  ;;  %v18136_v57 = vld [vmem:[#allocation67_spill] sm:$0xff] }
 0x2d4   : > { %18125 = vst [vmem:[#allocation52_spill] sm:$0xff] %v13952_v45  ;;  %v2285_v42 = vadd.f32 %v13560_v26, %v18129_v30  ;;  %v3804_v7 = vrot.slane %v3802_v51, 4  ;;  %v4060_v30 = vperm.slane %v18131_v49, %v11926_v33  ;;  %v1562_v26 = vperm.slane %v13814_v9, %v11926_v33 }
 0x2d5   : > { %9917 = vmatmul.msk.bf16.gmra.mxu2 %vm1899_vm1, %v4319_v29  ;;  %v13979_v43 = vpack.c.bf16 %v2853_v41, %v2852_v55  ;;  %v13984_v29 = vld [vmem:[%s17554_s13 + $0x1c] sm:$0xf]  ;;  %18132 = vst [vmem:[#allocation100_spill] sm:$0xff] %v13990_v13  ;;  %v4259_v55 = vunpack.c.l.bf16 %v4052_v5  ;;  %v18134_v49 = vunpack.c.l.bf16 %v13967_v62 }
 0x2d6   : > { %9880 = vmatmul.msk.bf16.gmra.mxu3 %vm1899_vm1, %v2992_v35  ;;  %v13995_v51 = vor.u32 %v3804_v7, %v3801_v63  ;;  %v4260_v13 = vunpack.c.l.bf16 %v4060_v30 }
 0x2d7   : > { %v4291_v45 = vmul.f32 %v18136_v57, %v4259_v55  ;;  %v2993_v57 = vshrl.u32 %v13899_v53, 16 }
 0x2d8   : > { %10875 = vset.pattern.permute.xlu2 %v17971_v60  ;;  %v13975_v21 = vpop.permute.xlu2 %4238  ;;  %v13977_v14 = vpop.f32.mrf.mxu2  ;;  %v3806_v9 = vsel %vm2037_vm3, %v13923_v19, %v13995_v51 }
 0x2d9   : > { %18130 = vst [vmem:[#allocation58_spill] sm:$0xff] %v13975_v21  ;;  %5426 = vperm.xlu2 %10875, %v13984_v29   ;;  %v3103_v35 = vpop.f32.mrf.mxu3  ;;  %v2997_v21 = vshll.u32 %v13979_v43, 16  ;;  %v2995_v62 = vor.u32 %v2993_v57, %v13944_v47  ;;  %v18143_v57 = vld [vmem:[#allocation71_spill] sm:$0xff] }
 0x2da   : > { %v3168_v31 = vadd.f32 %v3103_v35, %v2285_v42  ;;  %v13992_v23 = vpop.permute.xlu1 %4648  ;;  %v18135_v42 = vrot.slane %v13862_v59, 1  ;;  %v14008_v5 = vpop.permute.xlu0 %4688 }
 0x2db   : > { %10876 = vset.pattern.permute.xlu1 %v17937_v20  ;;  %18137 = vst [vmem:[#allocation93_spill] sm:$0xff] %v14008_v5  ;;  %v14020_v30 = vrot.slane %v2997_v21, 1  ;;  %v14032_v21 = vpop.f32.mrf.mxu1 }
 0x2dc   : > { %6777 = vperm.xlu1 %10876, %v11031_v40   ;;  %v13998_v41 = vadd.f32 %v13823_v32, %v3168_v31  ;;  %v3642_v35 = vmul.f32 %v18135_v42, %v18134_v49  ;;  %v18138_v40 = vld [vmem:[#allocation82_spill] sm:$0xff]  ;;  %v1804_v31 = vunpack.c.l.bf16 %v1562_v26 }
 0x2dd   : > { %v2287_v63 = vadd.f32 %v13592_v6, %v18138_v40  ;;  %v18139_v49 = vld [vmem:[#allocation74_spill] sm:$0xff]  ;;  %v3000_v47 = vsel %vm2876_vm5, %v2995_v62, %v14020_v30 }
 0x2de   : > { %18133 = vst [vmem:[#allocation41_spill] sm:$0xff] %v13998_v41  ;;  %v3659_v55 = vpack.c.bf16 %v3642_v35, %v3642_v35  ;;  %v4292_v6 = vmul.f32 %v18139_v49, %v4260_v13  ;;  %v2371_v42 = vld [vmem:[#allocation2 + $0x84] sm:$0x1]  ;;  %v1836_v13 = vmul.f32 %v12175_v24, %v1804_v31  ;;  %v4566_v49 = vperm.slane %v18143_v57, %v11926_v33  ;;  %v18145_v31 = vld [vmem:[#allocation73_spill] sm:$0xff]  ;;  %v18149_v57 = vld [vmem:[#allocation32_spill] sm:$0xff] }
 0x2df   : > { %v2290_v8 = vadd.f32 %v13634_v37, %v18149_v57  ;;  %v10619_v57 = vld [vmem:[#allocation2 + $0x8] sm:$0xff]  }
 0x2e0   : > { %v14012_v32 = vpop.f32.mrf.mxu2  ;;  %v4320_v41 = vpack.c.bf16 %v4292_v6, %v4291_v45  ;;  %v3808_v45 = vshrl.u32 %v3659_v55, 16  ;;  %v18144_v6 = vld [vmem:[#allocation72_spill] sm:$0xff] }
 0x2e1   : > { %10877 = vset.pattern.permute.xlu2 %v17937_v20  ;;  %v3105_v7 = vpop.f32.mrf.mxu3  ;;  %v1549_v59 = vpop.permute.xlu2 %1548  ;;  %v4582_v24 = vperm.slane %v18144_v6, %v11926_v33 }
 0x2e2   : > { %9905 = vmatmul.msk.bf16.gmra.mxu1 %vm1899_vm1, %v3806_v9  ;;  %v14023_v40 = vadd.f32 %v3105_v7, %v2287_v63  ;;  %6785 = vperm.xlu2 %10877, %v13984_v29   ;;  %v1554_v19 = vperm.slane %v1549_v59, %v11926_v33  ;;  %v18142_v9 = vld [vmem:[#allocation106_spill] sm:$0xff]  ;;  %v2660_v63 = vunpack.c.l.bf16 %v2371_v42  ;;  %v11033_v7 = vld [vmem:[%s17554_s13 + $0x54] sm:$0xf]  ;;  %v10239_v59 = vld [vmem:[%s17825_s4 + $0x58] sm:$0xff]  ;;  %v18146_v42 = vunpack.c.l.bf16 %v18145_v31 }
 0x2e3   : > { %v14027_v26 = vpop.permute.xlu1 %4222  ;;  %v4558_v53 = vperm.slane %v18142_v9, %v11926_v33  ;;  %v3811_v9 = vshll.u32 %v3659_v55, 16  ;;  %5252 = vmatpush.bf16.msra.mxu3 %v10239_v59  ;;  %v3810_v31 = vrot.slane %v3808_v45, 3 }
 0x2e4   : > { %18140 = vst [vmem:[#allocation96_spill] sm:$0xff] %v14023_v40  ;;  %v1803_v35 = vunpack.c.l.bf16 %v1554_v19  ;;  %10878 = vset.pattern.permute.xlu1 %v17867_v4  ;;  %v18148_v40 = vld [vmem:[#allocation30_spill] sm:$0xff] }
 0x2e5   : > { %18141 = vst [vmem:[#allocation81_spill] sm:$0xff] %v14027_v26  ;;  %4720 = vperm.xlu1 %10878, %v11033_v7   ;;  %v18147_v7 = vrot.slane %v13913_v54, 7  ;;  %9918 = vmatmul.msk.bf16.gmra.mxu2 %vm1899_vm1, %v4320_v41  ;;  %v4574_v26 = vperm.slane %v18148_v40, %v11926_v33  ;;  %v4840_v27 = vunpack.c.l.bf16 %v4558_v53  ;;  %v10238_v54 = vld [vmem:[%s17825_s4 + $0x50] sm:$0xff]  ;;  %v4841_v41 = vunpack.c.l.bf16 %v4566_v49 }
 0x2e6   : > { %v1835_v19 = vmul.f32 %v1803_v35, %v18146_v42  ;;  %9881 = vmatmul.msk.bf16.gmra.mxu3 %vm1899_vm1, %v3000_v47  ;;  %v18150_v35 = vld [vmem:[#allocation31_spill] sm:$0xff]  ;;  %v3813_v53 = vrot.slane %v3811_v9, 4  ;;  %v14073_v42 = vpop.permute.xlu0 %6761 }
 0x2e7   : > { %v2854_v62 = vmul.f32 %v18147_v7, %v2660_v63  ;;  %v4068_v47 = vperm.slane %v18150_v35, %v11926_v33  ;;  %v14065_v63 = vunpack.c.l.bf16 %v4582_v24  ;;  %18153 = vst [vmem:[#allocation66_spill] sm:$0xff] %v14073_v42  ;;  %5253 = vmatpush.bf16.msra.mxu3 %v10238_v54  ;;  %v4842_v49 = vunpack.c.l.bf16 %v4574_v26  ;;  %v14083_v35 = vpop.f32.mrf.mxu1 }
 0x2e8   : > { %v1867_v6 = vpack.c.bf16 %v1836_v13, %v1835_v19  ;;  %v14058_v5 = vpop.f32.mrf.mxu2  ;;  %v18152_v13 = vld [vmem:[#allocation94_spill] sm:$0xff]  ;;  %v4904_v24 = vrot.slane %v4840_v27, 7  ;;  %v4905_v9 = vrot.slane %v4841_v41, 7  ;;  %18155 = vst [vmem:[#allocation21_spill] sm:$0xff] %v14083_v35  ;;  %v10620_v27 = vld [vmem:[#allocation2 + $0x10] sm:$0xff]  }
 0x2e9   : > { %v3108_v55 = vpop.f32.mrf.mxu3  ;;  %v4076_v59 = vperm.slane %v18152_v13, %v11926_v33  ;;  %v2871_v45 = vpack.c.bf16 %v2854_v62, %v2854_v62  ;;  %v4261_v7 = vunpack.c.l.bf16 %v4068_v47  ;;  %v4907_v54 = vrot.slane %v4842_v49, 7  ;;  %v18156_v47 = vld [vmem:[#allocation92_spill] sm:$0xff] }
 0x2ea   : > { %v3170_v40 = vadd.f32 %v3108_v55, %v2290_v8  ;;  %10879 = vset.pattern.permute.xlu2 %v17953_v17  ;;  %9819 = vmatmul.msk.bf16.vlgmr.msrb.gmra.mxu0 %vm1899_vm1, %v1867_v6  ;;  %v14069_v37 = vpop.permute.xlu2 %6737  ;;  %v3001_v55 = vshrl.u32 %v13979_v43, 16  ;;  %v18157_v6 = vld [vmem:[#allocation77_spill] sm:$0xff] }
 0x2eb   : > { %18151 = vst [vmem:[#allocation44_spill] sm:$0xff] %v14069_v37  ;;  %6207 = vperm.xlu2 %10879, %v13805_v15   ;;  %v3814_v15 = vor.u32 %v3813_v53, %v3810_v31  ;;  %v4262_v62 = vunpack.c.l.bf16 %v4076_v59  ;;  %v3005_v26 = vshll.u32 %v2871_v45, 16  ;;  %v4293_v35 = vmul.f32 %v18157_v6, %v4261_v7 }
 0x2ec   : > { %v14076_v19 = vpop.permute.xlu1 %4672  ;;  %v14079_v8 = vadd.f32 %v13925_v1, %v3170_v40  ;;  %v4906_v1 = vsel %vm2725_vm4, %v4904_v24, %v4905_v9  ;;  %v2292_v40 = vadd.f32 %v13664_v3, %v18156_v47  ;;  %v14095_v31 = vunpack.c.h.bf16 %v10619_v57  ;;  %v18160_v47 = vld [vmem:[#allocation83_spill] sm:$0xff] }
 0x2ed   : > { %10880 = vset.pattern.permute.xlu1 %v17953_v17  ;;  %v3815_v13 = vsel %vm2037_vm3, %v13995_v51, %v3814_v15  ;;  %v3003_v43 = vor.u32 %v3001_v55, %v14020_v30  ;;  %v14099_v59 = vunpack.c.h.bf16 %v10620_v27  ;;  %v18158_v45 = vrot.slane %v14065_v63, 7  ;;  %v14115_v55 = vld [vmem:[%s17554_s13 + $0x20] sm:$0xf] }
 0x2ee   : > { %18154 = vst [vmem:[#allocation59_spill] sm:$0xff] %v14079_v8  ;;  %6215 = vperm.xlu1 %10880, %v13828_v58   ;;  %v10403_v58 = vunpack.c.l.bf16 %v10619_v57  ;;  %v4294_v51 = vmul.f32 %v18160_v47, %v4262_v62  ;;  %v3007_v15 = vrot.slane %v3005_v26, 1  ;;  %v5001_v57 = vmul.f32 %v14095_v31, %v4906_v1 }
 0x2ef   : > { %v4910_v3 = vsel %vm2725_vm4, %v4907_v54, %v18158_v45  ;;  %v4908_v30 = vsel %vm2725_vm4, %v4905_v9, %v4907_v54  ;;  %v14120_v62 = vunpack.c.l.bf16 %v10620_v27  ;;  %v18162_v9 = vld [vmem:[#allocation60_spill] sm:$0xff] }
 0x2f0   : > { %v14090_v41 = vpop.f32.mrf.mxu2  ;;  %v5000_v7 = vmul.f32 %v10403_v58, %v4904_v24  ;;  %v5003_v24 = vmul.f32 %v14099_v59, %v4910_v3  ;;  %v3008_v1 = vsel %vm2876_vm5, %v3003_v43, %v3007_v15  ;;  %v4598_v54 = vperm.slane %v18162_v9, %v11926_v33  ;;  %v18163_v43 = vld [vmem:[#allocation37_spill] sm:$0xff]  ;;  %v18164_v3 = vld [vmem:[#allocation24_spill] sm:$0xff] }
 0x2f1   : > { %v3110_v53 = vpop.f32.mrf.mxu3  ;;  %v4590_v58 = vperm.slane %v13566_v12, %v11926_v33  ;;  %v4084_v45 = vperm.slane %v18163_v43, %v11926_v33  ;;  %v2295_v47 = vadd.f32 %v13716_v50, %v18164_v3 }
 0x2f2   : > { %9906 = vmatmul.msk.bf16.gmra.mxu1 %vm1899_vm1, %v3815_v13  ;;  %v14104_v49 = vadd.f32 %v3110_v53, %v2292_v40  ;;  %v4321_v40 = vpack.c.bf16 %v4294_v51, %v4293_v35  ;;  %v14118_v13 = vpop.permute.xlu0 %6199  ;;  %v14130_v53 = vpop.f32.mrf.mxu1  ;;  %v5002_v35 = vmul.f32 %v14120_v62, %v4908_v30  ;;  %v5033_v27 = vpack.c.bf16 %v5001_v57, %v5000_v7 }
 0x2f3   : > { %10881 = vset.pattern.permute.xlu2 %v17971_v60  ;;  %v14109_v6 = vpop.permute.xlu2 %5378  ;;  %v14147_v30 = vunpack.c.l.bf16 %v4598_v54  ;;  %v4844_v7 = vunpack.c.l.bf16 %v4590_v58  ;;  %v4263_v42 = vunpack.c.l.bf16 %v4084_v45 }
 0x2f4   : > { %18159 = vst [vmem:[#allocation101_spill] sm:$0xff] %v14104_v49  ;;  %5434 = vperm.xlu2 %10881, %v14115_v55   ;;  %v14143_v51 = vpack.c.bf16 %v5003_v24, %v5002_v35  ;;  %v14159_v35 = vld [vmem:[%s17554_s13 + $0x24] sm:$0xf]  ;;  %v5055_v58 = vshrl.u32 %v5033_v27, 16 }
 0x2f5   : > { %v14123_v26 = vpop.permute.xlu1 %4246  ;;  %9919 = vmatmul.msk.bf16.gmra.mxu2 %vm1899_vm1, %v4321_v40  ;;  %v5057_v40 = vshll.u32 %v5033_v27, 16  ;;  %v4911_v45 = vrot.slane %v4844_v7, 7 }
 0x2f6   : > { %18161 = vst [vmem:[#allocation91_spill] sm:$0xff] %v14123_v26  ;;  %9882 = vmatmul.msk.bf16.gmra.mxu3 %vm1899_vm1, %v3008_v1  ;;  %10882 = vset.pattern.permute.xlu1 %v17937_v20  ;;  %v18165_v1 = vld [vmem:[#allocation36_spill] sm:$0xff]  ;;  %v5062_v24 = vshll.u32 %v14143_v51, 16 }
 0x2f7   : > { %6793 = vperm.xlu1 %10882, %v14115_v55   ;;  %v4092_v9 = vperm.slane %v18165_v1, %v11926_v33 }
 0x2f8   : > { %v14141_v12 = vpop.f32.mrf.mxu2  ;;  %v14178_v26 = vrot.slane %v5062_v24, 1  ;;  %v10241_v24 = vld [vmem:[%s17825_s4 + $0x68] sm:$0xff] }
 0x2f9   : > { %v3113_v15 = vpop.f32.mrf.mxu3  ;;  %v4264_v54 = vunpack.c.l.bf16 %v4092_v9  ;;  %v11036_v9 = vld [vmem:[%s17554_s13 + $0x58] sm:$0xf]  ;;  %6059 = vmatpush.bf16.msra.mxu0 %v10241_v24 }
 0x2fa   : > { %v3172_v57 = vadd.f32 %v3113_v15, %v2295_v47  ;;  %v14165_v47 = vpop.permute.xlu0 %6223  ;;  %v5059_v15 = vrot.slane %v5057_v40, 1  ;;  %v14171_v8 = vpop.f32.mrf.mxu1 }
 0x2fb   : > { %18169 = vst [vmem:[#allocation106_spill] sm:$0xff] %v14165_v47 }
 0x2fc   : > { %10883 = vset.pattern.permute.xlu2 %v17937_v20  ;;  %v14153_v50 = vadd.f32 %v14032_v21, %v3172_v57  ;;  %v18170_v21 = vld [vmem:[#allocation84_spill] sm:$0xff]  ;;  %v10621_v57 = vld [vmem:[#allocation2 + $0x18] sm:$0xff]   ;;  %18172 = vst [vmem:[#allocation71_spill] sm:$0xff] %v14171_v8  ;;  %v5060_v27 = vor.u32 %v5059_v15, %v5055_v58  ;;  %v4606_v15 = vperm.slane %v13556_v52, %v11926_v33  ;;  %v18181_v52 = vld [vmem:[#allocation27_spill] sm:$0xff] }
 0x2fd   : > { %v14150_v43 = vpop.permute.xlu2 %6745  ;;  %6801 = vperm.xlu2 %10883, %v14159_v35   ;;  %v4295_v1 = vmul.f32 %v18170_v21, %v4263_v42  ;;  %v18175_v42 = vrot.slane %v14065_v63, 7  ;;  %v5384_v63 = vperm.slane %v14109_v6, %v11926_v33  ;;  %v11037_v58 = vld [vmem:[%s17554_s13 + $0x5c] sm:$0xf] }
 0x2fe   : > { %18166 = vst [vmem:[#allocation67_spill] sm:$0xff] %v14150_v43  ;;  %v14163_v3 = vpop.permute.xlu1 %6729  ;;  %v18174_v43 = vld [vmem:[#allocation48_spill] sm:$0xff] }
 0x2ff   : > { %18167 = vst [vmem:[#allocation82_spill] sm:$0xff] %v14153_v50  ;;  %10884 = vset.pattern.permute.xlu1 %v17867_v4  ;;  %v18171_v50 = vld [vmem:[#allocation42_spill] sm:$0xff]  ;;  %v4296_v37 = vmul.f32 %v18174_v43, %v4264_v54  ;;  %v4912_v21 = vsel %vm2725_vm4, %v18175_v42, %v4911_v45 }
 0x300   : > { %18168 = vst [vmem:[#allocation74_spill] sm:$0xff] %v14163_v3  ;;  %v2297_v49 = vadd.f32 %v13755_v28, %v18171_v50  ;;  %4728 = vperm.xlu1 %10884, %v11036_v9   ;;  %v14176_v7 = vpop.f32.mrf.mxu2  ;;  %v18176_v28 = vrot.slane %v14147_v30, 7  ;;  %v14189_v3 = vunpack.c.l.bf16 %v10621_v57  ;;  %v14191_v9 = vunpack.c.h.bf16 %v10621_v57 }
 0x301   : > { %18173 = vst [vmem:[#allocation72_spill] sm:$0xff] %v14176_v7  ;;  %v3115_v40 = vpop.f32.mrf.mxu3  ;;  %v4322_v43 = vpack.c.bf16 %v4296_v37, %v4295_v1  ;;  %v10240_v37 = vld [vmem:[%s17825_s4 + $0x60] sm:$0xff]  ;;  %v4614_v57 = vperm.slane %v13864_v0, %v11926_v33  ;;  %v10243_v0 = vld [vmem:[%s17825_s4 + $0x78] sm:$0xff] }
 0x302   : > { %v4914_v50 = vsel %vm2725_vm4, %v4911_v45, %v18176_v28  ;;  %v14187_v8 = vadd.f32 %v3115_v40, %v2297_v49  ;;  %v5004_v54 = vmul.f32 %v14189_v3, %v4912_v21  ;;  %v5065_v45 = vsel %vm2876_vm5, %v5060_v27, %v14178_v26  ;;  %v5387_v6 = vpop.permute.xlu0 %5386  ;;  %v18180_v27 = vld [vmem:[#allocation38_spill] sm:$0xff]  ;;  %6060 = vmatpush.bf16.msra.mxu0 %v10240_v37 }
 0x303   : > { %v5005_v42 = vmul.f32 %v14191_v9, %v4914_v50  ;;  %v5392_v40 = vperm.slane %v5387_v6, %v11926_v33  ;;  %v5628_v21 = vunpack.c.l.bf16 %v5384_v63  ;;  %v4108_v24 = vperm.slane %v18180_v27, %v11926_v33  ;;  %v18182_v63 = vld [vmem:[#allocation47_spill] sm:$0xff]  ;;  %6580 = vmatpush.bf16.msra.mxu1 %v10243_v0 }
 0x304   : > { %18177 = vst [vmem:[#allocation73_spill] sm:$0xff] %v14187_v8  ;;  %v4100_v6 = vperm.slane %v18182_v63, %v11926_v33 }
 0x305   : > { %10885 = vset.pattern.permute.xlu2 %v17867_v4  ;;  %9920 = vmatmul.msk.bf16.gmra.mxu2 %vm1899_vm1, %v4322_v43  ;;  %v2300_v43 = vadd.f32 %v13808_v56, %v18181_v52  ;;  %v10242_v56 = vld [vmem:[%s17825_s4 + $0x70] sm:$0xff]  ;;  %v5629_v52 = vunpack.c.l.bf16 %v5392_v40 }
 0x306   : > { %v14201_v49 = vpop.permute.xlu2 %4680  ;;  %4736 = vperm.xlu2 %10885, %v11037_v58   ;;  %9939 = vmatmul.msk.bf16.vlgmr.msra.gmra.mxu3 %vm1899_vm1, %v5065_v45  ;;  %v14224_v45 = vpack.c.bf16 %v5005_v42, %v5004_v54  ;;  %v5367_v58 = vld [vmem:[#allocation2 + $0x8] sm:$0x8]  ;;  %v4846_v54 = vunpack.c.l.bf16 %v4606_v15 }
 0x307   : > { %18178 = vst [vmem:[#allocation30_spill] sm:$0xff] %v14201_v49  ;;  %v5371_v1 = vpop.permute.xlu1 %5370  ;;  %v5625_v37 = vunpack.c.l.bf16 %v5367_v58  ;;  %v4266_v49 = vunpack.c.l.bf16 %v4108_v24  ;;  %6581 = vmatpush.bf16.msra.mxu1 %v10242_v56  ;;  %v5694_v24 = vrot.slane %v5629_v52, 1  ;;  %v18184_v58 = vld [vmem:[#allocation57_spill] sm:$0xff]  ;;  %v18187_v56 = vld [vmem:[#allocation50_spill] sm:$0xff] }
 0x308   : > { %v5376_v28 = vperm.slane %v5371_v1, %v11926_v33  ;;  %10887 = vset.pattern.permute.xlu1 %v17953_v17  ;;  %v14220_v50 = vpop.f32.mrf.mxu2  ;;  %v14234_v1 = vpop.f32.mrf.mxu1  ;;  %v5070_v7 = vshll.u32 %v14224_v45, 16  ;;  %v4915_v15 = vrot.slane %v4846_v54, 7  ;;  %v2302_v0 = vadd.f32 %v13842_v11, %v18184_v58  ;;  %v10622_v54 = vld [vmem:[#allocation2 + $0x20] sm:$0xff]  }
 0x309   : > { %18179 = vst [vmem:[#allocation32_spill] sm:$0xff] %v14220_v50  ;;  %v3118_v8 = vpop.f32.mrf.mxu3  ;;  %6231 = vperm.xlu1 %10887, %v13984_v29   ;;  %v5692_v29 = vrot.slane %v5628_v21, 1  ;;  %v14239_v50 = vunpack.c.l.bf16 %v4614_v57  ;;  %v14251_v57 = vld [vmem:[%s17554_s13 + $0x28] sm:$0xf] }
 0x30a   : > { %v5627_v27 = vunpack.c.l.bf16 %v5376_v28  ;;  %v3174_v42 = vadd.f32 %v3118_v8, %v2300_v43  ;;  %v4265_v28 = vunpack.c.l.bf16 %v4100_v6  ;;  %v14265_v16 = vrot.slane %v5070_v7, 1 }
 0x30c   : > { %v5691_v47 = vrot.slane %v5627_v27, 1  ;;  %v14243_v63 = vadd.f32 %v14130_v53, %v3174_v42  ;;  %v17676_v27 = vrot.slane %v14239_v50, 7  ;;  %v18186_v42 = vld [vmem:[#allocation55_spill] sm:$0xff]  ;;  %v4297_v52 = vmul.f32 %v18187_v56, %v4265_v28 }
 0x30e   : > { %18183 = vst [vmem:[#allocation31_spill] sm:$0xff] %v14243_v63  ;;  %v5693_v8 = vsel %vm1396_vm2, %v5691_v47, %v5692_v29  ;;  %10888 = vset.pattern.permute.xlu2 %v17971_v60  ;;  %v5787_v43 = vmul.f32 %v5691_v47, %v5625_v37  ;;  %v4298_v37 = vmul.f32 %v18186_v42, %v4266_v49  ;;  %v5066_v63 = vshrl.u32 %v14143_v51, 16 }
 0x30f   : > { %v5788_v40 = vmul.f32 %v14095_v31, %v5693_v8  ;;  %5450 = vperm.xlu2 %10888, %v14251_v57   ;;  %v14254_v21 = vpop.permute.xlu2 %6183  ;;  %v5395_v53 = vpop.permute.xlu1 %5394  ;;  %v18189_v49 = vrot.slane %v14147_v30, 7  ;;  %v4918_v51 = vsel %vm2725_vm4, %v4915_v15, %v17676_v27  ;;  %v5695_v42 = vsel %vm1396_vm2, %v5692_v29, %v5694_v24 }
 0x310   : > { %v5400_v6 = vperm.slane %v5395_v53, %v11926_v33  ;;  %v14259_v47 = vpop.f32.mrf.mxu2  ;;  %v14275_v53 = vld [vmem:[%s17554_s13 + $0x2c] sm:$0xf]  ;;  %v5068_v28 = vor.u32 %v5066_v63, %v14178_v26  ;;  %v4323_v30 = vpack.c.bf16 %v4298_v37, %v4297_v52  ;;  %v4622_v26 = vperm.slane %v13921_v38, %v11926_v33  ;;  %v18191_v52 = vld [vmem:[#allocation43_spill] sm:$0xff] }
 0x311   : > { %18185 = vst [vmem:[#allocation94_spill] sm:$0xff] %v14259_v47  ;;  %v3120_v8 = vpop.f32.mrf.mxu3  ;;  %10889 = vset.pattern.permute.xlu1 %v17971_v60  ;;  %v4916_v58 = vsel %vm2725_vm4, %v18189_v49, %v4915_v15  ;;  %v5820_v7 = vpack.c.bf16 %v5788_v40, %v5787_v43  ;;  %v4630_v49 = vperm.slane %v13789_v18, %v11926_v33 }
 0x312   : > { %v14268_v48 = vunpack.c.l.bf16 %v5400_v6  ;;  %v14270_v11 = vadd.f32 %v3120_v8, %v2302_v0  ;;  %5458 = vperm.xlu1 %10889, %v14275_v53   ;;  %v14285_v0 = vunpack.c.l.bf16 %v10622_v54  ;;  %v14287_v6 = vunpack.c.h.bf16 %v10622_v54  ;;  %v14290_v8 = vpop.f32.mrf.mxu1 }
 0x313   : > { %18190 = vst [vmem:[#allocation77_spill] sm:$0xff] %v14290_v8  ;;  %v5073_v15 = vsel %vm2876_vm5, %v5068_v28, %v14265_v16  ;;  %v5789_v40 = vmul.f32 %v14120_v62, %v5695_v42  ;;  %v5842_v54 = vshrl.u32 %v5820_v7, 16  ;;  %v5845_v18 = vshll.u32 %v5820_v7, 16 }
 0x314   : > { %18188 = vst [vmem:[#allocation92_spill] sm:$0xff] %v14270_v11  ;;  %v17675_v56 = vrot.slane %v14268_v48, 1  ;;  %v5006_v63 = vmul.f32 %v14285_v0, %v4916_v58  ;;  %v5007_v43 = vmul.f32 %v14287_v6, %v4918_v51  ;;  %v4116_v58 = vperm.slane %v18191_v52, %v11926_v33  ;;  %v18192_v51 = vld [vmem:[#allocation46_spill] sm:$0xff] }
 0x315   : > { %9921 = vmatmul.msk.bf16.gmra.mxu2 %vm1899_vm1, %v4323_v30  ;;  %v14320_v7 = vunpack.c.l.bf16 %v4630_v49  ;;  %v11040_v49 = vld [vmem:[%s17554_s13 + $0x60] sm:$0xf] }
 0x316   : > { %v5697_v29 = vsel %vm1396_vm2, %v5694_v24, %v17675_v56  ;;  %9940 = vmatmul.msk.bf16.gmra.mxu3 %vm1899_vm1, %v5073_v15  ;;  %v2305_v24 = vadd.f32 %v13897_v44, %v18192_v51  ;;  %v18194_v56 = vld [vmem:[#allocation99_spill] sm:$0xff]  ;;  %v14324_v8 = vpack.c.bf16 %v5007_v43, %v5006_v63  ;;  %v5844_v44 = vrot.slane %v5842_v54, 3 }
 0x317   : > { %v5790_v37 = vmul.f32 %v14099_v59, %v5697_v29  ;;  %10890 = vset.pattern.permute.xlu2 %v17937_v20  ;;  %v4848_v29 = vunpack.c.l.bf16 %v4622_v26  ;;  %v4124_v27 = vperm.slane %v18194_v56, %v11926_v33  ;;  %v5847_v51 = vrot.slane %v5845_v18, 4  ;;  %v10623_v18 = vld [vmem:[#allocation2 + $0x28] sm:$0xff]  }
 0x318   : > { %v14309_v38 = vpop.permute.xlu2 %5410  ;;  %6809 = vperm.xlu2 %10890, %v14251_v57   ;;  %v14316_v28 = vpop.permute.xlu1 %6753  ;;  %v5078_v54 = vshll.u32 %v14324_v8, 16  ;;  %v18197_v56 = vld [vmem:[#allocation95_spill] sm:$0xff] }
 0x319   : > { %18193 = vst [vmem:[#allocation83_spill] sm:$0xff] %v14316_v28  ;;  %v14318_v42 = vpop.f32.mrf.mxu2  ;;  %v5821_v15 = vpack.c.bf16 %v5790_v37, %v5789_v40  ;;  %v3123_v30 = vpop.f32.mrf.mxu3  ;;  %v4267_v40 = vunpack.c.l.bf16 %v4116_v58  ;;  %v4919_v37 = vrot.slane %v4848_v29, 7  ;;  %v6189_v28 = vperm.slane %v14254_v21, %v11926_v33  ;;  %v18196_v58 = vld [vmem:[#allocation56_spill] sm:$0xff]  ;;  %v11041_v21 = vld [vmem:[%s17554_s13 + $0x64] sm:$0xf] }
 0x31a   : > { %v3176_v52 = vadd.f32 %v3123_v30, %v2305_v24  ;;  %10891 = vset.pattern.permute.xlu1 %v17867_v4  ;;  %v4268_v24 = vunpack.c.l.bf16 %v4124_v27  ;;  %v14334_v30 = vpop.f32.mrf.mxu1 }
 0x31b   : > { %v5850_v11 = vshrl.u32 %v5821_v15, 16  ;;  %v5853_v47 = vshll.u32 %v5821_v15, 16  ;;  %4744 = vperm.xlu1 %10891, %v11040_v49   ;;  %v5848_v15 = vor.u32 %v5847_v51, %v5844_v44 }
 0x31c   : > { %v14331_v26 = vadd.f32 %v14234_v1, %v3176_v52  ;;  %v5074_v1 = vshrl.u32 %v14224_v45, 16  ;;  %v4299_v52 = vmul.f32 %v18196_v58, %v4267_v40  ;;  %v18200_v40 = vld [vmem:[#allocation62_spill] sm:$0xff] }
 0x31d   : > { %v5852_v63 = vrot.slane %v5850_v11, 3  ;;  %v5855_v43 = vrot.slane %v5853_v47, 4  ;;  %v2307_v47 = vadd.f32 %v13934_v46, %v18197_v56  ;;  %v18199_v11 = vrot.slane %v14320_v7, 7 }
 0x31e   : > { %18195 = vst [vmem:[#allocation60_spill] sm:$0xff] %v14331_v26  ;;  %v5076_v46 = vor.u32 %v5074_v1, %v14265_v16  ;;  %v4300_v56 = vmul.f32 %v18200_v40, %v4268_v24  ;;  %v6431_v26 = vunpack.c.l.bf16 %v6189_v28  ;;  %v14372_v16 = vunpack.c.l.bf16 %v10623_v18 }
 0x31f   : > { %v14339_v49 = vor.u32 %v5855_v43, %v5852_v63  ;;  %v4922_v29 = vsel %vm2725_vm4, %v4919_v37, %v18199_v11  ;;  %v14360_v63 = vunpack.c.h.bf16 %v10623_v18  ;;  %v18202_v11 = vrot.slane %v14239_v50, 7 }
 0x320   : > { %10892 = vset.pattern.permute.xlu2 %v17867_v4  ;;  %v4324_v24 = vpack.c.bf16 %v4300_v56, %v4299_v52  ;;  %v5416_v50 = vperm.slane %v14309_v38, %v11926_v33  ;;  %v4646_v18 = vperm.slane %v13787_v61, %v11926_v33  ;;  %v18203_v52 = vld [vmem:[#allocation54_spill] sm:$0xff]  ;;  %v18204_v38 = vld [vmem:[#allocation68_spill] sm:$0xff] }
 0x321   : > { %v14346_v27 = vpop.f32.mrf.mxu2  ;;  %4752 = vperm.xlu2 %10892, %v11041_v21   ;;  %v14354_v44 = vpop.permute.xlu2 %4696  ;;  %v5857_v51 = vsel %vm2037_vm3, %v5848_v15, %v14339_v49  ;;  %v4920_v21 = vsel %vm2725_vm4, %v18202_v11, %v4919_v37  ;;  %v14370_v15 = vrot.slane %v5078_v54, 1  ;;  %v5009_v1 = vmul.f32 %v14360_v63, %v4922_v29 }
 0x322   : > { %18198 = vst [vmem:[#allocation37_spill] sm:$0xff] %v14346_v27  ;;  %v3125_v45 = vpop.f32.mrf.mxu3  ;;  %v6176_v58 = vpop.permute.xlu1 %6175  ;;  %9963 = vmatmul.msk.bf16.vlgmr.msra.gmra.mxu0 %vm1899_vm1, %v5857_v51  ;;  %v5008_v54 = vmul.f32 %v14372_v16, %v4920_v21  ;;  %v6463_v29 = vmul.f32 %v14120_v62, %v6431_v26  ;;  %v18205_v51 = vld [vmem:[#allocation28_spill] sm:$0xff]  ;;  %v14404_v26 = vunpack.c.l.bf16 %v4646_v18 }
 0x323   : > { %v14362_v43 = vadd.f32 %v3125_v45, %v2307_v47  ;;  %v6181_v27 = vperm.slane %v6176_v58, %v11926_v33  ;;  %10893 = vset.pattern.permute.xlu1 %v17953_v17  ;;  %v4638_v47 = vperm.slane %v13895_v34, %v11926_v33  ;;  %v5081_v37 = vsel %vm2876_vm5, %v5076_v46, %v14370_v15  ;;  %v14397_v61 = vpop.f32.mrf.mxu1 }
 0x324   : > { %6239 = vperm.xlu1 %10893, %v14115_v55   ;;  %v4140_v55 = vperm.slane %v18203_v52, %v11926_v33  ;;  %v14393_v45 = vpack.c.bf16 %v5009_v1, %v5008_v54  ;;  %v2310_v46 = vadd.f32 %v13977_v14, %v18205_v51  ;;  %18206 = vst [vmem:[#allocation36_spill] sm:$0xff] %v14397_v61  ;;  %v14401_v58 = vunpack.c.l.bf16 %v5416_v50  ;;  %v11042_v52 = vld [vmem:[%s17554_s13 + $0x34] sm:$0xf]  ;;  %v10624_v51 = vld [vmem:[#allocation2 + $0x30] sm:$0xff]  }
 0x325   : > { %18201 = vst [vmem:[#allocation24_spill] sm:$0xff] %v14362_v43  ;;  %v6430_v28 = vunpack.c.l.bf16 %v6181_v27  ;;  %9922 = vmatmul.msk.bf16.gmra.mxu2 %vm1899_vm1, %v4324_v24  ;;  %v4132_v27 = vperm.slane %v18204_v38, %v11926_v33  ;;  %v4850_v56 = vunpack.c.l.bf16 %v4638_v47  ;;  %v18208_v38 = vld [vmem:[#allocation64_spill] sm:$0xff] }
 0x326   : > { %9941 = vmatmul.msk.bf16.gmra.mxu3 %vm1899_vm1, %v5081_v37  ;;  %v4270_v1 = vunpack.c.l.bf16 %v4140_v55  ;;  %v5086_v47 = vshll.u32 %v14393_v45, 16  ;;  %v17677_v54 = vrot.slane %v14401_v58, 1  ;;  %v4925_v55 = vrot.slane %v14404_v26, 7 }
 0x327   : > { %v6462_v34 = vmul.f32 %v14095_v31, %v6430_v28  ;;  %v4269_v28 = vunpack.c.l.bf16 %v4132_v27  ;;  %v4923_v37 = vrot.slane %v4850_v56, 7 }
 0x329   : > { %v14399_v40 = vpop.f32.mrf.mxu2  ;;  %v6494_v62 = vpack.c.bf16 %v6463_v29, %v6462_v34  ;;  %10894 = vset.pattern.permute.xlu2 %v17953_v17  ;;  %v4302_v29 = vmul.f32 %v17966_v25, %v4270_v1  ;;  %v6205_v34 = vperm.slane %v14118_v13, %v11926_v33  ;;  %v4301_v27 = vmul.f32 %v18208_v38, %v4269_v28 }
 0x32a   : > { %v3128_v31 = vpop.f32.mrf.mxu3  ;;  %6247 = vperm.xlu2 %10894, %v14159_v35   ;;  %v6192_v21 = vpop.permute.xlu2 %6191  ;;  %v18211_v13 = vrot.slane %v14268_v48, 1  ;;  %v14450_v38 = vunpack.c.h.bf16 %v10624_v51 }
 0x32b   : > { %v3178_v11 = vadd.f32 %v3128_v31, %v2310_v46  ;;  %v5403_v24 = vpop.permute.xlu1 %5402  ;;  %9987 = vmatmul.msk.bf16.vlgmr.msra.gmra.mxu1 %vm1899_vm1, %v6494_v62  ;;  %v6197_v35 = vperm.slane %v6192_v21, %v11926_v33  ;;  %v18209_v46 = vld [vmem:[#allocation61_spill] sm:$0xff]  ;;  %v3940_v62 = vpop.f32.mrf.mxu1  ;;  %v14429_v21 = vrot.slane %v5086_v47, 1  ;;  %v6433_v48 = vunpack.c.l.bf16 %v6205_v34 }
 0x32c   : > { %v5408_v14 = vperm.slane %v5403_v24, %v11926_v33  ;;  %10896 = vset.pattern.permute.xlu1 %v17971_v60  ;;  %v2312_v56 = vadd.f32 %v14012_v32, %v18209_v46  ;;  %v18210_v24 = vrot.slane %v14320_v7, 7 }
 0x32d   : > { %v14412_v50 = vadd.f32 %v14334_v30, %v3178_v11  ;;  %5474 = vperm.xlu1 %10896, %v11042_v52   ;;  %v5082_v11 = vshrl.u32 %v14324_v8, 16  ;;  %v6432_v1 = vunpack.c.l.bf16 %v6197_v35  ;;  %v4926_v8 = vsel %vm2725_vm4, %v4923_v37, %v4925_v55 }
 0x32e   : > { %v5631_v18 = vunpack.c.l.bf16 %v5408_v14  ;;  %v4924_v25 = vsel %vm2725_vm4, %v18210_v24, %v4923_v37  ;;  %v14448_v35 = vunpack.c.l.bf16 %v10624_v51 }
 0x32f   : > { %18207 = vst [vmem:[#allocation84_spill] sm:$0xff] %v14412_v50  ;;  %v5084_v46 = vor.u32 %v5082_v11, %v14370_v15  ;;  %v6464_v51 = vmul.f32 %v14099_v59, %v6432_v1  ;;  %v6465_v15 = vmul.f32 %v14189_v3, %v6433_v48 }
 0x330   : > { %v5698_v30 = vrot.slane %v5631_v18, 1  ;;  %v5010_v34 = vmul.f32 %v14448_v35, %v4924_v25 }
 0x331   : > { %v14426_v31 = vpop.f32.mrf.mxu2 }
 0x332   : > { %v5699_v14 = vsel %vm1396_vm2, %v18211_v13, %v5698_v30  ;;  %v5701_v32 = vsel %vm1396_vm2, %v5698_v30, %v17677_v54  ;;  %v3130_v28 = vpop.f32.mrf.mxu3  ;;  %10897 = vset.pattern.permute.xlu2 %v17937_v20  ;;  %v14455_v30 = vld [vmem:[%s17554_s13 + $0x30] sm:$0xf] }
 0x333   : > { %v5791_v47 = vmul.f32 %v14189_v3, %v5699_v14  ;;  %v5792_v7 = vmul.f32 %v14191_v9, %v5701_v32  ;;  %v14445_v18 = vadd.f32 %v3130_v28, %v2312_v56  ;;  %6825 = vperm.xlu2 %10897, %v14455_v30   ;;  %v14458_v37 = vpop.permute.xlu1 %6769  ;;  %v4325_v56 = vpack.c.bf16 %v4302_v29, %v4301_v27  ;;  %v5427_v13 = vpop.permute.xlu2 %5426  ;;  %v18213_v27 = vld [vmem:[#allocation33_spill] sm:$0xff] }
 0x334   : > { %v5011_v14 = vmul.f32 %v14450_v38, %v4926_v8  ;;  %v5089_v32 = vsel %vm2876_vm5, %v5084_v46, %v14429_v21  ;;  %v4654_v29 = vperm.slane %v13992_v23, %v11926_v33  ;;  %v2315_v59 = vadd.f32 %v14058_v5, %v18213_v27  ;;  %v14482_v23 = vpop.f32.mrf.mxu1  ;;  %v18215_v5 = vld [vmem:[#allocation63_spill] sm:$0xff]  ;;  %v18217_v27 = vld [vmem:[#allocation97_spill] sm:$0xff] }
 0x335   : > { %18212 = vst [vmem:[#allocation42_spill] sm:$0xff] %v14445_v18  ;;  %v5822_v24 = vpack.c.bf16 %v5792_v7, %v5791_v47  ;;  %10898 = vset.pattern.permute.xlu1 %v17937_v20  ;;  %9923 = vmatmul.msk.bf16.gmra.mxu2 %vm1899_vm1, %v4325_v56  ;;  %v4156_v8 = vperm.slane %v13510_v2, %v11926_v33  ;;  %v11044_v2 = vld [vmem:[%s17554_s13 + $0x68] sm:$0xf] }
 0x336   : > { %9942 = vmatmul.msk.bf16.gmra.mxu3 %vm1899_vm1, %v5089_v32  ;;  %6833 = vperm.xlu1 %10898, %v11042_v52   ;;  %v4662_v52 = vperm.slane %v13889_v36, %v11926_v33  ;;  %v14480_v47 = vpack.c.bf16 %v5011_v14, %v5010_v34  ;;  %v6495_v3 = vpack.c.bf16 %v6465_v15, %v6464_v51 }
 0x337   : > { %v5859_v28 = vshrl.u32 %v5822_v24, 16  ;;  %v5862_v54 = vshll.u32 %v5822_v24, 16  ;;  %18214 = vst [vmem:[#allocation48_spill] sm:$0xff] %v14482_v23  ;;  %v4148_v56 = vperm.slane %v18215_v5, %v11926_v33  ;;  %v4852_v24 = vunpack.c.l.bf16 %v4654_v29  ;;  %v18229_v23 = vld [vmem:[#allocation114_spill] sm:$0xff] }
 0x338   : > { %v4272_v51 = vunpack.c.l.bf16 %v4156_v8  ;;  %v14502_v32 = vunpack.c.l.bf16 %v4662_v52  ;;  %v10625_v8 = vld [vmem:[#allocation2 + $0x38] sm:$0xff]  }
 0x339   : > { %v14474_v11 = vpop.f32.mrf.mxu2  ;;  %v5861_v25 = vrot.slane %v5859_v28, 3  ;;  %v5864_v1 = vrot.slane %v5862_v54, 4  ;;  %v5094_v28 = vshll.u32 %v14480_v47, 16  ;;  %v4271_v15 = vunpack.c.l.bf16 %v4148_v56 }
 0x33a   : > { %v3133_v7 = vpop.f32.mrf.mxu3  ;;  %v4927_v29 = vrot.slane %v4852_v24, 7  ;;  %v14528_v24 = vunpack.c.l.bf16 %v10625_v8 }
 0x33b   : > { %v3180_v48 = vadd.f32 %v3133_v7, %v2315_v59  ;;  %v14484_v46 = vor.u32 %v5864_v1, %v5861_v25  ;;  %10899 = vset.pattern.permute.xlu2 %v17867_v4  ;;  %9988 = vmatmul.msk.bf16.gmra.mxu1 %vm1899_vm1, %v6495_v3  ;;  %v2317_v59 = vadd.f32 %v14090_v41, %v18217_v27  ;;  %v17678_v1 = vrot.slane %v14502_v32, 7 }
 0x33c   : > { %4760 = vperm.xlu2 %10899, %v11044_v2   ;;  %v14493_v36 = vpop.permute.xlu2 %6785  ;;  %v14495_v54 = vpop.permute.xlu1 %4704  ;;  %v4304_v25 = vmul.f32 %v17979_v22, %v4272_v51  ;;  %v5090_v3 = vshrl.u32 %v14393_v45, 16  ;;  %v14516_v7 = vrot.slane %v5094_v28, 1  ;;  %v4928_v41 = vsel %vm2725_vm4, %v4925_v55, %v4927_v29 }
 0x33d   : > { %v5866_v34 = vsel %vm2037_vm3, %v14339_v49, %v14484_v46  ;;  %v14500_v14 = vadd.f32 %v3940_v62, %v3180_v48  ;;  %v5432_v49 = vperm.slane %v5427_v13, %v11926_v33  ;;  %v3945_v48 = vpop.f32.mrf.mxu1  ;;  %v4930_v22 = vsel %vm2725_vm4, %v4927_v29, %v17678_v1  ;;  %v5443_v28 = vpop.permute.xlu0 %5442  ;;  %v10626_v1 = vld [vmem:[#allocation2 + $0x40] sm:$0xff]  }
 0x33e   : > { %9964 = vmatmul.msk.bf16.gmra.mxu0 %vm1899_vm1, %v5866_v34  ;;  %10901 = vset.pattern.permute.xlu1 %v17953_v17  ;;  %v5092_v13 = vor.u32 %v5090_v3, %v14429_v21  ;;  %v14530_v45 = vunpack.c.h.bf16 %v10625_v8  ;;  %v5012_v21 = vmul.f32 %v14528_v24, %v4928_v41  ;;  %v4670_v27 = vperm.slane %v13964_v10, %v11926_v33  ;;  %v14559_v10 = vld [vmem:[%s17554_s13 + $0x38] sm:$0xf] }
 0x33f   : > { %18216 = vst [vmem:[#allocation38_spill] sm:$0xff] %v14500_v14  ;;  %6255 = vperm.xlu1 %10901, %v14251_v57   ;;  %v18219_v57 = vld [vmem:[#allocation70_spill] sm:$0xff]  ;;  %v14532_v2 = vunpack.c.l.bf16 %v5432_v49  ;;  %v4164_v49 = vperm.slane %v13599_v39, %v11926_v33 }
 0x340   : > { %v4303_v56 = vmul.f32 %v18219_v57, %v4271_v15  ;;  %v5097_v51 = vsel %vm2876_vm5, %v5092_v13, %v14516_v7  ;;  %v5013_v15 = vmul.f32 %v14530_v45, %v4930_v22  ;;  %v18221_v57 = vld [vmem:[#allocation108_spill] sm:$0xff] }
 0x341   : > { %v14511_v62 = vpop.f32.mrf.mxu2 }
 0x342   : > { %v3135_v52 = vpop.f32.mrf.mxu3  ;;  %v4326_v34 = vpack.c.bf16 %v4304_v25, %v4303_v56  ;;  %v18220_v25 = vld [vmem:[#allocation80_spill] sm:$0xff]  ;;  %v4172_v56 = vperm.slane %v18221_v57, %v11926_v33  ;;  %v14564_v41 = vpack.c.bf16 %v5013_v15, %v5012_v21 }
 0x343   : > { %v14518_v5 = vadd.f32 %v3135_v52, %v2317_v59  ;;  %v4678_v59 = vperm.slane %v14076_v19, %v11926_v33  ;;  %v2320_v8 = vadd.f32 %v14141_v12, %v18220_v25  ;;  %v5704_v52 = vrot.slane %v14532_v2, 1  ;;  %v18222_v2 = vld [vmem:[#allocation34_spill] sm:$0xff] }
 0x344   : > { %10902 = vset.pattern.permute.xlu2 %v17953_v17  ;;  %v4854_v12 = vunpack.c.l.bf16 %v4670_v27 }
 0x345   : > { %18218 = vst [vmem:[#allocation27_spill] sm:$0xff] %v14518_v5  ;;  %6263 = vperm.xlu2 %10902, %v14275_v53   ;;  %v14536_v26 = vpop.permute.xlu2 %6207  ;;  %v5419_v55 = vpop.permute.xlu1 %5418  ;;  %v5448_v53 = vperm.slane %v5443_v28, %v11926_v33  ;;  %9924 = vmatmul.msk.bf16.gmra.mxu2 %vm1899_vm1, %v4326_v34  ;;  %v14566_v34 = vunpack.c.l.bf16 %v4678_v59  ;;  %v4273_v28 = vunpack.c.l.bf16 %v4164_v49  ;;  %v18230_v5 = vld [vmem:[#allocation40_spill] sm:$0xff] }
 0x346   : > { %v5424_v29 = vperm.slane %v5419_v55, %v11926_v33  ;;  %9943 = vmatmul.msk.bf16.gmra.mxu3 %vm1899_vm1, %v5097_v51  ;;  %v14577_v21 = vpop.f32.mrf.mxu1  ;;  %v3968_v14 = vadd.f32 %v18230_v5, %v18229_v23  ;;  %v14614_v5 = vunpack.c.l.bf16 %v10626_v1 }
 0x347   : > { %10903 = vset.pattern.permute.xlu1 %v17971_v60  ;;  %v14571_v51 = vunpack.c.l.bf16 %v5448_v53  ;;  %18224 = vst [vmem:[#allocation47_spill] sm:$0xff] %v14577_v21  ;;  %v14587_v53 = vld [vmem:[%s17554_s13 + $0x3c] sm:$0xf] }
 0x348   : > { %v5633_v3 = vunpack.c.l.bf16 %v5424_v29  ;;  %5482 = vperm.xlu1 %10903, %v14559_v10   ;;  %v18223_v29 = vrot.slane %v14401_v58, 1 }
 0x349   : > { %v4411_v13 = vpop.f32.mrf.mxu2 }
 0x34a   : > { %v3138_v19 = vpop.f32.mrf.mxu3  ;;  %v5702_v39 = vrot.slane %v5633_v3, 1  ;;  %v14569_v55 = vadd.f32 %v4411_v13, %v18222_v2  ;;  %v5102_v3 = vshll.u32 %v14564_v41, 16 }
 0x34b   : > { %v3182_v22 = vadd.f32 %v3138_v19, %v2320_v8  ;;  %v4274_v8 = vunpack.c.l.bf16 %v4172_v56  ;;  %v17679_v19 = vrot.slane %v14566_v34, 7 }
 0x34c   : > { %v5703_v25 = vsel %vm1396_vm2, %v18223_v29, %v5702_v39  ;;  %v5705_v57 = vsel %vm1396_vm2, %v5702_v39, %v5704_v52  ;;  %v18227_v29 = vld [vmem:[#allocation102_spill] sm:$0xff] }
 0x34d   : > { %v5793_v15 = vmul.f32 %v14285_v0, %v5703_v25  ;;  %v5794_v27 = vmul.f32 %v14287_v6, %v5705_v57  ;;  %10904 = vset.pattern.permute.xlu2 %v17971_v60  ;;  %v14582_v59 = vadd.f32 %v3945_v48, %v3182_v22  ;;  %v4931_v48 = vrot.slane %v4854_v12, 7  ;;  %v18226_v22 = vld [vmem:[#allocation79_spill] sm:$0xff]  ;;  %v18228_v25 = vld [vmem:[#allocation72_spill] sm:$0xff]  ;;  %v18231_v12 = vld [vmem:[#allocation85_spill] sm:$0xff] }
 0x34e   : > { %5490 = vperm.xlu2 %10904, %v14587_v53   ;;  %v5435_v58 = vpop.permute.xlu2 %5434  ;;  %v14590_v49 = vpop.permute.xlu1 %6777  ;;  %v4305_v2 = vmul.f32 %v18226_v22, %v4273_v28  ;;  %v2322_v57 = vadd.f32 %v18228_v25, %v18227_v29  ;;  %v5098_v22 = vshrl.u32 %v14480_v47, 16  ;;  %v14607_v29 = vrot.slane %v5102_v3, 1 }
 0x34f   : > { %18225 = vst [vmem:[#allocation57_spill] sm:$0xff] %v14582_v59  ;;  %v5823_v39 = vpack.c.bf16 %v5794_v27, %v5793_v15  ;;  %v5440_v13 = vperm.slane %v5435_v58, %v11926_v33  ;;  %v4306_v58 = vmul.f32 %v18231_v12, %v4274_v8  ;;  %v3950_v8 = vpop.f32.mrf.mxu1  ;;  %v18234_v47 = vrot.slane %v14502_v32, 7  ;;  %v18236_v32 = vld [vmem:[#allocation93_spill] sm:$0xff] }
 0x350   : > { %10905 = vset.pattern.permute.xlu1 %v17937_v20 }
 0x351   : > { %v5635_v21 = vunpack.c.l.bf16 %v5440_v13  ;;  %6849 = vperm.xlu1 %10905, %v14587_v53   ;;  %v5868_v15 = vshrl.u32 %v5823_v39, 16  ;;  %v5871_v27 = vshll.u32 %v5823_v39, 16  ;;  %v4413_v28 = vpop.f32.mrf.mxu2  ;;  %v4934_v13 = vsel %vm2725_vm4, %v4931_v48, %v17679_v19 }
 0x352   : > { %v3140_v59 = vpop.f32.mrf.mxu3  ;;  %v14612_v61 = vadd.f32 %v4413_v28, %v3968_v14  ;;  %v14616_v39 = vunpack.c.h.bf16 %v10626_v1  ;;  %v4327_v12 = vpack.c.bf16 %v4306_v58, %v4305_v2  ;;  %v4932_v3 = vsel %vm2725_vm4, %v18234_v47, %v4931_v48  ;;  %v18238_v58 = vld [vmem:[#allocation115_spill] sm:$0xff] }
 0x353   : > { %v14604_v56 = vadd.f32 %v3140_v59, %v2322_v57  ;;  %v5706_v25 = vrot.slane %v5635_v21, 1  ;;  %v5870_v23 = vrot.slane %v5868_v15, 3  ;;  %v5100_v59 = vor.u32 %v5098_v22, %v14516_v7 }
 0x354   : > { %18233 = vst [vmem:[#allocation50_spill] sm:$0xff] %v14616_v39  ;;  %v5873_v57 = vrot.slane %v5871_v27, 4  ;;  %v18235_v21 = vrot.slane %v14571_v51, 1  ;;  %v5015_v15 = vmul.f32 %v14616_v39, %v4934_v13  ;;  %v4694_v48 = vperm.slane %v18236_v32, %v11926_v33 }
 0x355   : > { %18232 = vst [vmem:[#allocation55_spill] sm:$0xff] %v14604_v56  ;;  %v5707_v56 = vsel %vm1396_vm2, %v5704_v52, %v5706_v25  ;;  %v5105_v7 = vsel %vm2876_vm5, %v5100_v59, %v14607_v29  ;;  %v18237_v52 = vld [vmem:[#allocation30_spill] sm:$0xff]  ;;  %9925 = vmatmul.msk.bf16.gmra.mxu2 %vm1899_vm1, %v4327_v12  ;;  %v4180_v22 = vperm.slane %v18238_v58, %v11926_v33  ;;  %v18240_v59 = vld [vmem:[#allocation32_spill] sm:$0xff] }
 0x356   : > { %v5709_v14 = vsel %vm1396_vm2, %v5706_v25, %v18235_v21  ;;  %v5795_v1 = vmul.f32 %v14372_v16, %v5707_v56  ;;  %10906 = vset.pattern.permute.xlu2 %v17867_v4  ;;  %v4686_v2 = vperm.slane %v18237_v52, %v11926_v33  ;;  %9944 = vmatmul.msk.bf16.gmra.mxu3 %vm1899_vm1, %v5105_v7  ;;  %v18239_v25 = vld [vmem:[#allocation45_spill] sm:$0xff]  ;;  %v11047_v21 = vld [vmem:[%s17554_s13 + $0x70] sm:$0xf] }
 0x357   : > { %v5796_v28 = vmul.f32 %v14360_v63, %v5709_v14  ;;  %v14638_v27 = vpop.permute.xlu1 %4720  ;;  %v14640_v56 = vor.u32 %v5873_v57, %v5870_v23  ;;  %v5014_v13 = vmul.f32 %v14614_v5, %v4932_v3  ;;  %v2325_v47 = vadd.f32 %v18240_v59, %v18239_v25  ;;  %4776 = vperm.xlu2 %10906, %v11047_v21   ;;  %v14650_v12 = vpop.permute.xlu2 %6801  ;;  %v18242_v57 = vld [vmem:[#allocation112_spill] sm:$0xff] }
 0x358   : > { %18241 = vst [vmem:[#allocation43_spill] sm:$0xff] %v14650_v12  ;;  %v4188_v3 = vperm.slane %v18242_v57, %v11926_v33  ;;  %v4856_v25 = vunpack.c.l.bf16 %v4686_v2  ;;  %v4275_v21 = vunpack.c.l.bf16 %v4180_v22  ;;  %v18246_v2 = vld [vmem:[#allocation86_spill] sm:$0xff]  ;;  %v5106_v12 = vshrl.u32 %v14564_v41, 16 }
 0x359   : > { %v5824_v14 = vpack.c.bf16 %v5796_v28, %v5795_v1  ;;  %v5875_v23 = vsel %vm2037_vm3, %v14484_v46, %v14640_v56  ;;  %10907 = vset.pattern.permute.xlu1 %v17867_v4  ;;  %v14658_v32 = vpack.c.bf16 %v5015_v15, %v5014_v13  ;;  %v4416_v58 = vpop.f32.mrf.mxu2  ;;  %v11048_v1 = vld [vmem:[%s17554_s13 + $0x74] sm:$0xf]  ;;  %v14664_v28 = vunpack.c.l.bf16 %v4694_v48  ;;  %v18243_v46 = vld [vmem:[#allocation16_spill] sm:$0xff] }
 0x35a   : > { %v3143_v7 = vpop.f32.mrf.mxu3  ;;  %9965 = vmatmul.msk.bf16.gmra.mxu0 %vm1899_vm1, %v5875_v23  ;;  %4784 = vperm.xlu1 %10907, %v11048_v1   ;;  %v14667_v59 = vadd.f32 %v4416_v58, %v18243_v46  ;;  %v6213_v15 = vperm.slane %v14536_v26, %v11926_v33  ;;  %v14673_v23 = vpop.f32.mrf.mxu1  ;;  %v4935_v1 = vrot.slane %v4856_v25, 7  ;;  %v4307_v18 = vmul.f32 %v18246_v2, %v4275_v21  ;;  %v18247_v58 = vld [vmem:[#allocation49_spill] sm:$0xff]  ;;  %v18248_v46 = vld [vmem:[#allocation94_spill] sm:$0xff]  ;;  %v18251_v2 = vld [vmem:[#allocation19_spill] sm:$0xff] }
 0x35b   : > { %v3184_v52 = vadd.f32 %v3143_v7, %v2325_v47  ;;  %v5877_v13 = vshrl.u32 %v5824_v14, 16  ;;  %v5880_v47 = vshll.u32 %v5824_v14, 16  ;;  %v4276_v7 = vunpack.c.l.bf16 %v4188_v3  ;;  %18245 = vst [vmem:[#allocation99_spill] sm:$0xff] %v14673_v23  ;;  %v18250_v14 = vld [vmem:[#allocation110_spill] sm:$0xff] }
 0x35c   : > { %v5110_v57 = vshll.u32 %v14658_v32, 16  ;;  %v2327_v22 = vadd.f32 %v18248_v46, %v18247_v58  ;;  %v6434_v23 = vunpack.c.l.bf16 %v6213_v15  ;;  %v18253_v15 = vrot.slane %v14566_v34, 7 }
 0x35d   : > { %v14669_v19 = vadd.f32 %v3950_v8, %v3184_v52  ;;  %v18249_v52 = vld [vmem:[#allocation22_spill] sm:$0xff]  ;;  %v5879_v50 = vrot.slane %v5877_v13, 3  ;;  %v5882_v21 = vrot.slane %v5880_v47, 4  ;;  %v4308_v43 = vmul.f32 %v18251_v2, %v4276_v7  ;;  %v14705_v7 = vld [vmem:[%s17554_s13 + $0x40] sm:$0xf] }
 0x35e   : > { %v3970_v3 = vadd.f32 %v18250_v14, %v18249_v52  ;;  %v14692_v39 = vrot.slane %v5110_v57, 1  ;;  %v5108_v34 = vor.u32 %v5106_v12, %v14607_v29  ;;  %v6466_v14 = vmul.f32 %v14191_v9, %v6434_v23  ;;  %v18258_v9 = vld [vmem:[#allocation20_spill] sm:$0xff] }
 0x35f   : > { %18244 = vst [vmem:[#allocation46_spill] sm:$0xff] %v14669_v19  ;;  %10908 = vset.pattern.permute.xlu2 %v17953_v17  ;;  %v10627_v19 = vld [vmem:[#allocation2 + $0x48] sm:$0xff]   ;;  %v4702_v29 = vperm.slane %v14354_v44, %v11926_v33 }
 0x360   : > { %v14681_v8 = vpop.permute.xlu2 %4736  ;;  %v6216_v26 = vpop.permute.xlu1 %6215  ;;  %6271 = vperm.xlu2 %10908, %v14455_v30   ;;  %v4936_v30 = vsel %vm2725_vm4, %v18253_v15, %v4935_v1  ;;  %v14708_v41 = vunpack.c.l.bf16 %v10627_v19  ;;  %v14710_v57 = vunpack.c.h.bf16 %v10627_v19  ;;  %v5113_v2 = vsel %vm2876_vm5, %v5108_v34, %v14692_v39 }
 0x361   : > { %v6221_v48 = vperm.slane %v6216_v26, %v11926_v33  ;;  %v4418_v46 = vpop.f32.mrf.mxu2  ;;  %v18254_v26 = vrot.slane %v14664_v28, 7  ;;  %v4710_v19 = vperm.slane %v14495_v54, %v11926_v33 }
 0x362   : > { %v3145_v25 = vpop.f32.mrf.mxu3  ;;  %10910 = vset.pattern.permute.xlu1 %v17971_v60  ;;  %v14700_v52 = vadd.f32 %v4418_v46, %v3970_v3  ;;  %18256 = vst [vmem:[#allocation62_spill] sm:$0xff] %v14708_v41  ;;  %v5016_v3 = vmul.f32 %v14708_v41, %v4936_v30 }
 0x363   : > { %v14688_v58 = vadd.f32 %v3145_v25, %v2327_v22  ;;  %v4938_v13 = vsel %vm2725_vm4, %v4935_v1, %v18254_v26  ;;  %v6435_v47 = vunpack.c.l.bf16 %v6221_v48  ;;  %5498 = vperm.xlu1 %10910, %v14705_v7   ;;  %18257 = vst [vmem:[#allocation54_spill] sm:$0xff] %v14710_v57  ;;  %v4328_v22 = vpack.c.bf16 %v4308_v43, %v4307_v18  ;;  %v3955_v43 = vpop.f32.mrf.mxu1  ;;  %v18260_v26 = vld [vmem:[#allocation88_spill] sm:$0xff] }
 0x364   : > { %18255 = vst [vmem:[#allocation95_spill] sm:$0xff] %v14700_v52  ;;  %v14715_v1 = vor.u32 %v5882_v21, %v5879_v50  ;;  %v5017_v25 = vmul.f32 %v14710_v57, %v4938_v13  ;;  %v18259_v50 = vld [vmem:[#allocation116_spill] sm:$0xff]  ;;  %v14751_v13 = vunpack.c.l.bf16 %v4710_v19  ;;  %v18263_v19 = vld [vmem:[#allocation107_spill] sm:$0xff] }
 0x365   : > { %18252 = vst [vmem:[#allocation56_spill] sm:$0xff] %v14688_v58  ;;  %v6467_v48 = vmul.f32 %v14285_v0, %v6435_v47  ;;  %9926 = vmatmul.msk.bf16.gmra.mxu2 %vm1899_vm1, %v4328_v22  ;;  %v2330_v0 = vadd.f32 %v14318_v42, %v18258_v9  ;;  %v4196_v18 = vperm.slane %v18259_v50, %v11926_v33  ;;  %v14743_v42 = vld [vmem:[%s17554_s13 + $0x44] sm:$0xf]  ;;  %v18261_v47 = vld [vmem:[#allocation51_spill] sm:$0xff] }
 0x366   : > { %9945 = vmatmul.msk.bf16.gmra.mxu3 %vm1899_vm1, %v5113_v2  ;;  %v5884_v23 = vsel %vm2037_vm3, %v14640_v56, %v14715_v1  ;;  %v14738_v21 = vpack.c.bf16 %v5017_v25, %v5016_v3  ;;  %v4204_v56 = vperm.slane %v18260_v26, %v11926_v33  ;;  %v14760_v3 = vpop.permute.xlu0 %5466  ;;  %v18264_v9 = vld [vmem:[#allocation37_spill] sm:$0xff]  ;;  %v18265_v50 = vld [vmem:[#allocation87_spill] sm:$0xff] }
 0x367   : > { %v6496_v46 = vpack.c.bf16 %v6467_v48, %v6466_v14  ;;  %v4277_v14 = vunpack.c.l.bf16 %v4196_v18  ;;  %v4858_v48 = vunpack.c.l.bf16 %v4702_v29 }
 0x368   : > { %10911 = vset.pattern.permute.xlu2 %v17971_v60  ;;  %v5118_v25 = vshll.u32 %v14738_v21, 16  ;;  %v4278_v2 = vunpack.c.l.bf16 %v4204_v56 }
 0x369   : > { %v14732_v12 = vpop.permute.xlu2 %5450  ;;  %9989 = vmatmul.msk.bf16.gmra.mxu1 %vm1899_vm1, %v6496_v46  ;;  %5506 = vperm.xlu2 %10911, %v14743_v42   ;;  %v4421_v15 = vpop.f32.mrf.mxu2  ;;  %v5114_v46 = vshrl.u32 %v14658_v32, 16 }
 0x36a   : > { %v3148_v54 = vpop.f32.mrf.mxu3  ;;  %9966 = vmatmul.msk.bf16.gmra.mxu0 %vm1899_vm1, %v5884_v23  ;;  %v14747_v30 = vpop.permute.xlu1 %6793  ;;  %v14754_v34 = vadd.f32 %v4421_v15, %v18261_v47  ;;  %v10628_v23 = vld [vmem:[#allocation2 + $0x50] sm:$0xff]   ;;  %v4939_v15 = vrot.slane %v4858_v48, 7  ;;  %v18266_v47 = vld [vmem:[#allocation65_spill] sm:$0xff]  ;;  %v14775_v52 = vrot.slane %v5118_v25, 1 }
 0x36b   : > { %v3186_v44 = vadd.f32 %v3148_v54, %v2330_v0  ;;  %10912 = vset.pattern.permute.xlu1 %v17937_v20  ;;  %v2332_v0 = vadd.f32 %v18264_v9, %v18263_v19  ;;  %v4309_v54 = vmul.f32 %v18265_v50, %v4277_v14  ;;  %v14769_v18 = vpop.f32.mrf.mxu1  ;;  %v18270_v19 = vld [vmem:[#allocation23_spill] sm:$0xff]  ;;  %v18271_v14 = vrot.slane %v14751_v13, 7 }
 0x36c   : > { %6857 = vperm.xlu1 %10912, %v14705_v7   ;;  %18268 = vst [vmem:[#allocation28_spill] sm:$0xff] %v14769_v18  ;;  %v4310_v9 = vmul.f32 %v18270_v19, %v4278_v2  ;;  %v5116_v32 = vor.u32 %v5114_v46, %v14692_v39  ;;  %v18274_v2 = vrot.slane %v14664_v28, 7  ;;  %v1957_v39 = vpop.f32.mrf.mxu0  ;;  %v18276_v28 = vld [vmem:[#allocation106_spill] sm:$0xff] }
 0x36d   : > { %v14758_v22 = vadd.f32 %v3955_v43, %v3186_v44  ;;  %v18267_v43 = vld [vmem:[#allocation113_spill] sm:$0xff]  ;;  %v4942_v48 = vsel %vm2725_vm4, %v4939_v15, %v18271_v14  ;;  %v6229_v46 = vperm.slane %v18276_v28, %v11926_v33 }
 0x36e   : > { %v3972_v44 = vadd.f32 %v18267_v43, %v18266_v47  ;;  %v4329_v25 = vpack.c.bf16 %v4310_v9, %v4309_v54  ;;  %v5121_v14 = vsel %vm2876_vm5, %v5116_v32, %v14775_v52  ;;  %v4713_v54 = vpop.permute.xlu0 %4712  ;;  %v18277_v9 = vld [vmem:[#allocation75_spill] sm:$0xff]  ;;  %v18278_v32 = vld [vmem:[#allocation26_spill] sm:$0xff] }
 0x36f   : > { %18262 = vst [vmem:[#allocation68_spill] sm:$0xff] %v14758_v22  ;;  %v6436_v22 = vunpack.c.l.bf16 %v6229_v46 }
 0x371   : > { %10913 = vset.pattern.permute.xlu2 %v17937_v20  ;;  %v4423_v56 = vpop.f32.mrf.mxu2 }
 0x372   : > { %v3150_v26 = vpop.f32.mrf.mxu3  ;;  %v14781_v50 = vadd.f32 %v4423_v56, %v3972_v44  ;;  %6865 = vperm.xlu2 %10913, %v14743_v42   ;;  %v14784_v47 = vpop.permute.xlu2 %6809  ;;  %v11051_v44 = vld [vmem:[%s17554_s13 + $0x7c] sm:$0xf]  ;;  %v14798_v56 = vunpack.c.l.bf16 %v10628_v23 }
 0x373   : > { %v14772_v29 = vadd.f32 %v3150_v26, %v2332_v0  ;;  %v14786_v43 = vpop.permute.xlu1 %4728  ;;  %v14788_v0 = vunpack.c.h.bf16 %v10628_v23  ;;  %v4940_v26 = vsel %vm2725_vm4, %v18274_v2, %v4939_v15  ;;  %v4718_v15 = vperm.slane %v4713_v54, %v11926_v33 }
 0x374   : > { %18272 = vst [vmem:[#allocation61_spill] sm:$0xff] %v14781_v50  ;;  %10915 = vset.pattern.permute.xlu1 %v17867_v4  ;;  %v4726_v4 = vperm.slane %v14638_v27, %v11926_v33  ;;  %v5018_v23 = vmul.f32 %v14798_v56, %v4940_v26  ;;  %v2335_v2 = vadd.f32 %v14399_v40, %v18278_v32  ;;  %v18281_v40 = vld [vmem:[#allocation76_spill] sm:$0xff] }
 0x375   : > { %18269 = vst [vmem:[#allocation64_spill] sm:$0xff] %v14772_v29  ;;  %4800 = vperm.xlu1 %10915, %v11051_v44   ;;  %v5019_v19 = vmul.f32 %v14788_v0, %v4942_v48  ;;  %9927 = vmatmul.msk.bf16.gmra.mxu2 %vm1899_vm1, %v4329_v25  ;;  %v4220_v48 = vperm.slane %v18277_v9, %v11926_v33  ;;  %v18280_v29 = vld [vmem:[#allocation39_spill] sm:$0xff] }
 0x376   : > { %18273 = vst [vmem:[#allocation33_spill] sm:$0xff] %v14788_v0  ;;  %9946 = vmatmul.msk.bf16.gmra.mxu3 %vm1899_vm1, %v5121_v14  ;;  %v18279_v14 = vld [vmem:[#allocation53_spill] sm:$0xff]  ;;  %v14819_v18 = vunpack.c.l.bf16 %v4726_v4  ;;  %v2260_v32 = vadd.f32 %v18281_v40, %v1957_v39 }
 0x377   : > { %18275 = vst [vmem:[#allocation63_spill] sm:$0xff] %v14798_v56  ;;  %v14815_v44 = vpack.c.bf16 %v5019_v19, %v5018_v23  ;;  %v4212_v50 = vperm.slane %v18279_v14, %v11926_v33  ;;  %v3960_v19 = vpop.f32.mrf.mxu1  ;;  %v4860_v14 = vunpack.c.l.bf16 %v4718_v15  ;;  %v4280_v4 = vunpack.c.l.bf16 %v4220_v48  ;;  %v18284_v48 = vld [vmem:[#allocation29_spill] sm:$0xff]  ;;  %v18286_v56 = vld [vmem:[#allocation52_spill] sm:$0xff] }
 0x378   : > { %v3158_v40 = vadd.f32 %v18284_v48, %v2260_v32  ;;  %v18289_v32 = vld [vmem:[#allocation89_spill] sm:$0xff]  ;;  %v18295_v48 = vrot.slane %v14751_v13, 7  ;;  %v4742_v13 = vperm.slane %v14681_v8, %v11926_v33 }
 0x379   : > { %v4426_v25 = vpop.f32.mrf.mxu2  ;;  %v5126_v46 = vshll.u32 %v14815_v44, 16  ;;  %v4279_v39 = vunpack.c.l.bf16 %v4212_v50  ;;  %v4943_v58 = vrot.slane %v4860_v14, 7  ;;  %v18287_v50 = vld [vmem:[#allocation103_spill] sm:$0xff]  ;;  %v18290_v14 = vrot.slane %v14819_v18, 7 }
 0x37a   : > { %v3153_v27 = vpop.f32.mrf.mxu3  ;;  %v14822_v26 = vadd.f32 %v4426_v25, %v18280_v29  ;;  %10916 = vset.pattern.permute.xlu2 %v17953_v17  ;;  %v3974_v57 = vadd.f32 %v18287_v50, %v18286_v56 }
 0x37b   : > { %v3188_v28 = vadd.f32 %v3153_v27, %v2335_v2  ;;  %v14825_v54 = vpop.permute.xlu2 %4752  ;;  %v6232_v9 = vpop.permute.xlu1 %6231  ;;  %6287 = vperm.xlu2 %10916, %v14559_v10   ;;  %v5456_v2 = vperm.slane %v14732_v12, %v11926_v33  ;;  %v6468_v10 = vmul.f32 %v14287_v6, %v6436_v22  ;;  %v14849_v22 = vrot.slane %v5126_v46, 1  ;;  %v18294_v46 = vld [vmem:[#allocation104_spill] sm:$0xff] }
 0x37c   : > { %v6237_v23 = vperm.slane %v6232_v9, %v11926_v33  ;;  %v18283_v9 = vld [vmem:[#allocation109_spill] sm:$0xff] }
 0x37d   : > { %10917 = vset.pattern.permute.xlu1 %v17953_v17  ;;  %v14833_v29 = vadd.f32 %v3960_v19, %v3188_v28  ;;  %v2337_v15 = vadd.f32 %v14426_v31, %v18283_v9  ;;  %v10629_v28 = vld [vmem:[#allocation2 + $0x58] sm:$0xff]   ;;  %v5122_v31 = vshrl.u32 %v14738_v21, 16  ;;  %v18293_v9 = vld [vmem:[#allocation98_spill] sm:$0xff] }
 0x37e   : > { %v6437_v27 = vunpack.c.l.bf16 %v6237_v23  ;;  %6295 = vperm.xlu1 %10917, %v14587_v53   ;;  %v18285_v19 = vld [vmem:[#allocation17_spill] sm:$0xff]  ;;  %v1959_v53 = vpop.f32.mrf.mxu0 }
 0x37f   : > { %18282 = vst [vmem:[#allocation97_spill] sm:$0xff] %v14833_v29  ;;  %v4312_v23 = vmul.f32 %v18285_v19, %v4280_v4  ;;  %v5637_v29 = vunpack.c.l.bf16 %v5456_v2  ;;  %v4946_v4 = vsel %vm2725_vm4, %v4943_v58, %v18290_v14  ;;  %v2262_v56 = vadd.f32 %v18293_v9, %v1959_v53  ;;  %v14872_v19 = vld [vmem:[%s17554_s13 + $0x48] sm:$0xf] }
 0x380   : > { %v6469_v12 = vmul.f32 %v14372_v16, %v6437_v27  ;;  %v4311_v16 = vmul.f32 %v18289_v32, %v4279_v39  ;;  %v14857_v27 = vunpack.c.h.bf16 %v10629_v28  ;;  %v5124_v21 = vor.u32 %v5122_v31, %v14775_v52  ;;  %v18299_v32 = vld [vmem:[#allocation81_spill] sm:$0xff] }
 0x381   : > { %v4428_v6 = vpop.f32.mrf.mxu2  ;;  %v3965_v39 = vadd.f32 %v18294_v46, %v3158_v40  ;;  %v4734_v40 = vperm.slane %v14786_v43, %v11926_v33  ;;  %v18298_v43 = vld [vmem:[#allocation111_spill] sm:$0xff]  ;;  %v4228_v8 = vperm.slane %v18299_v32, %v11926_v33 }
 0x382   : > { %v3155_v0 = vpop.f32.mrf.mxu3  ;;  %v6497_v25 = vpack.c.bf16 %v6469_v12, %v6468_v10  ;;  %v14855_v2 = vadd.f32 %v4428_v6, %v3974_v57  ;;  %18292 = vst [vmem:[#allocation108_spill] sm:$0xff] %v14857_v27  ;;  %v4944_v57 = vsel %vm2725_vm4, %v18295_v48, %v4943_v58  ;;  %v5710_v12 = vrot.slane %v5637_v29, 1 }
 0x383   : > { %v14846_v41 = vadd.f32 %v3155_v0, %v2337_v15  ;;  %10918 = vset.pattern.permute.xlu2 %v17971_v60  ;;  %v4330_v15 = vpack.c.bf16 %v4312_v23, %v4311_v16  ;;  %v5021_v52 = vmul.f32 %v14857_v27, %v4946_v4  ;;  %v5129_v58 = vsel %vm2876_vm5, %v5124_v21, %v14849_v22 }
 0x384   : > { %18291 = vst [vmem:[#allocation80_spill] sm:$0xff] %v14855_v2  ;;  %v14861_v0 = vpop.permute.xlu2 %6247  ;;  %v5459_v10 = vpop.permute.xlu1 %5458  ;;  %9990 = vmatmul.msk.bf16.gmra.mxu1 %vm1899_vm1, %v6497_v25  ;;  %5514 = vperm.xlu2 %10918, %v14872_v19   ;;  %v14876_v25 = vunpack.c.l.bf16 %v10629_v28  ;;  %v18297_v28 = vld [vmem:[#allocation25_spill] sm:$0xff]  ;;  %v3159_v6 = vadd.f32 %v18298_v43, %v2262_v56  ;;  %v4486_v31 = vadd.f32 %v14474_v11, %v3965_v39  ;;  %v18300_v16 = vrot.slane %v14571_v51, 1 }
 0x385   : > { %18288 = vst [vmem:[#allocation70_spill] sm:$0xff] %v14846_v41  ;;  %v5464_v53 = vperm.slane %v5459_v10, %v11926_v33  ;;  %9928 = vmatmul.msk.bf16.gmra.mxu2 %vm1899_vm1, %v4330_v15  ;;  %v4236_v23 = vperm.slane %v18297_v28, %v11926_v33  ;;  %v4862_v21 = vunpack.c.l.bf16 %v4734_v40  ;;  %v14906_v56 = vunpack.c.l.bf16 %v4742_v13  ;;  %v18302_v39 = vld [vmem:[#allocation41_spill] sm:$0xff] }
 0x386   : > { %18296 = vst [vmem:[#allocation34_spill] sm:$0xff] %v14876_v25  ;;  %10920 = vset.pattern.permute.xlu1 %v17937_v20  ;;  %9947 = vmatmul.msk.bf16.gmra.mxu3 %vm1899_vm1, %v5129_v58  ;;  %v5020_v50 = vmul.f32 %v14876_v25, %v4944_v57  ;;  %v5711_v14 = vsel %vm1396_vm2, %v18300_v16, %v5710_v12  ;;  %v4281_v40 = vunpack.c.l.bf16 %v4228_v8 }
 0x387   : > { %v14886_v29 = vunpack.c.l.bf16 %v5464_v53  ;;  %6873 = vperm.xlu1 %10920, %v14872_v19   ;;  %v4282_v51 = vunpack.c.l.bf16 %v4236_v23  ;;  %v5797_v57 = vmul.f32 %v14448_v35, %v5711_v14 }
 0x388   : > { %v14902_v10 = vpack.c.bf16 %v5021_v52, %v5020_v50  ;;  %v18303_v52 = vld [vmem:[#allocation105_spill] sm:$0xff]  ;;  %v4947_v50 = vrot.slane %v4862_v21, 7  ;;  %v18305_v21 = vld [vmem:[#allocation90_spill] sm:$0xff] }
 0x389   : > { %v17690_v4 = vrot.slane %v14886_v29, 1  ;;  %v4431_v46 = vpop.f32.mrf.mxu2  ;;  %v3966_v58 = vadd.f32 %v18303_v52, %v3159_v6 }
 0x38a   : > { %v5255_v9 = vpop.f32.mrf.mxu3  ;;  %v14912_v48 = vadd.f32 %v4431_v46, %v18302_v39  ;;  %v5134_v23 = vshll.u32 %v14902_v10, 16  ;;  %v4313_v46 = vmul.f32 %v18305_v21, %v4281_v40  ;;  %v18311_v21 = vrot.slane %v14906_v56, 7 }
 0x38b   : > { %v14904_v15 = vadd.f32 %v5255_v9, %v4486_v31  ;;  %v5713_v11 = vsel %vm1396_vm2, %v5710_v12, %v17690_v4  ;;  %v14925_v12 = vld [vmem:[%s17554_s13 + $0x4c] sm:$0xf]  ;;  %v18304_v31 = vld [vmem:[#allocation35_spill] sm:$0xff]  ;;  %v4487_v8 = vadd.f32 %v14511_v62, %v3966_v58 }
 0x38c   : > { %v5798_v53 = vmul.f32 %v14450_v38, %v5713_v11  ;;  %10921 = vset.pattern.permute.xlu2 %v17937_v20  ;;  %v4314_v32 = vmul.f32 %v18304_v31, %v4282_v51  ;;  %v10645_v9 = vld [vmem:[#allocation2 + $0x60] sm:$0xff]   ;;  %v5130_v51 = vshrl.u32 %v14815_v44, 16  ;;  %v18309_v31 = vrot.slane %v14819_v18, 7 }
 0x38d   : > { %18301 = vst [vmem:[#allocation79_spill] sm:$0xff] %v14904_v15  ;;  %v14918_v28 = vpop.permute.xlu2 %6825  ;;  %v14920_v13 = vpop.permute.xlu1 %4744  ;;  %6881 = vperm.xlu2 %10921, %v14925_v12   ;;  %v18306_v11 = vld [vmem:[#allocation74_spill] sm:$0xff]  ;;  %v14945_v6 = vrot.slane %v5134_v23, 1  ;;  %v14959_v23 = vunpack.c.h.bf16 %v10645_v9 }
 0x38e   : > { %v5825_v43 = vpack.c.bf16 %v5798_v53, %v5797_v57  ;;  %v6735_v39 = vperm.slane %v18306_v11, %v11926_v33  ;;  %v18307_v57 = vld [vmem:[#allocation96_spill] sm:$0xff]  ;;  %v18308_v53 = vld [vmem:[#allocation69_spill] sm:$0xff]  ;;  %v4948_v62 = vsel %vm2725_vm4, %v18309_v31, %v4947_v50  ;;  %v6253_v11 = vperm.slane %v14861_v0, %v11926_v33  ;;  %v10245_v18 = vld [vmem:[%s17825_s4 + $0x88] sm:$0xff] }
 0x38f   : > { %10922 = vset.pattern.permute.xlu1 %v17953_v17  ;;  %v3976_v52 = vadd.f32 %v18308_v53, %v18307_v57  ;;  %18313 = vst [vmem:[#allocation114_spill] sm:$0xff] %v14959_v23  ;;  %v4331_v53 = vpack.c.bf16 %v4314_v32, %v4313_v46  ;;  %v5132_v0 = vor.u32 %v5130_v51, %v14849_v22 }
 0x390   : > { %v5886_v16 = vshrl.u32 %v5825_v43, 16  ;;  %v5889_v14 = vshll.u32 %v5825_v43, 16  ;;  %6303 = vperm.xlu1 %10922, %v14705_v7   ;;  %v4950_v7 = vsel %vm2725_vm4, %v4947_v50, %v18311_v21  ;;  %v14965_v31 = vunpack.c.l.bf16 %v6735_v39  ;;  %7429 = vmatpush.bf16.msrb.mxu2 %v10245_v18 }
 0x391   : > { %v4433_v58 = vpop.f32.mrf.mxu2  ;;  %v6439_v46 = vunpack.c.l.bf16 %v6253_v11  ;;  %v4750_v22 = vperm.slane %v14920_v13, %v11926_v33  ;;  %v5137_v51 = vsel %vm2876_vm5, %v5132_v0, %v14945_v6  ;;  %v18318_v11 = vld [vmem:[#allocation67_spill] sm:$0xff] }
 0x392   : > { %v5257_v4 = vpop.f32.mrf.mxu3  ;;  %v5888_v40 = vrot.slane %v5886_v16, 3  ;;  %v14952_v57 = vadd.f32 %v4433_v58, %v3976_v52  ;;  %v5891_v44 = vrot.slane %v5889_v14, 4  ;;  %v18315_v16 = vld [vmem:[#allocation44_spill] sm:$0xff]  ;;  %v14970_v52 = vld [vmem:[#allocation2 + $0xc] sm:$0xf]  ;;  %v7081_v0 = vrot.slane %v14965_v31, 7 }
 0x393   : > { %v14943_v43 = vadd.f32 %v5257_v4, %v4487_v8  ;;  %v5472_v4 = vperm.slane %v14760_v3, %v11926_v33  ;;  %v14961_v8 = vunpack.c.l.bf16 %v10645_v9  ;;  %v6743_v50 = vperm.slane %v18315_v16, %v11926_v33  ;;  %v18316_v58 = vld [vmem:[#allocation83_spill] sm:$0xff] }
 0x394   : > { %18312 = vst [vmem:[#allocation72_spill] sm:$0xff] %v14952_v57  ;;  %v14968_v14 = vor.u32 %v5891_v44, %v5888_v40  ;;  %v6759_v3 = vperm.slane %v18316_v58, %v11926_v33  ;;  %v5023_v9 = vmul.f32 %v14959_v23, %v4950_v7  ;;  %v4758_v16 = vperm.slane %v14825_v54, %v11926_v33  ;;  %v18317_v54 = vld [vmem:[#allocation58_spill] sm:$0xff]  ;;  %v18319_v13 = vld [vmem:[#allocation91_spill] sm:$0xff] }
 0x395   : > { %18310 = vst [vmem:[#allocation102_spill] sm:$0xff] %v14943_v43  ;;  %v5022_v21 = vmul.f32 %v14961_v8, %v4948_v62  ;;  %10923 = vset.pattern.permute.xlu2 %v17953_v17  ;;  %9929 = vmatmul.msk.bf16.gmra.mxu2 %vm1899_vm1, %v4331_v53  ;;  %v4244_v40 = vperm.slane %v18317_v54, %v11926_v33  ;;  %v14990_v7 = vunpack.c.l.bf16 %v6743_v50  ;;  %v6984_v53 = vunpack.c.l.bf16 %v14970_v52  ;;  %v11054_v31 = vld [vmem:[%s17554_s13 + $0x54] sm:$0xf]  ;;  %v10244_v52 = vld [vmem:[%s17825_s4 + $0x80] sm:$0xff] }
 0x396   : > { %18314 = vst [vmem:[#allocation40_spill] sm:$0xff] %v14961_v8  ;;  %v6240_v32 = vpop.permute.xlu1 %6239  ;;  %6311 = vperm.xlu2 %10923, %v14743_v42   ;;  %v14982_v39 = vpop.permute.xlu2 %4760  ;;  %v6751_v44 = vperm.slane %v18318_v11, %v11926_v33  ;;  %9948 = vmatmul.msk.bf16.gmra.mxu3 %vm1899_vm1, %v5137_v51  ;;  %v5893_v42 = vsel %vm2037_vm3, %v14715_v1, %v14968_v14  ;;  %v15006_v51 = vunpack.c.l.bf16 %v6759_v3  ;;  %v15010_v1 = vunpack.c.l.bf16 %v4758_v16  ;;  %v15023_v3 = vld [vmem:[#allocation2 + $0x18] sm:$0xff]   ;;  %v18327_v8 = vld [vmem:[#allocation100_spill] sm:$0xff] }
 0x397   : > { %v6245_v62 = vperm.slane %v6240_v32, %v11926_v33  ;;  %v4252_v18 = vperm.slane %v18319_v13, %v11926_v33  ;;  %9967 = vmatmul.msk.bf16.gmra.mxu0 %vm1899_vm1, %v5893_v42  ;;  %v15004_v32 = vld [vmem:[#allocation2 + $0x10] sm:$0xff]   ;;  %v15008_v54 = vpack.c.bf16 %v5023_v9, %v5022_v21  ;;  %v6471_v21 = vmul.f32 %v14448_v35, %v6439_v46  ;;  %v10631_v9 = vld [vmem:[#allocation2 + $0x68] sm:$0xff]  }
 0x398   : > { %10924 = vset.pattern.permute.xlu1 %v17971_v60  ;;  %v4864_v16 = vunpack.c.l.bf16 %v4750_v22  ;;  %v18321_v42 = vld [vmem:[#allocation59_spill] sm:$0xff]  ;;  %v5639_v57 = vunpack.c.l.bf16 %v5472_v4  ;;  %v4283_v2 = vunpack.c.l.bf16 %v4244_v40  ;;  %7430 = vmatpush.bf16.msrb.mxu2 %v10244_v52  ;;  %v10468_v15 = vunpack.c.h.bf16 %v15004_v32 }
 0x399   : > { %v6438_v58 = vunpack.c.l.bf16 %v6245_v62  ;;  %v4436_v11 = vpop.f32.mrf.mxu2  ;;  %5538 = vperm.xlu1 %10924, %v11054_v31   ;;  %v15021_v62 = vpop.permute.xlu0 %4768  ;;  %v7082_v31 = vrot.slane %v14990_v7, 7  ;;  %v4284_v43 = vunpack.c.l.bf16 %v4252_v18  ;;  %v10467_v41 = vunpack.c.l.bf16 %v15004_v32  ;;  %v18323_v32 = vld [vmem:[#allocation18_spill] sm:$0xff] }
 0x39a   : > { %v5260_v50 = vpop.f32.mrf.mxu3  ;;  %v10471_v46 = vunpack.c.l.bf16 %v15023_v3  ;;  %v15036_v22 = vunpack.c.l.bf16 %v10631_v9  ;;  %v15039_v40 = vunpack.c.h.bf16 %v10631_v9  ;;  %v4951_v7 = vrot.slane %v4864_v16, 7  ;;  %v18324_v16 = vld [vmem:[#allocation78_spill] sm:$0xff] }
 0x39b   : > { %v15013_v13 = vadd.f32 %v5260_v50, %v14569_v55  ;;  %v6470_v55 = vmul.f32 %v14360_v63, %v6438_v58  ;;  %v15028_v50 = vadd.f32 %v4436_v11, %v18321_v42  ;;  %v7083_v35 = vsel %vm2725_vm4, %v7081_v0, %v7082_v31 }
 0x39c   : > { %v5142_v18 = vshll.u32 %v15008_v54, 16  ;;  %v5714_v58 = vrot.slane %v5639_v57, 1  ;;  %v4315_v11 = vmul.f32 %v4283_v2, %v18323_v32  ;;  %v7177_v4 = vmul.f32 %v7081_v0, %v6984_v53  ;;  %v18326_v57 = vld [vmem:[#allocation101_spill] sm:$0xff] }
 0x39d   : > { %18320 = vst [vmem:[#allocation85_spill] sm:$0xff] %v15013_v13  ;;  %v7019_v13 = vunpack.c.l.bf16 %v6751_v44  ;;  %v6498_v23 = vpack.c.bf16 %v6471_v21, %v6470_v55  ;;  %v15048_v21 = vld [vmem:[%s17554_s13 + $0x50] sm:$0xf]  ;;  %v18325_v55 = vunpack.c.l.bf16 %v18324_v16  ;;  %v3978_v2 = vadd.f32 %v18327_v8, %v18326_v57 }
 0x39e   : > { %18322 = vst [vmem:[#allocation93_spill] sm:$0xff] %v15028_v50  ;;  %10925 = vset.pattern.permute.xlu2 %v17937_v20  ;;  %v18328_v32 = vrot.slane %v15006_v51, 7  ;;  %v18330_v8 = vrot.slane %v15010_v1, 7 }
 0x39f   : > { %v5475_v44 = vpop.permute.xlu1 %5474  ;;  %9991 = vmatmul.msk.bf16.gmra.mxu1 %vm1899_vm1, %v6498_v23  ;;  %v7084_v52 = vrot.slane %v7019_v13, 7  ;;  %6889 = vperm.xlu2 %10925, %v15048_v21   ;;  %v4316_v42 = vmul.f32 %v4284_v43, %v18325_v55  ;;  %v7178_v23 = vmul.f32 %v10467_v41, %v7083_v35  ;;  %v15054_v63 = vpop.permute.xlu2 %6263  ;;  %v5138_v41 = vshrl.u32 %v14902_v10, 16 }
 0x3a0   : > { %v5480_v9 = vperm.slane %v5475_v44, %v11926_v33  ;;  %v18329_v43 = vrot.slane %v14906_v56, 7  ;;  %v4954_v0 = vsel %vm2725_vm4, %v4951_v7, %v18330_v8  ;;  %v18333_v10 = vrot.slane %v14886_v29, 1  ;;  %v18334_v8 = vld [vmem:[#allocation82_spill] sm:$0xff] }
 0x3a1   : > { %v7087_v27 = vsel %vm2725_vm4, %v7084_v52, %v18328_v32  ;;  %v4438_v50 = vpop.f32.mrf.mxu2  ;;  %10927 = vset.pattern.permute.xlu1 %v17953_v17  ;;  %v7085_v55 = vsel %vm2725_vm4, %v7082_v31, %v7084_v52  ;;  %v5025_v31 = vmul.f32 %v15039_v40, %v4954_v0 }
 0x3a2   : > { %v5262_v13 = vpop.f32.mrf.mxu3  ;;  %v15061_v25 = vunpack.c.l.bf16 %v5480_v9  ;;  %v4952_v53 = vsel %vm2725_vm4, %v18329_v43, %v4951_v7  ;;  %v15074_v35 = vadd.f32 %v4438_v50, %v3978_v2  ;;  %6319 = vperm.xlu1 %10927, %v14872_v19   ;;  %v15077_v9 = vrot.slane %v5142_v18, 1 }
 0x3a3   : > { %v15064_v44 = vadd.f32 %v5262_v13, %v14612_v61  ;;  %v18332_v61 = vld [vmem:[#allocation66_spill] sm:$0xff]  ;;  %v5715_v56 = vsel %vm1396_vm2, %v18333_v10, %v5714_v58  ;;  %v15086_v13 = vpop.permute.xlu0 %6817  ;;  %v4332_v7 = vpack.c.bf16 %v4316_v42, %v4315_v11  ;;  %v7180_v50 = vmul.f32 %v10471_v46, %v7087_v27 }
 0x3a4   : > { %18331 = vst [vmem:[#allocation30_spill] sm:$0xff] %v15074_v35  ;;  %v6767_v16 = vperm.slane %v18332_v61, %v11926_v33  ;;  %v17700_v57 = vrot.slane %v15061_v25, 1  ;;  %v6775_v19 = vperm.slane %v14458_v37, %v11926_v33  ;;  %v5140_v18 = vor.u32 %v5138_v41, %v14945_v6 }
 0x3a5   : > { %v15091_v2 = vpack.c.bf16 %v7178_v23, %v7177_v4  ;;  %v5024_v32 = vmul.f32 %v15036_v22, %v4952_v53  ;;  %v7179_v52 = vmul.f32 %v10468_v15, %v7085_v55  ;;  %v5799_v43 = vmul.f32 %v14528_v24, %v5715_v56  ;;  %9930 = vmatmul.msk.bf16.gmra.mxu2 %vm1899_vm1, %v4332_v7  ;;  %v15130_v56 = vld [vmem:[#allocation2 + $0x20] sm:$0xff]   ;;  %v11056_v7 = vld [vmem:[%s17554_s13 + $0x58] sm:$0xf] }
 0x3a6   : > { %v5717_v29 = vsel %vm1396_vm2, %v5714_v58, %v17700_v57  ;;  %v5145_v37 = vsel %vm2876_vm5, %v5140_v18, %v15077_v9  ;;  %v4774_v6 = vperm.slane %v15021_v62, %v11926_v33  ;;  %v4766_v46 = vperm.slane %v14982_v39, %v11926_v33 }
 0x3a7   : > { %v5800_v27 = vmul.f32 %v14530_v45, %v5717_v29  ;;  %9949 = vmatmul.msk.bf16.gmra.mxu3 %vm1899_vm1, %v5145_v37  ;;  %10928 = vset.pattern.permute.xlu2 %v17953_v17  ;;  %v15109_v15 = vpack.c.bf16 %v7180_v50, %v7179_v52  ;;  %v15111_v4 = vunpack.c.l.bf16 %v6775_v19  ;;  %v7021_v23 = vunpack.c.l.bf16 %v6767_v16 }
 0x3a8   : > { %6327 = vperm.xlu2 %10928, %v14925_v12   ;;  %v15114_v11 = vpop.permute.xlu2 %5490  ;;  %v15116_v42 = vpop.permute.xlu1 %6833  ;;  %v7234_v62 = vshll.u32 %v15091_v2, 16  ;;  %v15119_v41 = vpack.c.bf16 %v5025_v31, %v5024_v32  ;;  %v15128_v10 = vunpack.c.l.bf16 %v4774_v6  ;;  %v4866_v16 = vunpack.c.l.bf16 %v4766_v46 }
 0x3a9   : > { %v5826_v58 = vpack.c.bf16 %v5800_v27, %v5799_v43  ;;  %v4441_v39 = vpop.f32.mrf.mxu2  ;;  %v7239_v50 = vshll.u32 %v15109_v15, 16  ;;  %v17699_v19 = vrot.slane %v15111_v4, 7  ;;  %v7088_v31 = vrot.slane %v7021_v23, 7  ;;  %v18336_v23 = vld [vmem:[#allocation73_spill] sm:$0xff] }
 0x3aa   : > { %v5265_v53 = vpop.f32.mrf.mxu3  ;;  %v15122_v0 = vadd.f32 %v4441_v39, %v18334_v8  ;;  %10929 = vset.pattern.permute.xlu1 %v17971_v60  ;;  %v10472_v29 = vunpack.c.h.bf16 %v15023_v3  ;;  %v6269_v52 = vperm.slane %v15054_v63, %v11926_v33  ;;  %v7236_v27 = vrot.slane %v7234_v62, 1  ;;  %v18337_v8 = vld [vmem:[#allocation21_spill] sm:$0xff] }
 0x3ab   : > { %v15125_v61 = vadd.f32 %v5265_v53, %v14667_v59  ;;  %v5895_v12 = vshrl.u32 %v5826_v58, 16  ;;  %v5898_v55 = vshll.u32 %v5826_v58, 16  ;;  %5546 = vperm.xlu1 %10929, %v11056_v7   ;;  %v10632_v59 = vld [vmem:[#allocation2 + $0x70] sm:$0xff]   ;;  %v15140_v43 = vpop.permute.xlu0 %6841  ;;  %v10475_v37 = vunpack.c.l.bf16 %v15130_v56 }
 0x3ac   : > { %v5150_v46 = vshll.u32 %v15119_v41, 16  ;;  %v15147_v39 = vunpack.c.l.bf16 %v10632_v59  ;;  %v4955_v53 = vrot.slane %v4866_v16, 7  ;;  %v3980_v3 = vadd.f32 %v18337_v8, %v18336_v23 }
 0x3ad   : > { %18335 = vst [vmem:[#allocation115_spill] sm:$0xff] %v15125_v61  ;;  %v5897_v18 = vrot.slane %v5895_v12, 3  ;;  %v5900_v32 = vrot.slane %v5898_v55, 4  ;;  %v7232_v12 = vshrl.u32 %v15091_v2, 16  ;;  %v15152_v63 = vrot.slane %v7239_v50, 1 }
 0x3ae   : > { %v7091_v62 = vsel %vm2725_vm4, %v7088_v31, %v17699_v19  ;;  %v18338_v16 = vrot.slane %v15006_v51, 7  ;;  %v6441_v2 = vunpack.c.l.bf16 %v6269_v52  ;;  %v15169_v50 = vld [vmem:[%s17554_s13 + $0x5c] sm:$0xf]  ;;  %v15181_v52 = vrot.slane %v5150_v46, 1 }
 0x3af   : > { %v15143_v6 = vor.u32 %v5900_v32, %v5897_v18  ;;  %v15164_v32 = vunpack.c.h.bf16 %v10632_v59  ;;  %v18340_v57 = vrot.slane %v15010_v1, 7  ;;  %v18341_v35 = vrot.slane %v15128_v10, 7 }
 0x3b0   : > { %10930 = vset.pattern.permute.xlu2 %v17971_v60  ;;  %v7089_v18 = vsel %vm2725_vm4, %v18338_v16, %v7088_v31  ;;  %v5146_v31 = vshrl.u32 %v15008_v54, 16  ;;  %v7182_v16 = vmul.f32 %v10475_v37, %v7091_v62  ;;  %v18342_v62 = vld [vmem:[#allocation31_spill] sm:$0xff] }
 0x3b1   : > { %v6256_v55 = vpop.permute.xlu1 %6255  ;;  %v5902_v7 = vsel %vm2037_vm3, %v14968_v14, %v15143_v6  ;;  %5554 = vperm.xlu2 %10930, %v15169_v50   ;;  %v15172_v23 = vpop.permute.xlu2 %4776  ;;  %v7237_v14 = vor.u32 %v7236_v27, %v7232_v12  ;;  %v4956_v58 = vsel %vm2725_vm4, %v18340_v57, %v4955_v53  ;;  %v7181_v27 = vmul.f32 %v10472_v29, %v7089_v18 }
 0x3b2   : > { %v4443_v8 = vpop.f32.mrf.mxu2  ;;  %v6261_v19 = vperm.slane %v6256_v55, %v11926_v33  ;;  %9968 = vmatmul.msk.bf16.gmra.mxu0 %vm1899_vm1, %v5902_v7  ;;  %v15178_v59 = vpop.f32.mrf.mxu3  ;;  %v4958_v55 = vsel %vm2725_vm4, %v4955_v53, %v18341_v35  ;;  %v5148_v54 = vor.u32 %v5146_v31, %v15077_v9  ;;  %v6791_v57 = vperm.slane %v14493_v36, %v11926_v33 }
 0x3b3   : > { %v15176_v51 = vadd.f32 %v4443_v8, %v3980_v3  ;;  %10931 = vset.pattern.permute.xlu1 %v17937_v20  ;;  %v5496_v3 = vperm.slane %v15114_v11, %v11926_v33  ;;  %v7242_v1 = vsel %vm2876_vm5, %v7237_v14, %v15152_v63  ;;  %v6783_v35 = vperm.slane %v14590_v49, %v11926_v33  ;;  %v6280_v36 = vpop.permute.xlu0 %6279 }
 0x3b4   : > { %v6440_v61 = vunpack.c.l.bf16 %v6261_v19  ;;  %6913 = vperm.xlu1 %10931, %v15169_v50   ;;  %v6473_v19 = vmul.f32 %v14528_v24, %v6441_v2  ;;  %v5026_v37 = vmul.f32 %v15147_v39, %v4956_v58  ;;  %v5027_v11 = vmul.f32 %v15164_v32, %v4958_v55 }
 0x3b5   : > { %18339 = vst [vmem:[#allocation45_spill] sm:$0xff] %v15176_v51  ;;  %v5153_v9 = vsel %vm2876_vm5, %v5148_v54, %v15181_v52  ;;  %10011 = vmatmul.msk.bf16.vlgmr.msrb.gmra.mxu2 %vm1899_vm1, %v7242_v1  ;;  %v15207_v46 = vpack.c.bf16 %v7182_v16, %v7181_v27  ;;  %v15210_v49 = vunpack.c.l.bf16 %v5496_v3  ;;  %v15212_v24 = vunpack.c.l.bf16 %v6791_v57  ;;  %v15235_v1 = vld [vmem:[%s17554_s13 + $0x60] sm:$0xf] }
 0x3b6   : > { %v6472_v29 = vmul.f32 %v14450_v38, %v6440_v61  ;;  %v7023_v38 = vunpack.c.l.bf16 %v6783_v35  ;;  %v15216_v12 = vpack.c.bf16 %v5027_v11, %v5026_v37  ;;  %v6285_v14 = vperm.slane %v6280_v36, %v11926_v33  ;;  %v15241_v37 = vld [vmem:[#allocation2 + $0x28] sm:$0xff]  }
 0x3b7   : > { %9950 = vmatmul.msk.bf16.gmra.mxu3 %vm1899_vm1, %v5153_v9  ;;  %v7247_v55 = vshll.u32 %v15207_v46, 16  ;;  %v5720_v27 = vrot.slane %v15210_v49, 1  ;;  %v7094_v54 = vrot.slane %v15212_v24, 7  ;;  %v7243_v35 = vshrl.u32 %v15109_v15, 16 }
 0x3b8   : > { %v6499_v53 = vpack.c.bf16 %v6473_v19, %v6472_v29  ;;  %v5158_v57 = vshll.u32 %v15216_v12, 16  ;;  %v6443_v19 = vunpack.c.l.bf16 %v6285_v14  ;;  %v10476_v29 = vunpack.c.h.bf16 %v15130_v56 }
 0x3b9   : > { %10932 = vset.pattern.permute.xlu2 %v17953_v17  ;;  %v15243_v9 = vrot.slane %v7247_v55, 1  ;;  %v7245_v15 = vor.u32 %v7243_v35, %v15152_v63  ;;  %v18347_v56 = vrot.slane %v15111_v4, 7  ;;  %v10479_v55 = vunpack.c.l.bf16 %v15241_v37 }
 0x3ba   : > { %v4446_v61 = vpop.f32.mrf.mxu2  ;;  %v5483_v58 = vpop.permute.xlu1 %5482  ;;  %9992 = vmatmul.msk.bf16.gmra.mxu1 %vm1899_vm1, %v6499_v53  ;;  %6335 = vperm.xlu2 %10932, %v15048_v21   ;;  %v7092_v21 = vrot.slane %v7023_v38, 7  ;;  %v18344_v53 = vrot.slane %v15061_v25, 1  ;;  %v5154_v63 = vshrl.u32 %v15119_v41, 16  ;;  %v15271_v35 = vrot.slane %v5158_v57, 1 }
 0x3bb   : > { %v15219_v7 = vadd.f32 %v4446_v61, %v18342_v62  ;;  %v5270_v18 = vpop.f32.mrf.mxu3  ;;  %v6272_v2 = vpop.permute.xlu2 %6271  ;;  %v5488_v8 = vperm.slane %v5483_v58, %v11926_v33  ;;  %v18345_v61 = vld [vmem:[#allocation92_spill] sm:$0xff]  ;;  %v18346_v58 = vld [vmem:[#allocation71_spill] sm:$0xff]  ;;  %v4782_v57 = vperm.slane %v15172_v23, %v11926_v33 }
 0x3bc   : > { %v15225_v31 = vadd.f32 %v5270_v18, %v14754_v34  ;;  %v6277_v16 = vperm.slane %v6272_v2, %v11926_v33  ;;  %10934 = vset.pattern.permute.xlu1 %v17971_v60  ;;  %v3982_v62 = vadd.f32 %v18346_v58, %v18345_v61  ;;  %v7093_v18 = vsel %vm2725_vm4, %v18347_v56, %v7092_v21 }
 0x3bd   : > { %v5641_v3 = vunpack.c.l.bf16 %v5488_v8  ;;  %5562 = vperm.xlu1 %10934, %v15235_v1   ;;  %v7095_v2 = vsel %vm2725_vm4, %v7092_v21, %v7094_v54  ;;  %v18348_v8 = vld [vmem:[#allocation50_spill] sm:$0xff]  ;;  %v6475_v21 = vmul.f32 %v14614_v5, %v6443_v19  ;;  %v7250_v58 = vsel %vm2876_vm5, %v7245_v15, %v15243_v9 }
 0x3be   : > { %18343 = vst [vmem:[#allocation32_spill] sm:$0xff] %v15225_v31  ;;  %v6442_v11 = vunpack.c.l.bf16 %v6277_v16  ;;  %v7184_v41 = vmul.f32 %v10479_v55, %v7095_v2 }
 0x3bf   : > { %v5718_v34 = vrot.slane %v5641_v3, 1 }
 0x3c1   : > { %v5719_v36 = vsel %vm1396_vm2, %v18344_v53, %v5718_v34  ;;  %v5721_v38 = vsel %vm1396_vm2, %v5718_v34, %v5720_v27  ;;  %v6474_v53 = vmul.f32 %v14530_v45, %v6442_v11  ;;  %v18351_v45 = vld [vmem:[#allocation43_spill] sm:$0xff]  ;;  %v6799_v11 = vperm.slane %v14747_v30, %v11926_v33 }
 0x3c2   : > { %v5801_v25 = vmul.f32 %v14614_v5, %v5719_v36  ;;  %v5802_v14 = vmul.f32 %v18348_v8, %v5721_v38  ;;  %v4448_v16 = vpop.f32.mrf.mxu2  ;;  %10935 = vset.pattern.permute.xlu2 %v17971_v60  ;;  %v15278_v38 = vld [vmem:[%s17554_s13 + $0x64] sm:$0xf]  ;;  %v5156_v5 = vor.u32 %v5154_v63, %v15181_v52  ;;  %v6807_v19 = vperm.slane %v18351_v45, %v11926_v33  ;;  %v18352_v63 = vld [vmem:[#allocation60_spill] sm:$0xff] }
 0x3c3   : > { %v15263_v3 = vadd.f32 %v4448_v16, %v3982_v62  ;;  %v15265_v34 = vpop.f32.mrf.mxu3  ;;  %v15268_v4 = vpop.permute.xlu1 %6849  ;;  %5570 = vperm.xlu2 %10935, %v15278_v38   ;;  %v7183_v62 = vmul.f32 %v10476_v29, %v7093_v18  ;;  %v6500_v23 = vpack.c.bf16 %v6475_v21, %v6474_v53  ;;  %v4868_v18 = vunpack.c.l.bf16 %v4782_v57 }
 0x3c4   : > { %18350 = vst [vmem:[#allocation16_spill] sm:$0xff] %v15265_v34  ;;  %v5827_v36 = vpack.c.bf16 %v5802_v14, %v5801_v25  ;;  %v5507_v61 = vpop.permute.xlu2 %5506  ;;  %v5161_v15 = vsel %vm2876_vm5, %v5156_v5, %v15271_v35  ;;  %v15298_v30 = vunpack.c.l.bf16 %v6807_v19  ;;  %v7025_v14 = vunpack.c.l.bf16 %v6799_v11 }
 0x3c5   : > { %18349 = vst [vmem:[#allocation112_spill] sm:$0xff] %v15263_v3  ;;  %10936 = vset.pattern.permute.xlu1 %v17937_v20  ;;  %10012 = vmatmul.msk.bf16.gmra.mxu2 %vm1899_vm1, %v7250_v58  ;;  %v15296_v2 = vpack.c.bf16 %v7184_v41, %v7183_v62  ;;  %v10633_v41 = vld [vmem:[#allocation2 + $0x78] sm:$0xff]   ;;  %v4959_v57 = vrot.slane %v4868_v18, 7 }
 0x3c6   : > { %v5904_v56 = vshrl.u32 %v5827_v36, 16  ;;  %v5907_v25 = vshll.u32 %v5827_v36, 16  ;;  %6921 = vperm.xlu1 %10936, %v15235_v1   ;;  %v7096_v19 = vrot.slane %v7025_v14, 7  ;;  %v15334_v18 = vunpack.c.h.bf16 %v10633_v41 }
 0x3c7   : > { %9951 = vmatmul.msk.bf16.gmra.mxu3 %vm1899_vm1, %v5161_v15  ;;  %v7255_v11 = vshll.u32 %v15296_v2, 16  ;;  %v15327_v15 = vld [vmem:[#allocation2 + $0x30] sm:$0xff]   ;;  %v7259_v49 = vshrl.u32 %v15296_v2, 16  ;;  %v18367_v51 = vrot.slane %v15298_v30, 7 }
 0x3c8   : > { %v5906_v52 = vrot.slane %v5904_v56, 3  ;;  %v5909_v29 = vrot.slane %v5907_v25, 4  ;;  %v15325_v25 = vunpack.c.l.bf16 %v10633_v41  ;;  %18355 = vst [vmem:[#allocation49_spill] sm:$0xff] %v15334_v18  ;;  %v10480_v41 = vunpack.c.h.bf16 %v15241_v37 }
 0x3c9   : > { %v6823_v37 = vperm.slane %v15086_v13, %v11926_v33 }
 0x3ca   : > { %v4451_v16 = vpop.f32.mrf.mxu2  ;;  %9993 = vmatmul.msk.bf16.gmra.mxu1 %vm1899_vm1, %v6500_v23  ;;  %v15301_v55 = vor.u32 %v5909_v29, %v5906_v52  ;;  %v5512_v23 = vperm.slane %v5507_v61, %v11926_v33  ;;  %v18354_v52 = vrot.slane %v15128_v10, 7  ;;  %v7251_v10 = vshrl.u32 %v15207_v46, 16 }
 0x3cb   : > { %v15304_v36 = vadd.f32 %v4451_v16, %v18352_v63  ;;  %v5275_v58 = vpop.f32.mrf.mxu3  ;;  %10937 = vset.pattern.permute.xlu2 %v17937_v20  ;;  %v18356_v16 = vld [vmem:[#allocation24_spill] sm:$0xff]  ;;  %v18357_v63 = vld [vmem:[#allocation77_spill] sm:$0xff] }
 0x3cc   : > { %v15307_v21 = vadd.f32 %v5275_v58, %v14822_v26  ;;  %v4785_v53 = vpop.permute.xlu1 %4784  ;;  %v5911_v62 = vsel %vm2037_vm3, %v15143_v6, %v15301_v55  ;;  %6929 = vperm.xlu2 %10937, %v15278_v38   ;;  %v15314_v5 = vpop.permute.xlu2 %6865  ;;  %v17701_v26 = vrot.slane %v15298_v30, 7  ;;  %v4960_v29 = vsel %vm2725_vm4, %v18354_v52, %v4959_v57 }
 0x3cd   : > { %v4790_v45 = vperm.slane %v4785_v53, %v11926_v33  ;;  %9969 = vmatmul.msk.bf16.gmra.mxu0 %vm1899_vm1, %v5911_v62  ;;  %v15323_v6 = vpop.permute.xlu0 %4792  ;;  %v3984_v58 = vadd.f32 %v18357_v63, %v18356_v16  ;;  %v7097_v53 = vsel %vm2725_vm4, %v7094_v54, %v7096_v19  ;;  %v15346_v62 = vrot.slane %v7255_v11, 1 }
 0x3ce   : > { %18353 = vst [vmem:[#allocation86_spill] sm:$0xff] %v15307_v21  ;;  %10938 = vset.pattern.permute.xlu1 %v17953_v17  ;;  %v7099_v61 = vsel %vm2725_vm4, %v7096_v19, %v17701_v26  ;;  %v5028_v16 = vmul.f32 %v15325_v25, %v4960_v29  ;;  %v15358_v19 = vunpack.c.l.bf16 %v5512_v23  ;;  %v7253_v11 = vor.u32 %v7251_v10, %v15243_v9  ;;  %v15372_v23 = vld [vmem:[%s17554_s13 + $0x68] sm:$0xf] }
 0x3cf   : > { %v15320_v56 = vunpack.c.l.bf16 %v4790_v45  ;;  %6359 = vperm.xlu1 %10938, %v15169_v50   ;;  %v10483_v45 = vunpack.c.l.bf16 %v15327_v15  ;;  %v7185_v63 = vmul.f32 %v10480_v41, %v7097_v53  ;;  %v15385_v41 = vunpack.c.l.bf16 %v6823_v37 }
 0x3d0   : > { %v7258_v29 = vsel %vm2876_vm5, %v7253_v11, %v15346_v62  ;;  %v18361_v37 = vrot.slane %v15358_v19, 1  ;;  %v7261_v31 = vor.u32 %v7259_v49, %v15346_v62  ;;  %v6831_v62 = vperm.slane %v14918_v28, %v11926_v33  ;;  %v18372_v49 = vld [vmem:[#allocation63_spill] sm:$0xff] }
 0x3d1   : > { %v17702_v14 = vrot.slane %v15320_v56, 7  ;;  %v7186_v26 = vmul.f32 %v10483_v45, %v7099_v61  ;;  %v5162_v61 = vshrl.u32 %v15216_v12, 16 }
 0x3d2   : > { %v4453_v50 = vpop.f32.mrf.mxu2 }
 0x3d3   : > { %v4962_v52 = vsel %vm2725_vm4, %v4959_v57, %v17702_v14  ;;  %v15353_v24 = vadd.f32 %v4453_v50, %v3984_v58  ;;  %v15355_v54 = vpop.f32.mrf.mxu3  ;;  %v6815_v58 = vperm.slane %v14784_v47, %v11926_v33  ;;  %v15387_v45 = vpack.c.bf16 %v7186_v26, %v7185_v63  ;;  %v18360_v14 = vld [vmem:[#allocation84_spill] sm:$0xff] }
 0x3d4   : > { %18359 = vst [vmem:[#allocation22_spill] sm:$0xff] %v15355_v54  ;;  %v5029_v46 = vmul.f32 %v15334_v18, %v4962_v52  ;;  %10939 = vset.pattern.permute.xlu2 %v17971_v60 }
 0x3d5   : > { %18358 = vst [vmem:[#allocation94_spill] sm:$0xff] %v15353_v24  ;;  %v5499_v57 = vpop.permute.xlu1 %5498  ;;  %5578 = vperm.xlu2 %10939, %v15372_v23   ;;  %v15375_v9 = vpop.permute.xlu2 %6287  ;;  %10013 = vmatmul.msk.bf16.gmra.mxu2 %vm1899_vm1, %v7258_v29 }
 0x3d6   : > { %v15367_v50 = vpack.c.bf16 %v5029_v46, %v5028_v16  ;;  %v5504_v13 = vperm.slane %v5499_v57, %v11926_v33  ;;  %v5523_v52 = vpop.permute.xlu0 %5522  ;;  %v7027_v16 = vunpack.c.l.bf16 %v6815_v58  ;;  %v5164_v57 = vor.u32 %v5162_v61, %v15271_v35  ;;  %v18363_v61 = vld [vmem:[#allocation62_spill] sm:$0xff] }
 0x3d7   : > { %10941 = vset.pattern.permute.xlu1 %v17937_v20 }
 0x3d8   : > { %v5643_v53 = vunpack.c.l.bf16 %v5504_v13  ;;  %v5166_v10 = vshll.u32 %v15367_v50, 16  ;;  %6937 = vperm.xlu1 %10941, %v15372_v23   ;;  %v5528_v13 = vperm.slane %v5523_v52, %v11926_v33 }
 0x3da   : > { %v5722_v46 = vrot.slane %v5643_v53, 1  ;;  %v4456_v11 = vpop.f32.mrf.mxu2  ;;  %v15391_v29 = vrot.slane %v5166_v10, 1  ;;  %v15408_v53 = vld [vmem:[#allocation2 + $0x38] sm:$0xff]   ;;  %v18364_v10 = vld [vmem:[#allocation54_spill] sm:$0xff] }
 0x3db   : > { %v15395_v12 = vadd.f32 %v4456_v11, %v18360_v14  ;;  %v5280_v47 = vpop.f32.mrf.mxu3 }
 0x3dc   : > { %v5723_v26 = vsel %vm1396_vm2, %v5720_v27, %v5722_v46  ;;  %v5725_v63 = vsel %vm1396_vm2, %v5722_v46, %v18361_v37  ;;  %v15404_v58 = vadd.f32 %v5280_v47, %v14912_v48  ;;  %v5169_v35 = vsel %vm2876_vm5, %v5164_v57, %v15391_v29  ;;  %v15423_v57 = vld [vmem:[%s17554_s13 + $0x6c] sm:$0xf] }
 0x3dd   : > { %v5803_v14 = vmul.f32 %v18363_v61, %v5723_v26  ;;  %v5804_v52 = vmul.f32 %v18364_v10, %v5725_v63  ;;  %9952 = vmatmul.msk.bf16.gmra.mxu3 %vm1899_vm1, %v5169_v35  ;;  %v7100_v27 = vrot.slane %v7027_v16, 7  ;;  %10942 = vset.pattern.permute.xlu2 %v17937_v20  ;;  %v7263_v48 = vshll.u32 %v15387_v45, 16 }
 0x3de   : > { %18362 = vst [vmem:[#allocation110_spill] sm:$0xff] %v15404_v58  ;;  %v15415_v46 = vpop.permute.xlu1 %6857  ;;  %v4798_v47 = vperm.slane %v15323_v6, %v11926_v33  ;;  %6945 = vperm.xlu2 %10942, %v15423_v57   ;;  %v5515_v26 = vpop.permute.xlu2 %5514  ;;  %v15426_v37 = vunpack.c.l.bf16 %v5528_v13  ;;  %v10484_v16 = vunpack.c.h.bf16 %v15327_v15  ;;  %v10487_v63 = vunpack.c.l.bf16 %v15408_v53  ;;  %v18365_v6 = vld [vmem:[#allocation42_spill] sm:$0xff] }
 0x3df   : > { %v5828_v11 = vpack.c.bf16 %v5804_v52, %v5803_v14  ;;  %v5520_v35 = vperm.slane %v5515_v26, %v11926_v33  ;;  %v18366_v14 = vld [vmem:[#allocation36_spill] sm:$0xff]  ;;  %v7101_v13 = vsel %vm2725_vm4, %v18367_v51, %v7100_v27  ;;  %v18368_v58 = vrot.slane %v15385_v41, 7 }
 0x3e0   : > { %10943 = vset.pattern.permute.xlu1 %v17953_v17  ;;  %v3986_v52 = vadd.f32 %v18366_v14, %v18365_v6  ;;  %v15442_v26 = vrot.slane %v7263_v48, 1  ;;  %v4870_v34 = vunpack.c.l.bf16 %v4798_v47  ;;  %v17705_v30 = vrot.slane %v15426_v37, 1 }
 0x3e1   : > { %v5913_v24 = vshrl.u32 %v5828_v11, 16  ;;  %v5916_v3 = vshll.u32 %v5828_v11, 16  ;;  %v7103_v15 = vsel %vm2725_vm4, %v7100_v27, %v18368_v58  ;;  %v5645_v54 = vunpack.c.l.bf16 %v5520_v35  ;;  %6367 = vperm.xlu1 %10943, %v15235_v1  }
 0x3e2   : > { %v4458_v21 = vpop.f32.mrf.mxu2  ;;  %v7187_v18 = vmul.f32 %v10484_v16, %v7101_v13  ;;  %v7188_v58 = vmul.f32 %v10487_v63, %v7103_v15  ;;  %v6839_v1 = vperm.slane %v15116_v42, %v11926_v33  ;;  %v18371_v48 = vrot.slane %v15358_v19, 1  ;;  %v18373_v16 = vld [vmem:[#allocation33_spill] sm:$0xff] }
 0x3e3   : > { %v15444_v6 = vadd.f32 %v4458_v21, %v3986_v52  ;;  %v15446_v2 = vpop.f32.mrf.mxu3  ;;  %v5915_v11 = vrot.slane %v5913_v24, 3  ;;  %v5918_v14 = vrot.slane %v5916_v3, 4  ;;  %v5726_v51 = vrot.slane %v5645_v54, 1 }
 0x3e4   : > { %18370 = vst [vmem:[#allocation20_spill] sm:$0xff] %v15446_v2  ;;  %v7266_v24 = vsel %vm2876_vm5, %v7261_v31, %v15442_v26  ;;  %v4963_v54 = vrot.slane %v4870_v34, 7  ;;  %v10649_v34 = vld [vmem:[#allocation2 + $0x80] sm:$0xff]   ;;  %v15476_v52 = vpack.c.bf16 %v7188_v58, %v7187_v18  ;;  %v15478_v13 = vunpack.c.l.bf16 %v6839_v1  ;;  %v11062_v18 = vld [vmem:[%s17554_s13 + $0x74] sm:$0xf]  ;;  %v18376_v1 = vld [vmem:[#allocation93_spill] sm:$0xff] }
 0x3e5   : > { %18369 = vst [vmem:[#allocation19_spill] sm:$0xff] %v15444_v6  ;;  %v15450_v27 = vor.u32 %v5918_v14, %v5915_v11  ;;  %v5727_v21 = vsel %vm1396_vm2, %v18371_v48, %v5726_v51  ;;  %v5729_v3 = vsel %vm1396_vm2, %v5726_v51, %v17705_v30  ;;  %10014 = vmatmul.msk.bf16.gmra.mxu2 %vm1899_vm1, %v7266_v24  ;;  %v18374_v14 = vrot.slane %v15320_v56, 7  ;;  %v18375_v48 = vld [vmem:[#allocation38_spill] sm:$0xff]  ;;  %v18380_v30 = vld [vmem:[#allocation48_spill] sm:$0xff] }
 0x3e6   : > { %v5805_v47 = vmul.f32 %v18372_v49, %v5727_v21  ;;  %v5806_v63 = vmul.f32 %v18373_v16, %v5729_v3  ;;  %10944 = vset.pattern.permute.xlu2 %v17953_v17  ;;  %v15495_v56 = vunpack.c.l.bf16 %v10649_v34 }
 0x3e7   : > { %v4801_v42 = vpop.permute.xlu1 %4800  ;;  %6375 = vperm.xlu2 %10944, %v15278_v38   ;;  %v15469_v19 = vpop.permute.xlu2 %6881  ;;  %v5920_v31 = vsel %vm2037_vm3, %v15301_v55, %v15450_v27  ;;  %v7029_v38 = vunpack.c.l.bf16 %v6831_v62  ;;  %v4964_v51 = vsel %vm2725_vm4, %v18374_v14, %v4963_v54  ;;  %v15493_v62 = vunpack.c.h.bf16 %v10649_v34 }
 0x3e8   : > { %v4806_v35 = vperm.slane %v4801_v42, %v11926_v33  ;;  %v5829_v28 = vpack.c.bf16 %v5806_v63, %v5805_v47  ;;  %9970 = vmatmul.msk.bf16.gmra.mxu0 %vm1899_vm1, %v5920_v31  ;;  %v6293_v63 = vperm.slane %v15375_v9, %v11926_v33  ;;  %v17708_v42 = vrot.slane %v15478_v13, 7 }
 0x3e9   : > { %10945 = vset.pattern.permute.xlu1 %v17971_v60  ;;  %18378 = vst [vmem:[#allocation88_spill] sm:$0xff] %v15493_v62  ;;  %v7271_v31 = vshll.u32 %v15476_v52, 16 }
 0x3ea   : > { %v4871_v15 = vunpack.c.l.bf16 %v4806_v35  ;;  %v4461_v11 = vpop.f32.mrf.mxu2  ;;  %5602 = vperm.xlu1 %10945, %v11062_v18   ;;  %v5922_v24 = vshrl.u32 %v5829_v28, 16  ;;  %v5925_v47 = vshll.u32 %v5829_v28, 16  ;;  %v15505_v18 = vld [vmem:[#allocation2 + $0x40] sm:$0xff]   ;;  %v6444_v9 = vunpack.c.l.bf16 %v6293_v63 }
 0x3eb   : > { %v15485_v21 = vadd.f32 %v4461_v11, %v18375_v48  ;;  %v5285_v55 = vpop.f32.mrf.mxu3  ;;  %v4550_v11 = vld [vmem:[#allocation2 + $0x88] sm:$0x1]  ;;  %v7104_v48 = vrot.slane %v7029_v38, 7  ;;  %v15524_v6 = vrot.slane %v7271_v31, 1 }
 0x3ec   : > { %v4965_v58 = vrot.slane %v4871_v15, 7  ;;  %v15491_v3 = vadd.f32 %v5285_v55, %v18376_v1  ;;  %v5030_v15 = vmul.f32 %v15495_v56, %v4964_v51  ;;  %v5924_v34 = vrot.slane %v5922_v24, 3 }
 0x3ed   : > { %v5927_v55 = vrot.slane %v5925_v47, 4  ;;  %v7107_v47 = vsel %vm2725_vm4, %v7104_v48, %v17708_v42  ;;  %v4839_v63 = vunpack.c.l.bf16 %v4550_v11  ;;  %v10491_v42 = vunpack.c.l.bf16 %v15505_v18 }
 0x3ee   : > { %18377 = vst [vmem:[#allocation116_spill] sm:$0xff] %v15491_v3  ;;  %v4966_v35 = vsel %vm2725_vm4, %v4963_v54, %v4965_v58  ;;  %v15512_v54 = vld [vmem:[%s17554_s13 + $0x70] sm:$0xf] }
 0x3ef   : > { %v5031_v14 = vmul.f32 %v15493_v62, %v4966_v35  ;;  %10946 = vset.pattern.permute.xlu2 %v17937_v20  ;;  %v18379_v35 = vld [vmem:[#allocation27_spill] sm:$0xff]  ;;  %v15539_v31 = vor.u32 %v5927_v55, %v5924_v34 }
 0x3f0   : > { %v6296_v28 = vpop.permute.xlu1 %6295  ;;  %6953 = vperm.xlu2 %10946, %v15512_v54   ;;  %v15515_v51 = vpop.permute.xlu2 %6311  ;;  %v3988_v24 = vadd.f32 %v18380_v30, %v18379_v35  ;;  %v18382_v35 = vrot.slane %v15385_v41, 7  ;;  %v7190_v41 = vmul.f32 %v10491_v42, %v7107_v47  ;;  %v15579_v47 = vld [vmem:[%s17554_s13 + $0x78] sm:$0xf] }
 0x3f1   : > { %v15507_v1 = vpack.c.bf16 %v5031_v14, %v5030_v15  ;;  %v6301_v38 = vperm.slane %v6296_v28, %v11926_v33  ;;  %v7267_v14 = vshrl.u32 %v15387_v45, 16  ;;  %v5170_v28 = vshrl.u32 %v15367_v50, 16 }
 0x3f2   : > { %v4463_v15 = vpop.f32.mrf.mxu2  ;;  %10948 = vset.pattern.permute.xlu1 %v17953_v17  ;;  %v7105_v11 = vsel %vm2725_vm4, %v18382_v35, %v7104_v48  ;;  %v5032_v35 = vmul.f32 %v4965_v58, %v4839_v63  ;;  %v5531_v63 = vpop.permute.xlu0 %5530 }
 0x3f3   : > { %v6445_v3 = vunpack.c.l.bf16 %v6301_v38  ;;  %v15526_v2 = vadd.f32 %v4463_v15, %v3988_v24  ;;  %v15528_v62 = vpop.f32.mrf.mxu3  ;;  %v5174_v30 = vshll.u32 %v15507_v1, 16  ;;  %6383 = vperm.xlu1 %10948, %v15372_v23   ;;  %v7269_v45 = vor.u32 %v7267_v14, %v15442_v26 }
 0x3f4   : > { %v6476_v38 = vmul.f32 %v18348_v8, %v6444_v9  ;;  %v5172_v50 = vor.u32 %v5170_v28, %v15391_v29  ;;  %v6855_v23 = vperm.slane %v15268_v4, %v11926_v33  ;;  %v5929_v29 = vsel %vm2037_vm3, %v15450_v27, %v15539_v31  ;;  %v18383_v27 = vld [vmem:[#allocation57_spill] sm:$0xff] }
 0x3f5   : > { %18381 = vst [vmem:[#allocation51_spill] sm:$0xff] %v15526_v2  ;;  %v6477_v24 = vmul.f32 %v18363_v61, %v6445_v3  ;;  %v5176_v15 = vrot.slane %v5174_v30, 1  ;;  %v10488_v2 = vunpack.c.h.bf16 %v15408_v53  ;;  %v7274_v48 = vsel %vm2876_vm5, %v7269_v45, %v15524_v6  ;;  %v15584_v45 = vld [vmem:[#allocation2 + $0x48] sm:$0xff]  }
 0x3f6   : > { %10015 = vmatmul.msk.bf16.gmra.mxu2 %vm1899_vm1, %v7274_v48  ;;  %v6847_v53 = vperm.slane %v15140_v43, %v11926_v33  ;;  %v15565_v58 = vunpack.c.l.bf16 %v6855_v23  ;;  %v5049_v3 = vpack.c.bf16 %v5032_v35, %v5032_v35  ;;  %v7275_v23 = vshrl.u32 %v15476_v52, 16 }
 0x3f7   : > { %v6501_v26 = vpack.c.bf16 %v6477_v24, %v6476_v38  ;;  %v5177_v8 = vsel %vm2876_vm5, %v5172_v50, %v5176_v15  ;;  %v7189_v34 = vmul.f32 %v10488_v2, %v7105_v11  ;;  %v18384_v38 = vld [vmem:[#allocation55_spill] sm:$0xff]  ;;  %v10492_v52 = vunpack.c.h.bf16 %v15505_v18 }
 0x3f8   : > { %9953 = vmatmul.msk.bf16.gmra.mxu3 %vm1899_vm1, %v5177_v8  ;;  %10949 = vset.pattern.permute.xlu2 %v17953_v17  ;;  %v7110_v28 = vrot.slane %v15565_v58, 7  ;;  %v5182_v30 = vshll.u32 %v5049_v3, 16  ;;  %v18385_v24 = vld [vmem:[#allocation47_spill] sm:$0xff]  ;;  %v5536_v3 = vperm.slane %v5531_v63, %v11926_v33 }
 0x3f9   : > { %9971 = vmatmul.msk.bf16.gmra.mxu0 %vm1899_vm1, %v5929_v29  ;;  %v15559_v4 = vpack.c.bf16 %v7190_v41, %v7189_v34  ;;  %6391 = vperm.xlu2 %10949, %v15423_v57   ;;  %v15562_v61 = vpop.permute.xlu2 %6889  ;;  %v15570_v55 = vpop.permute.xlu1 %6873  ;;  %v7031_v57 = vunpack.c.l.bf16 %v6847_v53  ;;  %v3990_v50 = vadd.f32 %v18385_v24, %v18384_v38  ;;  %v5178_v41 = vshrl.u32 %v15507_v1, 16  ;;  %v15605_v1 = vld [vmem:[%s17554_s13 + $0x7c] sm:$0xf] }
 0x3fa   : > { %v4466_v2 = vpop.f32.mrf.mxu2  ;;  %9994 = vmatmul.msk.bf16.gmra.mxu1 %vm1899_vm1, %v6501_v26  ;;  %v5184_v8 = vrot.slane %v5182_v30, 1  ;;  %v10495_v29 = vunpack.c.l.bf16 %v15584_v45  ;;  %v6871_v38 = vperm.slane %v15314_v5, %v11926_v33  ;;  %v5647_v24 = vunpack.c.l.bf16 %v5536_v3 }
 0x3fb   : > { %v15568_v42 = vadd.f32 %v4466_v2, %v18383_v27  ;;  %v5290_v43 = vpop.f32.mrf.mxu3  ;;  %10950 = vset.pattern.permute.xlu1 %v17971_v60  ;;  %v7279_v14 = vshll.u32 %v15559_v4, 16  ;;  %v7108_v11 = vrot.slane %v7031_v57, 7  ;;  %v7277_v2 = vor.u32 %v7275_v23, %v15524_v6 }
 0x3fc   : > { %v15573_v9 = vadd.f32 %v5290_v43, %v15122_v0  ;;  %5610 = vperm.xlu1 %10950, %v15579_v47   ;;  %v6317_v0 = vperm.slane %v15515_v51, %v11926_v33  ;;  %v18387_v27 = vrot.slane %v15478_v13, 7  ;;  %v6863_v6 = vperm.slane %v15415_v46, %v11926_v33 }
 0x3fd   : > { %v15593_v35 = vrot.slane %v7279_v14, 1  ;;  %v7111_v26 = vsel %vm2725_vm4, %v7108_v11, %v7110_v28 }
 0x3fe   : > { %v7109_v43 = vsel %vm2725_vm4, %v18387_v27, %v7108_v11  ;;  %v6447_v57 = vunpack.c.l.bf16 %v6317_v0  ;;  %v7192_v18 = vmul.f32 %v10495_v29, %v7111_v26  ;;  %v7033_v23 = vunpack.c.l.bf16 %v6863_v6 }
 0x3ff   : > { %v7282_v13 = vsel %vm2876_vm5, %v7277_v2, %v15593_v35  ;;  %v7191_v0 = vmul.f32 %v10492_v52, %v7109_v43 }
 0x400   : > { %v6479_v5 = vmul.f32 %v18372_v49, %v6447_v57  ;;  %v5730_v49 = vrot.slane %v5647_v24, 1  ;;  %v7112_v57 = vrot.slane %v7033_v23, 7  ;;  %v10496_v23 = vunpack.c.h.bf16 %v15584_v45 }
 0x401   : > { %10951 = vset.pattern.permute.xlu2 %v17971_v60  ;;  %v5180_v60 = vor.u32 %v5178_v41, %v5176_v15  ;;  %v15619_v15 = vpop.f32.mrf.mxu1  ;;  %v15637_v41 = vpack.c.bf16 %v7192_v18, %v7191_v0  ;;  %v18389_v18 = vrot.slane %v15426_v37, 1  ;;  %v7283_v0 = vshrl.u32 %v15559_v4, 16 }
 0x402   : > { %v4468_v48 = vpop.f32.mrf.mxu2  ;;  %5618 = vperm.xlu2 %10951, %v15605_v1   ;;  %v6304_v53 = vpop.permute.xlu1 %6303  ;;  %v7113_v24 = vsel %vm2725_vm4, %v7110_v28, %v7112_v57 }
 0x403   : > { %v15598_v34 = vadd.f32 %v4468_v48, %v3990_v50  ;;  %v15600_v51 = vpop.f32.mrf.mxu3  ;;  %v15615_v14 = vpop.permute.xlu2 %6327  ;;  %v6309_v30 = vperm.slane %v6304_v53, %v11926_v33  ;;  %v5185_v11 = vsel %vm2876_vm5, %v5180_v60, %v5184_v8  ;;  %v15639_v48 = vunpack.c.l.bf16 %v6871_v38  ;;  %v18388_v8 = vld [vmem:[#allocation46_spill] sm:$0xff] }
 0x404   : > { %10952 = vset.pattern.permute.xlu1 %v17937_v20  ;;  %v15630_v20 = vpop.permute.xlu0 %6897  ;;  %v15635_v50 = vpop.f32.mrf.mxu0  ;;  %v5731_v38 = vsel %vm1396_vm2, %v18389_v18, %v5730_v49  ;;  %v6333_v37 = vperm.slane %v15615_v14, %v11926_v33  ;;  %v7193_v45 = vmul.f32 %v10496_v23, %v7113_v24 }
 0x405   : > { %18386 = vst [vmem:[#allocation107_spill] sm:$0xff] %v15598_v34  ;;  %6977 = vperm.xlu1 %10952, %v15605_v1   ;;  %v6446_v63 = vunpack.c.l.bf16 %v6309_v30  ;;  %v7114_v43 = vrot.slane %v15639_v48, 7  ;;  %v7287_v30 = vshll.u32 %v15637_v41, 16 }
 0x406   : > { %10016 = vmatmul.msk.bf16.gmra.mxu2 %vm1899_vm1, %v7282_v13  ;;  %v18390_v13 = vld [vmem:[#allocation56_spill] sm:$0xff]  ;;  %v6449_v18 = vunpack.c.l.bf16 %v6333_v37 }
 0x407   : > { %v6478_v46 = vmul.f32 %v18364_v10, %v6446_v63  ;;  %v18391_v63 = vld [vmem:[#allocation99_spill] sm:$0xff] }
 0x408   : > { %9954 = vmatmul.msk.bf16.gmra.mxu3 %vm1899_vm1, %v5185_v11  ;;  %v3992_v11 = vadd.f32 %v18391_v63, %v18390_v13 }
 0x409   : > { %v6502_v29 = vpack.c.bf16 %v6479_v5, %v6478_v46  ;;  %v15651_v27 = vpop.f32.mrf.mxu1  ;;  %v7289_v46 = vrot.slane %v7287_v30, 1 }
 0x40a   : > { %v4471_v26 = vpop.f32.mrf.mxu2  ;;  %10953 = vset.pattern.permute.xlu2 %v17953_v17 }
 0x40b   : > { %v15642_v60 = vadd.f32 %v4471_v26, %v18388_v8  ;;  %v5295_v52 = vpop.f32.mrf.mxu3  ;;  %6399 = vperm.xlu2 %10953, %v15512_v54   ;;  %v5539_v10 = vpop.permute.xlu1 %5538  ;;  %9995 = vmatmul.msk.bf16.gmra.mxu1 %vm1899_vm1, %v6502_v29  ;;  %v15659_v54 = vld [vmem:[#allocation2 + $0x50] sm:$0xff]   ;;  %v18394_v29 = vld [vmem:[#allocation34_spill] sm:$0xff] }
 0x40c   : > { %v15646_v53 = vadd.f32 %v5295_v52, %v15219_v7  ;;  %v5555_v2 = vpop.permute.xlu2 %5554  ;;  %v5544_v3 = vperm.slane %v5539_v10, %v11926_v33  ;;  %v10499_v26 = vunpack.c.l.bf16 %v15659_v54  ;;  %v5807_v8 = vmul.f32 %v18394_v29, %v5731_v38  ;;  %v15688_v52 = vpop.f32.mrf.mxu0  ;;  %v18395_v10 = vld [vmem:[#allocation108_spill] sm:$0xff] }
 0x40d   : > { %10955 = vset.pattern.permute.xlu1 %v17953_v17  ;;  %v15668_v17 = vpop.permute.xlu0 %6905  ;;  %v6887_v38 = vperm.slane %v15469_v19, %v11926_v33  ;;  %v5560_v37 = vperm.slane %v5555_v2, %v11926_v33  ;;  %v6481_v23 = vmul.f32 %v18394_v29, %v6449_v18 }
 0x40e   : > { %v15656_v7 = vunpack.c.l.bf16 %v5544_v3  ;;  %6415 = vperm.xlu1 %10955, %v15579_v47   ;;  %v7115_v47 = vsel %vm2725_vm4, %v7112_v57, %v7114_v43  ;;  %v7285_v3 = vor.u32 %v7283_v0, %v15593_v35 }
 0x40f   : > { %v7194_v57 = vmul.f32 %v10499_v26, %v7115_v47 }
 0x410   : > { %v5732_v6 = vrot.slane %v15656_v7, 1  ;;  %v7290_v63 = vsel %vm2876_vm5, %v7285_v3, %v7289_v46  ;;  %v18396_v3 = vld [vmem:[#allocation68_spill] sm:$0xff] }
 0x411   : > { %v15700_v35 = vpop.f32.mrf.mxu1  ;;  %v15702_v47 = vpack.c.bf16 %v7194_v57, %v7193_v45 }
 0x412   : > { %v4473_v5 = vpop.f32.mrf.mxu2  ;;  %v5733_v4 = vsel %vm1396_vm2, %v5730_v49, %v5732_v6 }
 0x413   : > { %v15683_v58 = vadd.f32 %v4473_v5, %v3992_v11  ;;  %v15685_v28 = vpop.f32.mrf.mxu3  ;;  %v5808_v14 = vmul.f32 %v18395_v10, %v5733_v4  ;;  %6423 = vperm.xlu2 %10953, %v15605_v1   ;;  %v6879_v11 = vperm.slane %v15570_v55, %v11926_v33  ;;  %v15707_v55 = vunpack.c.l.bf16 %v6887_v38 }
 0x414   : > { %18393 = vst [vmem:[#allocation87_spill] sm:$0xff] %v15685_v28  ;;  %v6320_v30 = vpop.permute.xlu1 %6319  ;;  %v6336_v5 = vpop.permute.xlu2 %6335  ;;  %v7295_v57 = vshll.u32 %v15702_v47, 16 }
 0x415   : > { %18392 = vst [vmem:[#allocation37_spill] sm:$0xff] %v15683_v58  ;;  %v5830_v13 = vpack.c.bf16 %v5808_v14, %v5807_v8  ;;  %v6325_v49 = vperm.slane %v6320_v30, %v11926_v33  ;;  %v7035_v14 = vunpack.c.l.bf16 %v6879_v11  ;;  %v17709_v11 = vrot.slane %v15707_v55, 7 }
 0x416   : > { %10017 = vmatmul.msk.bf16.gmra.mxu2 %vm1899_vm1, %v7290_v63  ;;  %v6344_v63 = vpop.permute.xlu0 %6343 }
 0x417   : > { %v6448_v1 = vunpack.c.l.bf16 %v6325_v49  ;;  %v5931_v0 = vshrl.u32 %v5830_v13, 16  ;;  %v5934_v24 = vshll.u32 %v5830_v13, 16  ;;  %v15712_v13 = vpop.f32.mrf.mxu0 }
 0x419   : > { %v6480_v26 = vmul.f32 %v18373_v16, %v6448_v1  ;;  %v5933_v4 = vrot.slane %v5931_v0, 3  ;;  %v5936_v8 = vrot.slane %v5934_v24, 4  ;;  %v15719_v16 = vunpack.c.l.bf16 %v5560_v37 }
 0x41a   : > { %v4476_v19 = vpop.f32.mrf.mxu2  ;;  %v7116_v1 = vrot.slane %v7035_v14, 7  ;;  %v6349_v24 = vperm.slane %v6344_v63, %v11926_v33  ;;  %v6341_v37 = vperm.slane %v6336_v5, %v11926_v33  ;;  %v15737_v14 = vrot.slane %v7295_v57, 1 }
 0x41b   : > { %v15710_v30 = vadd.f32 %v4476_v19, %v18396_v3  ;;  %v5300_v49 = vpop.f32.mrf.mxu3  ;;  %v6503_v45 = vpack.c.bf16 %v6481_v23, %v6480_v26  ;;  %v15717_v29 = vor.u32 %v5936_v8, %v5933_v4  ;;  %v7291_v23 = vshrl.u32 %v15637_v41, 16  ;;  %v15732_v26 = vld [vmem:[#allocation2 + $0x58] sm:$0xff]   ;;  %v18399_v8 = vld [vmem:[#allocation28_spill] sm:$0xff] }
 0x41c   : > { %v15715_v2 = vadd.f32 %v5300_v49, %v15304_v36  ;;  %v15739_v49 = vpop.f32.mrf.mxu1  ;;  %v7117_v5 = vsel %vm2725_vm4, %v7114_v43, %v7116_v1  ;;  %v7119_v41 = vsel %vm2725_vm4, %v7116_v1, %v17709_v11  ;;  %v10500_v57 = vunpack.c.h.bf16 %v15659_v54 }
 0x41d   : > { %v5547_v18 = vpop.permute.xlu1 %5546  ;;  %9996 = vmatmul.msk.bf16.gmra.mxu1 %vm1899_vm1, %v6503_v45  ;;  %v5938_v38 = vsel %vm2037_vm3, %v15539_v31, %v15717_v29  ;;  %v5571_v36 = vpop.permute.xlu2 %5570  ;;  %v18398_v31 = vld [vmem:[#allocation64_spill] sm:$0xff]  ;;  %v6451_v19 = vunpack.c.l.bf16 %v6349_v24  ;;  %v18402_v43 = vrot.slane %v15719_v16, 1  ;;  %v18404_v24 = vld [vmem:[#allocation114_spill] sm:$0xff] }
 0x41e   : > { %18397 = vst [vmem:[#allocation65_spill] sm:$0xff] %v15715_v2  ;;  %v5552_v0 = vperm.slane %v5547_v18, %v11926_v33  ;;  %9972 = vmatmul.msk.bf16.gmra.mxu0 %vm1899_vm1, %v5938_v38  ;;  %v3994_v3 = vadd.f32 %v18399_v8, %v18398_v31  ;;  %v7293_v18 = vor.u32 %v7291_v23, %v7289_v46  ;;  %v10503_v31 = vunpack.c.l.bf16 %v15732_v26  ;;  %v15761_v23 = vpop.permute.xlu0 %6351 }
 0x41f   : > { %v6450_v8 = vunpack.c.l.bf16 %v6341_v37  ;;  %v7195_v54 = vmul.f32 %v10500_v57, %v7117_v5  ;;  %v6903_v5 = vperm.slane %v15630_v20, %v11926_v33 }
 0x420   : > { %v5649_v4 = vunpack.c.l.bf16 %v5552_v0  ;;  %v7298_v1 = vsel %vm2876_vm5, %v7293_v18, %v15737_v14 }
 0x421   : > { %v6482_v18 = vmul.f32 %v18395_v10, %v6450_v8 }
 0x422   : > { %v4478_v45 = vpop.f32.mrf.mxu2  ;;  %v5734_v63 = vrot.slane %v5649_v4, 1  ;;  %v15763_v4 = vpop.f32.mrf.mxu0 }
 0x423   : > { %v15747_v38 = vadd.f32 %v4478_v45, %v3994_v3  ;;  %v15749_v0 = vpop.f32.mrf.mxu3  ;;  %v7196_v3 = vmul.f32 %v10503_v31, %v7119_v41  ;;  %v18403_v45 = vld [vmem:[#allocation40_spill] sm:$0xff] }
 0x424   : > { %18401 = vst [vmem:[#allocation23_spill] sm:$0xff] %v15749_v0  ;;  %v5735_v48 = vsel %vm1396_vm2, %v5732_v6, %v5734_v63  ;;  %v5737_v46 = vsel %vm1396_vm2, %v5734_v63, %v18402_v43  ;;  %v6895_v63 = vperm.slane %v15562_v61, %v11926_v33  ;;  %v6483_v41 = vmul.f32 %v18403_v45, %v6451_v19  ;;  %v10247_v61 = vld [vmem:[%s17548_s7 + $0x8] sm:$0xff]  ;;  %v15787_v10 = vpop.f32.mrf.mxu1 }
 0x425   : > { %18400 = vst [vmem:[#allocation113_spill] sm:$0xff] %v15747_v38  ;;  %v5809_v37 = vmul.f32 %v18403_v45, %v5735_v48  ;;  %v5810_v11 = vmul.f32 %v18404_v24, %v5737_v46  ;;  %v15778_v57 = vpack.c.bf16 %v7196_v3, %v7195_v54  ;;  %v18405_v38 = vld [vmem:[#allocation97_spill] sm:$0xff]  ;;  %7734 = vmatpush.bf16.msrb.mxu3 %v10247_v61  ;;  %v15792_v3 = vunpack.c.l.bf16 %v6903_v5 }
 0x426   : > { %10018 = vmatmul.msk.bf16.gmra.mxu2 %vm1899_vm1, %v7298_v1  ;;  %v15768_v7 = vpop.permute.xlu2 %6929  ;;  %v15770_v6 = vpop.permute.xlu1 %6913  ;;  %v5576_v1 = vperm.slane %v5571_v36, %v11926_v33  ;;  %v7037_v20 = vunpack.c.l.bf16 %v6895_v63 }
 0x427   : > { %v5831_v43 = vpack.c.bf16 %v5810_v11, %v5809_v37  ;;  %v6504_v11 = vpack.c.bf16 %v6483_v41, %v6482_v18 }
 0x428   : > { %v5652_v45 = vunpack.c.l.bf16 %v5576_v1  ;;  %v17711_v1 = vrot.slane %v15792_v3, 7 }
 0x429   : > { %v5940_v48 = vshrl.u32 %v5831_v43, 16  ;;  %v5943_v46 = vshll.u32 %v5831_v43, 16  ;;  %v7120_v43 = vrot.slane %v7037_v20, 7 }
 0x42a   : > { %v4481_v31 = vpop.f32.mrf.mxu2  ;;  %v15794_v36 = vpop.f32.mrf.mxu0 }
 0x42b   : > { %v15782_v58 = vadd.f32 %v4481_v31, %v18405_v38  ;;  %v5305_v34 = vpop.f32.mrf.mxu3  ;;  %v5942_v8 = vrot.slane %v5940_v48, 3  ;;  %v5945_v54 = vrot.slane %v5943_v46, 4  ;;  %v7303_v38 = vshll.u32 %v15778_v57, 16  ;;  %v18407_v31 = vld [vmem:[#allocation70_spill] sm:$0xff] }
 0x42c   : > { %v15790_v19 = vadd.f32 %v5305_v34, %v15395_v12  ;;  %v10246_v12 = vld [vmem:[%s17548_s7] sm:$0xff]  ;;  %v5587_v34 = vpop.permute.xlu0 %5586  ;;  %v3996_v48 = vadd.f32 %v15619_v15, %v18407_v31  ;;  %v15820_v31 = vpop.f32.mrf.mxu1 }
 0x42d   : > { %9997 = vmatmul.msk.bf16.gmra.mxu1 %vm1899_vm1, %v6504_v11  ;;  %v15798_v37 = vor.u32 %v5945_v54, %v5942_v8  ;;  %v5592_v61 = vperm.slane %v5587_v34, %v11926_v33  ;;  %v7299_v11 = vshrl.u32 %v15702_v47, 16  ;;  %v15814_v8 = vrot.slane %v7303_v38, 1  ;;  %7735 = vmatpush.bf16.msrb.mxu3 %v10246_v12  ;;  %v11066_v12 = vld [vmem:[#allocation2 + $0x60] sm:$0xff]  }
 0x42e   : > { %18406 = vst [vmem:[#allocation106_spill] sm:$0xff] %v15790_v19  ;;  %v5740_v54 = vrot.slane %v5652_v45, 1  ;;  %v10504_v45 = vunpack.c.h.bf16 %v15732_v26 }
 0x42f   : > { %v5579_v63 = vpop.permute.xlu2 %5578  ;;  %v5563_v18 = vpop.permute.xlu1 %5562  ;;  %v5947_v46 = vsel %vm2037_vm3, %v15717_v29, %v15798_v37  ;;  %v18410_v29 = vrot.slane %v15707_v55, 7  ;;  %v7301_v38 = vor.u32 %v7299_v11, %v15737_v14  ;;  %v6919_v55 = vperm.slane %v15770_v6, %v11926_v33 }
 0x430   : > { %v5584_v5 = vperm.slane %v5579_v63, %v11926_v33  ;;  %v5568_v41 = vperm.slane %v5563_v18, %v11926_v33  ;;  %9973 = vmatmul.msk.bf16.gmra.mxu0 %vm1899_vm1, %v5947_v46  ;;  %v7123_v46 = vsel %vm2725_vm4, %v7120_v43, %v17711_v1  ;;  %v18411_v14 = vrot.slane %v15719_v16, 1 }
 0x431   : > { %v7121_v34 = vsel %vm2725_vm4, %v18410_v29, %v7120_v43  ;;  %v7306_v29 = vsel %vm2876_vm5, %v7301_v38, %v15814_v8 }
 0x432   : > { %v4483_v20 = vpop.f32.mrf.mxu2  ;;  %v5651_v63 = vunpack.c.l.bf16 %v5568_v41  ;;  %v5653_v47 = vunpack.c.l.bf16 %v5584_v5  ;;  %v10507_v41 = vunpack.c.l.bf16 %v11066_v12  ;;  %v7197_v43 = vmul.f32 %v10504_v45, %v7121_v34  ;;  %v18412_v12 = vld [vmem:[#allocation79_spill] sm:$0xff] }
 0x433   : > { %v15816_v18 = vadd.f32 %v4483_v20, %v3996_v48  ;;  %v15818_v15 = vpop.f32.mrf.mxu3  ;;  %v6911_v20 = vperm.slane %v15668_v17, %v11926_v33  ;;  %v6142_v38 = vadd.f32 %v15635_v50, %v18412_v12  ;;  %v15852_v45 = vunpack.c.l.bf16 %v6919_v55 }
 0x434   : > { %18409 = vst [vmem:[#allocation26_spill] sm:$0xff] %v15818_v15  ;;  %v5738_v48 = vrot.slane %v5651_v63, 1  ;;  %v7198_v5 = vmul.f32 %v10507_v41, %v7123_v46  ;;  %v15843_v63 = vpop.f32.mrf.mxu0  ;;  %v5742_v17 = vrot.slane %v5653_v47, 1 }
 0x435   : > { %18408 = vst [vmem:[#allocation75_spill] sm:$0xff] %v15816_v18  ;;  %v15832_v18 = vunpack.c.l.bf16 %v5592_v61  ;;  %v7039_v46 = vunpack.c.l.bf16 %v6911_v20 }
 0x436   : > { %v5739_v26 = vsel %vm1396_vm2, %v18411_v14, %v5738_v48  ;;  %v5741_v11 = vsel %vm1396_vm2, %v5738_v48, %v5740_v54  ;;  %10019 = vmatmul.msk.bf16.gmra.mxu2 %vm1899_vm1, %v7306_v29  ;;  %v6663_v29 = vadd.f32 %v15651_v27, %v6142_v38  ;;  %v15855_v14 = vpack.c.bf16 %v7198_v5, %v7197_v43  ;;  %v15869_v27 = vld [vmem:[%s18414_s5] ss:$0 sm:$0xff]  ;;  %v15876_v38 = vld [vmem:[#allocation2 + $0x68] sm:$0xff]  }
 0x437   : > { %v5811_v61 = vmul.f32 %v15036_v22, %v5739_v26  ;;  %v5812_v6 = vmul.f32 %v15039_v40, %v5741_v11  ;;  %v17710_v16 = vrot.slane %v15832_v18, 1  ;;  %v5743_v26 = vsel %vm1396_vm2, %v5740_v54, %v5742_v17 }
 0x438   : > { %v15849_v34 = vpop.permute.xlu1 %6921  ;;  %v15864_v12 = vpop.permute.xlu2 %6945  ;;  %v7124_v5 = vrot.slane %v7039_v46, 7  ;;  %v17712_v54 = vrot.slane %v15852_v45, 7  ;;  %v7307_v46 = vshrl.u32 %v15778_v57, 16 }
 0x439   : > { %v5832_v41 = vpack.c.bf16 %v5812_v6, %v5811_v61  ;;  %v5745_v50 = vsel %vm1396_vm2, %v5742_v17, %v17710_v16  ;;  %v15871_v61 = vpop.f32.mrf.mxu1  ;;  %v18415_v17 = vld [vmem:[#allocation102_spill] sm:$0xff]  ;;  %v6357_v16 = vperm.slane %v15761_v23, %v11926_v33 }
 0x43a   : > { %v7432_v48 = vpop.f32.mrf.mxu2  ;;  %v7127_v23 = vsel %vm2725_vm4, %v7124_v5, %v17712_v54 }
 0x43b   : > { %v5310_v47 = vpop.f32.mrf.mxu3  ;;  %v5949_v20 = vshrl.u32 %v5832_v41, 16  ;;  %v7512_v55 = vadd.f32 %v7432_v48, %v6663_v29  ;;  %v5952_v43 = vshll.u32 %v5832_v41, 16  ;;  %v5814_v48 = vmul.f32 %v15164_v32, %v5745_v50 }
 0x43c   : > { %v15862_v11 = vadd.f32 %v5310_v47, %v15485_v21  ;;  %v6143_v21 = vadd.f32 %v15688_v52, %v18415_v17  ;;  %v5813_v47 = vmul.f32 %v15147_v39, %v5743_v26  ;;  %v7311_v41 = vshll.u32 %v15855_v14, 16  ;;  %v15889_v52 = vld [vmem:[%s17547_s6] ss:$0 sm:$0xff]  ;;  %v15893_v50 = vpop.f32.mrf.mxu0 }
 0x43d   : > { %v5951_v6 = vrot.slane %v5949_v20, 3  ;;  %v5954_v29 = vrot.slane %v5952_v43, 4  ;;  %v7548_v20 = vmul.f32 %v15869_v27, %v7512_v55  ;;  %v10511_v43 = vunpack.c.l.bf16 %v15876_v38 }
 0x43e   : > { %18413 = vst [vmem:[#allocation53_spill] sm:$0xff] %v15862_v11  ;;  %v6664_v1 = vadd.f32 %v15700_v35, %v6143_v21  ;;  %v7309_v35 = vor.u32 %v7307_v46, %v15814_v8  ;;  %v18416_v55 = vrot.slane %v15792_v3, 7  ;;  %v5833_v21 = vpack.c.bf16 %v5814_v48, %v5813_v47 }
 0x43f   : > { %v15891_v26 = vor.u32 %v5954_v29, %v5951_v6  ;;  %v6452_v19 = vunpack.c.l.bf16 %v6357_v16  ;;  %v7313_v54 = vrot.slane %v7311_v41, 1  ;;  %v7200_v8 = vmul.f32 %v10511_v43, %v7127_v23 }
 0x440   : > { %v7125_v17 = vsel %vm2725_vm4, %v18416_v55, %v7124_v5  ;;  %v7584_v3 = vadd.f32 %v15889_v52, %v7548_v20  ;;  %v6927_v16 = vperm.slane %v15849_v34, %v11926_v33  ;;  %v5958_v20 = vshrl.u32 %v5833_v21, 16 }
 0x441   : > { %v6360_v29 = vpop.permute.xlu1 %6359  ;;  %v5956_v15 = vsel %vm2037_vm3, %v15798_v37, %v15891_v26  ;;  %v7199_v47 = vmul.f32 %v18404_v24, %v7125_v17  ;;  %v15913_v48 = vpop.f32.mrf.mxu1  ;;  %v7314_v37 = vsel %vm2876_vm5, %v7309_v35, %v7313_v54  ;;  %v5961_v43 = vshll.u32 %v5833_v21, 16 }
 0x442   : > { %v7434_v57 = vpop.f32.mrf.mxu2  ;;  %v6365_v0 = vperm.slane %v6360_v29, %v11926_v33  ;;  %9974 = vmatmul.msk.bf16.gmra.mxu0 %vm1899_vm1, %v5956_v15  ;;  %v6376_v15 = vpop.permute.xlu2 %6375  ;;  %v6484_v23 = vmul.f32 %v18404_v24, %v6452_v19  ;;  %v7616_v35 = vmax.f32 %v7584_v3, 0.0  ;;  %v5960_v2 = vrot.slane %v5958_v20, 3 }
 0x443   : > { %v15903_v11 = vpop.f32.mrf.mxu3  ;;  %v7513_v6 = vadd.f32 %v7434_v57, %v6664_v1  ;;  %v6935_v1 = vperm.slane %v15768_v7, %v11926_v33  ;;  %v18418_v57 = vld [vmem:[#allocation85_spill] sm:$0xff]  ;;  %v5963_v21 = vrot.slane %v5961_v43, 4 }
 0x444   : > { %18417 = vst [vmem:[#allocation39_spill] sm:$0xff] %v15903_v11  ;;  %v6453_v46 = vunpack.c.l.bf16 %v6365_v0  ;;  %v6144_v55 = vadd.f32 %v15712_v13, %v18418_v57  ;;  %v15926_v0 = vpack.c.bf16 %v7200_v8, %v7199_v47  ;;  %v15930_v28 = vpop.f32.mrf.mxu0  ;;  %v6145_v8 = vadd.f32 %v15763_v4, %v15064_v44 }
 0x445   : > { %v7549_v5 = vmul.f32 %v15869_v27, %v7513_v6  ;;  %v15928_v6 = vunpack.c.l.bf16 %v6935_v1 }
 0x446   : > { %10020 = vmatmul.msk.bf16.gmra.mxu2 %vm1899_vm1, %v7314_v37  ;;  %v6485_v7 = vmul.f32 %v15036_v22, %v6453_v46  ;;  %v6665_v22 = vadd.f32 %v15739_v49, %v6144_v55  ;;  %v7319_v19 = vshll.u32 %v15926_v0, 16  ;;  %v15942_v46 = vor.u32 %v5963_v21, %v5960_v2  ;;  %v15946_v49 = vld [vmem:[#allocation2 + $0x70] sm:$0xff]  }
 0x447   : > { %v7585_v41 = vadd.f32 %v15889_v52, %v7549_v5  ;;  %v7041_v5 = vunpack.c.l.bf16 %v6927_v16  ;;  %v7130_v47 = vrot.slane %v15928_v6, 7  ;;  %v6666_v4 = vadd.f32 %v15787_v10, %v6145_v8 }
 0x448   : > { %v6505_v34 = vpack.c.bf16 %v6485_v7, %v6484_v23  ;;  %v15952_v43 = vrot.slane %v7319_v19, 1  ;;  %v18419_v2 = vrot.slane %v15852_v45, 7  ;;  %v10515_v10 = vunpack.c.l.bf16 %v15946_v49 }
 0x449   : > { %v7617_v17 = vmax.f32 %v7585_v41, 0.0  ;;  %v7128_v1 = vrot.slane %v7041_v5, 7  ;;  %v15944_v16 = vpop.f32.mrf.mxu1  ;;  %v6381_v41 = vperm.slane %v6376_v15, %v11926_v33  ;;  %v5965_v15 = vsel %vm2037_vm3, %v15891_v26, %v15942_v46 }
 0x44a   : > { %v7437_v29 = vpop.f32.mrf.mxu2  ;;  %v6938_v13 = vpop.permute.xlu1 %6937  ;;  %9998 = vmatmul.msk.bf16.gmra.mxu1 %vm1899_vm1, %v6505_v34 }
 0x44b   : > { %v7648_v11 = vpack.c.bf16 %v7617_v17, %v7616_v35  ;;  %v5315_v37 = vpop.f32.mrf.mxu3  ;;  %v7514_v3 = vadd.f32 %v7437_v29, %v6665_v22  ;;  %v15949_v20 = vpop.permute.xlu2 %6953  ;;  %v7129_v57 = vsel %vm2725_vm4, %v18419_v2, %v7128_v1  ;;  %v7131_v55 = vsel %vm2725_vm4, %v7128_v1, %v7130_v47 }
 0x44c   : > { %v15933_v24 = vadd.f32 %v5315_v37, %v15568_v42  ;;  %v5595_v42 = vpop.permute.xlu0 %5594  ;;  %v15965_v7 = vpop.f32.mrf.mxu0  ;;  %v10512_v35 = vunpack.c.h.bf16 %v15876_v38  ;;  %v6455_v29 = vunpack.c.l.bf16 %v6381_v41  ;;  %v6951_v22 = vperm.slane %v15864_v12, %v11926_v33  ;;  %v18420_v41 = vld [vmem:[#allocation115_spill] sm:$0xff] }
 0x44d   : > { %10035 = vmatmul.msk.bf16.vlgmr.msrb.gmra.mxu3 %vm1899_vm1, %v7648_v11  ;;  %v7315_v11 = vshrl.u32 %v15855_v14, 16  ;;  %v7550_v44 = vmul.f32 %v15869_v27, %v7514_v3  ;;  %v5600_v34 = vperm.slane %v5595_v42, %v11926_v33  ;;  %v6943_v19 = vperm.slane %v6938_v13, %v11926_v33 }
 0x44e   : > { %v7201_v26 = vmul.f32 %v10512_v35, %v7129_v57 }
 0x44f   : > { %v7317_v14 = vor.u32 %v7315_v11, %v7313_v54  ;;  %v7202_v54 = vmul.f32 %v10515_v10, %v7131_v55  ;;  %v7586_v21 = vadd.f32 %v15889_v52, %v7550_v44  ;;  %v6146_v11 = vadd.f32 %v15794_v36, %v18420_v41 }
 0x450   : > { %v6487_v44 = vmul.f32 %v15147_v39, %v6455_v29  ;;  %v7043_v35 = vunpack.c.l.bf16 %v6943_v19  ;;  %v16009_v19 = vld [vmem:[#allocation2 + $0x78] sm:$0xff]   ;;  %v18422_v41 = vrot.slane %v15832_v18, 1 }
 0x451   : > { %v7322_v37 = vsel %vm2876_vm5, %v7317_v14, %v15952_v43  ;;  %v15980_v3 = vpop.f32.mrf.mxu1  ;;  %v15991_v13 = vpack.c.bf16 %v7202_v54, %v7201_v26  ;;  %v7618_v2 = vmax.f32 %v7586_v21, 0.0  ;;  %v15994_v14 = vunpack.c.l.bf16 %v6951_v22 }
 0x452   : > { %v7439_v23 = vpop.f32.mrf.mxu2  ;;  %9975 = vmatmul.msk.bf16.gmra.mxu0 %vm1899_vm1, %v5965_v15  ;;  %v6667_v15 = vadd.f32 %v15820_v31, %v6146_v11  ;;  %v7132_v21 = vrot.slane %v7043_v35, 7  ;;  %v10516_v35 = vunpack.c.h.bf16 %v15946_v49 }
 0x453   : > { %v7515_v17 = vadd.f32 %v7439_v23, %v6666_v4  ;;  %v6368_v45 = vpop.permute.xlu1 %6367  ;;  %v15982_v1 = vpop.f32.mrf.mxu3  ;;  %v5655_v23 = vunpack.c.l.bf16 %v5600_v34  ;;  %v7134_v54 = vrot.slane %v15994_v14, 7 }
 0x454   : > { %v6373_v5 = vperm.slane %v6368_v45, %v11926_v33  ;;  %v15989_v12 = vpop.permute.xlu0 %6961  ;;  %v6392_v10 = vpop.permute.xlu2 %6391  ;;  %v18421_v45 = vld [vmem:[#allocation95_spill] sm:$0xff] }
 0x455   : > { %v7551_v38 = vmul.f32 %v15869_v27, %v7515_v17  ;;  %v5340_v39 = vadd.f32 %v15178_v59, %v18421_v45  ;;  %v5746_v29 = vrot.slane %v5655_v23, 1  ;;  %v7323_v23 = vshrl.u32 %v15926_v0, 16  ;;  %v18423_v45 = vld [vmem:[#allocation49_spill] sm:$0xff] }
 0x456   : > { %v6454_v8 = vunpack.c.l.bf16 %v6373_v5  ;;  %10021 = vmatmul.msk.bf16.gmra.mxu2 %vm1899_vm1, %v7322_v37  ;;  %v15999_v5 = vpop.f32.mrf.mxu0  ;;  %v7327_v37 = vshll.u32 %v15991_v13, 16  ;;  %v6397_v18 = vperm.slane %v6392_v10, %v11926_v33  ;;  %v10519_v0 = vunpack.c.l.bf16 %v16009_v19 }
 0x457   : > { %v7587_v42 = vadd.f32 %v15889_v52, %v7551_v38  ;;  %v6147_v26 = vadd.f32 %v15843_v63, %v5340_v39  ;;  %v5747_v11 = vsel %vm1396_vm2, %v18422_v41, %v5746_v29  ;;  %v6959_v41 = vperm.slane %v15949_v20, %v11926_v33 }
 0x458   : > { %v6486_v4 = vmul.f32 %v15039_v40, %v6454_v8 }
 0x459   : > { %v7619_v57 = vmax.f32 %v7587_v42, 0.0  ;;  %v6668_v22 = vadd.f32 %v15871_v61, %v6147_v26  ;;  %v16018_v63 = vpop.f32.mrf.mxu1  ;;  %v7133_v61 = vsel %vm2725_vm4, %v7130_v47, %v7132_v21  ;;  %v7325_v47 = vor.u32 %v7323_v23, %v15952_v43 }
 0x45a   : > { %v7442_v55 = vpop.f32.mrf.mxu2  ;;  %v6506_v17 = vpack.c.bf16 %v6487_v44, %v6486_v4  ;;  %v6457_v26 = vunpack.c.l.bf16 %v6397_v18 }
 0x45b   : > { %v7649_v36 = vpack.c.bf16 %v7619_v57, %v7618_v2  ;;  %v7516_v40 = vadd.f32 %v7442_v55, %v6667_v15  ;;  %v16022_v2 = vrot.slane %v7327_v37, 1 }
 0x45c   : > { %v5603_v34 = vpop.permute.xlu1 %5602  ;;  %9999 = vmatmul.msk.bf16.gmra.mxu1 %vm1899_vm1, %v6506_v17  ;;  %v5619_v57 = vpop.permute.xlu2 %5618  ;;  %v5815_v17 = vmul.f32 %v15325_v25, %v5747_v11 }
 0x45d   : > { %10036 = vmatmul.msk.bf16.gmra.mxu3 %vm1899_vm1, %v7649_v36  ;;  %v5608_v31 = vperm.slane %v5603_v34, %v11926_v33  ;;  %v7552_v8 = vmul.f32 %v15869_v27, %v7516_v40  ;;  %v16031_v15 = vpop.permute.xlu0 %6969  ;;  %v7203_v34 = vmul.f32 %v10516_v35, %v7133_v61  ;;  %v7330_v37 = vsel %vm2876_vm5, %v7325_v47, %v16022_v2 }
 0x45e   : > { %v16043_v40 = vpop.f32.mrf.mxu0  ;;  %v5624_v18 = vperm.slane %v5619_v57, %v11926_v33 }
 0x45f   : > { %v16006_v38 = vunpack.c.l.bf16 %v5608_v31  ;;  %v7588_v36 = vadd.f32 %v15889_v52, %v7552_v8 }
 0x460   : > { %v5320_v59 = vpop.f32.mrf.mxu3 }
 0x461   : > { %v16013_v42 = vadd.f32 %v5320_v59, %v15642_v60  ;;  %v5748_v44 = vrot.slane %v16006_v38, 1  ;;  %v7135_v60 = vsel %vm2725_vm4, %v7132_v21, %v7134_v54  ;;  %v6967_v59 = vperm.slane %v15989_v12, %v11926_v33  ;;  %v16056_v61 = vpop.f32.mrf.mxu1  ;;  %v18428_v38 = vld [vmem:[#allocation86_spill] sm:$0xff] }
 0x462   : > { %v7444_v4 = vpop.f32.mrf.mxu2  ;;  %v7204_v49 = vmul.f32 %v10519_v0, %v7135_v60  ;;  %v7620_v11 = vmax.f32 %v7588_v36, 0.0  ;;  %v18425_v36 = vld [vmem:[#allocation61_spill] sm:$0xff] }
 0x463   : > { %v7517_v55 = vadd.f32 %v7444_v4, %v6668_v22  ;;  %v5749_v6 = vsel %vm1396_vm2, %v5746_v29, %v5748_v44  ;;  %v18424_v22 = vld [vmem:[#allocation32_spill] sm:$0xff] }
 0x464   : > { %v5816_v10 = vmul.f32 %v18423_v45, %v5749_v6  ;;  %v6148_v8 = vadd.f32 %v15893_v50, %v18424_v22  ;;  %v16058_v60 = vpack.c.bf16 %v7204_v49, %v7203_v34  ;;  %v6489_v6 = vmul.f32 %v15325_v25, %v6457_v26 }
 0x465   : > { %v7553_v39 = vmul.f32 %v15869_v27, %v7517_v55  ;;  %v6384_v31 = vpop.permute.xlu1 %6383  ;;  %v6400_v34 = vpop.permute.xlu2 %6399 }
 0x466   : > { %v5834_v29 = vpack.c.bf16 %v5816_v10, %v5815_v17  ;;  %v6389_v21 = vperm.slane %v6384_v31, %v11926_v33  ;;  %10022 = vmatmul.msk.bf16.gmra.mxu2 %vm1899_vm1, %v7330_v37  ;;  %v6669_v12 = vadd.f32 %v15913_v48, %v6148_v8  ;;  %v18426_v10 = vld [vmem:[#allocation16_spill] sm:$0xff]  ;;  %v7045_v31 = vunpack.c.l.bf16 %v6959_v41  ;;  %v6408_v57 = vpop.permute.xlu0 %6407 }
 0x467   : > { %v7589_v43 = vadd.f32 %v15889_v52, %v7553_v39  ;;  %v5342_v39 = vadd.f32 %v18426_v10, %v18425_v36  ;;  %v7335_v25 = vshll.u32 %v16058_v60, 16  ;;  %v6405_v22 = vperm.slane %v6400_v34, %v11926_v33 }
 0x468   : > { %v6456_v23 = vunpack.c.l.bf16 %v6389_v21  ;;  %v5967_v35 = vshrl.u32 %v5834_v29, 16  ;;  %v5970_v0 = vshll.u32 %v5834_v29, 16  ;;  %v16076_v21 = vpop.f32.mrf.mxu0 }
 0x469   : > { %v7621_v4 = vmax.f32 %v7589_v43, 0.0  ;;  %v16066_v43 = vunpack.c.l.bf16 %v5624_v18  ;;  %v6149_v26 = vadd.f32 %v15930_v28, %v5342_v39 }
 0x46a   : > { %v7447_v55 = vpop.f32.mrf.mxu2  ;;  %v6488_v50 = vmul.f32 %v15164_v32, %v6456_v23  ;;  %v5969_v20 = vrot.slane %v5967_v35, 3  ;;  %v5972_v17 = vrot.slane %v5970_v0, 4  ;;  %v16072_v32 = vunpack.c.l.bf16 %v6967_v59 }
 0x46b   : > { %v7650_v47 = vpack.c.bf16 %v7621_v4, %v7620_v11  ;;  %v7518_v37 = vadd.f32 %v7447_v55, %v6669_v12  ;;  %v6413_v11 = vperm.slane %v6408_v57, %v11926_v33  ;;  %v6670_v59 = vadd.f32 %v15944_v16, %v6149_v26 }
 0x46c   : > { %v6507_v49 = vpack.c.bf16 %v6489_v6, %v6488_v50  ;;  %v16069_v48 = vor.u32 %v5972_v17, %v5969_v20  ;;  %v7136_v4 = vrot.slane %v7045_v31, 7  ;;  %v5752_v23 = vrot.slane %v16066_v43, 1  ;;  %v16093_v6 = vpop.f32.mrf.mxu3  ;;  %v16095_v50 = vpop.f32.mrf.mxu1  ;;  %v18427_v43 = vld [vmem:[#allocation88_spill] sm:$0xff] }
 0x46d   : > { %10037 = vmatmul.msk.bf16.gmra.mxu3 %vm1899_vm1, %v7650_v47  ;;  %v7554_v28 = vmul.f32 %v15869_v27, %v7518_v37  ;;  %v7331_v35 = vshrl.u32 %v15991_v13, 16  ;;  %v16089_v0 = vrot.slane %v7335_v25, 1  ;;  %v7138_v12 = vrot.slane %v16072_v32, 7  ;;  %v11067_v47 = vld [vmem:[#allocation2 + $0x80] sm:$0xff]  }
 0x46e   : > { %v5611_v29 = vpop.permute.xlu1 %5610  ;;  %10000 = vmatmul.msk.bf16.gmra.mxu1 %vm1899_vm1, %v6507_v49  ;;  %v5974_v41 = vsel %vm2037_vm3, %v15942_v46, %v16069_v48  ;;  %v10520_v46 = vunpack.c.h.bf16 %v16009_v19  ;;  %v10523_v20 = vunpack.c.l.bf16 %v11067_v47  ;;  %v6458_v17 = vunpack.c.l.bf16 %v6405_v22 }
 0x46f   : > { %v5616_v8 = vperm.slane %v5611_v29, %v11926_v33  ;;  %9976 = vmatmul.msk.bf16.gmra.mxu0 %vm1899_vm1, %v5974_v41  ;;  %v7333_v10 = vor.u32 %v7331_v35, %v16022_v2  ;;  %v7137_v13 = vsel %vm2725_vm4, %v7134_v54, %v7136_v4  ;;  %v7139_v39 = vsel %vm2725_vm4, %v7136_v4, %v7138_v12  ;;  %v16114_v2 = vld [vmem:[#allocation2 + $0x88] sm:$0xf] }
 0x470   : > { %v7590_v19 = vadd.f32 %v15889_v52, %v7554_v28  ;;  %v6459_v34 = vunpack.c.l.bf16 %v6413_v11  ;;  %v6975_v54 = vperm.slane %v16031_v15, %v11926_v33  ;;  %v7205_v29 = vmul.f32 %v10520_v46, %v7137_v13  ;;  %v18429_v13 = vld [vmem:[#allocation80_spill] sm:$0xff] }
 0x471   : > { %v5657_v18 = vunpack.c.l.bf16 %v5616_v8  ;;  %v7338_v14 = vsel %vm2876_vm5, %v7333_v10, %v16089_v0  ;;  %v7206_v22 = vmul.f32 %v10523_v20, %v7139_v39  ;;  %v16122_v8 = vpop.f32.mrf.mxu0  ;;  %v6490_v41 = vmul.f32 %v18423_v45, %v6458_v17  ;;  %v18430_v39 = vld [vmem:[#allocation22_spill] sm:$0xff] }
 0x472   : > { %v7449_v55 = vpop.f32.mrf.mxu2  ;;  %v7622_v11 = vmax.f32 %v7590_v19, 0.0 }
 0x473   : > { %v7519_v16 = vadd.f32 %v7449_v55, %v6670_v59  ;;  %v5750_v36 = vrot.slane %v5657_v18, 1  ;;  %v6491_v18 = vmul.f32 %v15495_v56, %v6459_v34  ;;  %v5626_v55 = vunpack.c.l.bf16 %v16114_v2 }
 0x474   : > { %v16131_v45 = vpack.c.bf16 %v7206_v22, %v7205_v29 }
 0x475   : > { %v7555_v31 = vmul.f32 %v15869_v27, %v7519_v16  ;;  %v5751_v49 = vsel %vm1396_vm2, %v5748_v44, %v5750_v36  ;;  %v5753_v37 = vsel %vm1396_vm2, %v5750_v36, %v5752_v23  ;;  %v6150_v44 = vadd.f32 %v15965_v7, %v18428_v38 }
 0x476   : > { %v5817_v57 = vmul.f32 %v15495_v56, %v5751_v49  ;;  %v5818_v25 = vmul.f32 %v18427_v43, %v5753_v37  ;;  %10023 = vmatmul.msk.bf16.gmra.mxu2 %vm1899_vm1, %v7338_v14  ;;  %v7047_v36 = vunpack.c.l.bf16 %v6975_v54  ;;  %v5344_v56 = vadd.f32 %v18430_v39, %v18429_v13  ;;  %v16138_v49 = vpop.f32.mrf.mxu1  ;;  %v6726_v37 = vld [vmem:[#allocation2 + $0x88] sm:$0xf]  ;;  %v6424_v14 = vpop.permute.xlu2 %6423  ;;  %v18431_v39 = vld [vmem:[#allocation110_spill] sm:$0xff] }
 0x477   : > { %v7591_v26 = vadd.f32 %v15889_v52, %v7555_v31  ;;  %v6978_v15 = vpop.permute.xlu1 %6977  ;;  %v6671_v16 = vadd.f32 %v15980_v3, %v6150_v44  ;;  %v6508_v19 = vpack.c.bf16 %v6491_v18, %v6490_v41  ;;  %v5819_v3 = vmul.f32 %v5752_v23, %v5626_v55 }
 0x478   : > { %v5835_v59 = vpack.c.bf16 %v5818_v25, %v5817_v57  ;;  %v6983_v28 = vperm.slane %v6978_v15, %v11926_v33  ;;  %v6151_v2 = vadd.f32 %v15999_v5, %v5344_v56  ;;  %v7140_v57 = vrot.slane %v7047_v36, 7 }
 0x479   : > { %v7623_v4 = vmax.f32 %v7591_v26, 0.0  ;;  %v7339_v26 = vshrl.u32 %v16058_v60, 16  ;;  %v7343_v38 = vshll.u32 %v16131_v45, 16  ;;  %v7015_v23 = vunpack.c.l.bf16 %v6726_v37  ;;  %v16149_v15 = vpop.f32.mrf.mxu0 }
 0x47a   : > { %v7452_v35 = vpop.f32.mrf.mxu2  ;;  %v16129_v7 = vunpack.c.l.bf16 %v6983_v28  ;;  %v5976_v20 = vshrl.u32 %v5835_v59, 16  ;;  %v5979_v10 = vshll.u32 %v5835_v59, 16  ;;  %v6672_v44 = vadd.f32 %v16018_v63, %v6151_v2 }
 0x47b   : > { %v5325_v46 = vpop.f32.mrf.mxu3  ;;  %v7651_v47 = vpack.c.bf16 %v7623_v4, %v7622_v11  ;;  %v7520_v31 = vadd.f32 %v7452_v35, %v6671_v16  ;;  %v6429_v22 = vperm.slane %v6424_v14, %v11926_v33  ;;  %v5836_v5 = vpack.c.bf16 %v5819_v3, %v5819_v3 }
 0x47c   : > { %v16134_v17 = vadd.f32 %v5325_v46, %v15710_v30  ;;  %v5978_v34 = vrot.slane %v5976_v20, 3  ;;  %v5981_v54 = vrot.slane %v5979_v10, 4  ;;  %v7142_v30 = vrot.slane %v16129_v7, 7 }
 0x47d   : > { %10038 = vmatmul.msk.bf16.gmra.mxu3 %vm1899_vm1, %v7651_v47  ;;  %v7556_v29 = vmul.f32 %v15869_v27, %v7520_v31  ;;  %v7341_v60 = vor.u32 %v7339_v26, %v16089_v0  ;;  %v7141_v35 = vsel %vm2725_vm4, %v7138_v12, %v7140_v57  ;;  %v6461_v46 = vunpack.c.l.bf16 %v6429_v22 }
 0x47e   : > { %10001 = vmatmul.msk.bf16.gmra.mxu1 %vm1899_vm1, %v6508_v19  ;;  %v5982_v25 = vor.u32 %v5981_v54, %v5978_v34  ;;  %v7143_v63 = vsel %vm2725_vm4, %v7140_v57, %v7142_v30  ;;  %v5985_v47 = vshrl.u32 %v5836_v5, 16  ;;  %v5988_v20 = vshll.u32 %v5836_v5, 16  ;;  %v6615_v56 = vpop.f32.mrf.mxu1 }
 0x47f   : > { %v7592_v16 = vadd.f32 %v15889_v52, %v7556_v29  ;;  %v7208_v36 = vmul.f32 %v7143_v63, %v7015_v23  ;;  %v7207_v32 = vmul.f32 %v18427_v43, %v7141_v35  ;;  %v6152_v12 = vadd.f32 %v16043_v40, %v18431_v39  ;;  %v18432_v29 = vld [vmem:[#allocation72_spill] sm:$0xff] }
 0x480   : > { %v6416_v41 = vpop.permute.xlu1 %6415  ;;  %v5983_v4 = vsel %vm2037_vm3, %v16069_v48, %v5982_v25  ;;  %v6493_v31 = vmul.f32 %v6461_v46, %v5626_v55  ;;  %v5987_v37 = vrot.slane %v5985_v47, 3  ;;  %v5990_v14 = vrot.slane %v5988_v20, 4  ;;  %v18433_v40 = vld [vmem:[#allocation20_spill] sm:$0xff] }
 0x481   : > { %v6421_v11 = vperm.slane %v6416_v41, %v11926_v33  ;;  %9977 = vmatmul.msk.bf16.gmra.mxu0 %vm1899_vm1, %v5983_v4  ;;  %v7345_v33 = vrot.slane %v7343_v38, 1  ;;  %v7624_v19 = vmax.f32 %v7592_v16, 0.0  ;;  %v6097_v54 = vpop.f32.mrf.mxu0  ;;  %v7225_v2 = vpack.c.bf16 %v7208_v36, %v7207_v32  ;;  %v18434_v36 = vld [vmem:[#allocation116_spill] sm:$0xff] }
 0x482   : > { %v7454_v59 = vpop.f32.mrf.mxu2  ;;  %v6673_v26 = vadd.f32 %v16056_v61, %v6152_v12  ;;  %v5346_v22 = vadd.f32 %v18433_v40, %v18432_v29  ;;  %v7347_v35 = vshrl.u32 %v16131_v45, 16  ;;  %v18435_v12 = vld [vmem:[#allocation30_spill] sm:$0xff] }
 0x483   : > { %v7521_v28 = vadd.f32 %v7454_v59, %v6672_v44  ;;  %v16159_v18 = vpop.f32.mrf.mxu3  ;;  %v6460_v48 = vunpack.c.l.bf16 %v6421_v11  ;;  %v7346_v10 = vsel %vm2876_vm5, %v7341_v60, %v7345_v33  ;;  %v7351_v5 = vshll.u32 %v7225_v2, 16  ;;  %v6727_v59 = vld [vmem:[#allocation2 + $0x8c] sm:$0x1] }
 0x484   : > { %v6153_v11 = vadd.f32 %v16076_v21, %v5346_v22  ;;  %v7016_v60 = vunpack.c.l.bf16 %v6727_v59  ;;  %v7349_v21 = vor.u32 %v7347_v35, %v7345_v33 }
 0x485   : > { %v7557_v0 = vmul.f32 %v15869_v27, %v7521_v28  ;;  %v6492_v34 = vmul.f32 %v18427_v43, %v6460_v48  ;;  %v5991_v43 = vor.u32 %v5990_v14, %v5987_v37  ;;  %v7353_v16 = vrot.slane %v7351_v5, 1 }
 0x486   : > { %10024 = vmatmul.msk.bf16.gmra.mxu2 %vm1899_vm1, %v7346_v10  ;;  %v6618_v61 = vpop.f32.mrf.mxu1  ;;  %v6674_v4 = vadd.f32 %v16095_v50, %v6153_v11  ;;  %v7209_v50 = vmul.f32 %v7142_v30, %v7016_v60  ;;  %v7355_v37 = vshrl.u32 %v7225_v2, 16  ;;  %v6156_v2 = vadd.f32 %v6097_v54, %v15573_v9 }
 0x487   : > { %v7593_v13 = vadd.f32 %v15889_v52, %v7557_v0  ;;  %v6509_v41 = vpack.c.bf16 %v6493_v31, %v6492_v34  ;;  %v5992_v28 = vsel %vm2037_vm3, %v5982_v25, %v5991_v43  ;;  %v7354_v20 = vsel %vm2876_vm5, %v7349_v21, %v7353_v16 }
 0x488   : > { %v6154_v25 = vadd.f32 %v16122_v8, %v18434_v36  ;;  %v7226_v32 = vpack.c.bf16 %v7209_v50, %v7209_v50  ;;  %v7357_v29 = vor.u32 %v7355_v37, %v7353_v16  ;;  %v6677_v5 = vadd.f32 %v6618_v61, %v6156_v2 }
 0x489   : > { %v7625_v3 = vmax.f32 %v7593_v13, 0.0  ;;  %v6099_v48 = vpop.f32.mrf.mxu0  ;;  %vm9105_vm3 = vcmask 523264  }
 0x48a   : > { %v7457_v57 = vpop.f32.mrf.mxu2  ;;  %v6675_v7 = vadd.f32 %v16138_v49, %v6154_v25  ;;  %v7359_v8 = vshll.u32 %v7226_v32, 16 }
 0x48b   : > { %v5330_v38 = vpop.f32.mrf.mxu3  ;;  %v7652_v44 = vpack.c.bf16 %v7625_v3, %v7624_v19  ;;  %v7522_v55 = vadd.f32 %v7457_v57, %v6673_v26  ;;  %v5348_v19 = vadd.f32 %v15528_v62, %v18435_v12 }
 0x48c   : > { %v16175_v23 = vadd.f32 %v5330_v38, %v15782_v58  ;;  %v7361_v26 = vrot.slane %v7359_v8, 1 }
 0x48d   : > { %10039 = vmatmul.msk.bf16.gmra.mxu3 %vm1899_vm1, %v7652_v44  ;;  %v7558_v58 = vmul.f32 %v15869_v27, %v7522_v55  ;;  %v6155_v30 = vadd.f32 %v16149_v15, %v5348_v19 }
 0x48e   : > { %10002 = vmatmul.msk.bf16.gmra.mxu1 %vm1899_vm1, %v6509_v41  ;;  %v6620_v33 = vpop.f32.mrf.mxu1  ;;  %v7362_v15 = vsel %vm2876_vm5, %v7357_v29, %v7361_v26  ;;  %v18440_v29 = vld [vmem:[#allocation94_spill] sm:$0xff] }
 0x48f   : > { %v7594_v0 = vadd.f32 %v15889_v52, %v7558_v58  ;;  %v6676_v57 = vadd.f32 %v6615_v56, %v6155_v30 }
 0x491   : > { %9978 = vmatmul.msk.bf16.gmra.mxu0 %vm1899_vm1, %v5992_v28  ;;  %v7626_v10 = vmax.f32 %v7594_v0, 0.0  ;;  %v6102_v3 = vpop.f32.mrf.mxu0 }
 0x492   : > { %v7459_v63 = vpop.f32.mrf.mxu2 }
 0x493   : > { %v7523_v46 = vadd.f32 %v7459_v63, %v6674_v4  ;;  %v18436_v4 = vld [vmem:[#allocation45_spill] sm:$0xff] }
 0x494   : > { %v5350_v58 = vadd.f32 %v15600_v51, %v18436_v4 }
 0x495   : > { %v7559_v47 = vmul.f32 %v15869_v27, %v7523_v46 }
 0x496   : > { %10025 = vmatmul.msk.bf16.gmra.mxu2 %vm1899_vm1, %v7354_v20  ;;  %v6623_v38 = vpop.f32.mrf.mxu1  ;;  %v6157_v63 = vadd.f32 %v6099_v48, %v5350_v58 }
 0x497   : > { %v7595_v45 = vadd.f32 %v15889_v52, %v7559_v47  ;;  %v6158_v47 = vadd.f32 %v6102_v3, %v15646_v53  ;;  %v18439_v3 = vld [vmem:[#allocation65_spill] sm:$0xff] }
 0x498   : > { %v6678_v35 = vadd.f32 %v6620_v33, %v6157_v63  ;;  %v18442_v63 = vld [vmem:[#allocation106_spill] sm:$0xff] }
 0x499   : > { %v7627_v13 = vmax.f32 %v7595_v45, 0.0  ;;  %v6104_v41 = vpop.f32.mrf.mxu0  ;;  %v6679_v48 = vadd.f32 %v6623_v38, %v6158_v47  ;;  %v18437_v45 = vld [vmem:[#allocation112_spill] sm:$0xff] }
 0x49a   : > { %v7462_v39 = vpop.f32.mrf.mxu2 }
 0x49b   : > { %v7653_v31 = vpack.c.bf16 %v7627_v13, %v7626_v10  ;;  %v7524_v34 = vadd.f32 %v7462_v39, %v6675_v7  ;;  %v18438_v10 = vld [vmem:[#allocation87_spill] sm:$0xff] }
 0x49c   : > { %v5352_v13 = vadd.f32 %v18438_v10, %v18437_v45 }
 0x49d   : > { %10040 = vmatmul.msk.bf16.gmra.mxu3 %vm1899_vm1, %v7653_v31  ;;  %v7560_v14 = vmul.f32 %v15869_v27, %v7524_v34 }
 0x49e   : > { %v6625_v59 = vpop.f32.mrf.mxu1  ;;  %v6159_v39 = vadd.f32 %v6104_v41, %v5352_v13 }
 0x49f   : > { %v7596_v62 = vadd.f32 %v15889_v52, %v7560_v14  ;;  %v16224_v14 = vpop.f32.mrf.mxu3 }
 0x4a0   : > { %v6680_v12 = vadd.f32 %v6625_v59, %v6159_v39 }
 0x4a1   : > { %v7628_v55 = vmax.f32 %v7596_v62, 0.0  ;;  %v6107_v28 = vpop.f32.mrf.mxu0 }
 0x4a2   : > { %v7464_v44 = vpop.f32.mrf.mxu2  ;;  %v6160_v8 = vadd.f32 %v6107_v28, %v18439_v3 }
 0x4a3   : > { %v7525_v40 = vadd.f32 %v7464_v44, %v6676_v57 }
 0x4a5   : > { %v7561_v49 = vmul.f32 %v15869_v27, %v7525_v40  ;;  %v18441_v40 = vld [vmem:[#allocation23_spill] sm:$0xff] }
 0x4a6   : > { %10026 = vmatmul.msk.bf16.gmra.mxu2 %vm1899_vm1, %v7362_v15  ;;  %v6628_v9 = vpop.f32.mrf.mxu1  ;;  %v5354_v62 = vadd.f32 %v18441_v40, %v18440_v29 }
 0x4a7   : > { %v7597_v22 = vadd.f32 %v15889_v52, %v7561_v49  ;;  %v6681_v15 = vadd.f32 %v6628_v9, %v6160_v8 }
 0x4a9   : > { %v7629_v56 = vmax.f32 %v7597_v22, 0.0  ;;  %v6109_v20 = vpop.f32.mrf.mxu0 }
 0x4aa   : > { %v7467_v43 = vpop.f32.mrf.mxu2  ;;  %v6161_v41 = vadd.f32 %v6109_v20, %v5354_v62 }
 0x4ab   : > { %v7654_v11 = vpack.c.bf16 %v7629_v56, %v7628_v55  ;;  %v7526_v60 = vadd.f32 %v7467_v43, %v6677_v5 }
 0x4ad   : > { %10041 = vmatmul.msk.bf16.gmra.mxu3 %vm1899_vm1, %v7654_v11  ;;  %v7562_v16 = vmul.f32 %v15869_v27, %v7526_v60 }
 0x4ae   : > { %v6630_v33 = vpop.f32.mrf.mxu1 }
 0x4af   : > { %v7598_v54 = vadd.f32 %v15889_v52, %v7562_v16  ;;  %v6682_v43 = vadd.f32 %v6630_v33, %v6161_v41 }
 0x4b1   : > { %v7630_v51 = vmax.f32 %v7598_v54, 0.0  ;;  %v6112_v31 = vpop.f32.mrf.mxu0 }
 0x4b2   : > { %v7469_v46 = vpop.f32.mrf.mxu2  ;;  %v6162_v28 = vadd.f32 %v6112_v31, %v18442_v63 }
 0x4b3   : > { %v7527_v21 = vadd.f32 %v7469_v46, %v6678_v35 }
 0x4b5   : > { %v7563_v61 = vmul.f32 %v15869_v27, %v7527_v21 }
 0x4b6   : > { %v6633_v57 = vpop.f32.mrf.mxu1 }
 0x4b7   : > { %v7599_v0 = vadd.f32 %v15889_v52, %v7563_v61  ;;  %v18443_v61 = vld [vmem:[#allocation19_spill] sm:$0xff] }
 0x4b9   : > { %v7631_v50 = vmax.f32 %v7599_v0, 0.0  ;;  %v6114_v22 = vpop.f32.mrf.mxu0  ;;  %v18444_v0 = vld [vmem:[#allocation26_spill] sm:$0xff] }
 0x4ba   : > { %v7472_v36 = vpop.f32.mrf.mxu2  ;;  %v5356_v47 = vadd.f32 %v18444_v0, %v18443_v61 }
 0x4bb   : > { %v7655_v25 = vpack.c.bf16 %v7631_v50, %v7630_v51  ;;  %v7528_v32 = vadd.f32 %v7472_v36, %v6679_v48  ;;  %v6683_v50 = vadd.f32 %v6633_v57, %v6162_v28 }
 0x4bc   : > { %v6163_v20 = vadd.f32 %v6114_v22, %v5356_v47 }
 0x4bd   : > { %10042 = vmatmul.msk.bf16.gmra.mxu3 %vm1899_vm1, %v7655_v25  ;;  %v7564_v19 = vmul.f32 %v15869_v27, %v7528_v32 }
 0x4be   : > { %v6635_v5 = vpop.f32.mrf.mxu1 }
 0x4bf   : > { %v7600_v30 = vadd.f32 %v15889_v52, %v7564_v19  ;;  %v6684_v10 = vadd.f32 %v6635_v5, %v6163_v20 }
 0x4c1   : > { %v7632_v26 = vmax.f32 %v7600_v30, 0.0  ;;  %v6117_v4 = vpop.f32.mrf.mxu0 }
 0x4c2   : > { %v7474_v7 = vpop.f32.mrf.mxu2 }
 0x4c3   : > { %v7529_v53 = vadd.f32 %v7474_v7, %v6680_v12  ;;  %v18445_v7 = vld [vmem:[#allocation53_spill] sm:$0xff] }
 0x4c5   : > { %v7565_v34 = vmul.f32 %v15869_v27, %v7529_v53  ;;  %v6164_v53 = vadd.f32 %v6117_v4, %v18445_v7 }
 0x4c7   : > { %v7601_v37 = vadd.f32 %v15889_v52, %v7565_v34  ;;  %v6638_v9 = vpop.f32.mrf.mxu1 }
 0x4c9   : > { %v7633_v38 = vmax.f32 %v7601_v37, 0.0  ;;  %v6119_v48 = vpop.f32.mrf.mxu0  ;;  %v6685_v37 = vadd.f32 %v6638_v9, %v6164_v53  ;;  %v18448_v9 = vld [vmem:[#allocation107_spill] sm:$0xff] }
 0x4ca   : > { %v7477_v44 = vpop.f32.mrf.mxu2 }
 0x4cb   : > { %v7656_v49 = vpack.c.bf16 %v7633_v38, %v7632_v26  ;;  %v7530_v2 = vadd.f32 %v7477_v44, %v6681_v15  ;;  %v18446_v38 = vld [vmem:[#allocation51_spill] sm:$0xff] }
 0x4cc   : > { %v18447_v44 = vld [vmem:[#allocation39_spill] sm:$0xff] }
 0x4cd   : > { %10043 = vmatmul.msk.bf16.gmra.mxu3 %vm1899_vm1, %v7656_v49  ;;  %v7566_v56 = vmul.f32 %v15869_v27, %v7530_v2  ;;  %v5358_v29 = vadd.f32 %v18447_v44, %v18446_v38 }
 0x4cf   : > { %v7602_v58 = vadd.f32 %v15889_v52, %v7566_v56  ;;  %v6640_v33 = vpop.f32.mrf.mxu1  ;;  %v6165_v62 = vadd.f32 %v6119_v48, %v5358_v29 }
 0x4d0   : > { %v16229_v55 = vpop.f32.mrf.mxu3 }
 0x4d1   : > { %v7634_v46 = vmax.f32 %v7602_v58, 0.0  ;;  %v6122_v31 = vpop.f32.mrf.mxu0  ;;  %v6686_v49 = vadd.f32 %v6640_v33, %v6165_v62 }
 0x4d2   : > { %v7479_v11 = vpop.f32.mrf.mxu2  ;;  %v6166_v4 = vadd.f32 %v6122_v31, %v15933_v24  ;;  %v18449_v31 = vld [vmem:[#allocation37_spill] sm:$0xff] }
 0x4d3   : > { %v7531_v59 = vadd.f32 %v7479_v11, %v6682_v43  ;;  %v5362_v7 = vadd.f32 %v16093_v6, %v18449_v31 }
 0x4d5   : > { %v7567_v60 = vmul.f32 %v15869_v27, %v7531_v59 }
 0x4d7   : > { %v7603_v35 = vadd.f32 %v15889_v52, %v7567_v60 }
 0x4d8   : > { %v16236_v16 = vpop.f32.mrf.mxu3 }
 0x4d9   : > { %v7635_v21 = vmax.f32 %v7603_v35, 0.0  ;;  %v6643_v26 = vpop.f32.mrf.mxu1  ;;  %v6124_v41 = vpop.f32.mrf.mxu0 }
 0x4da   : > { %v7482_v54 = vpop.f32.mrf.mxu2 }
 0x4db   : > { %v7657_v51 = vpack.c.bf16 %v7635_v21, %v7634_v46  ;;  %v7532_v36 = vadd.f32 %v7482_v54, %v6683_v50  ;;  %v6687_v46 = vadd.f32 %v6643_v26, %v6166_v4  ;;  %v5360_v54 = vadd.f32 %v15982_v1, %v18448_v9 }
 0x4dd   : > { %10044 = vmatmul.msk.bf16.gmra.mxu3 %vm1899_vm1, %v7657_v51  ;;  %v7568_v25 = vmul.f32 %v15869_v27, %v7532_v36  ;;  %v6167_v47 = vadd.f32 %v6124_v41, %v5360_v54 }
 0x4df   : > { %v7604_v39 = vadd.f32 %v15889_v52, %v7568_v25 }
 0x4e0   : > { %v16242_v45 = vpop.f32.mrf.mxu3 }
 0x4e1   : > { %v7636_v30 = vmax.f32 %v7604_v39, 0.0  ;;  %v6645_v11 = vpop.f32.mrf.mxu1 }
 0x4e2   : > { %v7484_v13 = vpop.f32.mrf.mxu2  ;;  %v6688_v51 = vadd.f32 %v6645_v11, %v6167_v47  ;;  %v18450_v11 = vld [vmem:[#allocation113_spill] sm:$0xff] }
 0x4e3   : > { %v7533_v32 = vadd.f32 %v7484_v13, %v6684_v10 }
 0x4e5   : > { %v7569_v12 = vmul.f32 %v15869_v27, %v7533_v32 }
 0x4e7   : > { %v7605_v19 = vadd.f32 %v15889_v52, %v7569_v12 }
 0x4e8   : > { %v16248_v3 = vpop.f32.mrf.mxu3 }
 0x4e9   : > { %v7637_v34 = vmax.f32 %v7605_v19, 0.0 }
 0x4ea   : > { %v7487_v8 = vpop.f32.mrf.mxu2 }
 0x4eb   : > { %v7658_v57 = vpack.c.bf16 %v7637_v34, %v7636_v30  ;;  %v7534_v40 = vadd.f32 %v7487_v8, %v6685_v37  ;;  %v6648_v0 = vpop.f32.mrf.mxu1 }
 0x4ec   : > { %v6127_v28 = vpop.f32.mrf.mxu0 }
 0x4ed   : > { %10045 = vmatmul.msk.bf16.gmra.mxu3 %vm1899_vm1, %v7658_v57  ;;  %v7570_v15 = vmul.f32 %v15869_v27, %v7534_v40  ;;  %v6168_v13 = vadd.f32 %v6127_v28, %v16013_v42 }
 0x4ef   : > { %v7606_v43 = vadd.f32 %v15889_v52, %v7570_v15  ;;  %v6689_v30 = vadd.f32 %v6648_v0, %v6168_v13  ;;  %v11069_v15 = vld [vmem:[%s17547_s6] ss:$0 sm:$0xff] }
 0x4f0   : > { %v16254_v22 = vpop.f32.mrf.mxu3 }
 0x4f1   : > { %v7638_v58 = vmax.f32 %v7606_v43, 0.0 }
 0x4f2   : > { %v7489_v2 = vpop.f32.mrf.mxu2 }
 0x4f3   : > { %v7535_v56 = vadd.f32 %v7489_v2, %v6686_v49  ;;  %v6650_v32 = vpop.f32.mrf.mxu1 }
 0x4f4   : > { %v6129_v48 = vpop.f32.mrf.mxu0 }
 0x4f5   : > { %v7571_v5 = vmul.f32 %v15869_v27, %v7535_v56  ;;  %v6169_v8 = vadd.f32 %v6129_v48, %v5362_v7 }
 0x4f7   : > { %v7607_v59 = vadd.f32 %v15889_v52, %v7571_v5  ;;  %v6690_v26 = vadd.f32 %v6650_v32, %v6169_v8 }
 0x4f8   : > { %v16260_v63 = vpop.f32.mrf.mxu3 }
 0x4f9   : > { %v7639_v60 = vmax.f32 %v7607_v59, 0.0  ;;  %v5364_v59 = vadd.f32 %v16159_v18, %v18450_v11  ;;  %v16312_v11 = vld [vmem:[%s17549_s8] ss:$0 sm:$0xff] }
 0x4fa   : > { %v7492_v35 = vpop.f32.mrf.mxu2 }
 0x4fb   : > { %v7659_v21 = vpack.c.bf16 %v7639_v60, %v7638_v58  ;;  %v7536_v61 = vadd.f32 %v7492_v35, %v6687_v46  ;;  %v6653_v38 = vpop.f32.mrf.mxu1 }
 0x4fd   : > { %10046 = vmatmul.msk.bf16.gmra.mxu3 %vm1899_vm1, %v7659_v21  ;;  %v7572_v50 = vmul.f32 %v15869_v27, %v7536_v61 }
 0x4fe   : > { %v6132_v34 = vpop.f32.mrf.mxu0 }
 0x4ff   : > { %v7608_v25 = vadd.f32 %v15889_v52, %v7572_v50  ;;  %v6170_v49 = vadd.f32 %v6132_v34, %v16134_v17 }
 0x500   : > { %v16266_v24 = vpop.f32.mrf.mxu3 }
 0x501   : > { %v7640_v33 = vmax.f32 %v7608_v25, 0.0  ;;  %v6691_v58 = vadd.f32 %v6653_v38, %v6170_v49 }
 0x502   : > { %v7494_v20 = vpop.f32.mrf.mxu2 }
 0x503   : > { %v7537_v36 = vadd.f32 %v7494_v20, %v6688_v51 }
 0x505   : > { %v7573_v10 = vmul.f32 %v15869_v27, %v7537_v36  ;;  %v11068_v27 = vld [vmem:[%s18414_s5] ss:$0 sm:$0xff] }
 0x506   : > { %v6134_v62 = vpop.f32.mrf.mxu0 }
 0x507   : > { %v7609_v1 = vadd.f32 %v15889_v52, %v7573_v10  ;;  %v6171_v60 = vadd.f32 %v6134_v62, %v5364_v59  ;;  %v18451_v10 = vld [vmem:[#allocation75_spill] sm:$0xff]  ;;  %v7822_v59 = vmul.f32 %v16312_v11, %v16236_v16 }
 0x508   : > { %v16272_v12 = vpop.f32.mrf.mxu3  ;;  %v5366_v13 = vadd.f32 %v16224_v14, %v18451_v10 }
 0x509   : > { %v7641_v39 = vmax.f32 %v7609_v1, 0.0 }
 0x50a   : > { %v7497_v19 = vpop.f32.mrf.mxu2 }
 0x50b   : > { %v7660_v53 = vpack.c.bf16 %v7641_v39, %v7640_v33  ;;  %v7538_v37 = vadd.f32 %v7497_v19, %v6689_v30 }
 0x50d   : > { %10047 = vmatmul.msk.bf16.gmra.mxu3 %vm1899_vm1, %v7660_v53  ;;  %v7574_v42 = vmul.f32 %v11068_v27, %v7538_v37 }
 0x50e   : > { %v6137_v17 = vpop.f32.mrf.mxu0 }
 0x50f   : > { %v7610_v6 = vadd.f32 %v15889_v52, %v7574_v42  ;;  %v6655_v52 = vpop.f32.mrf.mxu1  ;;  %v6172_v51 = vadd.f32 %v6137_v17, %v16175_v23  ;;  %v7824_v17 = vmul.f32 %v16312_v11, %v16248_v3 }
 0x510   : > { %v16280_v57 = vpop.f32.mrf.mxu3  ;;  %v6692_v21 = vadd.f32 %v6655_v52, %v6171_v60  ;;  %v16323_v52 = vld [vmem:[%s17550_s9] ss:$0 sm:$0xff]  ;;  %v7823_v60 = vmul.f32 %v16312_v11, %v16242_v45 }
 0x511   : > { %v7642_v2 = vmax.f32 %v7610_v6, 0.0 }
 0x512   : > { %v7499_v44 = vpop.f32.mrf.mxu2 }
 0x513   : > { %v7539_v29 = vadd.f32 %v7499_v44, %v6690_v26 }
 0x515   : > { %v7575_v40 = vmul.f32 %v11068_v27, %v7539_v29 }
 0x516   : > { %v6139_v48 = vpop.f32.mrf.mxu0 }
 0x517   : > { %v7611_v41 = vadd.f32 %v11069_v15, %v7575_v40  ;;  %v6658_v47 = vpop.f32.mrf.mxu1  ;;  %v6173_v33 = vadd.f32 %v6139_v48, %v5366_v13 }
 0x518   : > { %v16287_v43 = vpop.f32.mrf.mxu3  ;;  %v6693_v32 = vadd.f32 %v6658_v47, %v6172_v51  ;;  %v7825_v51 = vmul.f32 %v16312_v11, %v16254_v22  ;;  %v11196_v22 = vmov 64.0  }
 0x519   : > { %v7643_v56 = vmax.f32 %v7611_v41, 0.0  ;;  %v7830_v45 = vmul.f32 %v16312_v11, %v16287_v43  ;;  %10963 = vrcp.f32 %v11196_v22 }
 0x51a   : > { %v7502_v5 = vpop.f32.mrf.mxu2 }
 0x51b   : > { %v7661_v4 = vpack.c.bf16 %v7643_v56, %v7642_v2  ;;  %v7540_v28 = vadd.f32 %v7502_v5, %v6691_v58  ;;  %v7821_v58 = vmul.f32 %v16312_v11, %v16229_v55  ;;  %v10255_v55 = vld [vmem:[%s17551_s10 + $0x38] sm:$0xff] }
 0x51c   : > { %8081 = vmatpush.bf16.msrb.mxu0 %v10255_v55 }
 0x51d   : > { %10048 = vmatmul.msk.bf16.gmra.mxu3 %vm1899_vm1, %v7661_v4  ;;  %v7576_v35 = vmul.f32 %v11068_v27, %v7540_v28  ;;  %v16328_v28 = vadd.f32 %v16323_v52, %v7822_v59  ;;  %v16333_v16 = vadd.f32 %v16323_v52, %v7821_v58 }
 0x51f   : > { %v7612_v61 = vadd.f32 %v11069_v15, %v7576_v35  ;;  %v6660_v19 = vpop.f32.mrf.mxu1  ;;  %v16336_v35 = vadd.f32 %v16323_v52, %v7823_v60 }
 0x520   : > { %v16292_v46 = vpop.f32.mrf.mxu3  ;;  %v6694_v53 = vadd.f32 %v6660_v19, %v6173_v33  ;;  %v7827_v19 = vmul.f32 %v16312_v11, %v16266_v24 }
 0x521   : > { %v7644_v50 = vmax.f32 %v7612_v61, 0.0  ;;  %v7831_v47 = vmul.f32 %v16312_v11, %v16292_v46 }
 0x522   : > { %v7504_v9 = vpop.f32.mrf.mxu2 }
 0x523   : > { %v7541_v54 = vadd.f32 %v7504_v9, %v6692_v21  ;;  %v7889_v21 = vadd.f32 %v16328_v28, %v16333_v16  ;;  %v16346_v9 = vadd.f32 %v16323_v52, %v7824_v17  ;;  %v16375_v13 = vadd.f32 %v16323_v52, %v7831_v47 }
 0x525   : > { %v7577_v0 = vmul.f32 %v11068_v27, %v7541_v54  ;;  %v7890_v61 = vadd.f32 %v7889_v21, %v16336_v35 }
 0x527   : > { %v7613_v18 = vadd.f32 %v11069_v15, %v7577_v0  ;;  %v7829_v0 = vmul.f32 %v16312_v11, %v16280_v57  ;;  %v7891_v48 = vadd.f32 %v7890_v61, %v16346_v9  ;;  %v7826_v57 = vmul.f32 %v16312_v11, %v16260_v63 }
 0x528   : > { %v7764_v36 = vpop.f32.mrf.mxu3 }
 0x529   : > { %v7645_v20 = vmax.f32 %v7613_v18, 0.0  ;;  %v16372_v10 = vadd.f32 %v16323_v52, %v7829_v0 }
 0x52a   : > { %v7507_v25 = vpop.f32.mrf.mxu2 }
 0x52b   : > { %v7662_v1 = vpack.c.bf16 %v7645_v20, %v7644_v50  ;;  %v7542_v39 = vadd.f32 %v7507_v25, %v6693_v32  ;;  %v16361_v50 = vadd.f32 %v16323_v52, %v7830_v45  ;;  %v7832_v20 = vmul.f32 %v16312_v11, %v7764_v36 }
 0x52d   : > { %10049 = vmatmul.msk.bf16.gmra.mxu3 %vm1899_vm1, %v7662_v1  ;;  %v7578_v31 = vmul.f32 %v11068_v27, %v7542_v39  ;;  %v16379_v1 = vadd.f32 %v16323_v52, %v7825_v51  ;;  %v10254_v39 = vld [vmem:[%s17551_s10 + $0x30] sm:$0xff] }
 0x52e   : > { %8082 = vmatpush.bf16.msrb.mxu0 %v10254_v39 }
 0x52f   : > { %v7614_v34 = vadd.f32 %v11069_v15, %v7578_v31  ;;  %v7923_v31 = vadd.f32 %v16361_v50, %v16372_v10  ;;  %v7910_v22 = vmax.f32 %v16333_v16, %v16379_v1 }
 0x530   : > { %v7767_v7 = vpop.f32.mrf.mxu3 }
 0x531   : > { %v7646_v42 = vmax.f32 %v7614_v34, 0.0  ;;  %v7833_v36 = vmul.f32 %v16312_v11, %v7767_v7  ;;  %v16396_v7 = vadd.f32 %v16323_v52, %v7832_v20 }
 0x532   : > { %v7509_v23 = vpop.f32.mrf.mxu2 }
 0x533   : > { %v7543_v30 = vadd.f32 %v7509_v23, %v6694_v53  ;;  %v16400_v23 = vadd.f32 %v16323_v52, %v7826_v57 }
 0x535   : > { %v7579_v8 = vmul.f32 %v11068_v27, %v7543_v30 }
 0x537   : > { %v7615_v37 = vadd.f32 %v11069_v15, %v7579_v8 }
 0x538   : > { %v7769_v38 = vpop.f32.mrf.mxu3 }
 0x539   : > { %v7647_v26 = vmax.f32 %v7615_v37, 0.0  ;;  %v7834_v53 = vmul.f32 %v16312_v11, %v7769_v38  ;;  %v7828_v37 = vmul.f32 %v16312_v11, %v16272_v12  ;;  %v10253_v12 = vld [vmem:[%s17551_s10 + $0x28] sm:$0xff] }
 0x53a   : > { %8083 = vmatpush.bf16.msrb.mxu0 %v10253_v12 }
 0x53b   : > { %v7663_v44 = vpack.c.bf16 %v7647_v26, %v7646_v42  ;;  %v7924_v42 = vadd.f32 %v7923_v31, %v16375_v13  ;;  %v16412_v26 = vadd.f32 %v16323_v52, %v7833_v36  ;;  %v16444_v55 = vadd.f32 %v16323_v52, %v7828_v37 }
 0x53d   : > { %10050 = vmatmul.msk.bf16.gmra.mxu3 %vm1899_vm1, %v7663_v44  ;;  %v7892_v44 = vadd.f32 %v7891_v48, %v16379_v1  ;;  %v7913_v48 = vmax.f32 %v16346_v9, %v16444_v55  ;;  %vm8253_vm1 = vcmask 31744  }
 0x53f   : > { %v7893_v17 = vadd.f32 %v7892_v44, %v16400_v23 }
 0x540   : > { %v16299_v14 = vpop.f32.mrf.mxu3 }
 0x541   : > { %v7835_v38 = vmul.f32 %v16312_v11, %v16299_v14  ;;  %v7925_v14 = vadd.f32 %v7924_v42, %v16396_v7 }
 0x543   : > { %v7926_v21 = vadd.f32 %v7925_v14, %v16412_v26  ;;  %v16448_v45 = vadd.f32 %v16323_v52, %v7835_v38 }
 0x545   : > { %v7939_v12 = vmax.f32 %v16375_v13, %v16448_v45 }
 0x548   : > { %v16301_v29 = vpop.f32.mrf.mxu3 }
 0x549   : > { %v7836_v59 = vmul.f32 %v16312_v11, %v16301_v29 }
 0x54b   : > { %v16460_v47 = vadd.f32 %v16323_v52, %v7836_v59 }
 0x550   : > { %v7777_v6 = vpop.f32.mrf.mxu3 }
 0x551   : > { %v7837_v43 = vmul.f32 %v16312_v11, %v7777_v6 }
 0x553   : > { %v16382_v63 = vadd.f32 %v16323_v52, %v7837_v43 }
 0x558   : > { %v7779_v40 = vpop.f32.mrf.mxu3 }
 0x559   : > { %v7838_v3 = vmul.f32 %v16312_v11, %v7779_v40 }
 0x55b   : > { %v16368_v25 = vadd.f32 %v16323_v52, %v7838_v3 }
 0x55d   : > { %v7950_v30 = vadd.f32 %v16368_v25, %v16382_v63 }
 0x560   : > { %v7782_v62 = vpop.f32.mrf.mxu3 }
 0x561   : > { %v7839_v18 = vmul.f32 %v16312_v11, %v7782_v62 }
 0x563   : > { %v16385_v32 = vadd.f32 %v16323_v52, %v7839_v18 }
 0x565   : > { %v7951_v6 = vadd.f32 %v7950_v30, %v16385_v32 }
 0x568   : > { %v7784_v49 = vpop.f32.mrf.mxu3 }
 0x569   : > { %v7840_v46 = vmul.f32 %v16312_v11, %v7784_v49  ;;  %v16425_v49 = vpop.eup %10963 }
 0x56a   : > { %v7903_v30 = vmul.f32 64.0, %v16425_v49  ;;  %vm7907_vm6 = vweird.f32 %v16425_v49 }
 0x56b   : > { %v16405_v34 = vadd.f32 %v16323_v52, %v7840_v46 }
 0x56d   : > { %v7952_v58 = vadd.f32 %v7951_v6, %v16405_v34  ;;  %v7937_v6 = vmax.f32 %v16372_v10, %v16412_v26 }
 0x570   : > { %v7787_v41 = vpop.f32.mrf.mxu3 }
 0x571   : > { %v7841_v33 = vmul.f32 %v16312_v11, %v7787_v41  ;;  %v16428_v41 = vadd.f32 %v16323_v52, %v7827_v19 }
 0x573   : > { %v16419_v40 = vadd.f32 %v16323_v52, %v7841_v33  ;;  %v7894_v61 = vadd.f32 %v7893_v17, %v16428_v41  ;;  %v10251_v33 = vld [vmem:[%s17551_s10 + $0x18] sm:$0xff]  ;;  %v7912_v39 = vmax.f32 %v16336_v35, %v16428_v41 }
 0x575   : > { %v7953_v29 = vadd.f32 %v7952_v58, %v16419_v40  ;;  %v7895_v20 = vadd.f32 %v7894_v61, %v16444_v55  ;;  %v7915_v38 = vmax.f32 %v7912_v39, %v7913_v48 }
 0x577   : > { %v7896_v42 = vrot.slane %v7895_v20, 4 }
 0x578   : > { %v7789_v2 = vpop.f32.mrf.mxu3 }
 0x579   : > { %v7842_v8 = vmul.f32 %v16312_v11, %v7789_v2  ;;  %v16432_v2 = vadd.f32 %v16323_v52, %v7834_v53  ;;  %v7911_v53 = vmax.f32 %v16328_v28, %v16400_v23 }
 0x57b   : > { %v7927_v0 = vadd.f32 %v7926_v21, %v16432_v2 }
 0x57d   : > { %v7928_v57 = vadd.f32 %v7927_v0, %v16448_v45  ;;  %v10249_v0 = vld [vmem:[%s17551_s10 + $0x8] sm:$0xff] }
 0x57f   : > { %v7929_v19 = vadd.f32 %v7928_v57, %v16460_v47 }
 0x580   : > { %v7792_v56 = vpop.f32.mrf.mxu3 }
 0x581   : > { %v7843_v62 = vmul.f32 %v16312_v11, %v7792_v56  ;;  %v16438_v56 = vadd.f32 %v16323_v52, %v7842_v8  ;;  %v7940_v8 = vmax.f32 %v16396_v7, %v16460_v47  ;;  %v7930_v59 = vrot.slane %v7929_v19, 4 }
 0x583   : > { %v16452_v3 = vadd.f32 %v16323_v52, %v7843_v62  ;;  %v7954_v51 = vadd.f32 %v7953_v29, %v16438_v56  ;;  %v7938_v62 = vmax.f32 %v16361_v50, %v16432_v2  ;;  %v7942_v17 = vmax.f32 %v7939_v12, %v7940_v8 }
 0x584   : > { %v7965_v21 = vmax.f32 %v16368_v25, %v16438_v56 }
 0x585   : > { %v7955_v36 = vadd.f32 %v7954_v51, %v16452_v3  ;;  %v7966_v29 = vmax.f32 %v16385_v32, %v16452_v3  ;;  %v7914_v51 = vmax.f32 %v7910_v22, %v7911_v53 }
 0x587   : > { %v7916_v53 = vmax.f32 %v7914_v51, %v7915_v38 }
 0x588   : > { %v16303_v5 = vpop.f32.mrf.mxu3 }
 0x589   : > { %v7844_v60 = vmul.f32 %v16312_v11, %v16303_v5  ;;  %v10252_v5 = vld [vmem:[%s17551_s10 + $0x20] sm:$0xff] }
 0x58a   : > { %8084 = vmatpush.bf16.msrb.mxu0 %v10252_v5 }
 0x58b   : > { %v16464_v43 = vadd.f32 %v16323_v52, %v7844_v60 }
 0x58d   : > { %v7956_v37 = vadd.f32 %v7955_v36, %v16464_v43  ;;  %v7967_v14 = vmax.f32 %v16405_v34, %v16464_v43  ;;  %v7941_v36 = vmax.f32 %v7937_v6, %v7938_v62 }
 0x58e   : > { %8085 = vmatpush.bf16.msrb.mxu0 %v10251_v33  ;;  %v7964_v33 = vmax.f32 %v16382_v63, %v16419_v40 }
 0x58f   : > { %v7957_v5 = vrot.slane %v7956_v37, 4  ;;  %v7969_v39 = vmax.f32 %v7966_v29, %v7967_v14 }
 0x590   : > { %v16305_v27 = vpop.f32.mrf.mxu3 }
 0x591   : > { %v7845_v31 = vmul.f32 %v16312_v11, %v16305_v27  ;;  %v7958_v12 = vadd.f32 %v7957_v5, %v7956_v37  ;;  %v7917_v37 = vrot.slane %v7916_v53, 4 }
 0x593   : > { %v16508_v58 = vadd.f32 %v16323_v52, %v7845_v31  ;;  %v7931_v31 = vadd.f32 %v7930_v59, %v7929_v19 }
 0x595   : > { %v7932_v62 = vrot.slane %v7931_v31, 2 }
 0x598   : > { %v16307_v15 = vpop.f32.mrf.mxu3 }
 0x599   : > { %v7846_v46 = vmul.f32 %v16312_v11, %v16307_v15 }
 0x59b   : > { %v16492_v44 = vadd.f32 %v16323_v52, %v7846_v46  ;;  %v7897_v46 = vadd.f32 %v7896_v42, %v7895_v20  ;;  %v7904_v42 = vsub.f32 1.0, %v7903_v30 }
 0x59d   : > { %v7977_v48 = vadd.f32 %v16492_v44, %v16508_v58  ;;  %v7898_v59 = vrot.slane %v7897_v46, 2 }
 0x5a0   : > { %v16316_v4 = vpop.f32.mrf.mxu3 }
 0x5a1   : > { %v7847_v15 = vmul.f32 %v16312_v11, %v16316_v4  ;;  %v10250_v4 = vld [vmem:[%s17551_s10 + $0x10] sm:$0xff] }
 0x5a2   : > { %8086 = vmatpush.bf16.msrb.mxu0 %v10250_v4  ;;  %v7943_v4 = vmax.f32 %v7941_v36, %v7942_v17  ;;  %v7959_v17 = vrot.slane %v7958_v12, 2  ;;  %v7899_v36 = vadd.f32 %v7898_v59, %v7897_v46 }
 0x5a4   : > { %v7900_v46 = vrot.slane %v7899_v36, 1 }
 0x5a6   : > { %8087 = vmatpush.bf16.msrb.mxu0 %v10249_v0  ;;  %v7933_v0 = vadd.f32 %v7932_v62, %v7931_v31 }
 0x5a8   : > { %v16349_v54 = vpop.f32.mrf.mxu3 }
 0x5a9   : > { %v7848_v27 = vmul.f32 %v16312_v11, %v16349_v54  ;;  %v16511_v54 = vadd.f32 %v16323_v52, %v7847_v15 }
 0x5ab   : > { %v7978_v15 = vadd.f32 %v7977_v48, %v16511_v54 }
 0x5b0   : > { %v7807_v24 = vpop.f32.mrf.mxu3 }
 0x5b1   : > { %v7849_v60 = vmul.f32 %v16312_v11, %v7807_v24  ;;  %v16524_v24 = vadd.f32 %v16323_v52, %v7848_v27  ;;  %v7968_v27 = vmax.f32 %v7964_v33, %v7965_v21  ;;  %v7918_v33 = vmax.f32 %v7916_v53, %v7917_v37 }
 0x5b3   : > { %v16531_v8 = vadd.f32 %v16323_v52, %v7849_v60  ;;  %v7979_v20 = vadd.f32 %v7978_v15, %v16524_v24  ;;  %v7970_v6 = vmax.f32 %v7968_v27, %v7969_v39  ;;  %v7944_v60 = vrot.slane %v7943_v4, 4 }
 0x5b4   : > { %v7960_v15 = vadd.f32 %v7959_v17, %v7958_v12  ;;  %v7919_v53 = vrot.slane %v7918_v33, 2 }
 0x5b5   : > { %v7980_v14 = vadd.f32 %v7979_v20, %v16531_v8  ;;  %v7971_v30 = vrot.slane %v7970_v6, 4  ;;  %v7945_v39 = vmax.f32 %v7943_v4, %v7944_v60  ;;  %v7934_v20 = vrot.slane %v7933_v0, 1 }
 0x5b6   : > { %v7961_v4 = vrot.slane %v7960_v15, 1 }
 0x5b7   : > { %v7935_v17 = vadd.f32 %v7934_v20, %v7933_v0 }
 0x5b8   : > { %v7809_v18 = vpop.f32.mrf.mxu3 }
 0x5b9   : > { %v7850_v57 = vmul.f32 %v16312_v11, %v7809_v18  ;;  %v10248_v18 = vld [vmem:[%s17551_s10] sm:$0xff] }
 0x5ba   : > { %8088 = vmatpush.bf16.msrb.mxu0 %v10248_v18  ;;  %v7972_v18 = vmax.f32 %v7970_v6, %v7971_v30  ;;  %v7920_v6 = vmax.f32 %v7918_v33, %v7919_v53  ;;  %v7962_v30 = vadd.f32 %v7961_v4, %v7960_v15 }
 0x5bb   : > { %v16539_v19 = vadd.f32 %v16323_v52, %v7850_v57 }
 0x5bc   : > { %v7973_v60 = vrot.slane %v7972_v18, 2 }
 0x5bd   : > { %18452 = vst [vmem:[#allocation76_spill] sm:$0xff] %v16539_v19  ;;  %v7981_v29 = vadd.f32 %v7980_v14, %v16539_v19  ;;  %v7992_v51 = vmax.f32 %v16492_v44, %v16539_v19  ;;  %v7946_v14 = vrot.slane %v7945_v39, 2 }
 0x5c0   : > { %v7812_v61 = vpop.f32.mrf.mxu3 }
 0x5c1   : > { %v7851_v22 = vmul.f32 %v16312_v11, %v7812_v61  ;;  %v7905_v61 = vmul.f32 %v16425_v49, %v7904_v42 }
 0x5c3   : > { %v16543_v38 = vadd.f32 %v16323_v52, %v7851_v22  ;;  %v7991_v22 = vmax.f32 %v16508_v58, %v16531_v8  ;;  %v7906_v12 = vadd.f32 %v16425_v49, %v7905_v61 }
 0x5c5   : > { %18453 = vst [vmem:[#allocation109_spill] sm:$0xff] %v16543_v38  ;;  %v7982_v48 = vadd.f32 %v7981_v29, %v16543_v38  ;;  %v7995_v42 = vmax.f32 %v7991_v22, %v7992_v51  ;;  %v7908_v51 = vsel %vm7907_vm6, %v16425_v49, %v7906_v12 }
 0x5c8   : > { %v7814_v21 = vpop.f32.mrf.mxu3 }
 0x5c9   : > { %v7852_v5 = vmul.f32 %v16312_v11, %v7814_v21  ;;  %v7993_v11 = vmax.f32 %v16511_v54, %v16543_v38 }
 0x5cb   : > { %v16552_v57 = vadd.f32 %v16323_v52, %v7852_v5  ;;  %v7901_v5 = vadd.f32 %v7900_v46, %v7899_v36 }
 0x5cd   : > { %18454 = vst [vmem:[#allocation29_spill] sm:$0xff] %v16552_v57  ;;  %v7983_v31 = vadd.f32 %v7982_v48, %v16552_v57  ;;  %v7994_v27 = vmax.f32 %v16524_v24, %v16552_v57  ;;  %v7947_v48 = vmax.f32 %v7945_v39, %v7946_v14  ;;  %v7936_v57 = vmul.f32 %v7935_v17, %v7908_v51 }
 0x5cf   : > { %v7984_v52 = vrot.slane %v7983_v31, 4  ;;  %v7996_v62 = vmax.f32 %v7993_v11, %v7994_v27  ;;  %v7974_v27 = vmax.f32 %v7972_v18, %v7973_v60 }
 0x5d1   : > { %v7985_v59 = vadd.f32 %v7984_v52, %v7983_v31  ;;  %v7997_v37 = vmax.f32 %v7995_v42, %v7996_v62  ;;  %v7909_v31 = vmul.f32 %v7908_v51, %v7901_v5  ;;  %v7921_v42 = vrot.slane %v7920_v6, 1 }
 0x5d2   : > { %v7963_v52 = vmul.f32 %v7962_v30, %v7908_v51  ;;  %v7948_v62 = vrot.slane %v7947_v48, 1  ;;  %v7975_v38 = vrot.slane %v7974_v27, 1 }
 0x5d3   : > { %v7986_v21 = vrot.slane %v7985_v59, 2  ;;  %v7998_v29 = vrot.slane %v7997_v37, 4  ;;  %v8004_v36 = vsel %vm2725_vm4, %v7909_v31, %v7936_v57  ;;  %v7922_v39 = vmax.f32 %v7920_v6, %v7921_v42  ;;  %v8096_v57 = vld [vmem:[%s17552_s11] sm:$0xf] }
 0x5d4   : > { %v8006_v15 = vsel %vm8005_vm7, %v8004_v36, %v7963_v52  ;;  %v7949_v18 = vmax.f32 %v7947_v48, %v7948_v62  ;;  %v7976_v53 = vmax.f32 %v7974_v27, %v7975_v38  ;;  %v8102_v60 = vsel %vm8009_vm9, %v8096_v57, 0 }
 0x5d5   : > { %v7987_v22 = vadd.f32 %v7986_v21, %v7985_v59  ;;  %v7999_v11 = vmax.f32 %v7997_v37, %v7998_v29  ;;  %8111 = vmatpush.bf16.msra.mxu0 %v8102_v60 }
 0x5d7   : > { %v7988_v61 = vrot.slane %v7987_v22, 1  ;;  %v8000_v19 = vrot.slane %v7999_v11, 2 }
 0x5d9   : > { %v7989_v0 = vadd.f32 %v7988_v61, %v7987_v22  ;;  %v8001_v20 = vmax.f32 %v7999_v11, %v8000_v19 }
 0x5db   : > { %v7990_v33 = vmul.f32 %v7989_v0, %v7908_v51  ;;  %v8002_v49 = vrot.slane %v8001_v20, 1 }
 0x5dd   : > { %v8008_v46 = vsel %vm8007_vm8, %v8006_v15, %v7990_v33  ;;  %v8003_v12 = vmax.f32 %v8001_v20, %v8002_v49  ;;  %v10256_v15 = vld [vmem:[%s17557_s16] sm:$0xff] }
 0x5de   : > { %v8010_v4 = vsel %vm8009_vm9, %v8008_v46, %v7922_v39  ;;  %v10258_v46 = vld [vmem:[%s17557_s16 + $0x10] sm:$0xff] }
 0x5df   : > { %v8012_v14 = vsel %vm8011_vm10, %v8010_v4, %v7949_v18  ;;  %v10257_v18 = vld [vmem:[%s17557_s16 + $0x8] sm:$0xff]  ;;  %v10260_v4 = vld [vmem:[%s17557_s16 + $0x20] sm:$0xff] }
 0x5e0   : > { %v8014_v19 = vsel %vm8013_vm11, %v8012_v14, %v7976_v53  ;;  %v10259_v53 = vld [vmem:[%s17557_s16 + $0x18] sm:$0xff]  ;;  %v10262_v14 = vld [vmem:[%s17557_s16 + $0x30] sm:$0xff] }
 0x5e1   : > { %v8015_v59 = vsel %vm1396_vm2, %v8014_v19, %v8003_v12  ;;  %v10261_v12 = vld [vmem:[%s17557_s16 + $0x28] sm:$0xff]  ;;  %v10263_v19 = vld [vmem:[%s17557_s16 + $0x38] sm:$0xff] }
 0x5e2   : > { %v8016_v37 = vpack.c.bf16 %v8015_v59, %v8015_v59  ;;  %v10264_v59 = vld [vmem:[%s17557_s16 + $0x40] sm:$0xff] }
 0x5e4   : > { %8089 = vmatmul.bf16.vlgmr.msrb.gmra.mxu0 %v8016_v37 }
 0x661   : > { %v8090_v17 = vpop.f32.mrf.mxu0 }
 0x662   : > { %v8094_v21 = vmax.f32 %v8090_v17, 0.0 }
 0x664   : > { %v8095_v38 = vpack.c.bf16 %v8094_v21, %v8094_v21  ;;  %v10265_v21 = vld [vmem:[%s17557_s16 + $0x48] sm:$0xff] }
 0x666   : > { %10083 = vmatmul.msk.bf16.vlgmr.msra.gmra.mxu0 %vm8097_vm12, %v8095_v38 }
 0x669   : > { %v8092_v29 = vpop.f32.mrf.mxu0 }
 0x6e3   : > { %v8113_v5 = vpop.f32.mrf.mxu0 }
 0x6e4   : > { %v8118_v6 = vrot.slane %v8113_v5, 4 }
 0x6e6   : > { %v8120_v30 = vadd.f32 %v8118_v6, %v8113_v5 }
 0x6e8   : > { %v10084_v51 = vmul.f32 -1.442695, %v8120_v30 }
 0x6ea   : > { %10965 = vpow2.f32 %v10084_v51  ;;  %v10267_v51 = vld [vmem:[%s17557_s16 + $0x58] sm:$0xff] }
 0x6eb   : > { %v8115_v48 = vpop.f32.mrf.mxu0 }
 0x6f0   : > { %v10966_v22 = vpop.eup %10965 }
 0x6f1   : > { %v8124_v11 = vadd.f32 1.0, %v10966_v22 }
 0x6f3   : > { %10967 = vrcp.f32 %v8124_v11  ;;  %v8136_v42 = vand.u32 2147483648, %v8124_v11  ;;  %v8134_v62 = vand.u32 2147483647, %v8124_v11  ;;  %vm8130_vm14 = vweird.f32 %v8124_v11 }
 0x6f5   : > { %v8137_v20 = vor.u32 1.1754944e-38, %v8136_v42  ;;  %vm8135_vm0 = vcmp.eq.f32.partialorder %v8134_v62, 8.507059e+37 }
 0x6f9   : > { %v10968_v27 = vpop.eup %10967 }
 0x6fa   : > { %v8126_v61 = vmul.f32 %v10968_v27, %v8124_v11  ;;  %vm8131_vm13 = vweird.f32 %v10968_v27  ;;  %v10268_v11 = vld [vmem:[%s17557_s16 + $0x60] sm:$0xff] }
 0x6fb   : > { %vm8132_vm15 = vmor %vm8130_vm14, %vm8131_vm13 }
 0x6fc   : > { %v8127_v31 = vsub.f32 1.0, %v8126_v61 }
 0x6fe   : > { %v8128_v52 = vmul.f32 %v10968_v27, %v8127_v31 }
 0x700   : > { %v8129_v0 = vadd.f32 %v10968_v27, %v8128_v52 }
 0x702   : > { %v8133_v36 = vsel %vm8132_vm15, %v10968_v27, %v8129_v0 }
 0x703   : > { %v8138_v33 = vsel %vm8135_vm0, %v8137_v20, %v8133_v36  ;;  %v10271_v36 = vld [vmem:[%s17557_s16 + $0x78] sm:$0xff] }
 0x704   : > { %v8172_v49 = vpack.c.bf16 %v8138_v33, %v8138_v33 }
 0x706   : > { %v8303_v39 = vsel %vm8005_vm7, %v8172_v49, 0  ;;  %v11197_v49 = vmov 128.0  }
 0x707   : > { %8312 = vmatpush.bf16.msrb.mxu0 %v8303_v39  ;;  %10969 = vrcp.f32 %v11197_v49 }
 0x70a   : > { %10149 = vmatmul.msk.bf16.vlgmr.msrb.gmra.mxu0 %vm8253_vm1, %v10256_v15  ;;  %v10526_v15 = vld [vmem:[%s18468_s30] sm:$0xff]  }
 0x71a   : > { %10150 = vmatmul.msk.bf16.gmra.mxu0 %vm8253_vm1, %v10257_v18 }
 0x72a   : > { %10151 = vmatmul.msk.bf16.gmra.mxu0 %vm8253_vm1, %v10258_v46  ;;  %v10970_v46 = vpop.eup %10969 }
 0x72b   : > { %vm8527_vm2 = vweird.f32 %v10970_v46 }
 0x73a   : > { %10152 = vmatmul.msk.bf16.gmra.mxu0 %vm8253_vm1, %v10259_v53 }
 0x74a   : > { %10153 = vmatmul.msk.bf16.gmra.mxu0 %vm8253_vm1, %v10260_v4 }
 0x75a   : > { %10154 = vmatmul.msk.bf16.gmra.mxu0 %vm8253_vm1, %v10261_v12  ;;  %v8523_v12 = vmul.f32 128.0, %v10970_v46 }
 0x76a   : > { %10155 = vmatmul.msk.bf16.gmra.mxu0 %vm8253_vm1, %v10262_v14 }
 0x77a   : > { %10156 = vmatmul.msk.bf16.gmra.mxu0 %vm8253_vm1, %v10263_v19 }
 0x787   : > { %v8314_v37 = vpop.f32.mrf.mxu0 }
 0x788   : > { %v16609_v57 = vmul.f32 %v8314_v37, %v16333_v16 }
 0x78a   : > { %10157 = vmatmul.msk.bf16.gmra.mxu0 %vm8253_vm1, %v10264_v59  ;;  %8593 = vmax.xlane.f32.xlu0 %v16609_v57  ;;  %v16721_v59 = vunpack.c.h.bf16 %v10526_v15 }
 0x78f   : > { %v8316_v60 = vpop.f32.mrf.mxu0 }
 0x790   : > { %v16614_v17 = vmul.f32 %v8316_v60, %v16328_v28  ;;  %v10266_v28 = vld [vmem:[%s17557_s16 + $0x50] sm:$0xff] }
 0x792   : > { %8595 = vmax.xlane.f32.xlu1 %v16614_v17 }
 0x797   : > { %v8319_v38 = vpop.f32.mrf.mxu0 }
 0x798   : > { %v16621_v29 = vmul.f32 %v8319_v38, %v16336_v35 }
 0x79a   : > { %18455 = vst [vmem:[#allocation17_spill] sm:$0xff] %v16621_v29  ;;  %10158 = vmatmul.msk.bf16.gmra.mxu0 %vm8253_vm1, %v10265_v21  ;;  %8597 = vmax.xlane.f32.xlu1 %v16621_v29  ;;  %v8524_v21 = vsub.f32 1.0, %v8523_v12 }
 0x79f   : > { %v8321_v16 = vpop.f32.mrf.mxu0 }
 0x7a0   : > { %v16626_v5 = vmul.f32 %v8321_v16, %v16346_v9 }
 0x7a2   : > { %18456 = vst [vmem:[#allocation52_spill] sm:$0xff] %v16626_v5  ;;  %8462 = vadd.xlane.f32.xlu1 %v16621_v29  ;;  %8599 = vmax.xlane.f32.xlu2 %v16626_v5 }
 0x7a7   : > { %v8324_v6 = vpop.f32.mrf.mxu0 }
 0x7a8   : > { %v16634_v35 = vmul.f32 %v8324_v6, %v16379_v1  ;;  %v8525_v6 = vmul.f32 %v10970_v46, %v8524_v21 }
 0x7aa   : > { %18457 = vst [vmem:[#allocation103_spill] sm:$0xff] %v16634_v35  ;;  %10159 = vmatmul.msk.bf16.gmra.mxu0 %vm8253_vm1, %v10266_v28  ;;  %8464 = vadd.xlane.f32.xlu2 %v16626_v5 }
 0x7ab   : > { %8601 = vmax.xlane.f32.xlu0 %v16634_v35 }
 0x7af   : > { %v8326_v9 = vpop.f32.mrf.mxu0 }
 0x7b0   : > { %v16640_v30 = vmul.f32 %v8326_v9, %v16400_v23 }
 0x7b2   : > { %18458 = vst [vmem:[#allocation89_spill] sm:$0xff] %v16640_v30  ;;  %8466 = vadd.xlane.f32.xlu2 %v16634_v35  ;;  %8603 = vmax.xlane.f32.xlu1 %v16640_v30 }
 0x7b7   : > { %v8329_v1 = vpop.f32.mrf.mxu0 }
 0x7b8   : > { %v16650_v22 = vmul.f32 %v8329_v1, %v16428_v41 }
 0x7ba   : > { %10160 = vmatmul.msk.bf16.gmra.mxu0 %vm8253_vm1, %v10267_v51  ;;  %8468 = vadd.xlane.f32.xlu2 %v16640_v30  ;;  %18459 = vst [vmem:[#allocation98_spill] sm:$0xff] %v16650_v22 }
 0x7bf   : > { %v8331_v48 = vpop.f32.mrf.mxu0 }
 0x7c0   : > { %v16653_v23 = vmul.f32 %v8331_v48, %v16444_v55 }
 0x7c2   : > { %18460 = vst [vmem:[#allocation104_spill] sm:$0xff] %v16653_v23  ;;  %8605 = vmax.xlane.f32.xlu2 %v16650_v22  ;;  %8607 = vmax.xlane.f32.xlu0 %v16653_v23 }
 0x7c7   : > { %v8334_v27 = vpop.f32.mrf.mxu0 }
 0x7c8   : > { %v16661_v61 = vmul.f32 %v8334_v27, %v16372_v10  ;;  %v10269_v10 = vld [vmem:[%s17557_s16 + $0x68] sm:$0xff] }
 0x7ca   : > { %18461 = vst [vmem:[#allocation25_spill] sm:$0xff] %v16661_v61  ;;  %10161 = vmatmul.msk.bf16.gmra.mxu0 %vm8253_vm1, %v10268_v11  ;;  %8470 = vadd.xlane.f32.xlu2 %v16650_v22  ;;  %v18497_v22 = vld [vmem:[#allocation109_spill] sm:$0xff] }
 0x7cb   : > { %8472 = vadd.xlane.f32.xlu0 %v16653_v23  ;;  %8609 = vmax.xlane.f32.xlu1 %v16661_v61 }
 0x7cf   : > { %v8336_v41 = vpop.f32.mrf.mxu0 }
 0x7d0   : > { %v16668_v55 = vmul.f32 %v8336_v41, %v16361_v50  ;;  %v8526_v41 = vadd.f32 %v10970_v46, %v8525_v6 }
 0x7d2   : > { %18462 = vst [vmem:[#allocation111_spill] sm:$0xff] %v16668_v55  ;;  %8474 = vadd.xlane.f32.xlu2 %v16661_v61 }
 0x7d3   : > { %8476 = vadd.xlane.f32.xlu0 %v16668_v55 }
 0x7d7   : > { %v8339_v31 = vpop.f32.mrf.mxu0 }
 0x7d8   : > { %v16676_v42 = vmul.f32 %v8339_v31, %v16375_v13  ;;  %v10270_v13 = vld [vmem:[%s17557_s16 + $0x70] sm:$0xff] }
 0x7da   : > { %18463 = vst [vmem:[#allocation81_spill] sm:$0xff] %v16676_v42  ;;  %10162 = vmatmul.msk.bf16.gmra.mxu0 %vm8253_vm1, %v10269_v10  ;;  %8611 = vmax.xlane.f32.xlu2 %v16668_v55 }
 0x7db   : > { %8613 = vmax.xlane.f32.xlu0 %v16676_v42 }
 0x7df   : > { %v8341_v50 = vpop.f32.mrf.mxu0 }
 0x7e0   : > { %v16682_v52 = vmul.f32 %v8341_v50, %v16396_v7 }
 0x7e2   : > { %18464 = vst [vmem:[#allocation41_spill] sm:$0xff] %v16682_v52  ;;  %8478 = vadd.xlane.f32.xlu2 %v16676_v42  ;;  %8615 = vmax.xlane.f32.xlu1 %v16682_v52 }
 0x7e3   : > { %8480 = vadd.xlane.f32.xlu0 %v16682_v52 }
 0x7e7   : > { %v8344_v62 = vpop.f32.mrf.mxu0 }
 0x7e8   : > { %v16691_v0 = vmul.f32 %v8344_v62, %v16412_v26  ;;  %v16745_v62 = vsel %vm8527_vm2, %v10970_v46, %v8526_v41 }
 0x7ea   : > { %18465 = vst [vmem:[#allocation105_spill] sm:$0xff] %v16691_v0  ;;  %10163 = vmatmul.msk.bf16.gmra.mxu0 %vm8253_vm1, %v10270_v13  ;;  %8482 = vadd.xlane.f32.xlu1 %v16691_v0 }
 0x7eb   : > { %8617 = vmax.xlane.f32.xlu2 %v16691_v0 }
 0x7ef   : > { %v8346_v7 = vpop.f32.mrf.mxu0 }
 0x7f0   : > { %v16697_v20 = vmul.f32 %v8346_v7, %v16432_v2 }
 0x7f2   : > { %18466 = vst [vmem:[#allocation35_spill] sm:$0xff] %v16697_v20  ;;  %8619 = vmax.xlane.f32.xlu0 %v16697_v20 }
 0x7f3   : > { %8484 = vadd.xlane.f32.xlu2 %v16697_v20 }
 0x7f7   : > { %v8349_v26 = vpop.f32.mrf.mxu0 }
 0x7f8   : > { %v16705_v33 = vmul.f32 %v8349_v26, %v16448_v45  ;;  %v16716_v45 = vunpack.c.l.bf16 %v10526_v15 }
 0x7fa   : > { %18467 = vst [vmem:[#allocation90_spill] sm:$0xff] %v16705_v33  ;;  %10164 = vmatmul.msk.bf16.gmra.mxu0 %vm8253_vm1, %v10271_v36  ;;  %8486 = vadd.xlane.f32.xlu0 %v16705_v33 }
 0x7fb   : > { %8621 = vmax.xlane.f32.xlu1 %v16705_v33 }
 0x7fd   : > { %v8594_v2 = vpop.xlane.xlu0 %8593 }
 0x7fe   : > { %v8657_v39 = vpack.c.bf16 %v8594_v2, %v8594_v2 }
 0x7ff   : > { %v8351_v18 = vpop.f32.mrf.mxu0 }
 0x800   : > { %v16714_v53 = vmul.f32 %v8351_v18, %v16460_v47  ;;  %v8817_v4 = vunpack.c.l.bf16 %v8657_v39 }
 0x802   : > { %18469 = vst [vmem:[#allocation74_spill] sm:$0xff] %v16714_v53  ;;  %8623 = vmax.xlane.f32.xlu2 %v16714_v53  ;;  %v8849_v19 = vmul.f32 %v16716_v45, %v8817_v4 }
 0x803   : > { %8488 = vadd.xlane.f32.xlu1 %v16714_v53 }
 0x804   : > { %v8881_v16 = vpack.c.bf16 %v8849_v19, %v8849_v19 }
 0x805   : > { %v8596_v14 = vpop.xlane.xlu1 %8595 }
 0x806   : > { %v8658_v37 = vpack.c.bf16 %v8596_v14, %v8596_v14  ;;  %v16729_v1 = vunpack.c.l.b16 %v8881_v16 }
 0x807   : > { %v8354_v60 = vpop.f32.mrf.mxu0 }
 0x808   : > { %v8818_v38 = vunpack.c.l.bf16 %v8658_v37  ;;  %v16724_v47 = vmul.f32 %v8354_v60, %v16382_v63  ;;  %v10650_v63 = vld [vmem:[%s18468_s30 + $0x8] sm:$0xff]  }
 0x809   : > { %v16741_v50 = vunpack.c.l.bf16 %v10650_v63  ;;  %v16749_v2 = vunpack.c.h.bf16 %v10650_v63 }
 0x80a   : > { %18470 = vst [vmem:[#allocation96_spill] sm:$0xff] %v16724_v47  ;;  %v8850_v28 = vmul.f32 %v16721_v59, %v8818_v38  ;;  %8490 = vadd.xlane.f32.xlu0 %v16724_v47  ;;  %8625 = vmax.xlane.f32.xlu2 %v16724_v47 }
 0x80b   : > { %18472 = vst [vmem:[#allocation44_spill] sm:$0xff] %v16741_v50 }
 0x80c   : > { %v8882_v9 = vpack.c.bf16 %v8850_v28, %v8850_v28  ;;  %18473 = vst [vmem:[#allocation83_spill] sm:$0xff] %v16749_v2  ;;  %v10651_v28 = vld [vmem:[%s18468_s30 + $0x10] sm:$0xff]  }
 0x80d   : > { %v8598_v51 = vpop.xlane.xlu1 %8597  ;;  %v16771_v41 = vunpack.c.l.bf16 %v10651_v28 }
 0x80e   : > { %v16731_v48 = vunpack.c.l.b16 %v8882_v9  ;;  %v8659_v11 = vpack.c.bf16 %v8598_v51, %v8598_v51 }
 0x80f   : > { %v8356_v27 = vpop.f32.mrf.mxu0  ;;  %18476 = vst [vmem:[#allocation91_spill] sm:$0xff] %v16771_v41 }
 0x810   : > { %v16739_v31 = vmul.f32 %v8356_v27, %v16368_v25  ;;  %v8819_v13 = vunpack.c.l.bf16 %v8659_v11 }
 0x812   : > { %18471 = vst [vmem:[#allocation69_spill] sm:$0xff] %v16739_v31  ;;  %8492 = vadd.xlane.f32.xlu1 %v16739_v31  ;;  %8627 = vmax.xlane.f32.xlu0 %v16739_v31  ;;  %v8851_v26 = vmul.f32 %v16741_v50, %v8819_v13 }
 0x814   : > { %v8883_v12 = vpack.c.bf16 %v8851_v26, %v8851_v26 }
 0x815   : > { %v8463_v7 = vpop.xlane.xlu1 %8462  ;;  %v8600_v36 = vpop.xlane.xlu2 %8599 }
 0x816   : > { %v8531_v49 = vmul.f32 %v16745_v62, %v8463_v7  ;;  %v8660_v25 = vpack.c.bf16 %v8600_v36, %v8600_v36  ;;  %v16757_v60 = vunpack.c.l.b16 %v8883_v12 }
 0x817   : > { %v8359_v39 = vpop.f32.mrf.mxu0 }
 0x818   : > { %v8563_v15 = vpack.c.bf16 %v8531_v49, %v8531_v49  ;;  %v8820_v18 = vunpack.c.l.bf16 %v8660_v25  ;;  %v16752_v4 = vmul.f32 %v8359_v39, %v16385_v32  ;;  %v16776_v49 = vunpack.c.h.bf16 %v10651_v28 }
 0x81a   : > { %18474 = vst [vmem:[#allocation58_spill] sm:$0xff] %v16752_v4  ;;  %v8852_v14 = vmul.f32 %v16749_v2, %v8820_v18  ;;  %8494 = vadd.xlane.f32.xlu2 %v16752_v4  ;;  %8629 = vmax.xlane.f32.xlu1 %v16752_v4  ;;  %v8691_v46 = vunpack.c.l.bf16 %v8563_v15 }
 0x81b   : > { %18477 = vst [vmem:[#allocation59_spill] sm:$0xff] %v16776_v49 }
 0x81c   : > { %v8884_v19 = vpack.c.bf16 %v8852_v14, %v8852_v14  ;;  %v8755_v32 = vmul.f32 %v16741_v50, %v8691_v46 }
 0x81d   : > { %v8465_v37 = vpop.xlane.xlu2 %8464 }
 0x81e   : > { %v16759_v21 = vunpack.c.l.b16 %v8884_v19  ;;  %v8532_v38 = vmul.f32 %v16745_v62, %v8465_v37  ;;  %v8602_v16 = vpop.xlane.xlu0 %8601  ;;  %v8787_v7 = vpack.c.bf16 %v8755_v32, %v8755_v32 }
 0x81f   : > { %v8661_v6 = vpack.c.bf16 %v8602_v16, %v8602_v16  ;;  %v8361_v9 = vpop.f32.mrf.mxu0 }
 0x820   : > { %v8564_v11 = vpack.c.bf16 %v8532_v38, %v8532_v38  ;;  %v16769_v63 = vmul.f32 %v8361_v9, %v16405_v34  ;;  %v16780_v12 = vunpack.c.l.b16 %v8787_v7 }
 0x821   : > { %v8821_v13 = vunpack.c.l.bf16 %v8661_v6 }
 0x822   : > { %18475 = vst [vmem:[#allocation67_spill] sm:$0xff] %v16769_v63  ;;  %v8692_v27 = vunpack.c.l.bf16 %v8564_v11  ;;  %8496 = vadd.xlane.f32.xlu1 %v16769_v63  ;;  %8631 = vmax.xlane.f32.xlu2 %v16769_v63 }
 0x823   : > { %v8853_v15 = vmul.f32 %v16771_v41, %v8821_v13 }
 0x824   : > { %v8756_v36 = vmul.f32 %v16749_v2, %v8692_v27 }
 0x825   : > { %v8467_v26 = vpop.xlane.xlu2 %8466  ;;  %v8604_v25 = vpop.xlane.xlu1 %8603  ;;  %v8885_v16 = vpack.c.bf16 %v8853_v15, %v8853_v15 }
 0x826   : > { %v8788_v39 = vpack.c.bf16 %v8756_v36, %v8756_v36  ;;  %v8533_v34 = vmul.f32 %v16745_v62, %v8467_v26  ;;  %v8662_v18 = vpack.c.bf16 %v8604_v25, %v8604_v25 }
 0x827   : > { %v8364_v14 = vpop.f32.mrf.mxu0  ;;  %v16791_v27 = vunpack.c.l.b16 %v8885_v16 }
 0x828   : > { %v16782_v46 = vunpack.c.l.b16 %v8788_v39  ;;  %v8565_v19 = vpack.c.bf16 %v8533_v34, %v8533_v34  ;;  %v8822_v37 = vunpack.c.l.bf16 %v8662_v18  ;;  %v16785_v38 = vmul.f32 %v8364_v14, %v16419_v40  ;;  %v10652_v34 = vld [vmem:[%s18468_s30 + $0x18] sm:$0xff]  }
 0x82a   : > { %18478 = vst [vmem:[#allocation18_spill] sm:$0xff] %v16785_v38  ;;  %v8854_v32 = vmul.f32 %v16776_v49, %v8822_v37  ;;  %8633 = vmax.xlane.f32.xlu0 %v16785_v38  ;;  %v8693_v6 = vunpack.c.l.bf16 %v8565_v19  ;;  %v16808_v19 = vunpack.c.l.bf16 %v10652_v34 }
 0x82c   : > { %v8886_v9 = vpack.c.bf16 %v8854_v32, %v8854_v32  ;;  %v8757_v40 = vmul.f32 %v16771_v41, %v8693_v6  ;;  %18480 = vst [vmem:[#allocation101_spill] sm:$0xff] %v16808_v19 }
 0x82d   : > { %v8469_v11 = vpop.xlane.xlu2 %8468 }
 0x82e   : > { %v16793_v13 = vunpack.c.l.b16 %v8886_v9  ;;  %v8534_v7 = vmul.f32 %v16745_v62, %v8469_v11  ;;  %v8789_v18 = vpack.c.bf16 %v8757_v40, %v8757_v40 }
 0x82f   : > { %v8366_v36 = vpop.f32.mrf.mxu0 }
 0x830   : > { %v8566_v25 = vpack.c.bf16 %v8534_v7, %v8534_v7  ;;  %v16800_v39 = vmul.f32 %v8366_v36, %v16438_v56  ;;  %v16810_v56 = vunpack.c.h.bf16 %v10652_v34  ;;  %v16812_v11 = vunpack.c.l.b16 %v8789_v18 }
 0x832   : > { %18479 = vst [vmem:[#allocation78_spill] sm:$0xff] %v16800_v39  ;;  %v8694_v15 = vunpack.c.l.bf16 %v8566_v25  ;;  %8498 = vadd.xlane.f32.xlu0 %v16785_v38  ;;  %8635 = vmax.xlane.f32.xlu1 %v16800_v39 }
 0x833   : > { %18481 = vst [vmem:[#allocation100_spill] sm:$0xff] %v16810_v56 }
 0x834   : > { %v8758_v14 = vmul.f32 %v16776_v49, %v8694_v15 }
 0x835   : > { %v8606_v37 = vpop.xlane.xlu2 %8605  ;;  %v8608_v16 = vpop.xlane.xlu0 %8607 }
 0x836   : > { %v8790_v32 = vpack.c.bf16 %v8758_v14, %v8758_v14  ;;  %v8663_v6 = vpack.c.bf16 %v8606_v37, %v8606_v37  ;;  %v8664_v9 = vpack.c.bf16 %v8608_v16, %v8608_v16 }
 0x837   : > { %v8369_v7 = vpop.f32.mrf.mxu0 }
 0x838   : > { %v16814_v36 = vunpack.c.l.b16 %v8790_v32  ;;  %v8823_v25 = vunpack.c.l.bf16 %v8663_v6  ;;  %v8824_v28 = vunpack.c.l.bf16 %v8664_v9  ;;  %v16817_v40 = vmul.f32 %v8369_v7, %v16452_v3 }
 0x83a   : > { %18482 = vst [vmem:[#allocation66_spill] sm:$0xff] %v16817_v40  ;;  %v8855_v15 = vmul.f32 %v16808_v19, %v8823_v25  ;;  %v8856_v10 = vmul.f32 %v16810_v56, %v8824_v28  ;;  %8500 = vadd.xlane.f32.xlu1 %v16800_v39  ;;  %8637 = vmax.xlane.f32.xlu2 %v16817_v40 }
 0x83c   : > { %v8887_v18 = vpack.c.bf16 %v8855_v15, %v8855_v15  ;;  %v8888_v14 = vpack.c.bf16 %v8856_v10, %v8856_v10 }
 0x83d   : > { %v8471_v37 = vpop.xlane.xlu2 %8470 }
 0x83e   : > { %v16825_v16 = vunpack.c.l.b16 %v8887_v18  ;;  %v16827_v32 = vunpack.c.l.b16 %v8888_v14  ;;  %v8535_v3 = vmul.f32 %v16745_v62, %v8471_v37  ;;  %v8473_v6 = vpop.xlane.xlu0 %8472 }
 0x83f   : > { %v8536_v9 = vmul.f32 %v16745_v62, %v8473_v6  ;;  %v8371_v28 = vpop.f32.mrf.mxu0 }
 0x840   : > { %v8567_v25 = vpack.c.bf16 %v8535_v3, %v8535_v3  ;;  %v16834_v51 = vmul.f32 %v8371_v28, %v16464_v43  ;;  %v10653_v43 = vld [vmem:[%s18468_s30 + $0x20] sm:$0xff]  }
 0x841   : > { %v8568_v15 = vpack.c.bf16 %v8536_v9, %v8536_v9 }
 0x842   : > { %18483 = vst [vmem:[#allocation82_spill] sm:$0xff] %v16834_v51  ;;  %v8695_v10 = vunpack.c.l.bf16 %v8567_v25  ;;  %8502 = vadd.xlane.f32.xlu2 %v16817_v40  ;;  %8639 = vmax.xlane.f32.xlu0 %v16834_v51  ;;  %v16854_v40 = vunpack.c.l.bf16 %v10653_v43 }
 0x843   : > { %v8696_v18 = vunpack.c.l.bf16 %v8568_v15 }
 0x844   : > { %v8759_v14 = vmul.f32 %v16808_v19, %v8695_v10  ;;  %18486 = vst [vmem:[#allocation31_spill] sm:$0xff] %v16854_v40 }
 0x845   : > { %v8760_v37 = vmul.f32 %v16810_v56, %v8696_v18  ;;  %v8475_v6 = vpop.xlane.xlu2 %8474 }
 0x846   : > { %v8791_v34 = vpack.c.bf16 %v8759_v14, %v8759_v14  ;;  %v8537_v26 = vmul.f32 %v16745_v62, %v8475_v6  ;;  %v8477_v7 = vpop.xlane.xlu0 %8476  ;;  %v16852_v14 = vunpack.c.h.bf16 %v10653_v43 }
 0x847   : > { %v8792_v3 = vpack.c.bf16 %v8760_v37, %v8760_v37  ;;  %v8538_v9 = vmul.f32 %v16745_v62, %v8477_v7  ;;  %v8374_v28 = vpop.f32.mrf.mxu0 }
 0x848   : > { %v16845_v25 = vunpack.c.l.b16 %v8791_v34  ;;  %v8569_v15 = vpack.c.bf16 %v8537_v26, %v8537_v26  ;;  %v16848_v10 = vmul.f32 %v8374_v28, %v16508_v58  ;;  %18485 = vst [vmem:[#allocation21_spill] sm:$0xff] %v16852_v14  ;;  %v8610_v58 = vpop.xlane.xlu1 %8609 }
 0x849   : > { %v16850_v18 = vunpack.c.l.b16 %v8792_v3  ;;  %v8570_v6 = vpack.c.bf16 %v8538_v9, %v8538_v9  ;;  %v8665_v4 = vpack.c.bf16 %v8610_v58, %v8610_v58  ;;  %v10654_v58 = vld [vmem:[%s18468_s30 + $0x28] sm:$0xff]  }
 0x84a   : > { %18484 = vst [vmem:[#allocation73_spill] sm:$0xff] %v16848_v10  ;;  %v8697_v37 = vunpack.c.l.bf16 %v8569_v15  ;;  %8504 = vadd.xlane.f32.xlu0 %v16834_v51  ;;  %8641 = vmax.xlane.f32.xlu1 %v16848_v10  ;;  %v16886_v31 = vunpack.c.h.bf16 %v10654_v58 }
 0x84b   : > { %v8698_v7 = vunpack.c.l.bf16 %v8570_v6 }
 0x84c   : > { %v8761_v26 = vmul.f32 %v16854_v40, %v8697_v37  ;;  %18490 = vst [vmem:[#allocation43_spill] sm:$0xff] %v16886_v31 }
 0x84d   : > { %v8762_v3 = vmul.f32 %v16852_v14, %v8698_v7  ;;  %v8612_v28 = vpop.xlane.xlu2 %8611 }
 0x84e   : > { %v8793_v39 = vpack.c.bf16 %v8761_v26, %v8761_v26  ;;  %v8614_v38 = vpop.xlane.xlu0 %8613  ;;  %v8666_v15 = vpack.c.bf16 %v8612_v28, %v8612_v28 }
 0x84f   : > { %v8794_v9 = vpack.c.bf16 %v8762_v3, %v8762_v3  ;;  %v8376_v43 = vpop.f32.mrf.mxu0  ;;  %v8825_v3 = vunpack.c.l.bf16 %v8665_v4  ;;  %v16884_v4 = vunpack.c.l.bf16 %v10654_v58  ;;  %v8667_v20 = vpack.c.bf16 %v8614_v38, %v8614_v38 }
 0x850   : > { %v16862_v63 = vunpack.c.l.b16 %v8793_v39  ;;  %v16865_v51 = vmul.f32 %v8376_v43, %v16492_v44  ;;  %v8826_v7 = vunpack.c.l.bf16 %v8666_v15 }
 0x851   : > { %v16867_v6 = vunpack.c.l.b16 %v8794_v9  ;;  %v8857_v37 = vmul.f32 %v16854_v40, %v8825_v3  ;;  %18489 = vst [vmem:[#allocation50_spill] sm:$0xff] %v16884_v4 }
 0x852   : > { %18487 = vst [vmem:[#allocation92_spill] sm:$0xff] %v16865_v51  ;;  %8506 = vadd.xlane.f32.xlu0 %v16848_v10  ;;  %8508 = vadd.xlane.f32.xlu1 %v16865_v51  ;;  %v8858_v34 = vmul.f32 %v16852_v14, %v8826_v7 }
 0x853   : > { %8643 = vmax.xlane.f32.xlu2 %v16865_v51 }
 0x854   : > { %v8890_v53 = vpack.c.bf16 %v8858_v34, %v8858_v34 }
 0x855   : > { %v8479_v26 = vpop.xlane.xlu2 %8478  ;;  %v8616_v39 = vpop.xlane.xlu1 %8615 }
 0x856   : > { %v8539_v28 = vmul.f32 %v16745_v62, %v8479_v26  ;;  %v8481_v44 = vpop.xlane.xlu0 %8480  ;;  %v9034_v0 = vunpack.c.l.b16 %v8890_v53  ;;  %v10655_v53 = vld [vmem:[%s18468_s30 + $0x30] sm:$0xff]  }
 0x857   : > { %v8540_v9 = vmul.f32 %v16745_v62, %v8481_v44  ;;  %v8379_v43 = vpop.f32.mrf.mxu0 }
 0x858   : > { %v8571_v51 = vpack.c.bf16 %v8539_v28, %v8539_v28  ;;  %v16881_v10 = vmul.f32 %v8379_v43, %v16511_v54  ;;  %v8668_v28 = vpack.c.bf16 %v8616_v39, %v8616_v39  ;;  %v8889_v54 = vpack.c.bf16 %v8857_v37, %v8857_v37 }
 0x859   : > { %v8572_v15 = vpack.c.bf16 %v8540_v9, %v8540_v9  ;;  %v8827_v37 = vunpack.c.l.bf16 %v8667_v20  ;;  %v16912_v20 = vunpack.c.l.bf16 %v10655_v53 }
 0x85a   : > { %18488 = vst [vmem:[#allocation71_spill] sm:$0xff] %v16881_v10  ;;  %v8699_v26 = vunpack.c.l.bf16 %v8571_v51  ;;  %v9033_v52 = vunpack.c.l.b16 %v8889_v54 }
 0x85b   : > { %v8700_v47 = vunpack.c.l.bf16 %v8572_v15  ;;  %8510 = vadd.xlane.f32.xlu2 %v16881_v10  ;;  %18492 = vst [vmem:[#allocation24_spill] sm:$0xff] %v16912_v20 }
 0x85c   : > { %v8763_v44 = vmul.f32 %v16884_v4, %v8699_v26  ;;  %v9061_v38 = vpack.c.b16 %v9034_v0, %v9033_v52 }
 0x85d   : > { %v8764_v7 = vmul.f32 %v16886_v31, %v8700_v47  ;;  %v8483_v33 = vpop.xlane.xlu1 %8482  ;;  %v8828_v47 = vunpack.c.l.bf16 %v8668_v28  ;;  %v8859_v28 = vmul.f32 %v16884_v4, %v8827_v37 }
 0x85e   : > { %v8795_v43 = vpack.c.bf16 %v8763_v44, %v8763_v44  ;;  %v8541_v9 = vmul.f32 %v16745_v62, %v8483_v33  ;;  %v16892_v3 = vpop.xlane.xlu2 %8617 }
 0x85f   : > { %v8796_v51 = vpack.c.bf16 %v8764_v7, %v8764_v7  ;;  %v8381_v58 = vpop.f32.mrf.mxu0  ;;  %v8860_v44 = vmul.f32 %v16886_v31, %v8828_v47  ;;  %v8891_v47 = vpack.c.bf16 %v8859_v28, %v8859_v28 }
 0x860   : > { %v16894_v15 = vunpack.c.l.b16 %v8795_v43  ;;  %v16897_v34 = vmul.f32 %v8381_v58, %v16524_v24  ;;  %v8573_v39 = vpack.c.bf16 %v8541_v9, %v8541_v9 }
 0x861   : > { %v16899_v26 = vunpack.c.l.b16 %v8796_v51  ;;  %v8892_v9 = vpack.c.bf16 %v8860_v44, %v8860_v44  ;;  %v10656_v44 = vld [vmem:[%s18468_s30 + $0x38] sm:$0xff]  }
 0x862   : > { %18491 = vst [vmem:[#allocation60_spill] sm:$0xff] %v16897_v34  ;;  %8647 = vmax.xlane.f32.xlu1 %v16897_v34  ;;  %v8701_v24 = vunpack.c.l.bf16 %v8573_v39  ;;  %v16920_v39 = vunpack.c.h.bf16 %v10655_v53  ;;  %v16939_v23 = vunpack.c.h.bf16 %v10656_v44 }
 0x863   : > { %v9036_v33 = vunpack.c.l.b16 %v8892_v9 }
 0x864   : > { %v8765_v51 = vmul.f32 %v16912_v20, %v8701_v24  ;;  %18494 = vst [vmem:[#allocation84_spill] sm:$0xff] %v16920_v39 }
 0x865   : > { %v16908_v7 = vpop.xlane.xlu0 %8619  ;;  %18496 = vst [vmem:[#allocation54_spill] sm:$0xff] %v16939_v23 }
 0x866   : > { %v8485_v43 = vpop.xlane.xlu2 %8484  ;;  %9081 = vrot.lane.b32.xlu0 %v9061_v38, %s11198_s12  ;;  %v8797_v37 = vpack.c.bf16 %v8765_v51, %v8765_v51 }
 0x867   : > { %v8542_v54 = vmul.f32 %v16745_v62, %v8485_v43  ;;  %v8384_v52 = vpop.f32.mrf.mxu0 }
 0x868   : > { %v16916_v0 = vmul.f32 %v8384_v52, %v16531_v8  ;;  %v9035_v8 = vunpack.c.l.b16 %v8891_v47  ;;  %v16929_v28 = vunpack.c.l.b16 %v8797_v37 }
 0x869   : > { %v8574_v58 = vpack.c.bf16 %v8542_v54, %v8542_v54 }
 0x86a   : > { %18493 = vst [vmem:[#allocation77_spill] sm:$0xff] %v16916_v0  ;;  %8514 = vadd.xlane.f32.xlu1 %v16916_v0  ;;  %v9062_v53 = vpack.c.b16 %v9036_v33, %v9035_v8 }
 0x86b   : > { %v8702_v38 = vunpack.c.l.bf16 %v8574_v58  ;;  %v16933_v58 = vunpack.c.l.bf16 %v10656_v44 }
 0x86d   : > { %v8766_v42 = vmul.f32 %v16920_v39, %v8702_v38  ;;  %v8487_v55 = vpop.xlane.xlu0 %8486  ;;  %18495 = vst [vmem:[#allocation62_spill] sm:$0xff] %v16933_v58 }
 0x86e   : > { %v8543_v43 = vmul.f32 %v16745_v62, %v8487_v55  ;;  %v8622_v61 = vpop.xlane.xlu1 %8621 }
 0x86f   : > { %v8798_v52 = vpack.c.bf16 %v8766_v42, %v8766_v42  ;;  %v8671_v24 = vpack.c.bf16 %v8622_v61, %v8622_v61  ;;  %v16927_v54 = vpop.f32.mrf.mxu0 }
 0x870   : > { %v8575_v51 = vpack.c.bf16 %v8543_v43, %v8543_v43 }
 0x871   : > { %v16931_v9 = vunpack.c.l.b16 %v8798_v52  ;;  %v8831_v38 = vunpack.c.l.bf16 %v8671_v24 }
 0x872   : > { %v8703_v42 = vunpack.c.l.bf16 %v8575_v51 }
 0x873   : > { %9083 = vrot.lane.b32.xlu2 %v9062_v53, %s11198_s12  ;;  %v8863_v61 = vmul.f32 %v16933_v58, %v8831_v38 }
 0x874   : > { %v8767_v24 = vmul.f32 %v16933_v58, %v8703_v42 }
 0x875   : > { %v8624_v47 = vpop.xlane.xlu2 %8623  ;;  %v8895_v35 = vpack.c.bf16 %v8863_v61, %v8863_v61 }
 0x876   : > { %v8489_v33 = vpop.xlane.xlu1 %8488  ;;  %v8672_v37 = vpack.c.bf16 %v8624_v47, %v8624_v47  ;;  %v8799_v55 = vpack.c.bf16 %v8767_v24, %v8767_v24 }
 0x877   : > { %v8544_v8 = vmul.f32 %v16745_v62, %v8489_v33  ;;  %v8389_v52 = vpop.f32.mrf.mxu0  ;;  %v16949_v29 = vunpack.c.l.b16 %v8895_v35 }
 0x878   : > { %v8832_v43 = vunpack.c.l.bf16 %v8672_v37  ;;  %v16943_v30 = vmul.f32 %v8389_v52, %v18497_v22  ;;  %v10657_v22 = vld [vmem:[%s18468_s30 + $0x40] sm:$0xff]   ;;  %v16959_v24 = vunpack.c.l.b16 %v8799_v55 }
 0x879   : > { %v8576_v53 = vpack.c.bf16 %v8544_v8, %v8544_v8  ;;  %v16963_v35 = vunpack.c.l.bf16 %v10657_v22 }
 0x87a   : > { %18498 = vst [vmem:[#allocation42_spill] sm:$0xff] %v16943_v30  ;;  %v8864_v51 = vmul.f32 %v16939_v23, %v8832_v43  ;;  %8653 = vmax.xlane.f32.xlu1 %v16943_v30 }
 0x87b   : > { %v8704_v38 = vunpack.c.l.bf16 %v8576_v53  ;;  %18499 = vst [vmem:[#allocation36_spill] sm:$0xff] %v16963_v35 }
 0x87c   : > { %v8896_v44 = vpack.c.bf16 %v8864_v51, %v8864_v51 }
 0x87d   : > { %v8768_v47 = vmul.f32 %v16939_v23, %v8704_v38  ;;  %v8491_v5 = vpop.xlane.xlu0 %8490  ;;  %v8626_v33 = vpop.xlane.xlu2 %8625 }
 0x87e   : > { %v16951_v37 = vunpack.c.l.b16 %v8896_v44  ;;  %v8545_v42 = vmul.f32 %v16745_v62, %v8491_v5  ;;  %v8673_v61 = vpack.c.bf16 %v8626_v33, %v8626_v33 }
 0x87f   : > { %v8800_v8 = vpack.c.bf16 %v8768_v47, %v8768_v47  ;;  %v16968_v47 = vunpack.c.h.bf16 %v10657_v22 }
 0x880   : > { %v8577_v43 = vpack.c.bf16 %v8545_v42, %v8545_v42  ;;  %v8833_v51 = vunpack.c.l.bf16 %v8673_v61 }
 0x881   : > { %v16961_v53 = vunpack.c.l.b16 %v8800_v8  ;;  %18500 = vst [vmem:[#allocation63_spill] sm:$0xff] %v16968_v47 }
 0x882   : > { %v8705_v44 = vunpack.c.l.bf16 %v8577_v43  ;;  %v8865_v23 = vmul.f32 %v16963_v35, %v8833_v51 }
 0x884   : > { %v8769_v55 = vmul.f32 %v16963_v35, %v8705_v44  ;;  %v8897_v31 = vpack.c.bf16 %v8865_v23, %v8865_v23  ;;  %v10658_v23 = vld [vmem:[%s18468_s30 + $0x48] sm:$0xff]  }
 0x885   : > { %v8493_v5 = vpop.xlane.xlu1 %8492  ;;  %v8628_v33 = vpop.xlane.xlu0 %8627 }
 0x886   : > { %v8546_v52 = vmul.f32 %v16745_v62, %v8493_v5  ;;  %v8674_v42 = vpack.c.bf16 %v8628_v33, %v8628_v33  ;;  %v8801_v14 = vpack.c.bf16 %v8769_v55, %v8769_v55  ;;  %v16974_v51 = vunpack.c.l.b16 %v8897_v31 }
 0x887   : > { %v16989_v33 = vunpack.c.l.bf16 %v10658_v23 }
 0x888   : > { %v8578_v8 = vpack.c.bf16 %v8546_v52, %v8546_v52  ;;  %v8834_v58 = vunpack.c.l.bf16 %v8674_v42  ;;  %v16982_v52 = vunpack.c.l.b16 %v8801_v14 }
 0x889   : > { %18502 = vst [vmem:[#allocation38_spill] sm:$0xff] %v16989_v33 }
 0x88a   : > { %v8706_v4 = vunpack.c.l.bf16 %v8578_v8  ;;  %v8866_v61 = vmul.f32 %v16968_v47, %v8834_v58  ;;  %18501 = vst [vmem:[#allocation33_spill] sm:$0xff] %v16982_v52 }
 0x88c   : > { %v8770_v43 = vmul.f32 %v16968_v47, %v8706_v4  ;;  %v8898_v38 = vpack.c.bf16 %v8866_v61, %v8866_v61  ;;  %v16994_v61 = vunpack.c.h.bf16 %v10658_v23 }
 0x88d   : > { %v8495_v40 = vpop.xlane.xlu2 %8494  ;;  %v8630_v22 = vpop.xlane.xlu1 %8629 }
 0x88e   : > { %v8802_v56 = vpack.c.bf16 %v8770_v43, %v8770_v43  ;;  %v16976_v19 = vunpack.c.l.b16 %v8898_v38  ;;  %v8547_v5 = vmul.f32 %v16745_v62, %v8495_v40  ;;  %v8675_v44 = vpack.c.bf16 %v8630_v22, %v8630_v22  ;;  %18503 = vst [vmem:[#allocation93_spill] sm:$0xff] %v16994_v61 }
 0x890   : > { %v16984_v58 = vunpack.c.l.b16 %v8802_v56  ;;  %v8579_v4 = vpack.c.bf16 %v8547_v5, %v8547_v5  ;;  %8645 = vmax.xlane.f32.xlu0 %v16881_v10  ;;  %v8835_v38 = vunpack.c.l.bf16 %v8675_v44  ;;  %v18504_v44 = vld [vmem:[#allocation76_spill] sm:$0xff] }
 0x891   : > { %v17001_v10 = vmul.f32 %v16927_v54, %v18504_v44 }
 0x892   : > { %v8707_v42 = vunpack.c.l.bf16 %v8579_v4  ;;  %v8867_v14 = vmul.f32 %v16989_v33, %v8835_v38 }
 0x893   : > { %18505 = vst [vmem:[#allocation27_spill] sm:$0xff] %v17001_v10 }
 0x894   : > { %v8771_v22 = vmul.f32 %v16989_v33, %v8707_v42  ;;  %v8899_v4 = vpack.c.bf16 %v8867_v14, %v8867_v14  ;;  %v8670_v42 = vpack.c.bf16 %v16908_v7, %v16908_v7  ;;  %v8669_v14 = vpack.c.bf16 %v16892_v3, %v16892_v3 }
 0x895   : > { %v8497_v55 = vpop.xlane.xlu1 %8496  ;;  %v8632_v8 = vpop.xlane.xlu2 %8631 }
 0x896   : > { %v8548_v56 = vmul.f32 %v16745_v62, %v8497_v55  ;;  %v8676_v43 = vpack.c.bf16 %v8632_v8, %v8632_v8  ;;  %v8803_v38 = vpack.c.bf16 %v8771_v22, %v8771_v22  ;;  %v17008_v8 = vunpack.c.l.b16 %v8899_v4 }
 0x897   : > { %v8830_v22 = vunpack.c.l.bf16 %v8670_v42  ;;  %v8829_v44 = vunpack.c.l.bf16 %v8669_v14 }
 0x898   : > { %v8580_v5 = vpack.c.bf16 %v8548_v56, %v8548_v56  ;;  %v8836_v31 = vunpack.c.l.bf16 %v8676_v43  ;;  %8512 = vadd.xlane.f32.xlu0 %v16897_v34 }
 0x899   : > { %v8862_v4 = vmul.f32 %v16920_v39, %v8830_v22 }
 0x89a   : > { %v8708_v40 = vunpack.c.l.bf16 %v8580_v5  ;;  %v8868_v47 = vmul.f32 %v16994_v61, %v8836_v31  ;;  %v10659_v31 = vld [vmem:[%s18468_s30 + $0x50] sm:$0xff]  }
 0x89b   : > { %v17032_v7 = vunpack.c.h.bf16 %v10659_v31 }
 0x89c   : > { %v8772_v23 = vmul.f32 %v16994_v61, %v8708_v40  ;;  %v8900_v35 = vpack.c.bf16 %v8868_v47, %v8868_v47  ;;  %8651 = vmax.xlane.f32.xlu2 %v17001_v10  ;;  %v17017_v47 = vunpack.c.l.b16 %v8803_v38  ;;  %v8894_v61 = vpack.c.bf16 %v8862_v4, %v8862_v4  ;;  %v8391_v4 = vpop.f32.mrf.mxu0 }
 0x89d   : > { %v8634_v55 = vpop.xlane.xlu0 %8633  ;;  %18507 = vst [vmem:[#allocation57_spill] sm:$0xff] %v17032_v7 }
 0x89e   : > { %v8804_v56 = vpack.c.bf16 %v8772_v23, %v8772_v23  ;;  %v17010_v43 = vunpack.c.l.b16 %v8900_v35  ;;  %v8677_v54 = vpack.c.bf16 %v8634_v55, %v8634_v55  ;;  %v17024_v35 = vunpack.c.l.bf16 %v10659_v31 }
 0x89f   : > { %v9038_v39 = vunpack.c.l.b16 %v8894_v61 }
 0x8a0   : > { %v17019_v40 = vunpack.c.l.b16 %v8804_v56  ;;  %8649 = vmax.xlane.f32.xlu0 %v16916_v0  ;;  %18506 = vst [vmem:[#allocation48_spill] sm:$0xff] %v17024_v35  ;;  %v8837_v5 = vunpack.c.l.bf16 %v8677_v54  ;;  %v8861_v0 = vmul.f32 %v16912_v20, %v8829_v44 }
 0x8a2   : > { %v8869_v55 = vmul.f32 %v17024_v35, %v8837_v5 }
 0x8a4   : > { %8516 = vadd.xlane.f32.xlu2 %v17001_v10  ;;  %v8901_v3 = vpack.c.bf16 %v8869_v55, %v8869_v55  ;;  %v8893_v10 = vpack.c.bf16 %v8861_v0, %v8861_v0 }
 0x8a5   : > { %v8499_v38 = vpop.xlane.xlu0 %8498  ;;  %v8636_v23 = vpop.xlane.xlu1 %8635 }
 0x8a6   : > { %v8549_v56 = vmul.f32 %v16745_v62, %v8499_v38  ;;  %v8678_v42 = vpack.c.bf16 %v8636_v23, %v8636_v23  ;;  %v17037_v38 = vunpack.c.l.b16 %v8901_v3  ;;  %v18508_v3 = vld [vmem:[#allocation29_spill] sm:$0xff] }
 0x8a8   : > { %v8581_v54 = vpack.c.bf16 %v8549_v56, %v8549_v56  ;;  %v8838_v34 = vunpack.c.l.bf16 %v8678_v42  ;;  %v9037_v56 = vunpack.c.l.b16 %v8893_v10 }
 0x8aa   : > { %v8870_v14 = vmul.f32 %v17032_v7, %v8838_v34  ;;  %v8709_v33 = vunpack.c.l.bf16 %v8581_v54  ;;  %v10660_v34 = vld [vmem:[%s18468_s30 + $0x58] sm:$0xff]   ;;  %v9063_v42 = vpack.c.b16 %v9038_v39, %v9037_v56  ;;  %v17049_v54 = vmul.f32 %v8391_v4, %v18508_v3 }
 0x8ac   : > { %v8902_v22 = vpack.c.bf16 %v8870_v14, %v8870_v14  ;;  %8518 = vadd.xlane.f32.xlu2 %v16943_v30  ;;  %v8773_v0 = vmul.f32 %v17024_v35, %v8709_v33  ;;  %18509 = vst [vmem:[#allocation55_spill] sm:$0xff] %v17049_v54  ;;  %v17056_v30 = vunpack.c.h.bf16 %v10660_v34 }
 0x8ad   : > { %v8501_v5 = vpop.xlane.xlu1 %8500  ;;  %v8638_v49 = vpop.xlane.xlu2 %8637 }
 0x8ae   : > { %v17039_v31 = vunpack.c.l.b16 %v8902_v22  ;;  %v8550_v44 = vmul.f32 %v16745_v62, %v8501_v5  ;;  %v8679_v23 = vpack.c.bf16 %v8638_v49, %v8638_v49  ;;  %v17051_v22 = vunpack.c.l.bf16 %v10660_v34  ;;  %18511 = vst [vmem:[#allocation46_spill] sm:$0xff] %v17056_v30 }
 0x8af   : > { %v8805_v10 = vpack.c.bf16 %v8773_v0, %v8773_v0 }
 0x8b0   : > { %v8582_v55 = vpack.c.bf16 %v8550_v44, %v8550_v44  ;;  %18510 = vst [vmem:[#allocation47_spill] sm:$0xff] %v17051_v22  ;;  %v8839_v49 = vunpack.c.l.bf16 %v8679_v23 }
 0x8b2   : > { %v8710_v14 = vunpack.c.l.bf16 %v8582_v55  ;;  %v8871_v39 = vmul.f32 %v17051_v22, %v8839_v49  ;;  %v17060_v55 = vunpack.c.l.b16 %v8805_v10 }
 0x8b4   : > { %v8774_v5 = vmul.f32 %v17032_v7, %v8710_v14  ;;  %8655 = vmax.xlane.f32.xlu2 %v17049_v54  ;;  %9085 = vrot.lane.b32.xlu0 %v9063_v42, %s11198_s12  ;;  %v8903_v14 = vpack.c.bf16 %v8871_v39, %v8871_v39  ;;  %v10661_v39 = vld [vmem:[%s18468_s30 + $0x60] sm:$0xff]  }
 0x8b5   : > { %v8503_v33 = vpop.xlane.xlu2 %8502  ;;  %v8640_v61 = vpop.xlane.xlu0 %8639  ;;  %v17079_v34 = vunpack.c.h.bf16 %v10661_v39 }
 0x8b6   : > { %v8806_v44 = vpack.c.bf16 %v8774_v5, %v8774_v5  ;;  %v8551_v56 = vmul.f32 %v16745_v62, %v8503_v33  ;;  %v8680_v4 = vpack.c.bf16 %v8640_v61, %v8640_v61  ;;  %v9047_v49 = vunpack.c.l.b16 %v8903_v14 }
 0x8b8   : > { %v17062_v23 = vunpack.c.l.b16 %v8806_v44  ;;  %v8583_v0 = vpack.c.bf16 %v8551_v56, %v8551_v56  ;;  %v8840_v3 = vunpack.c.l.bf16 %v8680_v4 }
 0x8ba   : > { %v8872_v7 = vmul.f32 %v17056_v30, %v8840_v3  ;;  %v8711_v42 = vunpack.c.l.bf16 %v8583_v0  ;;  %v17073_v0 = vunpack.c.l.bf16 %v10661_v39 }
 0x8bc   : > { %v8904_v35 = vpack.c.bf16 %v8872_v7, %v8872_v7  ;;  %v8775_v33 = vmul.f32 %v17051_v22, %v8711_v42 }
 0x8bd   : > { %v8505_v5 = vpop.xlane.xlu0 %8504  ;;  %v8642_v20 = vpop.xlane.xlu1 %8641 }
 0x8be   : > { %v9048_v41 = vunpack.c.l.b16 %v8904_v35  ;;  %v8552_v61 = vmul.f32 %v16745_v62, %v8505_v5  ;;  %v8681_v10 = vpack.c.bf16 %v8642_v20, %v8642_v20  ;;  %v8807_v3 = vpack.c.bf16 %v8775_v33, %v8775_v33 }
 0x8c0   : > { %v9068_v44 = vpack.c.b16 %v9048_v41, %v9047_v49  ;;  %v8584_v56 = vpack.c.bf16 %v8552_v61, %v8552_v61  ;;  %v8841_v7 = vunpack.c.l.bf16 %v8681_v10 }
 0x8c2   : > { %v8712_v4 = vunpack.c.l.bf16 %v8584_v56  ;;  %9095 = vrot.lane.b32.xlu1 %v9068_v44, %s11198_s12  ;;  %v8873_v61 = vmul.f32 %v17073_v0, %v8841_v7  ;;  %v17081_v44 = vunpack.c.l.b16 %v8807_v3 }
 0x8c4   : > { %v8776_v35 = vmul.f32 %v17056_v30, %v8712_v4 }
 0x8c5   : > { %v8507_v14 = vpop.xlane.xlu0 %8506  ;;  %v8509_v5 = vpop.xlane.xlu1 %8508 }
 0x8c6   : > { %v8808_v20 = vpack.c.bf16 %v8776_v35, %v8776_v35  ;;  %v8553_v42 = vmul.f32 %v16745_v62, %v8507_v14  ;;  %v8554_v41 = vmul.f32 %v16745_v62, %v8509_v5  ;;  %v8644_v49 = vpop.xlane.xlu2 %8643  ;;  %v8905_v14 = vpack.c.bf16 %v8873_v61, %v8873_v61 }
 0x8c7   : > { %v8682_v56 = vpack.c.bf16 %v8644_v49, %v8644_v49 }
 0x8c8   : > { %v17083_v22 = vunpack.c.l.b16 %v8808_v20  ;;  %v8585_v10 = vpack.c.bf16 %v8553_v42, %v8553_v42  ;;  %v8586_v33 = vpack.c.bf16 %v8554_v41, %v8554_v41  ;;  %v9049_v52 = vunpack.c.l.b16 %v8905_v14 }
 0x8c9   : > { %v8842_v4 = vunpack.c.l.bf16 %v8682_v56  ;;  %v18513_v14 = vpack.c.b16 %v16867_v6, %v16862_v63 }
 0x8ca   : > { %v8713_v30 = vunpack.c.l.bf16 %v8585_v10  ;;  %v8714_v2 = vunpack.c.l.bf16 %v8586_v33 }
 0x8cb   : > { %v8874_v5 = vmul.f32 %v17079_v34, %v8842_v4 }
 0x8cc   : > { %v8777_v7 = vmul.f32 %v17073_v0, %v8713_v30  ;;  %v8778_v39 = vmul.f32 %v17079_v34, %v8714_v2  ;;  %v18512_v2 = vpack.c.b16 %v16899_v26, %v16894_v15  ;;  %v10662_v15 = vld [vmem:[%s18468_s30 + $0x68] sm:$0xff]  }
 0x8cd   : > { %v8906_v49 = vpack.c.bf16 %v8874_v5, %v8874_v5  ;;  %v17117_v26 = vunpack.c.h.bf16 %v10662_v15 }
 0x8ce   : > { %v8809_v3 = vpack.c.bf16 %v8777_v7, %v8777_v7  ;;  %v8810_v50 = vpack.c.bf16 %v8778_v39, %v8778_v39  ;;  %v8511_v20 = vpop.xlane.xlu2 %8510 }
 0x8cf   : > { %v9050_v42 = vunpack.c.l.b16 %v8906_v49  ;;  %18515 = vst [vmem:[#allocation56_spill] sm:$0xff] %v17117_v26  ;;  %v8555_v63 = vmul.f32 %v16745_v62, %v8511_v20 }
 0x8d0   : > { %v17090_v41 = vunpack.c.l.b16 %v8809_v3  ;;  %v17092_v56 = vunpack.c.l.b16 %v8810_v50 }
 0x8d1   : > { %v9069_v10 = vpack.c.b16 %v9050_v42, %v9049_v52  ;;  %v18514_v52 = vpack.c.b16 %v16951_v37, %v16949_v29  ;;  %v17121_v42 = vunpack.c.l.bf16 %v10662_v15 }
 0x8d3   : > { %9097 = vrot.lane.b32.xlu2 %v9069_v10, %s11198_s12  ;;  %18516 = vst [vmem:[#allocation99_spill] sm:$0xff] %v17121_v42  ;;  %v8587_v10 = vpack.c.bf16 %v8555_v63, %v8555_v63  ;;  %v10663_v63 = vld [vmem:[%s18468_s30 + $0x70] sm:$0xff]  }
 0x8d5   : > { %v8648_v5 = vpop.xlane.xlu1 %8647 }
 0x8d6   : > { %v9084_v30 = vpop.permute.xlu2 %9083  ;;  %v8684_v7 = vpack.c.bf16 %v8648_v5, %v8648_v5 }
 0x8d7   : > { %v17101_v33 = vsel %vm9105_vm3, %v18512_v2, %v9084_v30  ;;  %v8715_v2 = vunpack.c.l.bf16 %v8587_v10  ;;  %v17130_v10 = vunpack.c.h.bf16 %v10663_v63 }
 0x8d8   : > { %v9082_v4 = vpop.permute.xlu0 %9081  ;;  %v8844_v39 = vunpack.c.l.bf16 %v8684_v7 }
 0x8d9   : > { %v17107_v50 = vsel %vm9105_vm3, %v18513_v14, %v9082_v4  ;;  %v8779_v20 = vmul.f32 %v17121_v42, %v8715_v2  ;;  %18517 = vst [vmem:[#allocation34_spill] sm:$0xff] %v17130_v10 }
 0x8da   : > { %v8876_v49 = vmul.f32 %v17117_v26, %v8844_v39 }
 0x8dc   : > { %v8908_v37 = vpack.c.bf16 %v8876_v49, %v8876_v49 }
 0x8dd   : > { %v8515_v14 = vpop.xlane.xlu1 %8514 }
 0x8de   : > { %8520 = vadd.xlane.f32.xlu0 %v17049_v54  ;;  %v9052_v5 = vunpack.c.l.b16 %v8908_v37  ;;  %v8557_v39 = vmul.f32 %v16745_v62, %v8515_v14  ;;  %v8811_v37 = vpack.c.bf16 %v8779_v20, %v8779_v20 }
 0x8e0   : > { %v17137_v61 = vunpack.c.l.b16 %v8811_v37 }
 0x8f2   : > { %9087 = vrot.lane.b32.xlu0 %v18514_v52, %s11198_s12 }
 0x903   : > { %v8646_v6 = vpop.xlane.xlu0 %8645 }
 0x904   : > { %v8683_v3 = vpack.c.bf16 %v8646_v6, %v8646_v6 }
 0x906   : > { %v8843_v29 = vunpack.c.l.bf16 %v8683_v3 }
 0x908   : > { %v8875_v30 = vmul.f32 %v17121_v42, %v8843_v29 }
 0x90a   : > { %v8907_v4 = vpack.c.bf16 %v8875_v30, %v8875_v30  ;;  %v8589_v30 = vpack.c.bf16 %v8557_v39, %v8557_v39 }
 0x90b   : > { %v8513_v52 = vpop.xlane.xlu0 %8512 }
 0x90c   : > { %v9051_v35 = vunpack.c.l.b16 %v8907_v4  ;;  %v8556_v7 = vmul.f32 %v16745_v62, %v8513_v52 }
 0x90e   : > { %v9070_v6 = vpack.c.b16 %v9052_v5, %v9051_v35  ;;  %v8588_v15 = vpack.c.bf16 %v8556_v7, %v8556_v7  ;;  %v17135_v7 = vunpack.c.l.bf16 %v10663_v63 }
 0x90f   : > { %v8652_v49 = vpop.xlane.xlu2 %8651 }
 0x910   : > { %v8716_v3 = vunpack.c.l.bf16 %v8588_v15  ;;  %v8686_v29 = vpack.c.bf16 %v8652_v49, %v8652_v49  ;;  %9099 = vrot.lane.b32.xlu1 %v9070_v6, %s11198_s12  ;;  %v8717_v15 = vunpack.c.l.bf16 %v8589_v30  ;;  %v8654_v30 = vpop.xlane.xlu1 %8653 }
 0x912   : > { %v8780_v4 = vmul.f32 %v17117_v26, %v8716_v3  ;;  %v8846_v2 = vunpack.c.l.bf16 %v8686_v29  ;;  %v8781_v29 = vmul.f32 %v17135_v7, %v8717_v15  ;;  %v8687_v26 = vpack.c.bf16 %v8654_v30, %v8654_v30  ;;  %v10664_v15 = vld [vmem:[%s18468_s30 + $0x78] sm:$0xff]  }
 0x913   : > { %v8650_v52 = vpop.xlane.xlu0 %8649  ;;  %v18518_v30 = vpack.c.b16 %v17039_v31, %v17037_v38  ;;  %v18521_v38 = vpack.c.b16 %v17092_v56, %v17090_v41  ;;  %v18525_v56 = vpack.c.b16 %v16961_v53, %v16959_v24  ;;  %v18528_v53 = vpack.c.b16 %v16850_v18, %v16845_v25 }
 0x914   : > { %v8812_v14 = vpack.c.bf16 %v8780_v4, %v8780_v4  ;;  %v8878_v35 = vmul.f32 %v17130_v10, %v8846_v2  ;;  %v8685_v5 = vpack.c.bf16 %v8650_v52, %v8650_v52 }
 0x916   : > { %v17139_v54 = vunpack.c.l.b16 %v8812_v14  ;;  %v8845_v49 = vunpack.c.l.bf16 %v8685_v5  ;;  %v8910_v6 = vpack.c.bf16 %v8878_v35, %v8878_v35  ;;  %v8813_v14 = vpack.c.bf16 %v8781_v29, %v8781_v29 }
 0x917   : > { %v8517_v42 = vpop.xlane.xlu2 %8516 }
 0x918   : > { %v8877_v20 = vmul.f32 %v17135_v7, %v8845_v49  ;;  %v8558_v39 = vmul.f32 %v16745_v62, %v8517_v42  ;;  %v9054_v2 = vunpack.c.l.b16 %v8910_v6 }
 0x91a   : > { %v8909_v4 = vpack.c.bf16 %v8877_v20, %v8877_v20  ;;  %v8590_v63 = vpack.c.bf16 %v8558_v39, %v8558_v39  ;;  %v17152_v20 = vunpack.c.l.b16 %v8813_v14  ;;  %v17156_v39 = vunpack.c.l.bf16 %v10664_v15 }
 0x91c   : > { %v9053_v37 = vunpack.c.l.b16 %v8909_v4  ;;  %v8718_v52 = vunpack.c.l.bf16 %v8590_v63  ;;  %8460 = vadd.xlane.f32.xlu0 %v16614_v17  ;;  %v8847_v4 = vunpack.c.l.bf16 %v8687_v26 }
 0x91e   : > { %v9071_v5 = vpack.c.b16 %v9054_v2, %v9053_v37  ;;  %v8782_v35 = vmul.f32 %v17130_v10, %v8718_v52  ;;  %v8879_v2 = vmul.f32 %v17156_v39, %v8847_v4  ;;  %v17161_v37 = vunpack.c.h.bf16 %v10664_v15 }
 0x91f   : > { %v8519_v49 = vpop.xlane.xlu2 %8518  ;;  %v18520_v15 = vpack.c.b16 %v16827_v32, %v16825_v16  ;;  %v18522_v4 = vpack.c.b16 %v16793_v13, %v16791_v27  ;;  %v18524_v16 = vpack.c.b16 %v16731_v48, %v16729_v1  ;;  %v18527_v1 = vpack.c.b16 %v17010_v43, %v17008_v8 }
 0x920   : > { %v8814_v42 = vpack.c.bf16 %v8782_v35, %v8782_v35  ;;  %9101 = vrot.lane.b32.xlu2 %v9071_v5, %s11198_s12  ;;  %v8911_v5 = vpack.c.bf16 %v8879_v2, %v8879_v2  ;;  %v18529_v8 = vpack.c.b16 %v16814_v36, %v16812_v11 }
 0x922   : > { %v17154_v6 = vunpack.c.l.b16 %v8814_v42  ;;  %v9055_v3 = vunpack.c.l.b16 %v8911_v5 }
 0x924   : > { %v8991_v29 = vpack.c.b16 %v17154_v6, %v17152_v20  ;;  %v18519_v20 = vpack.c.b16 %v16976_v19, %v16974_v51  ;;  %v18523_v19 = vpack.c.b16 %v16759_v21, %v16757_v60  ;;  %v18526_v60 = vpack.c.b16 %v16931_v9, %v16929_v28 }
 0x926   : > { %v9086_v32 = vpop.permute.xlu0 %9085 }
 0x927   : > { %v8656_v63 = vpop.xlane.xlu2 %8655  ;;  %v9132_v21 = vsel %vm9105_vm3, %v18526_v60, %v9086_v32 }
 0x928   : > { %v8688_v52 = vpack.c.bf16 %v8656_v63, %v8656_v63  ;;  %9093 = vrot.lane.b32.xlu2 %v18518_v30, %s11198_s12 }
 0x92a   : > { %v8848_v14 = vunpack.c.l.bf16 %v8688_v52 }
 0x92c   : > { %v8880_v35 = vmul.f32 %v17161_v37, %v8848_v14 }
 0x92e   : > { %v8912_v42 = vpack.c.bf16 %v8880_v35, %v8880_v35 }
 0x92f   : > { %v9098_v26 = vpop.permute.xlu2 %9097 }
 0x930   : > { %v9056_v10 = vunpack.c.l.b16 %v8912_v42  ;;  %9089 = vrot.lane.b32.xlu0 %v18519_v20, %s11198_s12  ;;  %9079 = vrot.lane.b32.xlu2 %v18520_v15, %s11198_s12  ;;  %v9156_v31 = vsel %vm9105_vm3, %v18521_v38, %v9098_v26 }
 0x932   : > { %v9072_v6 = vpack.c.b16 %v9056_v10, %v9055_v3 }
 0x934   : > { %9103 = vrot.lane.b32.xlu1 %v9072_v6, %s11198_s12  ;;  %v9096_v2 = vpop.permute.xlu1 %9095  ;;  %v18531_v6 = vpack.c.b16 %v17139_v54, %v17137_v61  ;;  %v9170_v61 = vld [vmem:[%s18534_s22] sm:$0xf]  ;;  %s17379_s22 = scalar_lea.vmem [#allocation6], %s9777_s21  ;;  %s18591_s21 = sld [smem:[#allocation11_spill]] }
 0x935   : > { %9172 = vst [vmem:[#allocation1] ss:$4 sm:$0xff] %v9170_v61  ;;  %v11070_v61 = vld [vmem:[%s17557_s16] sm:$0xff] }
 0x938   : > { %9077 = vrot.lane.b32.xlu2 %v18522_v4, %s11198_s12 }
 0x93a   : > { %s10280_s14 = sshll.u32 %s18591_s21, 8 }
 0x93b   : > { %s9693_s0 = scalar_lea.hbm %s18595_s24, %s10280_s14 }
 0x93c   : > { %s9696_s23 = sshll.u32 %s9693_s0, 4  ;;  %s9697_s23 = int_to_ptr.hbm [resolvable:$true] %s9696_s23 }
 0x93d   : > { %s11130_s21 = sshra.s32 %s9697_s23, 4  ;;  %s11131_s21 = int_to_ptr.hbm [resolvable:$true] %s11130_s21 }
 0x93e   : > { %s11132_s3 = scalar_lea.hbm %s11131_s21, 256  ;;  %p11137_p0 = scmp.lt.s32.totalorder %s11131_s21, %s18596_s28 }
 0x93f   : > { %p11133_p6 = scmp.ne.s32.totalorder %s11131_s21, %s11132_s3  ;;  %p11138_p1 = scmp.lt.s32.totalorder %s11136_s15, %s11132_s3 }
 0x940   : > { %9075 = vrot.lane.b32.xlu2 %v18523_v19, %s11198_s12  ;;  %v18533_v19 = vpack.c.b16 %v17062_v23, %v17060_v55  ;;  %v10279_v55 = vld [vmem:[%s18535_s26 + $0x38] sm:$0xff] }
 0x941   : > { %9268 = vmatpush.bf16.msra.mxu3 %v10279_v55  ;;  %v11074_v55 = vld [vmem:[%s17557_s16 + $0x20] sm:$0xff]  ;;  %p11134_p9 = pnand %p11133_p6, %p11341_p11  ;;  %p11139_p3 = por %p11138_p1, %p11137_p0 }
 0x943   : > { %p11135_p13 = pneg %p11134_p9 }
 0x945   : > { %p11140_p4 = pnand %p11139_p3, %p11135_p13 }
 0x948   : > { %9073 = vrot.lane.b32.xlu2 %v18524_v16, %s11198_s12 }
 0x951   : > { %v8521_v51 = vpop.xlane.xlu0 %8520 }
 0x952   : > { %v8560_v9 = vmul.f32 %v16745_v62, %v8521_v51 }
 0x954   : > { %v8592_v10 = vpack.c.bf16 %v8560_v9, %v8560_v9  ;;  %v10275_v9 = vld [vmem:[%s18536_s20 + $0x18] sm:$0xff] }
 0x956   : > { %v8720_v63 = vunpack.c.l.bf16 %v8592_v10 }
 0x958   : > { %v8784_v25 = vmul.f32 %v17161_v37, %v8720_v63 }
 0x95a   : > { %v8816_v5 = vpack.c.bf16 %v8784_v25, %v8784_v25  ;;  %v10274_v25 = vld [vmem:[%s18536_s20 + $0x10] sm:$0xff] }
 0x95c   : > { %v8976_v36 = vunpack.c.l.b16 %v8816_v5 }
 0x95e   : > { %8458 = vadd.xlane.f32.xlu1 %v16609_v57 }
 0x964   : > { %v9088_v41 = vpop.permute.xlu0 %9087 }
 0x965   : > { %v9136_v27 = vsel %vm9105_vm3, %v18525_v56, %v9088_v41  ;;  %v10278_v41 = vld [vmem:[%s18536_s20 + $0x30] sm:$0xff] }
 0x966   : > { %9177 = vmatpush.bf16.msra.mxu0 %v9136_v27  ;;  %9269 = vmatpush.bf16.msra.mxu3 %v10278_v41  ;;  %v11077_v41 = vld [vmem:[%s17557_s16 + $0x38] sm:$0xff] }
 0x96a   : > { %9178 = vmatpush.bf16.msra.mxu0 %v9132_v21 }
 0x96e   : > { %9179 = vmatpush.bf16.msra.mxu0 %v17101_v33  ;;  %v8559_v33 = vmul.f32 %v16745_v62, %v8519_v49  ;;  %v18530_v49 = vpack.c.b16 %v16782_v46, %v16780_v12  ;;  %v18532_v46 = vpack.c.b16 %v17083_v22, %v17081_v44 }
 0x970   : > { %v8591_v3 = vpack.c.bf16 %v8559_v33, %v8559_v33  ;;  %v9152_v4 = vsel %vm9105_vm3, %v18532_v46, %v9096_v2  ;;  %v9173_v33 = vld.sshfl [vmem:[#allocation1] sm:$0xff pattern:$0x73625140] }
 0x972   : > { %9180 = vmatpush.bf16.msra.mxu0 %v17107_v50  ;;  %v8719_v52 = vunpack.c.l.bf16 %v8591_v3 }
 0x974   : > { %v8783_v30 = vmul.f32 %v17156_v39, %v8719_v52  ;;  %v9174_v52 = vld.sshfl [vmem:[#allocation1 + $0x8] sm:$0xff pattern:$0x73625140] }
 0x976   : > { %v8815_v11 = vpack.c.bf16 %v8783_v30, %v8783_v30 }
 0x977   : > { %9091 = vrot.lane.b32.xlu1 %v18527_v1, %s11198_s12  ;;  %s9694_s12 = sshll.u32 %s17379_s22, 4  ;;  %s9695_s12 = int_to_ptr.vmem [resolvable:$true] %s9694_s12 }
 0x978   : > { %v8975_v42 = vunpack.c.l.b16 %v8815_v11 }
 0x97a   : > { %v9102_v48 = vpop.permute.xlu2 %9101  ;;  %v8992_v26 = vpack.c.b16 %v8976_v36, %v8975_v42 }
 0x97b   : > { %v9164_v38 = vsel %vm9105_vm3, %v8991_v29, %v9102_v48 }
 0x982   : > { %v9094_v13 = vpop.permute.xlu2 %9093  ;;  %v9100_v35 = vpop.permute.xlu1 %9099 }
 0x983   : > { %v9160_v12 = vsel %vm9105_vm3, %v18531_v6, %v9100_v35  ;;  %v9148_v16 = vsel %vm9105_vm3, %v18533_v19, %v9094_v13  ;;  %v10276_v13 = vld [vmem:[%s18536_s20 + $0x20] sm:$0xff] }
 0x98a   : > { %v9080_v24 = vpop.permute.xlu2 %9079 }
 0x98b   : > { %v9120_v28 = vsel %vm9105_vm3, %v18528_v53, %v9080_v24 }
 0x98c   : > { %9181 = vmatpush.bf16.msra.mxu0 %v9120_v28 }
 0x98f   : > { %v8461_v29 = vpop.xlane.xlu0 %8460 }
 0x990   : > { %v8530_v32 = vmul.f32 %v16745_v62, %v8461_v29 }
 0x992   : > { %v9078_v50 = vpop.permute.xlu2 %9077  ;;  %v8562_v54 = vpack.c.bf16 %v8530_v32, %v8530_v32 }
 0x993   : > { %v9116_v43 = vsel %vm9105_vm3, %v18529_v8, %v9078_v50  ;;  %v18537_v50 = vpack.c.b16 %v17019_v40, %v17017_v47  ;;  %v10273_v47 = vld [vmem:[%s18536_s20 + $0x8] sm:$0xff]  ;;  %v10272_v40 = vld [vmem:[%s18536_s20] sm:$0xff] }
 0x994   : > { %9182 = vmatpush.bf16.msra.mxu0 %v9116_v43  ;;  %v18538_v43 = vld [vmem:[#allocation33_spill] sm:$0xff] }
 0x995   : > { %v18539_v63 = vpack.c.b16 %v16984_v58, %v18538_v43  ;;  %v11080_v43 = vld [vmem:[%s17557_s16 + $0x50] sm:$0xff] }
 0x99a   : > { %v9076_v18 = vpop.permute.xlu2 %9075 }
 0x99b   : > { %v9112_v14 = vsel %vm9105_vm3, %v18530_v49, %v9076_v18 }
 0x99c   : > { %9183 = vmatpush.bf16.msra.mxu0 %v9112_v14 }
 0x9a2   : > { %v9074_v53 = vpop.permute.xlu2 %9073  ;;  %v9090_v8 = vpop.permute.xlu0 %9089 }
 0x9a3   : > { %v9140_v2 = vsel %vm9105_vm3, %v18539_v63, %v9090_v8 }
 0x9a6   : > { %v9104_v20 = vpop.permute.xlu1 %9103 }
 0x9a7   : > { %v9168_v15 = vsel %vm9105_vm3, %v8992_v26, %v9104_v20 }
 0x9a8   : > { %9190 = vmatpush.bf16.msra.mxu2 %v9168_v15 }
 0x9ac   : > { %9191 = vmatpush.bf16.msra.mxu2 %v9164_v38 }
 0x9b0   : > { %9192 = vmatpush.bf16.msra.mxu2 %v9160_v12 }
 0x9b4   : > { %9193 = vmatpush.bf16.msra.mxu2 %v9156_v31  ;;  %v8690_v31 = vunpack.c.l.bf16 %v8562_v54 }
 0x9b6   : > { %v8754_v23 = vmul.f32 %v16721_v59, %v8690_v31  ;;  %v11071_v31 = vld [vmem:[%s17557_s16 + $0x8] sm:$0xff] }
 0x9b8   : > { %9194 = vmatpush.bf16.msra.mxu2 %v9152_v4  ;;  %v8786_v27 = vpack.c.bf16 %v8754_v23, %v8754_v23  ;;  %v11075_v23 = vld [vmem:[%s17557_s16 + $0x28] sm:$0xff] }
 0x9ba   : > { %v8946_v1 = vunpack.c.l.b16 %v8786_v27 }
 0x9bc   : > { %9195 = vmatpush.bf16.msra.mxu2 %v9148_v16 }
 0x9d1   : > { %v8459_v22 = vpop.xlane.xlu1 %8458 }
 0x9d2   : > { %v8529_v44 = vmul.f32 %v16745_v62, %v8459_v22  ;;  %v10277_v62 = vld [vmem:[%s18536_s20 + $0x28] sm:$0xff]  ;;  %v11072_v22 = vld [vmem:[%s17557_s16 + $0x10] sm:$0xff] }
 0x9d3   : > { %9270 = vmatpush.bf16.msra.mxu3 %v10277_v62 }
 0x9d4   : > { %v8561_v51 = vpack.c.bf16 %v8529_v44, %v8529_v44  ;;  %v11073_v44 = vld [vmem:[%s17557_s16 + $0x18] sm:$0xff] }
 0x9d6   : > { %v8689_v56 = vunpack.c.l.bf16 %v8561_v51  ;;  %v11076_v51 = vld [vmem:[%s17557_s16 + $0x30] sm:$0xff] }
 0x9d7   : > { %9271 = vmatpush.bf16.msra.mxu3 %v10276_v13 }
 0x9d8   : > { %v8753_v60 = vmul.f32 %v16716_v45, %v8689_v56 }
 0x9da   : > { %v8785_v21 = vpack.c.bf16 %v8753_v60, %v8753_v60  ;;  %v11078_v60 = vld [vmem:[%s17557_s16 + $0x40] sm:$0xff] }
 0x9db   : > { %9272 = vmatpush.bf16.msra.mxu3 %v10275_v9 }
 0x9dc   : > { %v8945_v48 = vunpack.c.l.b16 %v8785_v21 }
 0x9de   : > { %v8977_v24 = vpack.c.b16 %v8946_v1, %v8945_v48 }
 0x9df   : > { %9273 = vmatpush.bf16.msra.mxu3 %v10274_v25 }
 0x9e0   : > { %v9108_v28 = vsel %vm9105_vm3, %v8977_v24, %v9074_v53  ;;  %v18540_v24 = vld [vmem:[#allocation44_spill] sm:$0xff] }
 0x9e1   : > { %9184 = vmatpush.bf16.msra.mxu0 %v9108_v28 }
 0x9e3   : > { %9274 = vmatpush.bf16.msra.mxu3 %v10273_v47 }
 0x9e4   : > { %9185 = vmatmul.bf16.vlgmr.msra.gmra.mxu0 %v9173_v33  ;;  %v18541_v33 = vld [vmem:[#allocation83_spill] sm:$0xff] }
 0x9e7   : > { %9275 = vmatpush.bf16.msra.mxu3 %v10272_v40 }
 0x9e9   : > { %v9092_v10 = vpop.permute.xlu1 %9091 }
 0x9ea   : > { %v9144_v3 = vsel %vm9105_vm3, %v18537_v50, %v9092_v10 }
 0x9eb   : > { %9196 = vmatpush.bf16.msra.mxu2 %v9144_v3  ;;  %v18542_v3 = vld [vmem:[#allocation91_spill] sm:$0xff] }
 0x9ef   : > { %9197 = vmatpush.bf16.msra.mxu2 %v9140_v2 }
 0x9f2   : > { %9198 = vmatmul.bf16.vlgmr.msra.gmra.mxu2 %v9174_v52  ;;  %v18543_v52 = vld [vmem:[#allocation59_spill] sm:$0xff] }
 0xa61   : > { %v9186_v58 = vpop.f32.mrf.mxu0 }
 0xa69   : > { %v9188_v18 = vpop.f32.mrf.mxu0 }
 0xa75   : > { %v9199_v30 = vpop.f32.mrf.mxu2 }
 0xa76   : > { %v9200_v49 = vadd.f32 %v9199_v30, %v9186_v58  ;;  %v18544_v58 = vld [vmem:[#allocation101_spill] sm:$0xff]  ;;  %v11081_v30 = vld [vmem:[%s17557_s16 + $0x58] sm:$0xff] }
 0xa78   : > { %v9203_v14 = vpack.c.bf16 %v9200_v49, %v9200_v49 }
 0xa7a   : > { %9276 = vmatmul.bf16.vlgmr.msra.gmra.mxu3 %v9203_v14 }
 0xa7d   : > { %v9201_v5 = vpop.f32.mrf.mxu2 }
 0xa7e   : > { %v18545_v5 = vld [vmem:[#allocation100_spill] sm:$0xff] }
 0xafd   : > { %v9277_v35 = vpop.f32.mrf.mxu3 }
 0xafe   : > { %v10197_v11 = vmul.f32 -1.442695, %v9277_v35 }
 0xb00   : > { %10971 = vpow2.f32 %v10197_v11 }
 0xb05   : > { %v9279_v36 = vpop.f32.mrf.mxu3 }
 0xb06   : > { %v10972_v42 = vpop.eup %10971 }
 0xb07   : > { %v9284_v26 = vadd.f32 1.0, %v10972_v42  ;;  %v18546_v42 = vld [vmem:[#allocation31_spill] sm:$0xff] }
 0xb09   : > { %10973 = vrcp.f32 %v9284_v26  ;;  %v9296_v6 = vand.u32 2147483648, %v9284_v26  ;;  %v9294_v46 = vand.u32 2147483647, %v9284_v26  ;;  %vm9290_vm5 = vweird.f32 %v9284_v26 }
 0xb0b   : > { %v9297_v19 = vor.u32 1.1754944e-38, %v9296_v6  ;;  %vm9295_vm8 = vcmp.eq.f32.partialorder %v9294_v46, 8.507059e+37  ;;  %v18547_v6 = vld [vmem:[#allocation21_spill] sm:$0xff] }
 0xb0f   : > { %v10974_v20 = vpop.eup %10973 }
 0xb10   : > { %v9286_v15 = vmul.f32 %v10974_v20, %v9284_v26  ;;  %vm9291_vm4 = vweird.f32 %v10974_v20 }
 0xb11   : > { %vm9292_vm6 = vmor %vm9290_vm5, %vm9291_vm4 }
 0xb12   : > { %v9287_v38 = vsub.f32 1.0, %v9286_v15 }
 0xb14   : > { %v9288_v12 = vmul.f32 %v10974_v20, %v9287_v38 }
 0xb16   : > { %v9289_v4 = vadd.f32 %v10974_v20, %v9288_v12 }
 0xb18   : > { %v9293_v16 = vsel %vm9292_vm6, %v10974_v20, %v9289_v4  ;;  %v11082_v20 = vld [vmem:[%s17557_s16 + $0x60] sm:$0xff] }
 0xb19   : > { %v9298_v29 = vsel %vm9295_vm8, %v9297_v19, %v9293_v16  ;;  %v18548_v19 = vld [vmem:[#allocation50_spill] sm:$0xff] }
 0xb1a   : > { %v9300_v32 = vpack.c.bf16 %v9298_v29, %v9298_v29  ;;  %v11083_v29 = vld [vmem:[%s17557_s16 + $0x68] sm:$0xff] }
 0xb1c   : > { %v9302_v54 = vsel %vm8005_vm7, %v9300_v32, 0 }
 0xb1d   : > { %9311 = vmatpush.bf16.msrb.mxu1 %v9302_v54 }
 0xb20   : > { %10198 = vmatmul.msk.bf16.vlgmr.msrb.gmra.mxu1 %vm8253_vm1, %v11070_v61  ;;  %v18549_v61 = vld [vmem:[#allocation43_spill] sm:$0xff] }
 0xb30   : > { %10199 = vmatmul.msk.bf16.gmra.mxu1 %vm8253_vm1, %v11071_v31 }
 0xb40   : > { %10200 = vmatmul.msk.bf16.gmra.mxu1 %vm8253_vm1, %v11072_v22 }
 0xb50   : > { %10201 = vmatmul.msk.bf16.gmra.mxu1 %vm8253_vm1, %v11073_v44 }
 0xb60   : > { %10202 = vmatmul.msk.bf16.gmra.mxu1 %vm8253_vm1, %v11074_v55  ;;  %v18550_v55 = vld [vmem:[#allocation24_spill] sm:$0xff] }
 0xb70   : > { %10203 = vmatmul.msk.bf16.gmra.mxu1 %vm8253_vm1, %v11075_v23 }
 0xb80   : > { %10204 = vmatmul.msk.bf16.gmra.mxu1 %vm8253_vm1, %v11076_v51  ;;  %v11084_v51 = vld [vmem:[%s17557_s16 + $0x70] sm:$0xff] }
 0xb90   : > { %10205 = vmatmul.msk.bf16.gmra.mxu1 %vm8253_vm1, %v11077_v41 }
 0xb9d   : > { %v9313_v56 = vpop.f32.mrf.mxu1 }
 0xb9e   : > { %v9393_v27 = vmul.f32 %v16716_v45, %v9313_v56  ;;  %v11079_v45 = vld [vmem:[%s17557_s16 + $0x48] sm:$0xff] }
 0xba0   : > { %10206 = vmatmul.msk.bf16.gmra.mxu1 %vm8253_vm1, %v11078_v60  ;;  %v9425_v62 = vsel %vm9105_vm3, %v9393_v27, 0.0  ;;  %v18551_v27 = vld [vmem:[#allocation84_spill] sm:$0xff] }
 0xba1   : > { %9426 = vadd.xlane.f32.xlu0 %v9425_v62 }
 0xba5   : > { %v9315_v21 = vpop.f32.mrf.mxu1 }
 0xba6   : > { %v9394_v1 = vmul.f32 %v16721_v59, %v9315_v21 }
 0xba8   : > { %v9428_v48 = vsel %vm9105_vm3, %v9394_v1, 0.0  ;;  %v18552_v1 = vld [vmem:[#allocation62_spill] sm:$0xff] }
 0xba9   : > { %9429 = vadd.xlane.f32.xlu2 %v9428_v48 }
 0xbad   : > { %v9318_v13 = vpop.f32.mrf.mxu1 }
 0xbae   : > { %v9395_v53 = vmul.f32 %v18540_v24, %v9318_v13  ;;  %v11085_v13 = vld [vmem:[%s17557_s16 + $0x78] sm:$0xff] }
 0xbb0   : > { %10207 = vmatmul.msk.bf16.gmra.mxu1 %vm8253_vm1, %v11079_v45  ;;  %v9431_v28 = vsel %vm9105_vm3, %v9395_v53, 0.0  ;;  %v9553_v53 = vld [vmem:[%s11383_s29] sm:$0xff] }
 0xbb1   : > { %9432 = vadd.xlane.f32.xlu1 %v9431_v28 }
 0xbb5   : > { %v9320_v9 = vpop.f32.mrf.mxu1 }
 0xbb6   : > { %v9396_v10 = vmul.f32 %v18541_v33, %v9320_v9  ;;  %v18553_v33 = vld [vmem:[#allocation54_spill] sm:$0xff] }
 0xbb8   : > { %v9434_v59 = vsel %vm9105_vm3, %v9396_v10, 0.0 }
 0xbb9   : > { %9435 = vadd.xlane.f32.xlu0 %v9434_v59 }
 0xbbd   : > { %v9323_v50 = vpop.f32.mrf.mxu1 }
 0xbbe   : > { %v9397_v8 = vmul.f32 %v18542_v3, %v9323_v50 }
 0xbc0   : > { %10208 = vmatmul.msk.bf16.gmra.mxu1 %vm8253_vm1, %v11080_v43  ;;  %v9437_v63 = vsel %vm9105_vm3, %v9397_v8, 0.0  ;;  %v9554_v8 = vld [vmem:[%s11383_s29 + $0x8] sm:$0xff] }
 0xbc1   : > { %9438 = vadd.xlane.f32.xlu2 %v9437_v63 }
 0xbc5   : > { %v9325_v2 = vpop.f32.mrf.mxu1 }
 0xbc6   : > { %v9398_v25 = vmul.f32 %v18543_v52, %v9325_v2  ;;  %v18554_v2 = vld [vmem:[#allocation36_spill] sm:$0xff] }
 0xbc8   : > { %v9440_v47 = vsel %vm9105_vm3, %v9398_v25, 0.0 }
 0xbc9   : > { %9441 = vadd.xlane.f32.xlu1 %v9440_v47 }
 0xbcd   : > { %v9328_v40 = vpop.f32.mrf.mxu1 }
 0xbce   : > { %v9399_v18 = vmul.f32 %v18544_v58, %v9328_v40  ;;  %v9555_v58 = vld [vmem:[%s11383_s29 + $0x10] sm:$0xff] }
 0xbd0   : > { %10209 = vmatmul.msk.bf16.gmra.mxu1 %vm8253_vm1, %v11081_v30  ;;  %v9443_v49 = vsel %vm9105_vm3, %v9399_v18, 0.0  ;;  %v18555_v30 = vld [vmem:[#allocation17_spill] sm:$0xff] }
 0xbd1   : > { %9444 = vadd.xlane.f32.xlu0 %v9443_v49 }
 0xbd5   : > { %v9330_v14 = vpop.f32.mrf.mxu1 }
 0xbd6   : > { %v9400_v35 = vmul.f32 %v18545_v5, %v9330_v14  ;;  %v18556_v5 = vld [vmem:[#allocation63_spill] sm:$0xff] }
 0xbd8   : > { %v9446_v11 = vsel %vm9105_vm3, %v9400_v35, 0.0 }
 0xbd9   : > { %9447 = vadd.xlane.f32.xlu2 %v9446_v11 }
 0xbdd   : > { %v9333_v36 = vpop.f32.mrf.mxu1 }
 0xbde   : > { %v9401_v26 = vmul.f32 %v18546_v42, %v9333_v36  ;;  %v9556_v42 = vld [vmem:[%s11383_s29 + $0x18] sm:$0xff] }
 0xbe0   : > { %10210 = vmatmul.msk.bf16.gmra.mxu1 %vm8253_vm1, %v11082_v20  ;;  %v9449_v15 = vsel %vm9105_vm3, %v9401_v26, 0.0  ;;  %v18557_v20 = vld [vmem:[#allocation52_spill] sm:$0xff] }
 0xbe1   : > { %9450 = vadd.xlane.f32.xlu1 %v9449_v15 }
 0xbe5   : > { %v9335_v38 = vpop.f32.mrf.mxu1 }
 0xbe6   : > { %v9402_v12 = vmul.f32 %v18547_v6, %v9335_v38  ;;  %v18558_v6 = vld [vmem:[#allocation38_spill] sm:$0xff] }
 0xbe8   : > { %v9452_v46 = vsel %vm9105_vm3, %v9402_v12, 0.0 }
 0xbe9   : > { %9453 = vadd.xlane.f32.xlu0 %v9452_v46 }
 0xbed   : > { %v9338_v4 = vpop.f32.mrf.mxu1 }
 0xbee   : > { %v9403_v16 = vmul.f32 %v18548_v19, %v9338_v4 }
 0xbf0   : > { %10211 = vmatmul.msk.bf16.gmra.mxu1 %vm8253_vm1, %v11083_v29  ;;  %v9455_v32 = vsel %vm9105_vm3, %v9403_v16, 0.0  ;;  %v9557_v16 = vld [vmem:[%s11383_s29 + $0x20] sm:$0xff] }
 0xbf1   : > { %9456 = vadd.xlane.f32.xlu2 %v9455_v32  ;;  %v18559_v32 = vld [vmem:[#allocation103_spill] sm:$0xff] }
 0xbf5   : > { %v9340_v54 = vpop.f32.mrf.mxu1 }
 0xbf6   : > { %v9404_v31 = vmul.f32 %v18549_v61, %v9340_v54 }
 0xbf8   : > { %v9458_v22 = vsel %vm9105_vm3, %v9404_v31, 0.0  ;;  %v18560_v31 = vld [vmem:[#allocation93_spill] sm:$0xff] }
 0xbf9   : > { %9459 = vadd.xlane.f32.xlu1 %v9458_v22 }
 0xbfd   : > { %v9343_v44 = vpop.f32.mrf.mxu1 }
 0xbfe   : > { %v9405_v23 = vmul.f32 %v18550_v55, %v9343_v44 }
 0xc00   : > { %10212 = vmatmul.msk.bf16.gmra.mxu1 %vm8253_vm1, %v11084_v51  ;;  %v9461_v41 = vsel %vm9105_vm3, %v9405_v23, 0.0  ;;  %v9558_v51 = vld [vmem:[%s11383_s29 + $0x28] sm:$0xff] }
 0xc01   : > { %9462 = vadd.xlane.f32.xlu0 %v9461_v41 }
 0xc05   : > { %v9345_v56 = vpop.f32.mrf.mxu1 }
 0xc06   : > { %v9406_v60 = vmul.f32 %v18551_v27, %v9345_v56  ;;  %v18561_v56 = vld [vmem:[#allocation89_spill] sm:$0xff] }
 0xc08   : > { %v9464_v62 = vsel %vm9105_vm3, %v9406_v60, 0.0 }
 0xc09   : > { %9465 = vadd.xlane.f32.xlu2 %v9464_v62  ;;  %v18562_v62 = vld [vmem:[#allocation48_spill] sm:$0xff] }
 0xc0d   : > { %v9348_v21 = vpop.f32.mrf.mxu1 }
 0xc0e   : > { %v9407_v48 = vmul.f32 %v18552_v1, %v9348_v21 }
 0xc10   : > { %10213 = vmatmul.msk.bf16.gmra.mxu1 %vm8253_vm1, %v11085_v13  ;;  %v9467_v24 = vsel %vm9105_vm3, %v9407_v48, 0.0 }
 0xc11   : > { %9468 = vadd.xlane.f32.xlu1 %v9467_v24  ;;  %v9559_v24 = vld [vmem:[%s11383_s29 + $0x30] sm:$0xff] }
 0xc14   : > { %v9427_v45 = vpop.xlane.xlu0 %9426 }
 0xc15   : > { %v9521_v28 = vmul.f32 %v9427_v45, %v16609_v57  ;;  %v9350_v9 = vpop.f32.mrf.mxu1  ;;  %v18563_v45 = vld [vmem:[#allocation98_spill] sm:$0xff] }
 0xc16   : > { %v9408_v10 = vmul.f32 %v18553_v33, %v9350_v9  ;;  %v18564_v33 = vld [vmem:[#allocation57_spill] sm:$0xff] }
 0xc17   : > { %v9585_v59 = vadd.f32 %v9553_v53, %v9521_v28 }
 0xc18   : > { %v9470_v50 = vsel %vm9105_vm3, %v9408_v10, 0.0 }
 0xc19   : > { %v9617_v3 = vmax.f32 %v9585_v59, 0.0  ;;  %9471 = vadd.xlane.f32.xlu0 %v9470_v50 }
 0xc1b   : > { %9649 = vst [vmem:[%s17379_s22] sm:$0xff] %v9617_v3 }
 0xc1c   : > { %v9430_v43 = vpop.xlane.xlu2 %9429 }
 0xc1d   : > { %v9522_v63 = vmul.f32 %v9430_v43, %v16614_v17  ;;  %v9353_v57 = vpop.f32.mrf.mxu1 }
 0xc1e   : > { %v9409_v52 = vmul.f32 %v18554_v2, %v9353_v57 }
 0xc1f   : > { %v9586_v25 = vadd.f32 %v9554_v8, %v9522_v63  ;;  %v9560_v8 = vld [vmem:[%s11383_s29 + $0x38] sm:$0xff]  ;;  %v18565_v63 = vld [vmem:[#allocation104_spill] sm:$0xff] }
 0xc20   : > { %v9473_v47 = vsel %vm9105_vm3, %v9409_v52, 0.0  ;;  %v18566_v52 = vld [vmem:[#allocation47_spill] sm:$0xff] }
 0xc21   : > { %v9618_v40 = vmax.f32 %v9586_v25, 0.0  ;;  %9474 = vadd.xlane.f32.xlu2 %v9473_v47 }
 0xc23   : > { %9650 = vst [vmem:[%s17379_s22 + $0x8] sm:$0xff] %v9618_v40 }
 0xc24   : > { %v9433_v18 = vpop.xlane.xlu1 %9432 }
 0xc25   : > { %v9523_v49 = vmul.f32 %v9433_v18, %v18555_v30  ;;  %v9355_v14 = vpop.f32.mrf.mxu1  ;;  %v9561_v18 = vld [vmem:[%s11383_s29 + $0x40] sm:$0xff] }
 0xc26   : > { %v9410_v35 = vmul.f32 %v18556_v5, %v9355_v14 }
 0xc27   : > { %v9587_v17 = vadd.f32 %v9555_v58, %v9523_v49  ;;  %v18567_v49 = vld [vmem:[#allocation25_spill] sm:$0xff] }
 0xc28   : > { %v9476_v11 = vsel %vm9105_vm3, %v9410_v35, 0.0  ;;  %v18568_v35 = vld [vmem:[#allocation46_spill] sm:$0xff] }
 0xc29   : > { %v9619_v36 = vmax.f32 %v9587_v17, 0.0  ;;  %9477 = vadd.xlane.f32.xlu1 %v9476_v11 }
 0xc2b   : > { %9651 = vst [vmem:[%s17379_s22 + $0x10] sm:$0xff] %v9619_v36 }
 0xc2c   : > { %v9436_v26 = vpop.xlane.xlu0 %9435 }
 0xc2d   : > { %v9524_v15 = vmul.f32 %v9436_v26, %v18557_v20  ;;  %v9358_v38 = vpop.f32.mrf.mxu1  ;;  %v9562_v26 = vld [vmem:[%s11383_s29 + $0x48] sm:$0xff] }
 0xc2e   : > { %v9411_v12 = vmul.f32 %v18558_v6, %v9358_v38 }
 0xc2f   : > { %v9588_v46 = vadd.f32 %v9556_v42, %v9524_v15  ;;  %v18569_v15 = vld [vmem:[#allocation111_spill] sm:$0xff] }
 0xc30   : > { %v9479_v4 = vsel %vm9105_vm3, %v9411_v12, 0.0 }
 0xc31   : > { %v9620_v19 = vmax.f32 %v9588_v46, 0.0  ;;  %9480 = vadd.xlane.f32.xlu0 %v9479_v4 }
 0xc33   : > { %9652 = vst [vmem:[%s17379_s22 + $0x18] sm:$0xff] %v9620_v19 }
 0xc34   : > { %v9439_v29 = vpop.xlane.xlu2 %9438 }
 0xc35   : > { %v9525_v54 = vmul.f32 %v9439_v29, %v18559_v32  ;;  %v9360_v61 = vpop.f32.mrf.mxu1  ;;  %v18570_v32 = vld [vmem:[#allocation81_spill] sm:$0xff] }
 0xc36   : > { %v9412_v22 = vmul.f32 %v18560_v31, %v9360_v61 }
 0xc37   : > { %v9589_v44 = vadd.f32 %v9557_v16, %v9525_v54  ;;  %v9563_v16 = vld [vmem:[%s11383_s29 + $0x50] sm:$0xff] }
 0xc38   : > { %v9482_v55 = vsel %vm9105_vm3, %v9412_v22, 0.0 }
 0xc39   : > { %v9621_v23 = vmax.f32 %v9589_v44, 0.0  ;;  %9483 = vadd.xlane.f32.xlu2 %v9482_v55  ;;  %v9564_v55 = vld [vmem:[%s11383_s29 + $0x58] sm:$0xff] }
 0xc3b   : > { %9653 = vst [vmem:[%s17379_s22 + $0x20] sm:$0xff] %v9621_v23 }
 0xc3c   : > { %v9442_v41 = vpop.xlane.xlu1 %9441 }
 0xc3d   : > { %v9526_v27 = vmul.f32 %v9442_v41, %v18561_v56  ;;  %v9363_v60 = vpop.f32.mrf.mxu1 }
 0xc3e   : > { %v9413_v21 = vmul.f32 %v18562_v62, %v9363_v60 }
 0xc3f   : > { %v9590_v1 = vadd.f32 %v9558_v51, %v9526_v27  ;;  %v18571_v51 = vld [vmem:[#allocation41_spill] sm:$0xff]  ;;  %v18572_v27 = vld [vmem:[#allocation99_spill] sm:$0xff] }
 0xc40   : > { %v9485_v48 = vsel %vm9105_vm3, %v9413_v21, 0.0 }
 0xc41   : > { %v9622_v13 = vmax.f32 %v9590_v1, 0.0  ;;  %9486 = vadd.xlane.f32.xlu1 %v9485_v48  ;;  %v9565_v1 = vld [vmem:[%s11383_s29 + $0x60] sm:$0xff] }
 0xc43   : > { %9654 = vst [vmem:[%s17379_s22 + $0x28] sm:$0xff] %v9622_v13  ;;  %v18573_v13 = vld [vmem:[#allocation105_spill] sm:$0xff] }
 0xc44   : > { %v9445_v53 = vpop.xlane.xlu0 %9444 }
 0xc45   : > { %v9527_v28 = vmul.f32 %v9445_v53, %v18563_v45  ;;  %v9365_v9 = vpop.f32.mrf.mxu1  ;;  %v18574_v45 = vld [vmem:[#allocation56_spill] sm:$0xff] }
 0xc46   : > { %v9414_v10 = vmul.f32 %v18564_v33, %v9365_v9 }
 0xc47   : > { %v9591_v59 = vadd.f32 %v9559_v24, %v9527_v28 }
 0xc48   : > { %v9488_v50 = vsel %vm9105_vm3, %v9414_v10, 0.0 }
 0xc49   : > { %v9623_v3 = vmax.f32 %v9591_v59, 0.0  ;;  %9489 = vadd.xlane.f32.xlu0 %v9488_v50  ;;  %v9566_v59 = vld [vmem:[%s11383_s29 + $0x68] sm:$0xff] }
 0xc4b   : > { %9655 = vst [vmem:[%s17379_s22 + $0x30] sm:$0xff] %v9623_v3  ;;  %v18575_v3 = vld [vmem:[#allocation35_spill] sm:$0xff] }
 0xc4c   : > { %v9448_v43 = vpop.xlane.xlu2 %9447 }
 0xc4d   : > { %v9528_v57 = vmul.f32 %v9448_v43, %v18565_v63  ;;  %v9368_v2 = vpop.f32.mrf.mxu1 }
 0xc4e   : > { %v9415_v25 = vmul.f32 %v18566_v52, %v9368_v2 }
 0xc4f   : > { %v9592_v47 = vadd.f32 %v9560_v8, %v9528_v57 }
 0xc50   : > { %v9491_v40 = vsel %vm9105_vm3, %v9415_v25, 0.0  ;;  %v9567_v25 = vld [vmem:[%s11383_s29 + $0x70] sm:$0xff] }
 0xc51   : > { %v9624_v58 = vmax.f32 %v9592_v47, 0.0  ;;  %9492 = vadd.xlane.f32.xlu2 %v9491_v40  ;;  %v18576_v40 = vld [vmem:[#allocation90_spill] sm:$0xff] }
 0xc53   : > { %9656 = vst [vmem:[%s17379_s22 + $0x38] sm:$0xff] %v9624_v58 }
 0xc54   : > { %v9451_v30 = vpop.xlane.xlu1 %9450 }
 0xc55   : > { %v9529_v14 = vmul.f32 %v9451_v30, %v18567_v49  ;;  %v9370_v5 = vpop.f32.mrf.mxu1  ;;  %v18577_v30 = vld [vmem:[#allocation34_spill] sm:$0xff] }
 0xc56   : > { %v9416_v17 = vmul.f32 %v18568_v35, %v9370_v5  ;;  %v9568_v35 = vld [vmem:[%s11383_s29 + $0x78] sm:$0xff] }
 0xc57   : > { %v9593_v11 = vadd.f32 %v9561_v18, %v9529_v14 }
 0xc58   : > { %v9494_v36 = vsel %vm9105_vm3, %v9416_v17, 0.0 }
 0xc59   : > { %v9625_v42 = vmax.f32 %v9593_v11, 0.0  ;;  %9495 = vadd.xlane.f32.xlu1 %v9494_v36  ;;  %v18578_v11 = vld [vmem:[#allocation74_spill] sm:$0xff] }
 0xc5b   : > { %9657 = vst [vmem:[%s17379_s22 + $0x40] sm:$0xff] %v9625_v42 }
 0xc5c   : > { %v9454_v20 = vpop.xlane.xlu0 %9453 }
 0xc5d   : > { %v9530_v38 = vmul.f32 %v9454_v20, %v18569_v15  ;;  %v9373_v6 = vpop.f32.mrf.mxu1 }
 0xc5e   : > { %v9417_v12 = vmul.f32 %v17073_v0, %v9373_v6  ;;  %v9569_v6 = vld [vmem:[%s11383_s29 + $0x80] sm:$0xff] }
 0xc5f   : > { %v9594_v46 = vadd.f32 %v9562_v26, %v9530_v38 }
 0xc60   : > { %v9497_v4 = vsel %vm9105_vm3, %v9417_v12, 0.0 }
 0xc61   : > { %v9626_v19 = vmax.f32 %v9594_v46, 0.0  ;;  %9498 = vadd.xlane.f32.xlu0 %v9497_v4  ;;  %v18579_v46 = vld [vmem:[#allocation96_spill] sm:$0xff] }
 0xc63   : > { %9658 = vst [vmem:[%s17379_s22 + $0x48] sm:$0xff] %v9626_v19 }
 0xc64   : > { %v9457_v29 = vpop.xlane.xlu2 %9456 }
 0xc65   : > { %v9531_v54 = vmul.f32 %v9457_v29, %v18570_v32  ;;  %v9375_v61 = vpop.f32.mrf.mxu1 }
 0xc66   : > { %v9418_v31 = vmul.f32 %v17079_v34, %v9375_v61 }
 0xc67   : > { %v9595_v22 = vadd.f32 %v9563_v16, %v9531_v54  ;;  %v9570_v54 = vld [vmem:[%s11383_s29 + $0x88] sm:$0xff] }
 0xc68   : > { %v9500_v44 = vsel %vm9105_vm3, %v9418_v31, 0.0  ;;  %v18580_v31 = vld [vmem:[#allocation69_spill] sm:$0xff] }
 0xc69   : > { %v9627_v0 = vmax.f32 %v9595_v22, 0.0  ;;  %9501 = vadd.xlane.f32.xlu2 %v9500_v44 }
 0xc6b   : > { %9659 = vst [vmem:[%s17379_s22 + $0x50] sm:$0xff] %v9627_v0 }
 0xc6c   : > { %v9460_v23 = vpop.xlane.xlu1 %9459 }
 0xc6d   : > { %v9532_v41 = vmul.f32 %v9460_v23, %v18571_v51  ;;  %v9378_v56 = vpop.f32.mrf.mxu1 }
 0xc6e   : > { %v9419_v60 = vmul.f32 %v18572_v27, %v9378_v56  ;;  %v9572_v27 = vld [vmem:[%s11383_s29 + $0x98] sm:$0xff] }
 0xc6f   : > { %v9596_v62 = vadd.f32 %v9564_v55, %v9532_v41  ;;  %v9571_v55 = vld [vmem:[%s11383_s29 + $0x90] sm:$0xff] }
 0xc70   : > { %v9503_v21 = vsel %vm9105_vm3, %v9419_v60, 0.0 }
 0xc71   : > { %v9628_v34 = vmax.f32 %v9596_v62, 0.0  ;;  %9504 = vadd.xlane.f32.xlu1 %v9503_v21  ;;  %v18582_v62 = vld [vmem:[#allocation67_spill] sm:$0xff] }
 0xc73   : > { %9660 = vst [vmem:[%s17379_s22 + $0x58] sm:$0xff] %v9628_v34 }
 0xc74   : > { %v9463_v48 = vpop.xlane.xlu0 %9462 }
 0xc75   : > { %v9533_v24 = vmul.f32 %v9463_v48, %v18573_v13  ;;  %v9380_v53 = vpop.f32.mrf.mxu1  ;;  %v9573_v48 = vld [vmem:[%s11383_s29 + $0xa0] sm:$0xff] }
 0xc76   : > { %v9420_v28 = vmul.f32 %v18574_v45, %v9380_v53 }
 0xc77   : > { %v9597_v9 = vadd.f32 %v9565_v1, %v9533_v24  ;;  %v18583_v24 = vld [vmem:[#allocation18_spill] sm:$0xff] }
 0xc78   : > { %v9506_v33 = vsel %vm9105_vm3, %v9420_v28, 0.0 }
 0xc79   : > { %v9629_v10 = vmax.f32 %v9597_v9, 0.0  ;;  %9507 = vadd.xlane.f32.xlu0 %v9506_v33  ;;  %v9574_v9 = vld [vmem:[%s11383_s29 + $0xa8] sm:$0xff] }
 0xc7b   : > { %9661 = vst [vmem:[%s17379_s22 + $0x60] sm:$0xff] %v9629_v10  ;;  %v18584_v10 = vld [vmem:[#allocation78_spill] sm:$0xff] }
 0xc7c   : > { %v9466_v50 = vpop.xlane.xlu2 %9465 }
 0xc7d   : > { %v9534_v8 = vmul.f32 %v9466_v50, %v18575_v3  ;;  %v9383_v43 = vpop.f32.mrf.mxu1 }
 0xc7e   : > { %v9421_v63 = vmul.f32 %v17135_v7, %v9383_v43 }
 0xc7f   : > { %v9598_v57 = vadd.f32 %v9566_v59, %v9534_v8  ;;  %v9575_v8 = vld [vmem:[%s11383_s29 + $0xb0] sm:$0xff] }
 0xc80   : > { %v9509_v2 = vsel %vm9105_vm3, %v9421_v63, 0.0  ;;  %v18585_v63 = vld [vmem:[#allocation66_spill] sm:$0xff] }
 0xc81   : > { %v9630_v52 = vmax.f32 %v9598_v57, 0.0  ;;  %9510 = vadd.xlane.f32.xlu2 %v9509_v2 }
 0xc83   : > { %9662 = vst [vmem:[%s17379_s22 + $0x68] sm:$0xff] %v9630_v52 }
 0xc84   : > { %v9469_v47 = vpop.xlane.xlu1 %9468 }
 0xc85   : > { %v9535_v58 = vmul.f32 %v9469_v47, %v18576_v40  ;;  %v9385_v18 = vpop.f32.mrf.mxu1  ;;  %v18586_v40 = vld [vmem:[#allocation82_spill] sm:$0xff] }
 0xc86   : > { %v9422_v49 = vmul.f32 %v18577_v30, %v9385_v18 }
 0xc87   : > { %v9599_v14 = vadd.f32 %v9567_v25, %v9535_v58  ;;  %v9576_v25 = vld [vmem:[%s11383_s29 + $0xb8] sm:$0xff] }
 0xc88   : > { %v9512_v5 = vsel %vm9105_vm3, %v9422_v49, 0.0  ;;  %v9577_v49 = vld [vmem:[%s11383_s29 + $0xc0] sm:$0xff] }
 0xc89   : > { %v9631_v7 = vmax.f32 %v9599_v14, 0.0  ;;  %9513 = vadd.xlane.f32.xlu1 %v9512_v5  ;;  %v18587_v5 = vld [vmem:[#allocation73_spill] sm:$0xff] }
 0xc8b   : > { %9663 = vst [vmem:[%s17379_s22 + $0x70] sm:$0xff] %v9631_v7 }
 0xc8c   : > { %v9472_v17 = vpop.xlane.xlu0 %9471 }
 0xc8d   : > { %v9536_v36 = vmul.f32 %v9472_v17, %v18578_v11  ;;  %v9388_v42 = vpop.f32.mrf.mxu1  ;;  %v9578_v11 = vld [vmem:[%s11383_s29 + $0xc8] sm:$0xff] }
 0xc8e   : > { %v9423_v26 = vmul.f32 %v17156_v39, %v9388_v42  ;;  %v18588_v42 = vld [vmem:[#allocation92_spill] sm:$0xff] }
 0xc8f   : > { %v9600_v20 = vadd.f32 %v9568_v35, %v9536_v36 }
 0xc90   : > { %v9515_v15 = vsel %vm9105_vm3, %v9423_v26, 0.0 }
 0xc91   : > { %v9632_v38 = vmax.f32 %v9600_v20, 0.0  ;;  %9516 = vadd.xlane.f32.xlu0 %v9515_v15 }
 0xc93   : > { %9664 = vst [vmem:[%s17379_s22 + $0x78] sm:$0xff] %v9632_v38  ;;  %v9579_v38 = vld [vmem:[%s11383_s29 + $0xd0] sm:$0xff] }
 0xc94   : > { %v9475_v12 = vpop.xlane.xlu2 %9474 }
 0xc95   : > { %v9537_v4 = vmul.f32 %v9475_v12, %v18579_v46  ;;  %v9390_v19 = vpop.f32.mrf.mxu1  ;;  %v18589_v12 = vld [vmem:[#allocation71_spill] sm:$0xff] }
 0xc96   : > { %v9424_v16 = vmul.f32 %v17161_v37, %v9390_v19  ;;  %v18581_v37 = vld [vmem:[#allocation58_spill] sm:$0xff] }
 0xc97   : > { %v9601_v29 = vadd.f32 %v9569_v6, %v9537_v4 }
 0xc98   : > { %v9518_v39 = vsel %vm9105_vm3, %v9424_v16, 0.0  ;;  %v9580_v16 = vld [vmem:[%s11383_s29 + $0xd8] sm:$0xff] }
 0xc99   : > { %v9633_v32 = vmax.f32 %v9601_v29, 0.0  ;;  %9519 = vadd.xlane.f32.xlu2 %v9518_v39  ;;  %v18590_v39 = vld [vmem:[#allocation60_spill] sm:$0xff] }
 0xc9b   : > { %9665 = vst [vmem:[%s17379_s22 + $0x80] sm:$0xff] %v9633_v32 }
 0xc9c   : > { %v9478_v61 = vpop.xlane.xlu1 %9477 }
 0xc9d   : > { %v9538_v22 = vmul.f32 %v9478_v61, %v18580_v31  ;;  %v9581_v31 = vld [vmem:[%s11383_s29 + $0xe0] sm:$0xff] }
 0xc9f   : > { %v9602_v44 = vadd.f32 %v9570_v54, %v9538_v22 }
 0xca1   : > { %v9634_v0 = vmax.f32 %v9602_v44, 0.0  ;;  %v18592_v44 = vld [vmem:[#allocation77_spill] sm:$0xff] }
 0xca3   : > { %9666 = vst [vmem:[%s17379_s22 + $0x88] sm:$0xff] %v9634_v0 }
 0xca4   : > { %v9481_v23 = vpop.xlane.xlu0 %9480 }
 0xca5   : > { %v9539_v51 = vmul.f32 %v9481_v23, %v18581_v37  ;;  %v9582_v37 = vld [vmem:[%s11383_s29 + $0xe8] sm:$0xff] }
 0xca7   : > { %v9603_v41 = vadd.f32 %v9571_v55, %v9539_v51 }
 0xca9   : > { %v9635_v56 = vmax.f32 %v9603_v41, 0.0  ;;  %v18593_v41 = vld [vmem:[#allocation27_spill] sm:$0xff] }
 0xcab   : > { %9667 = vst [vmem:[%s17379_s22 + $0x90] sm:$0xff] %v9635_v56 }
 0xcac   : > { %v9484_v60 = vpop.xlane.xlu2 %9483 }
 0xcad   : > { %v9540_v21 = vmul.f32 %v9484_v60, %v18582_v62  ;;  %v9583_v62 = vld [vmem:[%s11383_s29 + $0xf0] sm:$0xff] }
 0xcaf   : > { %v9604_v34 = vadd.f32 %v9572_v27, %v9540_v21 }
 0xcb1   : > { %v9636_v1 = vmax.f32 %v9604_v34, 0.0  ;;  %v18594_v34 = vld [vmem:[#allocation42_spill] sm:$0xff] }
 0xcb3   : > { %9668 = vst [vmem:[%s17379_s22 + $0x98] sm:$0xff] %v9636_v1 }
 0xcb4   : > { %v9487_v13 = vpop.xlane.xlu1 %9486 }
 0xcb5   : > { %v9541_v53 = vmul.f32 %v9487_v13, %v18583_v24  ;;  %v9584_v24 = vld [vmem:[%s11383_s29 + $0xf8] sm:$0xff] }
 0xcb7   : > { %v9605_v45 = vadd.f32 %v9573_v48, %v9541_v53 }
 0xcb9   : > { %v9637_v28 = vmax.f32 %v9605_v45, 0.0  ;;  %v18598_v45 = vld [vmem:[#allocation55_spill] sm:$0xff] }
 0xcbb   : > { %9669 = vst [vmem:[%s17379_s22 + $0xa0] sm:$0xff] %v9637_v28 }
 0xcbc   : > { %v9490_v33 = vpop.xlane.xlu0 %9489 }
 0xcbd   : > { %v9542_v59 = vmul.f32 %v9490_v33, %v18584_v10 }
 0xcbf   : > { %v9606_v50 = vadd.f32 %v9574_v9, %v9542_v59 }
 0xcc1   : > { %v9638_v3 = vmax.f32 %v9606_v50, 0.0 }
 0xcc3   : > { %9670 = vst [vmem:[%s17379_s22 + $0xa8] sm:$0xff] %v9638_v3 }
 0xcc4   : > { %v9493_v43 = vpop.xlane.xlu2 %9492 }
 0xcc5   : > { %v9543_v57 = vmul.f32 %v9493_v43, %v18585_v63 }
 0xcc7   : > { %v9607_v2 = vadd.f32 %v9575_v8, %v9543_v57 }
 0xcc9   : > { %v9639_v52 = vmax.f32 %v9607_v2, 0.0 }
 0xccb   : > { %9671 = vst [vmem:[%s17379_s22 + $0xb0] sm:$0xff] %v9639_v52 }
 0xccc   : > { %v9496_v47 = vpop.xlane.xlu1 %9495 }
 0xccd   : > { %v9544_v58 = vmul.f32 %v9496_v47, %v18586_v40 }
 0xccf   : > { %v9608_v18 = vadd.f32 %v9576_v25, %v9544_v58 }
 0xcd1   : > { %v9640_v30 = vmax.f32 %v9608_v18, 0.0 }
 0xcd3   : > { %9672 = vst [vmem:[%s17379_s22 + $0xb8] sm:$0xff] %v9640_v30 }
 0xcd4   : > { %v9499_v14 = vpop.xlane.xlu0 %9498 }
 0xcd5   : > { %v9545_v7 = vmul.f32 %v9499_v14, %v18587_v5 }
 0xcd7   : > { %v9609_v35 = vadd.f32 %v9577_v49, %v9545_v7 }
 0xcd9   : > { %v9641_v17 = vmax.f32 %v9609_v35, 0.0 }
 0xcdb   : > { %9673 = vst [vmem:[%s17379_s22 + $0xc0] sm:$0xff] %v9641_v17 }
 0xcdc   : > { %v9502_v36 = vpop.xlane.xlu2 %9501 }
 0xcdd   : > { %v9546_v26 = vmul.f32 %v9502_v36, %v18588_v42 }
 0xcdf   : > { %v9610_v20 = vadd.f32 %v9578_v11, %v9546_v26 }
 0xce1   : > { %v9642_v15 = vmax.f32 %v9610_v20, 0.0 }
 0xce3   : > { %9674 = vst [vmem:[%s17379_s22 + $0xc8] sm:$0xff] %v9642_v15 }
 0xce4   : > { %v9505_v6 = vpop.xlane.xlu1 %9504 }
 0xce5   : > { %v9547_v46 = vmul.f32 %v9505_v6, %v18589_v12 }
 0xce7   : > { %v9611_v4 = vadd.f32 %v9579_v38, %v9547_v46 }
 0xce9   : > { %v9643_v19 = vmax.f32 %v9611_v4, 0.0 }
 0xceb   : > { %9675 = vst [vmem:[%s17379_s22 + $0xd0] sm:$0xff] %v9643_v19 }
 0xcec   : > { %v9508_v29 = vpop.xlane.xlu0 %9507 }
 0xced   : > { %v9548_v32 = vmul.f32 %v9508_v29, %v18590_v39 }
 0xcef   : > { %v9612_v54 = vadd.f32 %v9580_v16, %v9548_v32 }
 0xcf1   : > { %v9644_v61 = vmax.f32 %v9612_v54, 0.0 }
 0xcf3   : > { %9676 = vst [vmem:[%s17379_s22 + $0xd8] sm:$0xff] %v9644_v61 }
 0xcf4   : > { %v9511_v22 = vpop.xlane.xlu2 %9510 }
 0xcf5   : > { %v9549_v0 = vmul.f32 %v9511_v22, %v18592_v44 }
 0xcf7   : > { %v9613_v55 = vadd.f32 %v9581_v31, %v9549_v0 }
 0xcf9   : > { %v9645_v23 = vmax.f32 %v9613_v55, 0.0 }
 0xcfb   : > { %9677 = vst [vmem:[%s17379_s22 + $0xe0] sm:$0xff] %v9645_v23 }
 0xcfc   : > { %v9514_v51 = vpop.xlane.xlu1 %9513 }
 0xcfd   : > { %v9550_v56 = vmul.f32 %v9514_v51, %v18593_v41 }
 0xcff   : > { %v9614_v27 = vadd.f32 %v9582_v37, %v9550_v56 }
 0xd01   : > { %v9646_v60 = vmax.f32 %v9614_v27, 0.0 }
 0xd03   : > { %9678 = vst [vmem:[%s17379_s22 + $0xe8] sm:$0xff] %v9646_v60 }
 0xd04   : > { %v9517_v21 = vpop.xlane.xlu0 %9516 }
 0xd05   : > { %v9551_v1 = vmul.f32 %v9517_v21, %v18594_v34 }
 0xd07   : > { %v9615_v48 = vadd.f32 %v9583_v62, %v9551_v1 }
 0xd09   : > { %v9647_v13 = vmax.f32 %v9615_v48, 0.0 }
 0xd0b   : > { %9679 = vst [vmem:[%s17379_s22 + $0xf0] sm:$0xff] %v9647_v13 }
 0xd0c   : > { %v9520_v53 = vpop.xlane.xlu2 %9519 }
 0xd0d   : > { %v9552_v28 = vmul.f32 %v9520_v53, %v18598_v45 }
 0xd0f   : > { %v9616_v9 = vadd.f32 %v9584_v24, %v9552_v28 }
 0xd11   : > { %v9648_v33 = vmax.f32 %v9616_v9, 0.0 }
 0xd13   : > { %9680 = vst [vmem:[%s17379_s22 + $0xf8] sm:$0xff] %v9648_v33 }
 0xd14   : > { %11143 = shalt.err (!%p11140_p4)
}
 0xd15   : > { %s11199_s18 = smov 128   ;;  %s11200_s22 = smov 8  }
 0xd16   : > { %10673 = dma.vmem_to_hbm [thread:$0]  (%p11341_p11), %s9695_s12, 4096, %s9697_s23, %s9682_s2, %s11199_s18, %s11199_s18, %s11200_s22  }
 0xd17 PF: > { %s18599_s0 = sld [smem:[#allocation9_spill]]  ;;  %p18601_p7 = scmp.ge.s32.totalorder %s11182_s27, 2 }
 0xd19   : > { %p10680_p5 = pnand %p18601_p7, %p11345_p12 }
 0xd1b   : > { %p10681_p8 = pneg %p10680_p5 }
 0xd1d   : > { %s9711_s5 = sand.u32 1, %s18599_s0  }
 0xd1e   : > { %s9712_s14 = scalar_lea.sflag [#allocation5], %s9711_s5 }
 0xd1f   : > { %11165 = dma.done.wait (%p10681_p8), %s9712_s14, 4096  }
 0xd20   : > { %11167 = vsyncadd (%p10681_p8), %s9712_s14, 4294963200  ;;  %s18602_s27 = sld [smem:[#allocation12_spill]]  ;;  %s18605_s24 = smov %s11174_s25 }
 0xd21   : > { %s18603_s3 = sld [smem:[#allocation10_spill]] }
 0xd22   : > { %s18604_s26 = sld [smem:[#allocation13_spill]] }
 0xd26   : > { %p30_p10 = scmp.ge.s32.totalorder %s18602_s27, 4  }
 0xd27   : > { %s18606_s25 = smov %s18603_s3 }
 0xd28   :  { %32 = sbr.rel (!%p30_p10) target bundleno = 16 (0x10), region = 133 }
 0xd2d   :  { %9718 = vsyncpa [#allocation4], 1 }
 0xd2e   :  { %9720 = vsyncpa [#allocation4 + $0x1], 1 }
 0xd2f   :  { %9721 = vsyncpa [#allocation5], 1 }
 0xd30   :  { %9723 = vsyncpa [#allocation5 + $0x1], 1 }

</bundles_post_ra>
